<compile_context>
chip_gen: v6e
topology: v6e:2x2x1
jax: 0.10.0
libtpu: 0.0.40
codegen_flags: <defaults>
</compile_context>

<pallas_src>
import functools

import jax
import jax.numpy as jnp
from jax import lax
from jax.experimental import pallas as pl
from jax.experimental.pallas import tpu as pltpu

D_IN = 768
D_MODEL = 512
N_HEADS = 8
D_HEAD = D_MODEL // N_HEADS
D_FF = 1024
LN_EPS = 1e-5
NEG_INF = -1e9
LANE = 128
ROW_TARGET = 256          # MXU row-fill target (v6e/v7x MXUs are 256 rows wide)


def _layer_norm(x, w, b):
    mu = jnp.mean(x, axis=-1, keepdims=True)
    xc = x - mu
    var = jnp.mean(xc * xc, axis=-1, keepdims=True)
    return xc * lax.rsqrt(var + LN_EPS) * w + b


# ------------------------------------------------------------ fused encoder
def _fused_encoder_kernel(bt, seq,
                          x0_ref, mb_ref,
                          wqkv_ref, bqkv_ref, wo_ref, bo_ref,
                          ln1w_ref, ln1b_ref, w1_ref, b1_ref,
                          w2_ref, b2_ref, ln2w_ref, ln2b_ref,
                          hw_ref, hb_ref,
                          out_ref, x_scr, ctx_scr):
    layer = pl.program_id(0)
    n_layers = pl.num_programs(0)
    btile = pl.program_id(1)
    m = bt * seq

    # ---- layer-0 prologue: seed the resident activation slab for this tile ----
    @pl.when(layer == 0)
    def _():
        x_scr[btile] = x0_ref[...].reshape(m, D_MODEL).astype(jnp.float32)

    x = x_scr[btile]                                   # (m, 512) f32 residual
    xb = x.astype(jnp.bfloat16)

    # ---- fused QKV projection: one (m,512)x(512,1536) MXU matmul ----
    qkv = jnp.dot(xb, wqkv_ref[0], preferred_element_type=jnp.float32) + bqkv_ref[0]

    scale = 1.0 / (D_HEAD ** 0.5)
    q = (qkv[:, :D_MODEL] * scale).reshape(bt, seq, D_MODEL).astype(jnp.bfloat16)
    k = qkv[:, D_MODEL:2 * D_MODEL].reshape(bt, seq, D_MODEL).astype(jnp.bfloat16)
    v = qkv[:, 2 * D_MODEL:].reshape(bt, seq, D_MODEL).astype(jnp.bfloat16)
    mb = mb_ref[...]                                   # (bt, 1, seq) additive bias

    # Per-head attention (static unroll): each head's context goes straight into a
    # VMEM scratch slab -> no 8 live contexts + concatenate (no relayout / spills).
    for h in range(N_HEADS):
        lo = h * D_HEAD
        s = jnp.einsum('bqd,bkd->bqk',
                       q[:, :, lo:lo + D_HEAD], k[:, :, lo:lo + D_HEAD],
                       preferred_element_type=jnp.float32)
        s = s + mb                                     # broadcast add, not materialized
        s = s - jnp.max(s, axis=-1, keepdims=True)
        p = jnp.exp(s)
        # NOTE: approx reciprocal deviates ~1e-3 rel. from exact softmax; rows whose
        # keys are ALL padded give a uniform distribution instead of PyTorch's NaN.
        p = p * pl.reciprocal(jnp.sum(p, axis=-1, keepdims=True), approx=True)
        ctx_h = jnp.einsum('bqk,bkd->bqd',
                           p.astype(jnp.bfloat16), v[:, :, lo:lo + D_HEAD],
                           preferred_element_type=jnp.float32)
        ctx_scr[:, lo:lo + D_HEAD] = ctx_h.reshape(m, D_HEAD)

    # ---- single K=512 output projection (heads folded into one matmul) ----
    attn = jnp.dot(ctx_scr[...].astype(jnp.bfloat16), wo_ref[0],
                   preferred_element_type=jnp.float32) + bo_ref[0]
    x = _layer_norm(x + attn, ln1w_ref[0], ln1b_ref[0])

    # ---- feed-forward ----
    h1 = jnp.dot(x.astype(jnp.bfloat16), w1_ref[0],
                 preferred_element_type=jnp.float32) + b1_ref[0]
    h1 = jnp.maximum(h1, 0.0)
    h2 = jnp.dot(h1.astype(jnp.bfloat16), w2_ref[0],
                 preferred_element_type=jnp.float32) + b2_ref[0]
    x = _layer_norm(x + h2, ln2w_ref[0], ln2b_ref[0])
    x_scr[btile] = x

    # ---- last-layer epilogue: mean-pool (includes padding, like the module) + head ----
    @pl.when(layer == n_layers - 1)
    def _():
        pooled = jnp.mean(x.reshape(bt, seq, D_MODEL), axis=1)       # (bt, 512)
        logits = jnp.dot(pooled.astype(jnp.bfloat16), hw_ref[...],
                         preferred_element_type=jnp.float32) + hb_ref[...]
        out_ref[btile] = logits


# ------------------------------------------------------------ tiling helpers
def _vmem_capacity_bytes():
    try:
        return int(pltpu.get_tpu_info().vmem_capacity_bytes)
    except Exception:
        return 64 << 20          # conservative default (v7x per-TC size)


def _pick_chunk(batch, seq, act_budget_bytes):
    """Largest divisor of batch whose resident f32 activations fit the budget."""
    per_sample = seq * D_MODEL * 4
    best = 1
    for d in range(1, batch + 1):
        if batch % d == 0 and d * per_sample <= act_budget_bytes:
            best = d
    return best


def _pick_block_batch(chunk, seq):
    """Smallest batch tile that fills the MXU rows (>=256); weight streaming no
    longer depends on the number of tiles (layer axis is outer), so keeping the
    tile small bounds the per-step attention temporaries."""
    divs = [d for d in range(1, chunk + 1) if chunk % d == 0]
    temp_cap = 8 << 20           # per-step (bt, seq, seq) f32 score budget
    good = [d for d in divs if d * seq >= ROW_TARGET and d * seq * seq * 4 <= temp_cap]
    if good:
        return min(good)
    ok = [d for d in divs if d * seq * seq * 4 <= temp_cap]
    return max(ok) if ok else 1


def _vmem_limit_bytes(n_tiles, bt, seq, c_pad, capacity):
    f32, bf16 = 4, 2
    m = bt * seq
    slab = (D_MODEL * 3 * D_MODEL * bf16 + 3 * D_MODEL * f32       # Wqkv
            + D_MODEL * D_MODEL * bf16 + D_MODEL * f32             # Wo
            + D_MODEL * D_FF * bf16 + D_FF * f32                   # W1
            + D_FF * D_MODEL * bf16 + D_MODEL * f32                # W2
            + 4 * D_MODEL * f32)                                   # 2x LayerNorm
    head = D_MODEL * c_pad * bf16 + c_pad * f32
    streamed = m * D_MODEL * bf16 + bt * seq * f32                 # x0 tile + mask tile
    out_resident = n_tiles * bt * c_pad * f32
    scratch = (n_tiles + 1) * m * D_MODEL * f32                    # x_scr + ctx_scr
    temps = m * (3 * D_MODEL + 4 * D_MODEL + D_FF) * f32 + 2 * bt * seq * seq * f32
    est = 2 * (slab + head + streamed) + out_resident + scratch + temps + (8 << 20)
    return int(min(max(est, 16 << 20), int(capacity * 0.85)))


# ------------------------------------------------------------ forward wrapper
def _forward_chunk(params, x0, mask_bias, n_layers, c_pad, capacity):
    chunk, seq, _ = x0.shape
    bt = _pick_block_batch(chunk, seq)
    n_tiles = chunk // bt
    m = bt * seq

    kernel = functools.partial(_fused_encoder_kernel, bt, seq)

    def layer_spec(shape):
        return pl.BlockSpec(shape, lambda l, b, _n=len(shape): (l,) + (0,) * (_n - 1))

    # x0 is consumed only on layer 0: collapse its block index afterwards so it is
    # not re-streamed from HBM on every layer.
    x0_spec = pl.BlockSpec((bt, seq, D_MODEL),
                           lambda l, b: (jnp.where(l == 0, b, 0), 0, 0))
    mask_spec = pl.BlockSpec((bt, 1, seq), lambda l, b: (b, 0, 0))

    grid_spec = pltpu.PrefetchScalarGridSpec(
        num_scalar_prefetch=0,
        grid=(n_layers, n_tiles),            # layer OUTER, batch tile INNER
        in_specs=[
            x0_spec, mask_spec,
            layer_spec((1, D_MODEL, 3 * D_MODEL)), layer_spec((1, 1, 3 * D_MODEL)),
            layer_spec((1, D_MODEL, D_MODEL)), layer_spec((1, 1, D_MODEL)),
            layer_spec((1, 1, D_MODEL)), layer_spec((1, 1, D_MODEL)),
            layer_spec((1, D_MODEL, D_FF)), layer_spec((1, 1, D_FF)),
            layer_spec((1, D_FF, D_MODEL)), layer_spec((1, 1, D_MODEL)),
            layer_spec((1, 1, D_MODEL)), layer_spec((1, 1, D_MODEL)),
            pl.BlockSpec((D_MODEL, c_pad), lambda l, b: (0, 0)),
            pl.BlockSpec((1, c_pad), lambda l, b: (0, 0)),
        ],
        # whole logits slab is VMEM-resident; written back once at grid end
        out_specs=pl.BlockSpec((n_tiles, bt, c_pad), lambda l, b: (0, 0, 0)),
        scratch_shapes=[pltpu.VMEM((n_tiles, m, D_MODEL), jnp.float32),   # residual
                        pltpu.VMEM((m, D_MODEL), jnp.float32)],           # head ctx
    )

    out = pl.pallas_call(
        kernel,
        out_shape=jax.ShapeDtypeStruct((n_tiles, bt, c_pad), jnp.float32),
        grid_spec=grid_spec,
        compiler_params=pltpu.CompilerParams(
            # layer axis carries the residual stream; batch tiles share x_scr,
            # so keep both axes sequential ("arbitrary").
            dimension_semantics=("arbitrary", "arbitrary"),
            vmem_limit_bytes=_vmem_limit_bytes(n_tiles, bt, seq, c_pad, capacity)),
    )(x0, mask_bias,
      params['wqkv'], params['bqkv'], params['wo'], params['bo'],
      params['ln1_w'], params['ln1_b'], params['w1'], params['b1'],
      params['w2'], params['b2'], params['ln2_w'], params['ln2_b'],
      params['head_w'], params['head_b'])

    return out.reshape(chunk, c_pad)


def section_classifier_forward(params, embeddings, mask):
    # mask: (B, S) bool, True = padded key (src_key_padding_mask convention).
    batch, seq, _ = embeddings.shape
    n_layers = params['wqkv'].shape[0]
    c_pad = params['head_w'].shape[1]
    num_classes = params['num_classes']
    capacity = _vmem_capacity_bytes()

    # 768->512 projection as a plain XLA matmul: the wide 768-dim embeddings are
    # never held resident in kernel VMEM.
    x0 = (embeddings.astype(jnp.float32) @ params['proj_w'].astype(jnp.float32)
          + params['proj_b']).astype(jnp.bfloat16)
    mask_bias = jnp.where(mask, NEG_INF, 0.0).astype(jnp.float32)[:, None, :]  # (B,1,S)

    # Chunk the batch so one chunk's full residual stream fits in VMEM; inside a
    # chunk each layer's weights are DMA'd from HBM exactly once.
    chunk = _pick_chunk(batch, seq, int(capacity * 0.4))
    outs = []
    for c0 in range(0, batch, chunk):
        outs.append(_forward_chunk(params, x0[c0:c0 + chunk],
                                   mask_bias[c0:c0 + chunk],
                                   n_layers, c_pad, capacity))
    out = outs[0] if len(outs) == 1 else jnp.concatenate(outs, axis=0)
    return out[:, :num_classes]


# ------------------------------------------------------------------ parameters
def init_params(key, num_layers, num_classes):
    c_pad = max(LANE, ((num_classes + LANE - 1) // LANE) * LANE)
    keys = jax.random.split(key, 2 + num_layers)

    def dense(k, fan_in, fan_out):
        kw, kb = jax.random.split(k)
        w = jax.random.normal(kw, (fan_in, fan_out), jnp.float32) * 0.02
        b = jax.random.normal(kb, (1, fan_out), jnp.float32) * 0.01
        return w.astype(jnp.bfloat16), b                   # bf16 weights, f32 bias

    proj_w, proj_b = dense(keys[0], D_IN, D_MODEL)
    hw, hb = dense(keys[1], D_MODEL, num_classes)
    head_w = jnp.zeros((D_MODEL, c_pad), jnp.bfloat16).at[:, :num_classes].set(hw)
    head_b = jnp.zeros((1, c_pad), jnp.float32).at[:, :num_classes].set(hb)

    wqkv_l, bqkv_l, wo_l, bo_l, w1_l, b1_l, w2_l, b2_l = ([] for _ in range(8))
    for i in range(num_layers):
        ks = jax.random.split(keys[2 + i], 4)
        wqkv, bqkv = dense(ks[0], D_MODEL, 3 * D_MODEL)
        wo, bo = dense(ks[1], D_MODEL, D_MODEL)
        w1, b1 = dense(ks[2], D_MODEL, D_FF)
        w2, b2 = dense(ks[3], D_FF, D_MODEL)
        wqkv_l.append(wqkv); bqkv_l.append(bqkv); wo_l.append(wo); bo_l.append(bo)
        w1_l.append(w1); b1_l.append(b1); w2_l.append(w2); b2_l.append(b2)

    ones = jnp.ones((num_layers, 1, D_MODEL), jnp.float32)
    zeros = jnp.zeros((num_layers, 1, D_MODEL), jnp.float32)
    return dict(
        num_classes=num_classes,
        proj_w=proj_w, proj_b=proj_b, head_w=head_w, head_b=head_b,
        wqkv=jnp.stack(wqkv_l), bqkv=jnp.stack(bqkv_l),
        wo=jnp.stack(wo_l), bo=jnp.stack(bo_l),
        ln1_w=ones, ln1_b=zeros,
        w1=jnp.stack(w1_l), b1=jnp.stack(b1_l),
        w2=jnp.stack(w2_l), b2=jnp.stack(b2_l),
        ln2_w=ones, ln2_b=zeros)


# --------------------------------------------------- pure-JAX reference (f32)
def reference_forward(params, embeddings, mask):
    f = lambda a: a.astype(jnp.float32)
    mask_bias = jnp.where(mask, NEG_INF, 0.0)[:, None, None, :]     # (B,1,1,S)
    x = embeddings @ f(params['proj_w']) + params['proj_b']
    B, S, _ = x.shape
    n_layers = params['wqkv'].shape[0]

    def ln(z, w, b):
        mu = z.mean(-1, keepdims=True)
        var = ((z - mu) ** 2).mean(-1, keepdims=True)
        return (z - mu) / jnp.sqrt(var + LN_EPS) * w + b

    for i in range(n_layers):
        qkv = x @ f(params['wqkv'][i]) + params['bqkv'][i]
        q, k, v = jnp.split(qkv, 3, axis=-1)
        q = q.reshape(B, S, N_HEADS, D_HEAD).transpose(0, 2, 1, 3)
        k = k.reshape(B, S, N_HEADS, D_HEAD).transpose(0, 2, 1, 3)
        v = v.reshape(B, S, N_HEADS, D_HEAD).transpose(0, 2, 1, 3)
        s = jnp.einsum('bhqd,bhkd->bhqk', q, k) / (D_HEAD ** 0.5) + mask_bias
        p = jax.nn.softmax(s, axis=-1)
        a = jnp.einsum('bhqk,bhkd->bhqd', p, v).transpose(0, 2, 1, 3).reshape(B, S, D_MODEL)
        a = a @ f(params['wo'][i]) + params['bo'][i]
        x = ln(x + a, params['ln1_w'][i], params['ln1_b'][i])
        h = jax.nn.relu(x @ f(params['w1'][i]) + params['b1'][i]) @ f(params['w2'][i]) \
            + params['b2'][i]
        x = ln(x + h, params['ln2_w'][i], params['ln2_b'][i])

    logits = x.mean(axis=1) @ f(params['head_w']) + params['head_b']
    return logits[:, :params['num_classes']]


if __name__ == "__main__":
    import numpy as np

    config = dict(dropout=0.0, num_layers=2, num_classes=5)
    B, S = 2, 8

    key = jax.random.PRNGKey(0)
    k_emb, k_par = jax.random.split(key)
    embeddings = jax.random.normal(k_emb, (B, S, D_IN), jnp.float32)
    # last two positions of batch 1 are padding
    mask = jnp.zeros((B, S), jnp.bool_).at[1, 6:].set(True)

    params = init_params(k_par, config['num_layers'], config['num_classes'])

    out = section_classifier_forward(params, embeddings, mask)
    out = jax.block_until_ready(out)

    # kernel runs matmuls in bf16 (f32 accumulate); compare against f32 reference
    ref = reference_forward(params, embeddings, mask)
    np.testing.assert_allclose(np.asarray(out), np.asarray(ref), rtol=2e-2, atol=2e-2)

    print("KERNEL_OK")
</pallas_src>

<mosaic_0001>
module attributes {stable_mosaic.version = 11 : i64} {
  func.func @_fused_encoder_kernel(%arg0: i32, %arg1: i32, %arg2: memref<2x8x512xbf16, #tpu.memory_space<vmem>>, %arg3: memref<2x1x8xf32, #tpu.memory_space<vmem>>, %arg4: memref<1x512x1536xbf16, #tpu.memory_space<vmem>>, %arg5: memref<1x1x1536xf32, #tpu.memory_space<vmem>>, %arg6: memref<1x512x512xbf16, #tpu.memory_space<vmem>>, %arg7: memref<1x1x512xf32, #tpu.memory_space<vmem>>, %arg8: memref<1x1x512xf32, #tpu.memory_space<vmem>>, %arg9: memref<1x1x512xf32, #tpu.memory_space<vmem>>, %arg10: memref<1x512x1024xbf16, #tpu.memory_space<vmem>>, %arg11: memref<1x1x1024xf32, #tpu.memory_space<vmem>>, %arg12: memref<1x1024x512xbf16, #tpu.memory_space<vmem>>, %arg13: memref<1x1x512xf32, #tpu.memory_space<vmem>>, %arg14: memref<1x1x512xf32, #tpu.memory_space<vmem>>, %arg15: memref<1x1x512xf32, #tpu.memory_space<vmem>>, %arg16: memref<512x128xbf16, #tpu.memory_space<vmem>>, %arg17: memref<1x128xf32, #tpu.memory_space<vmem>>, %arg18: memref<1x2x128xf32, #tpu.memory_space<vmem>>, %arg19: memref<1x16x512xf32, #tpu.memory_space<vmem>>, %arg20: memref<16x512xf32, #tpu.memory_space<vmem>>) attributes {dimension_semantics = [#tpu.dimension_semantics<arbitrary>, #tpu.dimension_semantics<arbitrary>], iteration_bounds = array<i64: 2, 1>, scalar_prefetch = 0 : i64, scratch_operands = 2 : i64, tpu.core_type = #tpu.core_type<tc>, window_params = [{transform_indices = @transform_0, window_bounds = array<i64: 2, 8, 512>}, {transform_indices = @transform_1, window_bounds = array<i64: 2, 1, 8>}, {transform_indices = @transform_2, window_bounds = array<i64: 1, 512, 1536>}, {transform_indices = @transform_3, window_bounds = array<i64: 1, 1, 1536>}, {transform_indices = @transform_4, window_bounds = array<i64: 1, 512, 512>}, {transform_indices = @transform_5, window_bounds = array<i64: 1, 1, 512>}, {transform_indices = @transform_6, window_bounds = array<i64: 1, 1, 512>}, {transform_indices = @transform_7, window_bounds = array<i64: 1, 1, 512>}, {transform_indices = @transform_8, window_bounds = array<i64: 1, 512, 1024>}, {transform_indices = @transform_9, window_bounds = array<i64: 1, 1, 1024>}, {transform_indices = @transform_10, window_bounds = array<i64: 1, 1024, 512>}, {transform_indices = @transform_11, window_bounds = array<i64: 1, 1, 512>}, {transform_indices = @transform_12, window_bounds = array<i64: 1, 1, 512>}, {transform_indices = @transform_13, window_bounds = array<i64: 1, 1, 512>}, {pipeline_mode = #tpu.pipeline_mode<synchronous>, transform_indices = @transform_14, window_bounds = array<i64: 512, 128>}, {pipeline_mode = #tpu.pipeline_mode<synchronous>, transform_indices = @transform_15, window_bounds = array<i64: 1, 128>}, {pipeline_mode = #tpu.pipeline_mode<synchronous>, transform_indices = @transform_16, window_bounds = array<i64: 1, 2, 128>}]} {
    %c0_i32 = arith.constant 0 : i32
    %0 = arith.cmpi eq, %arg0, %c0_i32 : i32
    %1 = arith.extui %0 : i1 to i32
    %c0_i32_0 = arith.constant 0 : i32
    %2 = arith.cmpi ne, %1, %c0_i32_0 : i32
    scf.if %2 {
      %c0_102 = arith.constant 0 : index
      %c0_103 = arith.constant 0 : index
      %c0_104 = arith.constant 0 : index
      %270 = vector.load %arg2[%c0_102, %c0_103, %c0_104] : memref<2x8x512xbf16, #tpu.memory_space<vmem>>, vector<2x8x512xbf16>
      %271 = vector.shape_cast %270 : vector<2x8x512xbf16> to vector<16x512xbf16>
      %272 = arith.extf %271 : vector<16x512xbf16> to vector<16x512xf32>
      %273 = arith.index_cast %arg1 : i32 to index
      %c0_105 = arith.constant 0 : index
      %c0_106 = arith.constant 0 : index
      %274 = vector.load %arg19[%273, %c0_105, %c0_106] : memref<1x16x512xf32, #tpu.memory_space<vmem>>, vector<1x16x512xf32>
      %275 = vector.shape_cast %274 : vector<1x16x512xf32> to vector<16x512xf32>
      %276 = vector.shape_cast %272 : vector<16x512xf32> to vector<1x16x512xf32>
      tpu.vector_store %arg19[%273, %c0_105, %c0_106], %276 {strides = array<i32>} : memref<1x16x512xf32, #tpu.memory_space<vmem>>, vector<1x16x512xf32>,
    } else {
    }
    %3 = arith.index_cast %arg1 : i32 to index
    %c0 = arith.constant 0 : index
    %c0_1 = arith.constant 0 : index
    %4 = vector.load %arg19[%3, %c0, %c0_1] : memref<1x16x512xf32, #tpu.memory_space<vmem>>, vector<1x16x512xf32>
    %5 = vector.shape_cast %4 : vector<1x16x512xf32> to vector<16x512xf32>
    %6 = arith.truncf %5 : vector<16x512xf32> to vector<16x512xbf16>
    %c0_2 = arith.constant 0 : index
    %c0_3 = arith.constant 0 : index
    %c0_4 = arith.constant 0 : index
    %7 = vector.load %arg4[%c0_2, %c0_3, %c0_4] : memref<1x512x1536xbf16, #tpu.memory_space<vmem>>, vector<1x512x1536xbf16>
    %8 = vector.shape_cast %7 : vector<1x512x1536xbf16> to vector<512x1536xbf16>
    %cst = arith.constant dense<0.000000e+00> : vector<16x1536xf32>
    %9 = tpu.matmul %6, %8, %cst {dimension_numbers = #tpu.dot_dimension_numbers<[1], [0], [0], [1], [0, 0, 1, 1], [], []>} : vector<16x512xbf16>, vector<512x1536xbf16>, vector<16x1536xf32> -> vector<16x1536xf32>
    %c0_5 = arith.constant 0 : index
    %c0_6 = arith.constant 0 : index
    %c0_7 = arith.constant 0 : index
    %10 = vector.load %arg5[%c0_5, %c0_6, %c0_7] : memref<1x1x1536xf32, #tpu.memory_space<vmem>>, vector<1x1x1536xf32>
    %11 = vector.shape_cast %10 : vector<1x1x1536xf32> to vector<1x1536xf32>
    %12 = vector.broadcast %11 : vector<1x1536xf32> to vector<16x1536xf32>
    %13 = arith.addf %9, %12 : vector<16x1536xf32>
    %14 = vector.extract_strided_slice %13 {offsets = [0, 0], sizes = [16, 512], strides = [1, 1]} : vector<16x1536xf32> to vector<16x512xf32>
    %cst_8 = arith.constant 1.250000e-01 : f32
    %15 = vector.broadcast %cst_8 : f32 to vector<16x512xf32>
    %16 = arith.mulf %14, %15 : vector<16x512xf32>
    %17 = vector.shape_cast %16 : vector<16x512xf32> to vector<2x8x512xf32>
    %18 = arith.truncf %17 : vector<2x8x512xf32> to vector<2x8x512xbf16>
    %19 = vector.extract_strided_slice %13 {offsets = [0, 512], sizes = [16, 512], strides = [1, 1]} : vector<16x1536xf32> to vector<16x512xf32>
    %20 = vector.shape_cast %19 : vector<16x512xf32> to vector<2x8x512xf32>
    %21 = arith.truncf %20 : vector<2x8x512xf32> to vector<2x8x512xbf16>
    %22 = vector.extract_strided_slice %13 {offsets = [0, 1024], sizes = [16, 512], strides = [1, 1]} : vector<16x1536xf32> to vector<16x512xf32>
    %23 = vector.shape_cast %22 : vector<16x512xf32> to vector<2x8x512xf32>
    %24 = arith.truncf %23 : vector<2x8x512xf32> to vector<2x8x512xbf16>
    %c0_9 = arith.constant 0 : index
    %c0_10 = arith.constant 0 : index
    %c0_11 = arith.constant 0 : index
    %25 = vector.load %arg3[%c0_9, %c0_10, %c0_11] : memref<2x1x8xf32, #tpu.memory_space<vmem>>, vector<2x1x8xf32>
    %26 = vector.extract_strided_slice %18 {offsets = [0, 0, 0], sizes = [2, 8, 64], strides = [1, 1, 1]} : vector<2x8x512xbf16> to vector<2x8x64xbf16>
    %27 = vector.extract_strided_slice %21 {offsets = [0, 0, 0], sizes = [2, 8, 64], strides = [1, 1, 1]} : vector<2x8x512xbf16> to vector<2x8x64xbf16>
    "tpu.trace_start"() <{level = 10 : i32, message = "bqd,bkd->bqk"}> : () -> ()
    %cst_12 = arith.constant dense<0.000000e+00> : vector<2x8x8xf32>
    %28 = tpu.matmul %26, %27, %cst_12 {dimension_numbers = #tpu.dot_dimension_numbers<[2], [2], [1], [1], [0, 0, 0, 1, 1, 1], [0], [0]>} : vector<2x8x64xbf16>, vector<2x8x64xbf16>, vector<2x8x8xf32> -> vector<2x8x8xf32>
    "tpu.trace_stop"() : () -> ()
    %29 = vector.broadcast %25 : vector<2x1x8xf32> to vector<2x8x8xf32>
    %30 = arith.addf %28, %29 : vector<2x8x8xf32>
    %cst_13 = arith.constant dense<0xFF800000> : vector<2x8xf32>
    %31 = vector.multi_reduction <maximumf>, %30, %cst_13 [2] : vector<2x8x8xf32> to vector<2x8xf32>
    %32 = vector.shape_cast %31 : vector<2x8xf32> to vector<2x8x1xf32>
    %33 = vector.broadcast %32 : vector<2x8x1xf32> to vector<2x8x8xf32>
    %34 = arith.subf %30, %33 : vector<2x8x8xf32>
    %35 = math.exp %34 : vector<2x8x8xf32>
    %cst_14 = arith.constant dense<0.000000e+00> : vector<2x8xf32>
    %36 = vector.multi_reduction <add>, %35, %cst_14 [2] : vector<2x8x8xf32> to vector<2x8xf32>
    %37 = vector.shape_cast %36 : vector<2x8xf32> to vector<2x8x1xf32>
    %38 = tpu.reciprocal %37 {approx = true} : vector<2x8x1xf32> -> vector<2x8x1xf32>
    %39 = vector.broadcast %38 : vector<2x8x1xf32> to vector<2x8x8xf32>
    %40 = arith.mulf %35, %39 : vector<2x8x8xf32>
    %41 = arith.truncf %40 : vector<2x8x8xf32> to vector<2x8x8xbf16>
    %42 = vector.extract_strided_slice %24 {offsets = [0, 0, 0], sizes = [2, 8, 64], strides = [1, 1, 1]} : vector<2x8x512xbf16> to vector<2x8x64xbf16>
    "tpu.trace_start"() <{level = 10 : i32, message = "bqk,bkd->bqd"}> : () -> ()
    %cst_15 = arith.constant dense<0.000000e+00> : vector<2x8x64xf32>
    %43 = tpu.matmul %41, %42, %cst_15 {dimension_numbers = #tpu.dot_dimension_numbers<[2], [1], [1], [2], [0, 0, 0, 1, 1, 2], [0], [0]>} : vector<2x8x8xbf16>, vector<2x8x64xbf16>, vector<2x8x64xf32> -> vector<2x8x64xf32>
    "tpu.trace_stop"() : () -> ()
    %44 = vector.shape_cast %43 : vector<2x8x64xf32> to vector<16x64xf32>
    %c0_16 = arith.constant 0 : index
    %c0_17 = arith.constant 0 : index
    %45 = vector.load %arg20[%c0_16, %c0_17] : memref<16x512xf32, #tpu.memory_space<vmem>>, vector<16x64xf32>
    tpu.vector_store %arg20[%c0_16, %c0_17], %44 {strides = array<i32>} : memref<16x512xf32, #tpu.memory_space<vmem>>, vector<16x64xf32>,
    %46 = vector.extract_strided_slice %18 {offsets = [0, 0, 64], sizes = [2, 8, 64], strides = [1, 1, 1]} : vector<2x8x512xbf16> to vector<2x8x64xbf16>
    %47 = vector.extract_strided_slice %21 {offsets = [0, 0, 64], sizes = [2, 8, 64], strides = [1, 1, 1]} : vector<2x8x512xbf16> to vector<2x8x64xbf16>
    "tpu.trace_start"() <{level = 10 : i32, message = "bqd,bkd->bqk"}> : () -> ()
    %cst_18 = arith.constant dense<0.000000e+00> : vector<2x8x8xf32>
    %48 = tpu.matmul %46, %47, %cst_18 {dimension_numbers = #tpu.dot_dimension_numbers<[2], [2], [1], [1], [0, 0, 0, 1, 1, 1], [0], [0]>} : vector<2x8x64xbf16>, vector<2x8x64xbf16>, vector<2x8x8xf32> -> vector<2x8x8xf32>
    "tpu.trace_stop"() : () -> ()
    %49 = vector.broadcast %25 : vector<2x1x8xf32> to vector<2x8x8xf32>
    %50 = arith.addf %48, %49 : vector<2x8x8xf32>
    %cst_19 = arith.constant dense<0xFF800000> : vector<2x8xf32>
    %51 = vector.multi_reduction <maximumf>, %50, %cst_19 [2] : vector<2x8x8xf32> to vector<2x8xf32>
    %52 = vector.shape_cast %51 : vector<2x8xf32> to vector<2x8x1xf32>
    %53 = vector.broadcast %52 : vector<2x8x1xf32> to vector<2x8x8xf32>
    %54 = arith.subf %50, %53 : vector<2x8x8xf32>
    %55 = math.exp %54 : vector<2x8x8xf32>
    %cst_20 = arith.constant dense<0.000000e+00> : vector<2x8xf32>
    %56 = vector.multi_reduction <add>, %55, %cst_20 [2] : vector<2x8x8xf32> to vector<2x8xf32>
    %57 = vector.shape_cast %56 : vector<2x8xf32> to vector<2x8x1xf32>
    %58 = tpu.reciprocal %57 {approx = true} : vector<2x8x1xf32> -> vector<2x8x1xf32>
    %59 = vector.broadcast %58 : vector<2x8x1xf32> to vector<2x8x8xf32>
    %60 = arith.mulf %55, %59 : vector<2x8x8xf32>
    %61 = arith.truncf %60 : vector<2x8x8xf32> to vector<2x8x8xbf16>
    %62 = vector.extract_strided_slice %24 {offsets = [0, 0, 64], sizes = [2, 8, 64], strides = [1, 1, 1]} : vector<2x8x512xbf16> to vector<2x8x64xbf16>
    "tpu.trace_start"() <{level = 10 : i32, message = "bqk,bkd->bqd"}> : () -> ()
    %cst_21 = arith.constant dense<0.000000e+00> : vector<2x8x64xf32>
    %63 = tpu.matmul %61, %62, %cst_21 {dimension_numbers = #tpu.dot_dimension_numbers<[2], [1], [1], [2], [0, 0, 0, 1, 1, 2], [0], [0]>} : vector<2x8x8xbf16>, vector<2x8x64xbf16>, vector<2x8x64xf32> -> vector<2x8x64xf32>
    "tpu.trace_stop"() : () -> ()
    %64 = vector.shape_cast %63 : vector<2x8x64xf32> to vector<16x64xf32>
    %c0_22 = arith.constant 0 : index
    %c64 = arith.constant 64 : index
    %65 = vector.load %arg20[%c0_22, %c64] : memref<16x512xf32, #tpu.memory_space<vmem>>, vector<16x64xf32>
    tpu.vector_store %arg20[%c0_22, %c64], %64 {strides = array<i32>} : memref<16x512xf32, #tpu.memory_space<vmem>>, vector<16x64xf32>,
    %66 = vector.extract_strided_slice %18 {offsets = [0, 0, 128], sizes = [2, 8, 64], strides = [1, 1, 1]} : vector<2x8x512xbf16> to vector<2x8x64xbf16>
    %67 = vector.extract_strided_slice %21 {offsets = [0, 0, 128], sizes = [2, 8, 64], strides = [1, 1, 1]} : vector<2x8x512xbf16> to vector<2x8x64xbf16>
    "tpu.trace_start"() <{level = 10 : i32, message = "bqd,bkd->bqk"}> : () -> ()
    %cst_23 = arith.constant dense<0.000000e+00> : vector<2x8x8xf32>
    %68 = tpu.matmul %66, %67, %cst_23 {dimension_numbers = #tpu.dot_dimension_numbers<[2], [2], [1], [1], [0, 0, 0, 1, 1, 1], [0], [0]>} : vector<2x8x64xbf16>, vector<2x8x64xbf16>, vector<2x8x8xf32> -> vector<2x8x8xf32>
    "tpu.trace_stop"() : () -> ()
    %69 = vector.broadcast %25 : vector<2x1x8xf32> to vector<2x8x8xf32>
    %70 = arith.addf %68, %69 : vector<2x8x8xf32>
    %cst_24 = arith.constant dense<0xFF800000> : vector<2x8xf32>
    %71 = vector.multi_reduction <maximumf>, %70, %cst_24 [2] : vector<2x8x8xf32> to vector<2x8xf32>
    %72 = vector.shape_cast %71 : vector<2x8xf32> to vector<2x8x1xf32>
    %73 = vector.broadcast %72 : vector<2x8x1xf32> to vector<2x8x8xf32>
    %74 = arith.subf %70, %73 : vector<2x8x8xf32>
    %75 = math.exp %74 : vector<2x8x8xf32>
    %cst_25 = arith.constant dense<0.000000e+00> : vector<2x8xf32>
    %76 = vector.multi_reduction <add>, %75, %cst_25 [2] : vector<2x8x8xf32> to vector<2x8xf32>
    %77 = vector.shape_cast %76 : vector<2x8xf32> to vector<2x8x1xf32>
    %78 = tpu.reciprocal %77 {approx = true} : vector<2x8x1xf32> -> vector<2x8x1xf32>
    %79 = vector.broadcast %78 : vector<2x8x1xf32> to vector<2x8x8xf32>
    %80 = arith.mulf %75, %79 : vector<2x8x8xf32>
    %81 = arith.truncf %80 : vector<2x8x8xf32> to vector<2x8x8xbf16>
    %82 = vector.extract_strided_slice %24 {offsets = [0, 0, 128], sizes = [2, 8, 64], strides = [1, 1, 1]} : vector<2x8x512xbf16> to vector<2x8x64xbf16>
    "tpu.trace_start"() <{level = 10 : i32, message = "bqk,bkd->bqd"}> : () -> ()
    %cst_26 = arith.constant dense<0.000000e+00> : vector<2x8x64xf32>
    %83 = tpu.matmul %81, %82, %cst_26 {dimension_numbers = #tpu.dot_dimension_numbers<[2], [1], [1], [2], [0, 0, 0, 1, 1, 2], [0], [0]>} : vector<2x8x8xbf16>, vector<2x8x64xbf16>, vector<2x8x64xf32> -> vector<2x8x64xf32>
    "tpu.trace_stop"() : () -> ()
    %84 = vector.shape_cast %83 : vector<2x8x64xf32> to vector<16x64xf32>
    %c0_27 = arith.constant 0 : index
    %c128 = arith.constant 128 : index
    %85 = vector.load %arg20[%c0_27, %c128] : memref<16x512xf32, #tpu.memory_space<vmem>>, vector<16x64xf32>
    tpu.vector_store %arg20[%c0_27, %c128], %84 {strides = array<i32>} : memref<16x512xf32, #tpu.memory_space<vmem>>, vector<16x64xf32>,
    %86 = vector.extract_strided_slice %18 {offsets = [0, 0, 192], sizes = [2, 8, 64], strides = [1, 1, 1]} : vector<2x8x512xbf16> to vector<2x8x64xbf16>
    %87 = vector.extract_strided_slice %21 {offsets = [0, 0, 192], sizes = [2, 8, 64], strides = [1, 1, 1]} : vector<2x8x512xbf16> to vector<2x8x64xbf16>
    "tpu.trace_start"() <{level = 10 : i32, message = "bqd,bkd->bqk"}> : () -> ()
    %cst_28 = arith.constant dense<0.000000e+00> : vector<2x8x8xf32>
    %88 = tpu.matmul %86, %87, %cst_28 {dimension_numbers = #tpu.dot_dimension_numbers<[2], [2], [1], [1], [0, 0, 0, 1, 1, 1], [0], [0]>} : vector<2x8x64xbf16>, vector<2x8x64xbf16>, vector<2x8x8xf32> -> vector<2x8x8xf32>
    "tpu.trace_stop"() : () -> ()
    %89 = vector.broadcast %25 : vector<2x1x8xf32> to vector<2x8x8xf32>
    %90 = arith.addf %88, %89 : vector<2x8x8xf32>
    %cst_29 = arith.constant dense<0xFF800000> : vector<2x8xf32>
    %91 = vector.multi_reduction <maximumf>, %90, %cst_29 [2] : vector<2x8x8xf32> to vector<2x8xf32>
    %92 = vector.shape_cast %91 : vector<2x8xf32> to vector<2x8x1xf32>
    %93 = vector.broadcast %92 : vector<2x8x1xf32> to vector<2x8x8xf32>
    %94 = arith.subf %90, %93 : vector<2x8x8xf32>
    %95 = math.exp %94 : vector<2x8x8xf32>
    %cst_30 = arith.constant dense<0.000000e+00> : vector<2x8xf32>
    %96 = vector.multi_reduction <add>, %95, %cst_30 [2] : vector<2x8x8xf32> to vector<2x8xf32>
    %97 = vector.shape_cast %96 : vector<2x8xf32> to vector<2x8x1xf32>
    %98 = tpu.reciprocal %97 {approx = true} : vector<2x8x1xf32> -> vector<2x8x1xf32>
    %99 = vector.broadcast %98 : vector<2x8x1xf32> to vector<2x8x8xf32>
    %100 = arith.mulf %95, %99 : vector<2x8x8xf32>
    %101 = arith.truncf %100 : vector<2x8x8xf32> to vector<2x8x8xbf16>
    %102 = vector.extract_strided_slice %24 {offsets = [0, 0, 192], sizes = [2, 8, 64], strides = [1, 1, 1]} : vector<2x8x512xbf16> to vector<2x8x64xbf16>
    "tpu.trace_start"() <{level = 10 : i32, message = "bqk,bkd->bqd"}> : () -> ()
    %cst_31 = arith.constant dense<0.000000e+00> : vector<2x8x64xf32>
    %103 = tpu.matmul %101, %102, %cst_31 {dimension_numbers = #tpu.dot_dimension_numbers<[2], [1], [1], [2], [0, 0, 0, 1, 1, 2], [0], [0]>} : vector<2x8x8xbf16>, vector<2x8x64xbf16>, vector<2x8x64xf32> -> vector<2x8x64xf32>
    "tpu.trace_stop"() : () -> ()
    %104 = vector.shape_cast %103 : vector<2x8x64xf32> to vector<16x64xf32>
    %c0_32 = arith.constant 0 : index
    %c192 = arith.constant 192 : index
    %105 = vector.load %arg20[%c0_32, %c192] : memref<16x512xf32, #tpu.memory_space<vmem>>, vector<16x64xf32>
    tpu.vector_store %arg20[%c0_32, %c192], %104 {strides = array<i32>} : memref<16x512xf32, #tpu.memory_space<vmem>>, vector<16x64xf32>,
    %106 = vector.extract_strided_slice %18 {offsets = [0, 0, 256], sizes = [2, 8, 64], strides = [1, 1, 1]} : vector<2x8x512xbf16> to vector<2x8x64xbf16>
    %107 = vector.extract_strided_slice %21 {offsets = [0, 0, 256], sizes = [2, 8, 64], strides = [1, 1, 1]} : vector<2x8x512xbf16> to vector<2x8x64xbf16>
    "tpu.trace_start"() <{level = 10 : i32, message = "bqd,bkd->bqk"}> : () -> ()
    %cst_33 = arith.constant dense<0.000000e+00> : vector<2x8x8xf32>
    %108 = tpu.matmul %106, %107, %cst_33 {dimension_numbers = #tpu.dot_dimension_numbers<[2], [2], [1], [1], [0, 0, 0, 1, 1, 1], [0], [0]>} : vector<2x8x64xbf16>, vector<2x8x64xbf16>, vector<2x8x8xf32> -> vector<2x8x8xf32>
    "tpu.trace_stop"() : () -> ()
    %109 = vector.broadcast %25 : vector<2x1x8xf32> to vector<2x8x8xf32>
    %110 = arith.addf %108, %109 : vector<2x8x8xf32>
    %cst_34 = arith.constant dense<0xFF800000> : vector<2x8xf32>
    %111 = vector.multi_reduction <maximumf>, %110, %cst_34 [2] : vector<2x8x8xf32> to vector<2x8xf32>
    %112 = vector.shape_cast %111 : vector<2x8xf32> to vector<2x8x1xf32>
    %113 = vector.broadcast %112 : vector<2x8x1xf32> to vector<2x8x8xf32>
    %114 = arith.subf %110, %113 : vector<2x8x8xf32>
    %115 = math.exp %114 : vector<2x8x8xf32>
    %cst_35 = arith.constant dense<0.000000e+00> : vector<2x8xf32>
    %116 = vector.multi_reduction <add>, %115, %cst_35 [2] : vector<2x8x8xf32> to vector<2x8xf32>
    %117 = vector.shape_cast %116 : vector<2x8xf32> to vector<2x8x1xf32>
    %118 = tpu.reciprocal %117 {approx = true} : vector<2x8x1xf32> -> vector<2x8x1xf32>
    %119 = vector.broadcast %118 : vector<2x8x1xf32> to vector<2x8x8xf32>
    %120 = arith.mulf %115, %119 : vector<2x8x8xf32>
    %121 = arith.truncf %120 : vector<2x8x8xf32> to vector<2x8x8xbf16>
    %122 = vector.extract_strided_slice %24 {offsets = [0, 0, 256], sizes = [2, 8, 64], strides = [1, 1, 1]} : vector<2x8x512xbf16> to vector<2x8x64xbf16>
    "tpu.trace_start"() <{level = 10 : i32, message = "bqk,bkd->bqd"}> : () -> ()
    %cst_36 = arith.constant dense<0.000000e+00> : vector<2x8x64xf32>
    %123 = tpu.matmul %121, %122, %cst_36 {dimension_numbers = #tpu.dot_dimension_numbers<[2], [1], [1], [2], [0, 0, 0, 1, 1, 2], [0], [0]>} : vector<2x8x8xbf16>, vector<2x8x64xbf16>, vector<2x8x64xf32> -> vector<2x8x64xf32>
    "tpu.trace_stop"() : () -> ()
    %124 = vector.shape_cast %123 : vector<2x8x64xf32> to vector<16x64xf32>
    %c0_37 = arith.constant 0 : index
    %c256 = arith.constant 256 : index
    %125 = vector.load %arg20[%c0_37, %c256] : memref<16x512xf32, #tpu.memory_space<vmem>>, vector<16x64xf32>
    tpu.vector_store %arg20[%c0_37, %c256], %124 {strides = array<i32>} : memref<16x512xf32, #tpu.memory_space<vmem>>, vector<16x64xf32>,
    %126 = vector.extract_strided_slice %18 {offsets = [0, 0, 320], sizes = [2, 8, 64], strides = [1, 1, 1]} : vector<2x8x512xbf16> to vector<2x8x64xbf16>
    %127 = vector.extract_strided_slice %21 {offsets = [0, 0, 320], sizes = [2, 8, 64], strides = [1, 1, 1]} : vector<2x8x512xbf16> to vector<2x8x64xbf16>
    "tpu.trace_start"() <{level = 10 : i32, message = "bqd,bkd->bqk"}> : () -> ()
    %cst_38 = arith.constant dense<0.000000e+00> : vector<2x8x8xf32>
    %128 = tpu.matmul %126, %127, %cst_38 {dimension_numbers = #tpu.dot_dimension_numbers<[2], [2], [1], [1], [0, 0, 0, 1, 1, 1], [0], [0]>} : vector<2x8x64xbf16>, vector<2x8x64xbf16>, vector<2x8x8xf32> -> vector<2x8x8xf32>
    "tpu.trace_stop"() : () -> ()
    %129 = vector.broadcast %25 : vector<2x1x8xf32> to vector<2x8x8xf32>
    %130 = arith.addf %128, %129 : vector<2x8x8xf32>
    %cst_39 = arith.constant dense<0xFF800000> : vector<2x8xf32>
    %131 = vector.multi_reduction <maximumf>, %130, %cst_39 [2] : vector<2x8x8xf32> to vector<2x8xf32>
    %132 = vector.shape_cast %131 : vector<2x8xf32> to vector<2x8x1xf32>
    %133 = vector.broadcast %132 : vector<2x8x1xf32> to vector<2x8x8xf32>
    %134 = arith.subf %130, %133 : vector<2x8x8xf32>
    %135 = math.exp %134 : vector<2x8x8xf32>
    %cst_40 = arith.constant dense<0.000000e+00> : vector<2x8xf32>
    %136 = vector.multi_reduction <add>, %135, %cst_40 [2] : vector<2x8x8xf32> to vector<2x8xf32>
    %137 = vector.shape_cast %136 : vector<2x8xf32> to vector<2x8x1xf32>
    %138 = tpu.reciprocal %137 {approx = true} : vector<2x8x1xf32> -> vector<2x8x1xf32>
    %139 = vector.broadcast %138 : vector<2x8x1xf32> to vector<2x8x8xf32>
    %140 = arith.mulf %135, %139 : vector<2x8x8xf32>
    %141 = arith.truncf %140 : vector<2x8x8xf32> to vector<2x8x8xbf16>
    %142 = vector.extract_strided_slice %24 {offsets = [0, 0, 320], sizes = [2, 8, 64], strides = [1, 1, 1]} : vector<2x8x512xbf16> to vector<2x8x64xbf16>
    "tpu.trace_start"() <{level = 10 : i32, message = "bqk,bkd->bqd"}> : () -> ()
    %cst_41 = arith.constant dense<0.000000e+00> : vector<2x8x64xf32>
    %143 = tpu.matmul %141, %142, %cst_41 {dimension_numbers = #tpu.dot_dimension_numbers<[2], [1], [1], [2], [0, 0, 0, 1, 1, 2], [0], [0]>} : vector<2x8x8xbf16>, vector<2x8x64xbf16>, vector<2x8x64xf32> -> vector<2x8x64xf32>
    "tpu.trace_stop"() : () -> ()
    %144 = vector.shape_cast %143 : vector<2x8x64xf32> to vector<16x64xf32>
    %c0_42 = arith.constant 0 : index
    %c320 = arith.constant 320 : index
    %145 = vector.load %arg20[%c0_42, %c320] : memref<16x512xf32, #tpu.memory_space<vmem>>, vector<16x64xf32>
    tpu.vector_store %arg20[%c0_42, %c320], %144 {strides = array<i32>} : memref<16x512xf32, #tpu.memory_space<vmem>>, vector<16x64xf32>,
    %146 = vector.extract_strided_slice %18 {offsets = [0, 0, 384], sizes = [2, 8, 64], strides = [1, 1, 1]} : vector<2x8x512xbf16> to vector<2x8x64xbf16>
    %147 = vector.extract_strided_slice %21 {offsets = [0, 0, 384], sizes = [2, 8, 64], strides = [1, 1, 1]} : vector<2x8x512xbf16> to vector<2x8x64xbf16>
    "tpu.trace_start"() <{level = 10 : i32, message = "bqd,bkd->bqk"}> : () -> ()
    %cst_43 = arith.constant dense<0.000000e+00> : vector<2x8x8xf32>
    %148 = tpu.matmul %146, %147, %cst_43 {dimension_numbers = #tpu.dot_dimension_numbers<[2], [2], [1], [1], [0, 0, 0, 1, 1, 1], [0], [0]>} : vector<2x8x64xbf16>, vector<2x8x64xbf16>, vector<2x8x8xf32> -> vector<2x8x8xf32>
    "tpu.trace_stop"() : () -> ()
    %149 = vector.broadcast %25 : vector<2x1x8xf32> to vector<2x8x8xf32>
    %150 = arith.addf %148, %149 : vector<2x8x8xf32>
    %cst_44 = arith.constant dense<0xFF800000> : vector<2x8xf32>
    %151 = vector.multi_reduction <maximumf>, %150, %cst_44 [2] : vector<2x8x8xf32> to vector<2x8xf32>
    %152 = vector.shape_cast %151 : vector<2x8xf32> to vector<2x8x1xf32>
    %153 = vector.broadcast %152 : vector<2x8x1xf32> to vector<2x8x8xf32>
    %154 = arith.subf %150, %153 : vector<2x8x8xf32>
    %155 = math.exp %154 : vector<2x8x8xf32>
    %cst_45 = arith.constant dense<0.000000e+00> : vector<2x8xf32>
    %156 = vector.multi_reduction <add>, %155, %cst_45 [2] : vector<2x8x8xf32> to vector<2x8xf32>
    %157 = vector.shape_cast %156 : vector<2x8xf32> to vector<2x8x1xf32>
    %158 = tpu.reciprocal %157 {approx = true} : vector<2x8x1xf32> -> vector<2x8x1xf32>
    %159 = vector.broadcast %158 : vector<2x8x1xf32> to vector<2x8x8xf32>
    %160 = arith.mulf %155, %159 : vector<2x8x8xf32>
    %161 = arith.truncf %160 : vector<2x8x8xf32> to vector<2x8x8xbf16>
    %162 = vector.extract_strided_slice %24 {offsets = [0, 0, 384], sizes = [2, 8, 64], strides = [1, 1, 1]} : vector<2x8x512xbf16> to vector<2x8x64xbf16>
    "tpu.trace_start"() <{level = 10 : i32, message = "bqk,bkd->bqd"}> : () -> ()
    %cst_46 = arith.constant dense<0.000000e+00> : vector<2x8x64xf32>
    %163 = tpu.matmul %161, %162, %cst_46 {dimension_numbers = #tpu.dot_dimension_numbers<[2], [1], [1], [2], [0, 0, 0, 1, 1, 2], [0], [0]>} : vector<2x8x8xbf16>, vector<2x8x64xbf16>, vector<2x8x64xf32> -> vector<2x8x64xf32>
    "tpu.trace_stop"() : () -> ()
    %164 = vector.shape_cast %163 : vector<2x8x64xf32> to vector<16x64xf32>
    %c0_47 = arith.constant 0 : index
    %c384 = arith.constant 384 : index
    %165 = vector.load %arg20[%c0_47, %c384] : memref<16x512xf32, #tpu.memory_space<vmem>>, vector<16x64xf32>
    tpu.vector_store %arg20[%c0_47, %c384], %164 {strides = array<i32>} : memref<16x512xf32, #tpu.memory_space<vmem>>, vector<16x64xf32>,
    %166 = vector.extract_strided_slice %18 {offsets = [0, 0, 448], sizes = [2, 8, 64], strides = [1, 1, 1]} : vector<2x8x512xbf16> to vector<2x8x64xbf16>
    %167 = vector.extract_strided_slice %21 {offsets = [0, 0, 448], sizes = [2, 8, 64], strides = [1, 1, 1]} : vector<2x8x512xbf16> to vector<2x8x64xbf16>
    "tpu.trace_start"() <{level = 10 : i32, message = "bqd,bkd->bqk"}> : () -> ()
    %cst_48 = arith.constant dense<0.000000e+00> : vector<2x8x8xf32>
    %168 = tpu.matmul %166, %167, %cst_48 {dimension_numbers = #tpu.dot_dimension_numbers<[2], [2], [1], [1], [0, 0, 0, 1, 1, 1], [0], [0]>} : vector<2x8x64xbf16>, vector<2x8x64xbf16>, vector<2x8x8xf32> -> vector<2x8x8xf32>
    "tpu.trace_stop"() : () -> ()
    %169 = vector.broadcast %25 : vector<2x1x8xf32> to vector<2x8x8xf32>
    %170 = arith.addf %168, %169 : vector<2x8x8xf32>
    %cst_49 = arith.constant dense<0xFF800000> : vector<2x8xf32>
    %171 = vector.multi_reduction <maximumf>, %170, %cst_49 [2] : vector<2x8x8xf32> to vector<2x8xf32>
    %172 = vector.shape_cast %171 : vector<2x8xf32> to vector<2x8x1xf32>
    %173 = vector.broadcast %172 : vector<2x8x1xf32> to vector<2x8x8xf32>
    %174 = arith.subf %170, %173 : vector<2x8x8xf32>
    %175 = math.exp %174 : vector<2x8x8xf32>
    %cst_50 = arith.constant dense<0.000000e+00> : vector<2x8xf32>
    %176 = vector.multi_reduction <add>, %175, %cst_50 [2] : vector<2x8x8xf32> to vector<2x8xf32>
    %177 = vector.shape_cast %176 : vector<2x8xf32> to vector<2x8x1xf32>
    %178 = tpu.reciprocal %177 {approx = true} : vector<2x8x1xf32> -> vector<2x8x1xf32>
    %179 = vector.broadcast %178 : vector<2x8x1xf32> to vector<2x8x8xf32>
    %180 = arith.mulf %175, %179 : vector<2x8x8xf32>
    %181 = arith.truncf %180 : vector<2x8x8xf32> to vector<2x8x8xbf16>
    %182 = vector.extract_strided_slice %24 {offsets = [0, 0, 448], sizes = [2, 8, 64], strides = [1, 1, 1]} : vector<2x8x512xbf16> to vector<2x8x64xbf16>
    "tpu.trace_start"() <{level = 10 : i32, message = "bqk,bkd->bqd"}> : () -> ()
    %cst_51 = arith.constant dense<0.000000e+00> : vector<2x8x64xf32>
    %183 = tpu.matmul %181, %182, %cst_51 {dimension_numbers = #tpu.dot_dimension_numbers<[2], [1], [1], [2], [0, 0, 0, 1, 1, 2], [0], [0]>} : vector<2x8x8xbf16>, vector<2x8x64xbf16>, vector<2x8x64xf32> -> vector<2x8x64xf32>
    "tpu.trace_stop"() : () -> ()
    %184 = vector.shape_cast %183 : vector<2x8x64xf32> to vector<16x64xf32>
    %c0_52 = arith.constant 0 : index
    %c448 = arith.constant 448 : index
    %185 = vector.load %arg20[%c0_52, %c448] : memref<16x512xf32, #tpu.memory_space<vmem>>, vector<16x64xf32>
    tpu.vector_store %arg20[%c0_52, %c448], %184 {strides = array<i32>} : memref<16x512xf32, #tpu.memory_space<vmem>>, vector<16x64xf32>,
    %c0_53 = arith.constant 0 : index
    %c0_54 = arith.constant 0 : index
    %186 = vector.load %arg20[%c0_53, %c0_54] : memref<16x512xf32, #tpu.memory_space<vmem>>, vector<16x512xf32>
    %187 = arith.truncf %186 : vector<16x512xf32> to vector<16x512xbf16>
    %c0_55 = arith.constant 0 : index
    %c0_56 = arith.constant 0 : index
    %c0_57 = arith.constant 0 : index
    %188 = vector.load %arg6[%c0_55, %c0_56, %c0_57] : memref<1x512x512xbf16, #tpu.memory_space<vmem>>, vector<1x512x512xbf16>
    %189 = vector.shape_cast %188 : vector<1x512x512xbf16> to vector<512x512xbf16>
    %cst_58 = arith.constant dense<0.000000e+00> : vector<16x512xf32>
    %190 = tpu.matmul %187, %189, %cst_58 {dimension_numbers = #tpu.dot_dimension_numbers<[1], [0], [0], [1], [0, 0, 1, 1], [], []>} : vector<16x512xbf16>, vector<512x512xbf16>, vector<16x512xf32> -> vector<16x512xf32>
    %c0_59 = arith.constant 0 : index
    %c0_60 = arith.constant 0 : index
    %c0_61 = arith.constant 0 : index
    %191 = vector.load %arg7[%c0_59, %c0_60, %c0_61] : memref<1x1x512xf32, #tpu.memory_space<vmem>>, vector<1x1x512xf32>
    %192 = vector.shape_cast %191 : vector<1x1x512xf32> to vector<1x512xf32>
    %193 = vector.broadcast %192 : vector<1x512xf32> to vector<16x512xf32>
    %194 = arith.addf %190, %193 : vector<16x512xf32>
    %195 = arith.addf %5, %194 : vector<16x512xf32>
    %c0_62 = arith.constant 0 : index
    %c0_63 = arith.constant 0 : index
    %c0_64 = arith.constant 0 : index
    %196 = vector.load %arg8[%c0_62, %c0_63, %c0_64] : memref<1x1x512xf32, #tpu.memory_space<vmem>>, vector<1x1x512xf32>
    %197 = vector.shape_cast %196 : vector<1x1x512xf32> to vector<1x512xf32>
    %c0_65 = arith.constant 0 : index
    %c0_66 = arith.constant 0 : index
    %c0_67 = arith.constant 0 : index
    %198 = vector.load %arg9[%c0_65, %c0_66, %c0_67] : memref<1x1x512xf32, #tpu.memory_space<vmem>>, vector<1x1x512xf32>
    %199 = vector.shape_cast %198 : vector<1x1x512xf32> to vector<1x512xf32>
    %cst_68 = arith.constant dense<0.000000e+00> : vector<16xf32>
    %200 = vector.multi_reduction <add>, %195, %cst_68 [1] : vector<16x512xf32> to vector<16xf32>
    %201 = vector.shape_cast %200 : vector<16xf32> to vector<16x1xf32>
    %cst_69 = arith.constant 5.120000e+02 : f32
    %202 = vector.broadcast %cst_69 : f32 to vector<16x1xf32>
    %203 = arith.divf %201, %202 : vector<16x1xf32>
    %204 = vector.broadcast %203 : vector<16x1xf32> to vector<16x512xf32>
    %205 = arith.subf %195, %204 : vector<16x512xf32>
    %206 = arith.mulf %205, %205 : vector<16x512xf32>
    %cst_70 = arith.constant dense<0.000000e+00> : vector<16xf32>
    %207 = vector.multi_reduction <add>, %206, %cst_70 [1] : vector<16x512xf32> to vector<16xf32>
    %208 = vector.shape_cast %207 : vector<16xf32> to vector<16x1xf32>
    %cst_71 = arith.constant 5.120000e+02 : f32
    %209 = vector.broadcast %cst_71 : f32 to vector<16x1xf32>
    %210 = arith.divf %208, %209 : vector<16x1xf32>
    %cst_72 = arith.constant 9.99999974E-6 : f32
    %211 = vector.broadcast %cst_72 : f32 to vector<16x1xf32>
    %212 = arith.addf %210, %211 : vector<16x1xf32>
    %213 = math.rsqrt %212 : vector<16x1xf32>
    %214 = vector.broadcast %213 : vector<16x1xf32> to vector<16x512xf32>
    %215 = arith.mulf %205, %214 : vector<16x512xf32>
    %216 = vector.broadcast %197 : vector<1x512xf32> to vector<16x512xf32>
    %217 = arith.mulf %215, %216 : vector<16x512xf32>
    %218 = vector.broadcast %199 : vector<1x512xf32> to vector<16x512xf32>
    %219 = arith.addf %217, %218 : vector<16x512xf32>
    %220 = arith.truncf %219 : vector<16x512xf32> to vector<16x512xbf16>
    %c0_73 = arith.constant 0 : index
    %c0_74 = arith.constant 0 : index
    %c0_75 = arith.constant 0 : index
    %221 = vector.load %arg10[%c0_73, %c0_74, %c0_75] : memref<1x512x1024xbf16, #tpu.memory_space<vmem>>, vector<1x512x1024xbf16>
    %222 = vector.shape_cast %221 : vector<1x512x1024xbf16> to vector<512x1024xbf16>
    %cst_76 = arith.constant dense<0.000000e+00> : vector<16x1024xf32>
    %223 = tpu.matmul %220, %222, %cst_76 {dimension_numbers = #tpu.dot_dimension_numbers<[1], [0], [0], [1], [0, 0, 1, 1], [], []>} : vector<16x512xbf16>, vector<512x1024xbf16>, vector<16x1024xf32> -> vector<16x1024xf32>
    %c0_77 = arith.constant 0 : index
    %c0_78 = arith.constant 0 : index
    %c0_79 = arith.constant 0 : index
    %224 = vector.load %arg11[%c0_77, %c0_78, %c0_79] : memref<1x1x1024xf32, #tpu.memory_space<vmem>>, vector<1x1x1024xf32>
    %225 = vector.shape_cast %224 : vector<1x1x1024xf32> to vector<1x1024xf32>
    %226 = vector.broadcast %225 : vector<1x1024xf32> to vector<16x1024xf32>
    %227 = arith.addf %223, %226 : vector<16x1024xf32>
    %cst_80 = arith.constant 0.000000e+00 : f32
    %228 = vector.broadcast %cst_80 : f32 to vector<16x1024xf32>
    %229 = arith.maximumf %227, %228 : vector<16x1024xf32>
    %230 = arith.truncf %229 : vector<16x1024xf32> to vector<16x1024xbf16>
    %c0_81 = arith.constant 0 : index
    %c0_82 = arith.constant 0 : index
    %c0_83 = arith.constant 0 : index
    %231 = vector.load %arg12[%c0_81, %c0_82, %c0_83] : memref<1x1024x512xbf16, #tpu.memory_space<vmem>>, vector<1x1024x512xbf16>
    %232 = vector.shape_cast %231 : vector<1x1024x512xbf16> to vector<1024x512xbf16>
    %cst_84 = arith.constant dense<0.000000e+00> : vector<16x512xf32>
    %233 = tpu.matmul %230, %232, %cst_84 {dimension_numbers = #tpu.dot_dimension_numbers<[1], [0], [0], [1], [0, 0, 1, 1], [], []>} : vector<16x1024xbf16>, vector<1024x512xbf16>, vector<16x512xf32> -> vector<16x512xf32>
    %c0_85 = arith.constant 0 : index
    %c0_86 = arith.constant 0 : index
    %c0_87 = arith.constant 0 : index
    %234 = vector.load %arg13[%c0_85, %c0_86, %c0_87] : memref<1x1x512xf32, #tpu.memory_space<vmem>>, vector<1x1x512xf32>
    %235 = vector.shape_cast %234 : vector<1x1x512xf32> to vector<1x512xf32>
    %236 = vector.broadcast %235 : vector<1x512xf32> to vector<16x512xf32>
    %237 = arith.addf %233, %236 : vector<16x512xf32>
    %238 = arith.addf %219, %237 : vector<16x512xf32>
    %c0_88 = arith.constant 0 : index
    %c0_89 = arith.constant 0 : index
    %c0_90 = arith.constant 0 : index
    %239 = vector.load %arg14[%c0_88, %c0_89, %c0_90] : memref<1x1x512xf32, #tpu.memory_space<vmem>>, vector<1x1x512xf32>
    %240 = vector.shape_cast %239 : vector<1x1x512xf32> to vector<1x512xf32>
    %c0_91 = arith.constant 0 : index
    %c0_92 = arith.constant 0 : index
    %c0_93 = arith.constant 0 : index
    %241 = vector.load %arg15[%c0_91, %c0_92, %c0_93] : memref<1x1x512xf32, #tpu.memory_space<vmem>>, vector<1x1x512xf32>
    %242 = vector.shape_cast %241 : vector<1x1x512xf32> to vector<1x512xf32>
    %cst_94 = arith.constant dense<0.000000e+00> : vector<16xf32>
    %243 = vector.multi_reduction <add>, %238, %cst_94 [1] : vector<16x512xf32> to vector<16xf32>
    %244 = vector.shape_cast %243 : vector<16xf32> to vector<16x1xf32>
    %cst_95 = arith.constant 5.120000e+02 : f32
    %245 = vector.broadcast %cst_95 : f32 to vector<16x1xf32>
    %246 = arith.divf %244, %245 : vector<16x1xf32>
    %247 = vector.broadcast %246 : vector<16x1xf32> to vector<16x512xf32>
    %248 = arith.subf %238, %247 : vector<16x512xf32>
    %249 = arith.mulf %248, %248 : vector<16x512xf32>
    %cst_96 = arith.constant dense<0.000000e+00> : vector<16xf32>
    %250 = vector.multi_reduction <add>, %249, %cst_96 [1] : vector<16x512xf32> to vector<16xf32>
    %251 = vector.shape_cast %250 : vector<16xf32> to vector<16x1xf32>
    %cst_97 = arith.constant 5.120000e+02 : f32
    %252 = vector.broadcast %cst_97 : f32 to vector<16x1xf32>
    %253 = arith.divf %251, %252 : vector<16x1xf32>
    %cst_98 = arith.constant 9.99999974E-6 : f32
    %254 = vector.broadcast %cst_98 : f32 to vector<16x1xf32>
    %255 = arith.addf %253, %254 : vector<16x1xf32>
    %256 = math.rsqrt %255 : vector<16x1xf32>
    %257 = vector.broadcast %256 : vector<16x1xf32> to vector<16x512xf32>
    %258 = arith.mulf %248, %257 : vector<16x512xf32>
    %259 = vector.broadcast %240 : vector<1x512xf32> to vector<16x512xf32>
    %260 = arith.mulf %258, %259 : vector<16x512xf32>
    %261 = vector.broadcast %242 : vector<1x512xf32> to vector<16x512xf32>
    %262 = arith.addf %260, %261 : vector<16x512xf32>
    %263 = arith.index_cast %arg1 : i32 to index
    %c0_99 = arith.constant 0 : index
    %c0_100 = arith.constant 0 : index
    %264 = vector.load %arg19[%263, %c0_99, %c0_100] : memref<1x16x512xf32, #tpu.memory_space<vmem>>, vector<1x16x512xf32>
    %265 = vector.shape_cast %264 : vector<1x16x512xf32> to vector<16x512xf32>
    %266 = vector.shape_cast %262 : vector<16x512xf32> to vector<1x16x512xf32>
    tpu.vector_store %arg19[%263, %c0_99, %c0_100], %266 {strides = array<i32>} : memref<1x16x512xf32, #tpu.memory_space<vmem>>, vector<1x16x512xf32>,
    %c1_i32 = arith.constant 1 : i32
    %267 = arith.cmpi eq, %arg0, %c1_i32 : i32
    %268 = arith.extui %267 : i1 to i32
    %c0_i32_101 = arith.constant 0 : i32
    %269 = arith.cmpi ne, %268, %c0_i32_101 : i32
    scf.if %269 {
      %270 = vector.shape_cast %262 : vector<16x512xf32> to vector<2x8x512xf32>
      %cst_102 = arith.constant dense<0.000000e+00> : vector<2x512xf32>
      %271 = vector.multi_reduction <add>, %270, %cst_102 [1] : vector<2x8x512xf32> to vector<2x512xf32>
      %cst_103 = arith.constant 8.000000e+00 : f32
      %272 = vector.broadcast %cst_103 : f32 to vector<2x512xf32>
      %273 = arith.divf %271, %272 : vector<2x512xf32>
      %274 = arith.truncf %273 : vector<2x512xf32> to vector<2x512xbf16>
      %c0_104 = arith.constant 0 : index
      %c0_105 = arith.constant 0 : index
      %275 = vector.load %arg16[%c0_104, %c0_105] : memref<512x128xbf16, #tpu.memory_space<vmem>>, vector<512x128xbf16>
      %cst_106 = arith.constant dense<0.000000e+00> : vector<2x128xf32>
      %276 = tpu.matmul %274, %275, %cst_106 {dimension_numbers = #tpu.dot_dimension_numbers<[1], [0], [0], [1], [0, 0, 1, 1], [], []>} : vector<2x512xbf16>, vector<512x128xbf16>, vector<2x128xf32> -> vector<2x128xf32>
      %c0_107 = arith.constant 0 : index
      %c0_108 = arith.constant 0 : index
      %277 = vector.load %arg17[%c0_107, %c0_108] : memref<1x128xf32, #tpu.memory_space<vmem>>, vector<1x128xf32>
      %278 = vector.broadcast %277 : vector<1x128xf32> to vector<2x128xf32>
      %279 = arith.addf %276, %278 : vector<2x128xf32>
      %280 = arith.index_cast %arg1 : i32 to index
      %c0_109 = arith.constant 0 : index
      %c0_110 = arith.constant 0 : index
      %281 = vector.load %arg18[%280, %c0_109, %c0_110] : memref<1x2x128xf32, #tpu.memory_space<vmem>>, vector<1x2x128xf32>
      %282 = vector.shape_cast %281 : vector<1x2x128xf32> to vector<2x128xf32>
      %283 = vector.shape_cast %279 : vector<2x128xf32> to vector<1x2x128xf32>
      tpu.vector_store %arg18[%280, %c0_109, %c0_110], %283 {strides = array<i32>} : memref<1x2x128xf32, #tpu.memory_space<vmem>>, vector<1x2x128xf32>,
    } else {
    }
    return
  }
  func.func @transform_0(%arg0: i32, %arg1: i32) -> (i32, i32, i32) {
    %c0_i32 = arith.constant 0 : i32
    %0 = arith.cmpi eq, %arg0, %c0_i32 : i32
    %c0_i32_0 = arith.constant 0 : i32
    %1 = arith.select %0, %arg1, %c0_i32_0 : i32
    %c0_i32_1 = arith.constant 0 : i32
    %c0_i32_2 = arith.constant 0 : i32
    %c0_i32_3 = arith.constant 0 : i32
    return %1, %c0_i32_1, %c0_i32_2 : i32, i32, i32
  }
  func.func @transform_1(%arg0: i32, %arg1: i32) -> (i32, i32, i32) {
    %c0_i32 = arith.constant 0 : i32
    %c0_i32_0 = arith.constant 0 : i32
    %c0_i32_1 = arith.constant 0 : i32
    return %arg1, %c0_i32, %c0_i32_0 : i32, i32, i32
  }
  func.func @transform_2(%arg0: i32, %arg1: i32) -> (i32, i32, i32) {
    %c0_i32 = arith.constant 0 : i32
    %c0_i32_0 = arith.constant 0 : i32
    %c0_i32_1 = arith.constant 0 : i32
    return %arg0, %c0_i32, %c0_i32_0 : i32, i32, i32
  }
  func.func @transform_3(%arg0: i32, %arg1: i32) -> (i32, i32, i32) {
    %c0_i32 = arith.constant 0 : i32
    %c0_i32_0 = arith.constant 0 : i32
    %c0_i32_1 = arith.constant 0 : i32
    return %arg0, %c0_i32, %c0_i32_0 : i32, i32, i32
  }
  func.func @transform_4(%arg0: i32, %arg1: i32) -> (i32, i32, i32) {
    %c0_i32 = arith.constant 0 : i32
    %c0_i32_0 = arith.constant 0 : i32
    %c0_i32_1 = arith.constant 0 : i32
    return %arg0, %c0_i32, %c0_i32_0 : i32, i32, i32
  }
  func.func @transform_5(%arg0: i32, %arg1: i32) -> (i32, i32, i32) {
    %c0_i32 = arith.constant 0 : i32
    %c0_i32_0 = arith.constant 0 : i32
    %c0_i32_1 = arith.constant 0 : i32
    return %arg0, %c0_i32, %c0_i32_0 : i32, i32, i32
  }
  func.func @transform_6(%arg0: i32, %arg1: i32) -> (i32, i32, i32) {
    %c0_i32 = arith.constant 0 : i32
    %c0_i32_0 = arith.constant 0 : i32
    %c0_i32_1 = arith.constant 0 : i32
    return %arg0, %c0_i32, %c0_i32_0 : i32, i32, i32
  }
  func.func @transform_7(%arg0: i32, %arg1: i32) -> (i32, i32, i32) {
    %c0_i32 = arith.constant 0 : i32
    %c0_i32_0 = arith.constant 0 : i32
    %c0_i32_1 = arith.constant 0 : i32
    return %arg0, %c0_i32, %c0_i32_0 : i32, i32, i32
  }
  func.func @transform_8(%arg0: i32, %arg1: i32) -> (i32, i32, i32) {
    %c0_i32 = arith.constant 0 : i32
    %c0_i32_0 = arith.constant 0 : i32
    %c0_i32_1 = arith.constant 0 : i32
    return %arg0, %c0_i32, %c0_i32_0 : i32, i32, i32
  }
  func.func @transform_9(%arg0: i32, %arg1: i32) -> (i32, i32, i32) {
    %c0_i32 = arith.constant 0 : i32
    %c0_i32_0 = arith.constant 0 : i32
    %c0_i32_1 = arith.constant 0 : i32
    return %arg0, %c0_i32, %c0_i32_0 : i32, i32, i32
  }
  func.func @transform_10(%arg0: i32, %arg1: i32) -> (i32, i32, i32) {
    %c0_i32 = arith.constant 0 : i32
    %c0_i32_0 = arith.constant 0 : i32
    %c0_i32_1 = arith.constant 0 : i32
    return %arg0, %c0_i32, %c0_i32_0 : i32, i32, i32
  }
  func.func @transform_11(%arg0: i32, %arg1: i32) -> (i32, i32, i32) {
    %c0_i32 = arith.constant 0 : i32
    %c0_i32_0 = arith.constant 0 : i32
    %c0_i32_1 = arith.constant 0 : i32
    return %arg0, %c0_i32, %c0_i32_0 : i32, i32, i32
  }
  func.func @transform_12(%arg0: i32, %arg1: i32) -> (i32, i32, i32) {
    %c0_i32 = arith.constant 0 : i32
    %c0_i32_0 = arith.constant 0 : i32
    %c0_i32_1 = arith.constant 0 : i32
    return %arg0, %c0_i32, %c0_i32_0 : i32, i32, i32
  }
  func.func @transform_13(%arg0: i32, %arg1: i32) -> (i32, i32, i32) {
    %c0_i32 = arith.constant 0 : i32
    %c0_i32_0 = arith.constant 0 : i32
    %c0_i32_1 = arith.constant 0 : i32
    return %arg0, %c0_i32, %c0_i32_0 : i32, i32, i32
  }
  func.func @transform_14(%arg0: i32, %arg1: i32) -> (i32, i32) {
    %c0_i32 = arith.constant 0 : i32
    %c0_i32_0 = arith.constant 0 : i32
    %c0_i32_1 = arith.constant 0 : i32
    return %c0_i32, %c0_i32_0 : i32, i32
  }
  func.func @transform_15(%arg0: i32, %arg1: i32) -> (i32, i32) {
    %c0_i32 = arith.constant 0 : i32
    %c0_i32_0 = arith.constant 0 : i32
    %c0_i32_1 = arith.constant 0 : i32
    return %c0_i32, %c0_i32_0 : i32, i32
  }
  func.func @transform_16(%arg0: i32, %arg1: i32) -> (i32, i32, i32) {
    %c0_i32 = arith.constant 0 : i32
    %c0_i32_0 = arith.constant 0 : i32
    %c0_i32_1 = arith.constant 0 : i32
    %c0_i32_2 = arith.constant 0 : i32
    return %c0_i32, %c0_i32_0, %c0_i32_1 : i32, i32, i32
  }
}

</mosaic_0001>

<bundles_post_ra>
// kernel: tpu_custom_call.1
= control target key start
LH: loop header
LB: loop body
LE: loop exit
PB: predicated region body
PF: predicated region fallthrough
CT: control target
= control target key end

     0   :  { %s17293_s0 = inlined_call_operand.hbm [shape: bf16[2,8,512], index: 0, kind: input, shape index: {}]   ;;  %s17294_s1 = inlined_call_operand.hbm [shape: f32[2,1,8], index: 1, kind: input, shape index: {}]   ;;  %s17295_s2 = inlined_call_operand.hbm [shape: bf16[2,512,1536], index: 2, kind: input, shape index: {}]   ;;  %s17296_s3 = inlined_call_operand.hbm [shape: f32[2,1,1536], index: 3, kind: input, shape index: {}]   ;;  %s17297_s4 = inlined_call_operand.hbm [shape: bf16[2,512,512], index: 4, kind: input, shape index: {}]   ;;  %s17298_s5 = inlined_call_operand.hbm [shape: f32[2,1,512], index: 5, kind: input, shape index: {}]   ;;  %s17299_s6 = inlined_call_operand.hbm [shape: f32[2,1,512], index: 6, kind: input, shape index: {}]   ;;  %s17300_s7 = inlined_call_operand.hbm [shape: f32[2,1,512], index: 7, kind: input, shape index: {}]   ;;  %s17301_s8 = inlined_call_operand.hbm [shape: bf16[2,512,1024], index: 8, kind: input, shape index: {}]   ;;  %s17302_s9 = inlined_call_operand.hbm [shape: f32[2,1,1024], index: 9, kind: input, shape index: {}]   ;;  %s17303_s10 = inlined_call_operand.hbm [shape: bf16[2,1024,512], index: 10, kind: input, shape index: {}]   ;;  %s17304_s11 = inlined_call_operand.hbm [shape: f32[2,1,512], index: 11, kind: input, shape index: {}]   ;;  %s17305_s12 = inlined_call_operand.hbm [shape: f32[2,1,512], index: 12, kind: input, shape index: {}]   ;;  %s17306_s13 = inlined_call_operand.hbm [shape: f32[2,1,512], index: 13, kind: input, shape index: {}]   ;;  %s17307_s14 = inlined_call_operand.hbm [shape: bf16[512,128], index: 14, kind: input, shape index: {}]   ;;  %s17308_s15 = inlined_call_operand.hbm [shape: f32[1,128], index: 15, kind: input, shape index: {}]   ;;  %s17309_s16 = inlined_call_operand.hbm [shape: f32[1,2,128], index: 16, kind: output, shape index: {}]  }
   0x1   :  { %17328 = sst [smem:[#allocation39_spill]] %s17293_s0 }
   0x2   :  { %17329 = sst [smem:[#allocation40_spill]] %s17294_s1 }
   0x3   :  { %17330 = sst [smem:[#allocation41_spill]] %s17295_s2 }
   0x4   :  { %17331 = sst [smem:[#allocation42_spill]] %s17296_s3 }
   0x5   :  { %17332 = sst [smem:[#allocation43_spill]] %s17297_s4 }
   0x6   :  { %17333 = sst [smem:[#allocation44_spill]] %s17305_s12 }
   0x7   :  { %17334 = sst [smem:[#allocation45_spill]] %s17306_s13 }
   0x8   :  { %17335 = sst [smem:[#allocation46_spill]] %s17307_s14 }
   0x9   :  { %17336 = sst [smem:[#allocation47_spill]] %s17308_s15 }
   0xa   :  { %17337 = sst [smem:[#allocation48_spill]] %s17309_s16 }
   0xb   :  { %21 = vsyncpa [#allocation5], 0 }
   0xc   :  { %23 = vsyncpa [#allocation5 + $0x1], 0 }
   0xd   :  { %24 = vsyncpa [#allocation8], 0 }
   0xe   :  { %25 = vsyncpa [#allocation23], 0 }
   0xf   :  { %26 = vsyncpa [#allocation6], 0  ;;  %s15141_s21 = smov 0   ;;  %s15143_s22 = smov 0  }
  0x10   :  { %s15145_s23 = smov 0   ;;  %s15147_s24 = smov 0  }
  0x11   :  { %s15149_s25 = smov 0   ;;  %s15151_s26 = smov 0  }
  0x12 LB: > { %17338 = sst [smem:[#allocation31_spill]] %s15008_s22  ;;  %s15170_s27 = sadd.s32 4294967295, %s15024_s26   ;;  %s15024_s26 = sphi %s15151_s26, %s32_s26   ;;  %s15020_s25 = sphi %s15149_s25, %s17389_s25   ;;  %s15016_s24 = sphi %s15147_s24, %s17388_s24   ;;  %s15012_s23 = sphi %s15145_s23, %s17387_s23   ;;  %s15008_s22 = sphi %s15143_s22, %s17386_s22   ;;  %s15004_s21 = sphi %s15141_s21, %s17383_s21  }
  0x13   : > { %17339 = sst [smem:[#allocation32_spill]] %s15016_s24  ;;  %s44_s28 = sadd.s32 1, %s15020_s25 }
  0x14   : > { %17340 = sst [smem:[#allocation33_spill]] %s15024_s26  ;;  %p46_p0 = scmp.ge.s32.totalorder %s44_s28, 2 }
  0x15   : > { %17341 = sst [smem:[#allocation34_spill]] %s15170_s27  ;;  %s107_s29 = sadd.s32 1, %s15012_s23 }
  0x16   : > { %p114_p1 = scmp.ne.s32.totalorder %s15012_s23, %s15008_s22  ;;  %p17314_p2 = scmp.eq.s32.totalorder %s15024_s26, 0 }
  0x17   : > { %s17391_s28 = smov (%p46_p0, %s44_s28), 0  ;;  %p120_p4 = scmp.ne.s32.totalorder %s15008_s22, %s15004_s21 }
  0x18   : > { %17342 = sst [smem:[#allocation35_spill]] %s17391_s28  ;;  %p15181_p3 = por %p17314_p2, %p114_p1 }
  0x19   : > { %s104_s0 = ssub.s32 %s15020_s25, %s17391_s28  ;;  %p17313_p5 = scmp.eq.s32.totalorder %s15170_s27, 0 }
  0x1a   : > { %p105_p6 = scmp.eq.s32.totalorder %s104_s0, 0  ;;  %p11653_p7 = scmp.ge.s32.totalorder %s15024_s26, 1 }
  0x1b   : > { %p15192_p8 = por %p17313_p5, %p120_p4  ;;  %p480_p9 = scmp.lt.s32.totalorder %s15024_s26, 3 }
  0x1c   : > { %s15198_s18 = scalar_select %p105_p6, %s15012_s23, %s107_s29  }
  0x1d   : > { %s17344_s17 = scalar_select %p15192_p8, 1, 0 }
  0x1e   : > { %17346 = sst [smem:[#allocation37_spill]] %s15198_s18  ;;  %p15200_p10 = pnand %p11653_p7, %p480_p9 }
  0x1f   : > { %17345 = sst [smem:[#allocation36_spill]] %s17344_s17  ;;  %s15026_s20 = smov [#allocation7]  }
  0x20   : > { %s17347_s19 = scalar_select %p15200_p10, 1, 0 }
  0x21   : > { %p13163_p11 = pneg %p15200_p10  ;;  %s495_s21 = sshll.u32 %s15026_s20, 4  ;;  %s496_s21 = int_to_ptr.vmem [resolvable:$true] %s495_s21 }
  0x22   : > { %17348 = sst [smem:[#allocation38_spill]] %s17347_s19  ;;  %s15027_s28 = smov [#allocation21]  }
  0x23   : > { %p15208_p12 = pnand %p13163_p11, %p17313_p5  ;;  %s508_s29 = sshll.u32 %s15027_s28, 4  ;;  %s509_s29 = int_to_ptr.vmem [resolvable:$true] %s508_s29 }
  0x24   : > { %s14527_s18 = scalar_lea.vmem %s496_s21, 32  ;;  %p14535_p6 = scmp.lt.s32.totalorder %s496_s21, %s496_s21 }
  0x25   : > { %p14518_p13 = pneg %p15208_p12  ;;  %p14528_p0 = scmp.ne.s32.totalorder %s496_s21, %s14527_s18 }
  0x26   : > { %p14536_p7 = scmp.lt.s32.totalorder %s14527_s18, %s14527_s18 }
  0x27   : > { %p14530_p1 = pnand %p14528_p0, %p14518_p13 }
  0x28   : > { %p14537_p9 = por %p14536_p7, %p14535_p6 }
  0x29   : > { %p14531_p4 = pneg %p14530_p1 }
  0x2b   : > { %p14538_p11 = pnand %p14537_p9, %p14531_p4 }
  0x2d   : > { %14541 = shalt.err (!%p14538_p11)
}
  0x2e   : > { %s15028_s20 = smov 16   ;;  %s15029_s16 = smov 1  }
  0x2f   : > { %s17350_s1 = sld [smem:[#allocation40_spill]]  ;;  %s14553_s17 = scalar_lea.vmem %s509_s29, 4096 }
  0x30   : > { %p14554_p5 = scmp.ne.s32.totalorder %s509_s29, %s14553_s17  ;;  %p14561_p2 = scmp.lt.s32.totalorder %s509_s29, %s509_s29 }
  0x31   : > { %p14562_p8 = scmp.lt.s32.totalorder %s14553_s17, %s14553_s17 }
  0x32   : > { %p14556_p0 = pnand %p14554_p5, %p14518_p13 }
  0x33   : > { %p14563_p6 = por %p14562_p8, %p14561_p2 }
  0x34   : > { %p14557_p1 = pneg %p14556_p0 }
  0x35   : > { %13166 = dma.hbm_to_vmem [thread:$0]  (!%p15208_p12), %s17350_s1, 32, %s496_s21, [#allocation8], %s15028_s20, %s15028_s20, %s15029_s16  }
  0x36   : > { %p14564_p4 = pnand %p14563_p6, %p14557_p1 }
  0x38   : > { %14567 = shalt.err (!%p14564_p4)
}
  0x39   : > { %s15030_s18 = smov 64   ;;  %s15031_s22 = smov 4  }
  0x3a   : > { %s17351_s14 = sld [smem:[#allocation46_spill]]  ;;  %s15032_s16 = smov [#allocation22]  }
  0x3b   : > { %s522_s24 = sshll.u32 %s15032_s16, 4  ;;  %s523_s24 = int_to_ptr.vmem [resolvable:$true] %s522_s24 }
  0x3c   : > { %s14579_s21 = scalar_lea.vmem %s523_s24, 16  ;;  %s14586_s17 = scalar_lea.vmem %s523_s24, 32 }
  0x3d   : > { %p14580_p5 = scmp.ne.s32.totalorder %s523_s24, %s14579_s21  ;;  %p14587_p8 = scmp.lt.s32.totalorder %s523_s24, %s523_s24 }
  0x3e   : > { %p14588_p9 = scmp.lt.s32.totalorder %s14586_s17, %s14579_s21 }
  0x3f   : > { %p14582_p7 = pnand %p14580_p5, %p14518_p13 }
  0x40   : > { %13169 = dma.hbm_to_vmem [thread:$0]  (!%p15208_p12), %s17351_s14, 4096, %s509_s29, [#allocation8], %s15030_s18, %s15030_s18, %s15031_s22  }
  0x41   : > { %p14583_p2 = pneg %p14582_p7  ;;  %p14589_p11 = por %p14588_p9, %p14587_p8 }
  0x43   : > { %p14590_p0 = pnand %p14589_p11, %p14583_p2 }
  0x45   : > { %14593 = shalt.err (!%p14590_p0)
}
  0x46   : > { %s17352_s15 = sld [smem:[#allocation47_spill]]  ;;  %p11657_p1 = scmp.ge.s32.totalorder %s15024_s26, 2 }
  0x47   : > { %s533_s22 = sand.u32 (!%p11657_p1), 1, %s15024_s26   ;;  %s15033_s19 = smov (!%p11657_p1), [#allocation4]  }
  0x48   : > { %529 = sbr.rel (%p11657_p1) target bundleno = 253 (0xfd), region = 28  ;;  %s547_s29 = sshll.u32 (!%p11657_p1), %s15033_s19, 4  ;;  %s548_s29 = int_to_ptr.vmem [resolvable:$true] %s547_s29 }
  0x49   : > { %s15240_s28 = scalar_lea.sflag (!%p11657_p1), [#allocation5], %s533_s22  ;;  %s14604_s18 = scalar_lea.vmem (!%p11657_p1), %s548_s29, 512 }
  0x4a   : > { %p14605_p13 = scmp.ne.s32.totalorder (!%p11657_p1), %s548_s29, %s14604_s18  ;;  %p17353_p6 = scmp.eq.s32.totalorder (!%p11657_p1), %s15024_s26, 0 }
  0x4b   : > { %s14610_s0 = scalar_lea.vmem (!%p11657_p1), %s548_s29, 1024  ;;  %p14611_p7 = scmp.lt.s32.totalorder (!%p11657_p1), %s548_s29, %s548_s29 }
  0x4c   : > { %13172 = dma.hbm_to_vmem [thread:$0]  (!%p15208_p12), %s17352_s15, 16, %s523_s24, [#allocation23]  }
  0x4d   : > { %p14606_p4 = pnand %p14605_p13, %p17353_p6  ;;  %p14612_p2 = scmp.lt.s32.totalorder %s14610_s0, %s14604_s18 }
  0x4f   : > { %p14607_p5 = pneg %p14606_p4  ;;  %p14613_p12 = por %p14612_p2, %p14611_p7 }
  0x51   : > { %p14614_p8 = pnand %p14613_p12, %p14607_p5 }
  0x53   : > { %14617 = shalt.err (!%p14614_p8)
}
  0x54   : > { %s17322_s16 = smov 256   ;;  %s17324_s24 = smov 16  }
  0x55   : > { %p17354_p9 = pmov %p17353_p6  ;;  %s17355_s20 = sld [smem:[#allocation39_spill]] }
  0x56   : > { %s15254_s27 = sand.u32 1, %s15012_s23   ;;  %s13114_s22 = smul.u32 49152, %s15020_s25 }
  0x57   : > { %s13113_s19 = smul.u32 3072, %s15254_s27  ;;  %s17356_s2 = sld [smem:[#allocation41_spill]] }
  0x58   : > { %s13115_s14 = smul.u32 12, %s15254_s27 }
  0x59   : > { %s561_s15 = scalar_lea.vmem [#allocation9], %s13113_s19  ;;  %s13116_s13 = smul.u32 192, %s15020_s25 }
  0x5a   : > { %s568_s26 = sshll.u32 %s561_s15, 4  ;;  %s569_s26 = int_to_ptr.vmem [resolvable:$true] %s568_s26 }
  0x5b   : > { %13126 = dma.hbm_to_vmem [thread:$0]  (%p17354_p9), %s17355_s20, 512, %s548_s29, %s15240_s28, %s17322_s16, %s17322_s16, %s17324_s24  }
  0x5c   : > { %s14630_s12 = scalar_lea.vmem %s569_s26, 49152  ;;  %s15036_s29 = smov [#allocation9]  }
  0x5d   : > { %s567_s1 = scalar_lea.hbm %s17356_s2, %s13114_s22  ;;  %p14631_p11 = scmp.ne.s32.totalorder %s569_s26, %s14630_s12 }
  0x5e   : > { %s14634_s21 = sshll.u32 %s15036_s29, 4  ;;  %s14635_s21 = int_to_ptr.vmem [resolvable:$false] %s14634_s21 }
  0x5f   : > { %p14632_p0 = pnand %p14631_p11, %p15181_p3  ;;  %s14636_s17 = scalar_lea.vmem %s14635_s21, 98304 }
  0x60   : > { %p14637_p13 = scmp.lt.s32.totalorder %s569_s26, %s14635_s21  ;;  %p14638_p6 = scmp.lt.s32.totalorder %s14636_s17, %s14630_s12 }
  0x61   : > { %p14633_p1 = pneg %p14632_p0 }
  0x62   : > { %p14639_p4 = por %p14638_p6, %p14637_p13 }
  0x64   : > { %p14640_p5 = pnand %p14639_p4, %p14633_p1 }
  0x66   : > { %14643 = shalt.err (!%p14640_p5)
}
  0x67   : > { %s15037_s20 = smov 768   ;;  %s15038_s15 = smov 48  }
  0x68   : > { %13127 = dma.hbm_to_vmem [thread:$0]  (%p15181_p3), %s567_s1, 49152, %s569_s26, %s15240_s28, %s15037_s20, %s15037_s20, %s15038_s15  }
  0x69   : > { %s17357_s3 = sld [smem:[#allocation42_spill]]  ;;  %s582_s0 = scalar_lea.vmem [#allocation10], %s13115_s14 }
  0x6a   : > { %s590_s29 = sshll.u32 %s582_s0, 4  ;;  %s11661_s21 = sshll.u32 %s15254_s27, 10  ;;  %s591_s29 = int_to_ptr.vmem [resolvable:$true] %s590_s29 }
  0x6b   : > { %s14656_s12 = scalar_lea.vmem %s591_s29, 192  ;;  %s15039_s17 = smov [#allocation10]  }
  0x6c   : > { %p14657_p7 = scmp.ne.s32.totalorder %s591_s29, %s14656_s12  ;;  %s14660_s16 = sshll.u32 %s15039_s17, 4  ;;  %s14661_s16 = int_to_ptr.vmem [resolvable:$false] %s14660_s16 }
  0x6d   : > { %s14662_s24 = scalar_lea.vmem %s14661_s16, 384  ;;  %p14663_p8 = scmp.lt.s32.totalorder %s591_s29, %s14661_s16 }
  0x6e   : > { %p14658_p2 = pnand %p14657_p7, %p15181_p3  ;;  %p14664_p9 = scmp.lt.s32.totalorder %s14662_s24, %s14656_s12 }
  0x6f   : > { %s588_s18 = scalar_lea.hbm %s17357_s3, %s13116_s13 }
  0x70   : > { %p14659_p12 = pneg %p14658_p2  ;;  %p14665_p11 = por %p14664_p9, %p14663_p8 }
  0x72   : > { %p14666_p0 = pnand %p14665_p11, %p14659_p12 }
  0x74   : > { %14669 = shalt.err (!%p14666_p0)
}
  0x75   : > { %13128 = dma.hbm_to_vmem [thread:$0]  (%p15181_p3), %s588_s18, 192, %s591_s29, %s15240_s28  }
  0x76   : > { %s12803_s1 = sshll.u32 %s15020_s25, 14  ;;  %s17358_s4 = sld [smem:[#allocation43_spill]] }
  0x77   : > { %s601_s20 = scalar_lea.vmem [#allocation11], %s11661_s21  ;;  %s15282_s16 = sshll.u32 %s15254_s27, 2 }
  0x78   : > { %s608_s15 = sshll.u32 %s601_s20, 4  ;;  %s15040_s22 = smov [#allocation11]   ;;  %s609_s15 = int_to_ptr.vmem [resolvable:$true] %s608_s15 }
  0x79   : > { %s14682_s24 = scalar_lea.vmem %s609_s15, 16384  ;;  %s14686_s19 = sshll.u32 %s15040_s22, 4  ;;  %s14687_s19 = int_to_ptr.vmem [resolvable:$false] %s14686_s19 }
  0x7a   : > { %p14683_p1 = scmp.ne.s32.totalorder %s609_s15, %s14682_s24  ;;  %s14688_s0 = scalar_lea.vmem %s14687_s19, 32768 }
  0x7b   : > { %p14689_p4 = scmp.lt.s32.totalorder %s609_s15, %s14687_s19  ;;  %p14690_p5 = scmp.lt.s32.totalorder %s14688_s0, %s14682_s24 }
  0x7c   : > { %s607_s26 = scalar_lea.hbm %s17358_s4, %s12803_s1  ;;  %p14684_p13 = pnand %p14683_p1, %p15181_p3 }
  0x7d   : > { %p14691_p7 = por %p14690_p5, %p14689_p4 }
  0x7e   : > { %p14685_p6 = pneg %p14684_p13 }
  0x80   : > { %p14692_p2 = pnand %p14691_p7, %p14685_p6 }
  0x82   : > { %14695 = shalt.err (!%p14692_p2)
}
  0x83   : > { %s17359_s18 = smov 16   ;;  %s17360_s29 = smov 256  }
  0x84   : > { %13129 = dma.hbm_to_vmem [thread:$0]  (%p15181_p3), %s607_s26, 16384, %s609_s15, %s15240_s28, %s17360_s29, %s17360_s29, %s17359_s18  }
  0x85   : > { %s15293_s21 = sshll.u32 %s15020_s25, 6  ;;  %s622_s13 = scalar_lea.vmem [#allocation12], %s15282_s16 }
  0x86   : > { %s628_s1 = scalar_lea.hbm %s17298_s5, %s15293_s21  ;;  %s630_s14 = sshll.u32 %s622_s13, 4  ;;  %s631_s14 = int_to_ptr.vmem [resolvable:$true] %s630_s14 }
  0x87   : > { %s14708_s20 = scalar_lea.vmem %s631_s14, 64  ;;  %s15041_s24 = smov [#allocation12]  }
  0x88   : > { %p14709_p12 = scmp.ne.s32.totalorder %s631_s14, %s14708_s20  ;;  %s14712_s22 = sshll.u32 %s15041_s24, 4  ;;  %s14713_s22 = int_to_ptr.vmem [resolvable:$false] %s14712_s22 }
  0x89   : > { %s14714_s19 = scalar_lea.vmem %s14713_s22, 128  ;;  %p14715_p11 = scmp.lt.s32.totalorder %s631_s14, %s14713_s22 }
  0x8a   : > { %p14710_p8 = pnand %p14709_p12, %p15181_p3  ;;  %p14716_p0 = scmp.lt.s32.totalorder %s14714_s19, %s14708_s20 }
  0x8c   : > { %p14711_p9 = pneg %p14710_p8  ;;  %p14717_p1 = por %p14716_p0, %p14715_p11 }
  0x8e   : > { %p14718_p13 = pnand %p14717_p1, %p14711_p9 }
  0x90   : > { %14721 = shalt.err (!%p14718_p13)
}
  0x91   : > { %13130 = dma.hbm_to_vmem [thread:$0]  (%p15181_p3), %s628_s1, 64, %s631_s14, %s15240_s28  }
  0x92   : > { %s647_s0 = scalar_lea.hbm %s17299_s6, %s15293_s21  ;;  %s641_s12 = scalar_lea.vmem [#allocation13], %s15282_s16 }
  0x93   : > { %s649_s17 = sshll.u32 %s641_s12, 4  ;;  %s15042_s20 = smov [#allocation13]   ;;  %s650_s17 = int_to_ptr.vmem [resolvable:$true] %s649_s17 }
  0x94   : > { %s14734_s13 = scalar_lea.vmem %s650_s17, 64  ;;  %s14738_s24 = sshll.u32 %s15042_s20, 4  ;;  %s14739_s24 = int_to_ptr.vmem [resolvable:$false] %s14738_s24 }
  0x95   : > { %p14735_p6 = scmp.ne.s32.totalorder %s650_s17, %s14734_s13  ;;  %s14740_s22 = scalar_lea.vmem %s14739_s24, 128 }
  0x96   : > { %p14741_p7 = scmp.lt.s32.totalorder %s650_s17, %s14739_s24  ;;  %p14742_p2 = scmp.lt.s32.totalorder %s14740_s22, %s14734_s13 }
  0x97   : > { %p14736_p4 = pnand %p14735_p6, %p15181_p3 }
  0x98   : > { %p14743_p12 = por %p14742_p2, %p14741_p7 }
  0x99   : > { %p14737_p5 = pneg %p14736_p4 }
  0x9b   : > { %p14744_p8 = pnand %p14743_p12, %p14737_p5 }
  0x9d   : > { %14747 = shalt.err (!%p14744_p8)
}
  0x9e   : > { %13131 = dma.hbm_to_vmem [thread:$0]  (%p15181_p3), %s647_s0, 64, %s650_s17, %s15240_s28  }
  0x9f   : > { %s666_s19 = scalar_lea.hbm %s17300_s7, %s15293_s21  ;;  %s660_s26 = scalar_lea.vmem [#allocation14], %s15282_s16 }
  0xa0   : > { %s668_s15 = sshll.u32 %s660_s26, 4  ;;  %s17326_s12 = sshll.u32 %s15254_s27, 11  ;;  %s669_s15 = int_to_ptr.vmem [resolvable:$true] %s668_s15 }
  0xa1   : > { %s14760_s13 = scalar_lea.vmem %s669_s15, 64  ;;  %s15043_s20 = smov [#allocation14]  }
  0xa2   : > { %p14761_p9 = scmp.ne.s32.totalorder %s669_s15, %s14760_s13  ;;  %s14764_s24 = sshll.u32 %s15043_s20, 4  ;;  %s14765_s24 = int_to_ptr.vmem [resolvable:$false] %s14764_s24 }
  0xa3   : > { %s14766_s22 = scalar_lea.vmem %s14765_s24, 128  ;;  %p14767_p1 = scmp.lt.s32.totalorder %s669_s15, %s14765_s24 }
  0xa4   : > { %p14762_p11 = pnand %p14761_p9, %p15181_p3  ;;  %p14768_p13 = scmp.lt.s32.totalorder %s14766_s22, %s14760_s13 }
  0xa6   : > { %p14763_p0 = pneg %p14762_p11  ;;  %p14769_p6 = por %p14768_p13, %p14767_p1 }
  0xa8   : > { %p14770_p4 = pnand %p14769_p6, %p14763_p0 }
  0xaa   : > { %14773 = shalt.err (!%p14770_p4)
}
  0xab   : > { %13132 = dma.hbm_to_vmem [thread:$0]  (%p15181_p3), %s666_s19, 64, %s669_s15, %s15240_s28  }
  0xac   : > { %s17327_s0 = sshll.u32 %s15020_s25, 15  ;;  %s679_s26 = scalar_lea.vmem [#allocation15], %s17326_s12 }
  0xad   : > { %s685_s14 = scalar_lea.hbm %s17301_s8, %s17327_s0  ;;  %s686_s13 = sshll.u32 %s679_s26, 4  ;;  %s687_s13 = int_to_ptr.vmem [resolvable:$true] %s686_s13 }
  0xae   : > { %s11676_s20 = sshll.u32 %s15254_s27, 3  ;;  %s14786_s24 = scalar_lea.vmem %s687_s13, 32768 }
  0xaf   : > { %p14787_p5 = scmp.ne.s32.totalorder %s687_s13, %s14786_s24  ;;  %s15044_s22 = smov [#allocation15]  }
  0xb0   : > { %s14790_s2 = sshll.u32 %s15044_s22, 4  ;;  %s14791_s2 = int_to_ptr.vmem [resolvable:$false] %s14790_s2 }
  0xb1   : > { %p14788_p7 = pnand %p14787_p5, %p15181_p3  ;;  %s14792_s19 = scalar_lea.vmem %s14791_s2, 65536 }
  0xb2   : > { %p14793_p12 = scmp.lt.s32.totalorder %s687_s13, %s14791_s2  ;;  %p14794_p8 = scmp.lt.s32.totalorder %s14792_s19, %s14786_s24 }
  0xb3   : > { %p14789_p2 = pneg %p14788_p7 }
  0xb4   : > { %p14795_p9 = por %p14794_p8, %p14793_p12 }
  0xb6   : > { %p14796_p11 = pnand %p14795_p9, %p14789_p2 }
  0xb8   : > { %14799 = shalt.err (!%p14796_p11)
}
  0xb9   : > { %s15045_s15 = smov 512   ;;  %s15046_s17 = smov 32  }
  0xba   : > { %13133 = dma.hbm_to_vmem [thread:$0]  (%p15181_p3), %s685_s14, 32768, %s687_s13, %s15240_s28, %s15045_s15, %s15045_s15, %s15046_s17  }
  0xbb   : > { %s12808_s1 = sshll.u32 %s15020_s25, 7  ;;  %s700_s0 = scalar_lea.vmem [#allocation16], %s11676_s20 }
  0xbc   : > { %s706_s22 = scalar_lea.hbm %s17302_s9, %s12808_s1  ;;  %s708_s3 = sshll.u32 %s700_s0, 4  ;;  %s709_s3 = int_to_ptr.vmem [resolvable:$true] %s708_s3 }
  0xbd   : > { %s14812_s2 = scalar_lea.vmem %s709_s3, 128  ;;  %s15047_s24 = smov [#allocation16]  }
  0xbe   : > { %p14813_p0 = scmp.ne.s32.totalorder %s709_s3, %s14812_s2  ;;  %s14816_s19 = sshll.u32 %s15047_s24, 4  ;;  %s14817_s19 = int_to_ptr.vmem [resolvable:$false] %s14816_s19 }
  0xbf   : > { %s14818_s4 = scalar_lea.vmem %s14817_s19, 256  ;;  %p14819_p6 = scmp.lt.s32.totalorder %s709_s3, %s14817_s19 }
  0xc0   : > { %p14814_p1 = pnand %p14813_p0, %p15181_p3  ;;  %p14820_p4 = scmp.lt.s32.totalorder %s14818_s4, %s14812_s2 }
  0xc2   : > { %p14815_p13 = pneg %p14814_p1  ;;  %p14821_p5 = por %p14820_p4, %p14819_p6 }
  0xc4   : > { %p14822_p7 = pnand %p14821_p5, %p14815_p13 }
  0xc6   : > { %14825 = shalt.err (!%p14822_p7)
}
  0xc7   : > { %13134 = dma.hbm_to_vmem [thread:$0]  (%p15181_p3), %s706_s22, 128, %s709_s3, %s15240_s28  }
  0xc8   : > { %s17361_s12 = sshll.u32 %s15020_s25, 15  ;;  %s17362_s20 = sshll.u32 %s15254_s27, 11 }
  0xc9   : > { %s725_s13 = scalar_lea.hbm %s17303_s10, %s17361_s12  ;;  %s719_s15 = scalar_lea.vmem [#allocation17], %s17362_s20 }
  0xca   : > { %s726_s17 = sshll.u32 %s719_s15, 4  ;;  %s15048_s1 = smov [#allocation17]   ;;  %s727_s17 = int_to_ptr.vmem [resolvable:$true] %s726_s17 }
  0xcb   : > { %s14838_s4 = scalar_lea.vmem %s727_s17, 32768  ;;  %s14842_s26 = sshll.u32 %s15048_s1, 4  ;;  %s14843_s26 = int_to_ptr.vmem [resolvable:$false] %s14842_s26 }
  0xcc   : > { %p14839_p2 = scmp.ne.s32.totalorder %s727_s17, %s14838_s4  ;;  %s14844_s2 = scalar_lea.vmem %s14843_s26, 65536 }
  0xcd   : > { %p14845_p9 = scmp.lt.s32.totalorder %s727_s17, %s14843_s26  ;;  %p14846_p11 = scmp.lt.s32.totalorder %s14844_s2, %s14838_s4 }
  0xce   : > { %p14840_p12 = pnand %p14839_p2, %p15181_p3 }
  0xcf   : > { %p14847_p0 = por %p14846_p11, %p14845_p9 }
  0xd0   : > { %p14841_p8 = pneg %p14840_p12 }
  0xd2   : > { %p14848_p1 = pnand %p14847_p0, %p14841_p8 }
  0xd4   : > { %14851 = shalt.err (!%p14848_p1)
}
  0xd5   : > { %13135 = dma.hbm_to_vmem [thread:$0]  (%p15181_p3), %s725_s13, 32768, %s727_s17, %s15240_s28, %s17360_s29, %s17360_s29, %s17359_s18  }
  0xd6   : > { %s746_s22 = scalar_lea.hbm %s17304_s11, %s15293_s21  ;;  %s740_s24 = scalar_lea.vmem [#allocation18], %s15282_s16 }
  0xd7   : > { %s748_s19 = sshll.u32 %s740_s24, 4  ;;  %s15049_s0 = smov [#allocation18]   ;;  %s749_s19 = int_to_ptr.vmem [resolvable:$true] %s748_s19 }
  0xd8   : > { %s14864_s12 = scalar_lea.vmem %s749_s19, 64  ;;  %s14868_s14 = sshll.u32 %s15049_s0, 4  ;;  %s14869_s14 = int_to_ptr.vmem [resolvable:$false] %s14868_s14 }
  0xd9   : > { %p14865_p13 = scmp.ne.s32.totalorder %s749_s19, %s14864_s12  ;;  %s14870_s20 = scalar_lea.vmem %s14869_s14, 128 }
  0xda   : > { %p14871_p5 = scmp.lt.s32.totalorder %s749_s19, %s14869_s14  ;;  %p14872_p7 = scmp.lt.s32.totalorder %s14870_s20, %s14864_s12 }
  0xdb   : > { %p14866_p6 = pnand %p14865_p13, %p15181_p3 }
  0xdc   : > { %p14873_p2 = por %p14872_p7, %p14871_p5 }
  0xdd   : > { %p14867_p4 = pneg %p14866_p6 }
  0xdf   : > { %p14874_p12 = pnand %p14873_p2, %p14867_p4 }
  0xe1   : > { %14877 = shalt.err (!%p14874_p12)
}
  0xe2   : > { %13136 = dma.hbm_to_vmem [thread:$0]  (%p15181_p3), %s746_s22, 64, %s749_s19, %s15240_s28  }
  0xe3   : > { %s17363_s13 = sld [smem:[#allocation44_spill]]  ;;  %s759_s17 = scalar_lea.vmem [#allocation19], %s15282_s16 }
  0xe4   : > { %s767_s4 = sshll.u32 %s759_s17, 4  ;;  %s15050_s26 = smov [#allocation19]   ;;  %s768_s4 = int_to_ptr.vmem [resolvable:$true] %s767_s4 }
  0xe5   : > { %s14890_s1 = scalar_lea.vmem %s768_s4, 64  ;;  %s14894_s2 = sshll.u32 %s15050_s26, 4  ;;  %s14895_s2 = int_to_ptr.vmem [resolvable:$false] %s14894_s2 }
  0xe6   : > { %p14891_p8 = scmp.ne.s32.totalorder %s768_s4, %s14890_s1  ;;  %s14896_s3 = scalar_lea.vmem %s14895_s2, 128 }
  0xe7   : > { %p14897_p0 = scmp.lt.s32.totalorder %s768_s4, %s14895_s2  ;;  %p14898_p1 = scmp.lt.s32.totalorder %s14896_s3, %s14890_s1 }
  0xe8   : > { %p14892_p9 = pnand %p14891_p8, %p15181_p3 }
  0xe9   : > { %s765_s15 = scalar_lea.hbm %s17363_s13, %s15293_s21  ;;  %p14899_p13 = por %p14898_p1, %p14897_p0 }
  0xea   : > { %p14893_p11 = pneg %p14892_p9 }
  0xec   : > { %p14900_p6 = pnand %p14899_p13, %p14893_p11 }
  0xee   : > { %14903 = shalt.err (!%p14900_p6)
}
  0xef   : > { %13137 = dma.hbm_to_vmem [thread:$0]  (%p15181_p3), %s765_s15, 64, %s768_s4, %s15240_s28  }
  0xf0   : > { %s17364_s24 = sld [smem:[#allocation45_spill]]  ;;  %s778_s12 = scalar_lea.vmem [#allocation20], %s15282_s16 }
  0xf1   : > { %s786_s0 = sshll.u32 %s778_s12, 4  ;;  %s15051_s20 = smov [#allocation20]   ;;  %s787_s0 = int_to_ptr.vmem [resolvable:$true] %s786_s0 }
  0xf2   : > { %s14916_s14 = scalar_lea.vmem %s787_s0, 64  ;;  %s14920_s18 = sshll.u32 %s15051_s20, 4  ;;  %s14921_s18 = int_to_ptr.vmem [resolvable:$false] %s14920_s18 }
  0xf3   : > { %p14917_p4 = scmp.ne.s32.totalorder %s787_s0, %s14916_s14  ;;  %s14922_s29 = scalar_lea.vmem %s14921_s18, 128 }
  0xf4   : > { %p14923_p2 = scmp.lt.s32.totalorder %s787_s0, %s14921_s18  ;;  %p14924_p12 = scmp.lt.s32.totalorder %s14922_s29, %s14916_s14 }
  0xf5   : > { %p14918_p5 = pnand %p14917_p4, %p15181_p3 }
  0xf6   : > { %s784_s19 = scalar_lea.hbm %s17364_s24, %s15293_s21  ;;  %p14925_p8 = por %p14924_p12, %p14923_p2 }
  0xf7   : > { %p14919_p7 = pneg %p14918_p5 }
  0xf9   : > { %p14926_p9 = pnand %p14925_p8, %p14919_p7 }
  0xfb   : > { %14929 = shalt.err (!%p14926_p9)
}
  0xfc   : > { %13138 = dma.hbm_to_vmem [thread:$0]  (%p15181_p3), %s784_s19, 64, %s787_s0, %s15240_s28  }
  0xfd PF: > { %795 = sbr.rel (%p15200_p10) target bundleno = 7057 (0x1b91), region = 84  ;;  %s17366_s21 = sld [smem:[#allocation34_spill]] (!%p15200_p10) }
 0x103   : > { %s797_s13 = sand.u32 1, %s17366_s21   ;;  %p17367_p11 = scmp.eq.s32.totalorder %s17366_s21, 0 }
 0x104   : > { %s798_s15 = scalar_lea.sflag [#allocation5], %s797_s13 }
 0x105   : > { %14979 = dma.done.wait (%p17367_p11), %s798_s15, 512   ;;  %p17368_p0 = pmov %p17367_p11 }
 0x107   : > { %14981 = vsyncadd (%p17368_p0), %s798_s15, 4294966784  ;;  %p17369_p1 = pmov %p17368_p0 }
 0x108   : > { %p17370_p13 = pmov %p17368_p0 }
 0x109   : > { %14983 = dma.done.wait (%p17369_p1), [#allocation8], 32  }
 0x10a   : > { %14985 = vsyncadd (%p17370_p13), [#allocation8], 4294967264  ;;  %s17371_s30 = sld [smem:[#allocation31_spill]] }
 0x10b   : > { %s17372_s28 = sld [smem:[#allocation36_spill]] }
 0x110   : > { %s812_s17 = sand.u32 1, %s17371_s30  }
 0x111   : > { %s13117_s4 = smul.u32 3072, %s812_s17  ;;  %p17373_p3 = scmp.ne.s32.totalorder %s17372_s28, 0 }
 0x113   : > { %s15406_s1 = scalar_lea.vmem [#allocation9], %s13117_s4 }
 0x114   : > { %14987 = dma.done.wait (%p17373_p3), %s798_s15, 131776  }
 0x115   : > { %14989 = vsyncadd (%p17373_p3), %s798_s15, 4294835520  ;;  %s13118_s26 = smul.u32 12, %s812_s17  ;;  %s11694_s2 = sshll.u32 %s812_s17, 10 }
 0x116   : > { %s15412_s3 = sshll.u32 %s812_s17, 2  ;;  %s11698_s27 = sshll.u32 %s812_s17, 11 }
 0x117   : > { %s11699_s22 = sshll.u32 %s812_s17, 3  ;;  %s15414_s24 = scalar_lea.vmem [#allocation10], %s13118_s26 }
 0x118   : > { %s15416_s19 = scalar_lea.vmem [#allocation11], %s11694_s2  ;;  %s841_s12 = scalar_lea.vmem [#allocation12], %s15412_s3 }
 0x119   : > { %s850_s0 = scalar_lea.vmem [#allocation13], %s15412_s3  ;;  %s859_s14 = scalar_lea.vmem [#allocation14], %s15412_s3 }
 0x11a   : > { %s15421_s20 = scalar_lea.vmem [#allocation15], %s11698_s27  ;;  %s15423_s18 = scalar_lea.vmem [#allocation16], %s11699_s22 }
 0x11b   : > { %s15425_s29 = scalar_lea.vmem [#allocation17], %s11698_s27  ;;  %s895_s16 = scalar_lea.vmem [#allocation18], %s15412_s3 }
 0x11c   : > { %s904_s13 = scalar_lea.vmem [#allocation19], %s15412_s3  ;;  %s913_s15 = scalar_lea.vmem [#allocation20], %s15412_s3 }
 0x11d   : > { %p17374_p10 = pmov %p17368_p0 }
 0x11e   : > { %p17375_p6 = pmov %p17368_p0 }
 0x11f   : > { %14991 = dma.done.wait (%p17374_p10), [#allocation8], 4096  }
 0x120   : > { %14993 = vsyncadd (%p17375_p6), [#allocation8], 4294963200  ;;  %p17376_p4 = pmov %p17368_p0 }
 0x121   : > { %p17377_p5 = pmov %p17368_p0 }
 0x122   : > { %14995 = dma.done.wait (%p17376_p4), [#allocation23], 16  }
 0x123   : > { %14997 = vsyncadd (%p17377_p5), [#allocation23], 4294967280  ;;  %s17378_s30 = sld [smem:[#allocation32_spill]] }
 0x129   : > { %p11706_p7 = scmp.ne.s32.totalorder %s17378_s30, 0 }
 0x12b   : > { %1033 = sbr.rel (%p11706_p7) target bundleno = 311 (0x137), region = 152 }
 0x130   : > { %v1034_v0 = vld [vmem:[#allocation4] sm:$0xff]  ;;  %v1035_v1 = vld [vmem:[#allocation4 + $0x8] sm:$0xff]  ;;  %v1036_v2 = vld [vmem:[#allocation4 + $0x10] sm:$0xff] }
 0x131   : > { %v1038_v3 = vunpack.c.l.bf16 %v1034_v0  ;;  %v1039_v4 = vunpack.c.h.bf16 %v1034_v0  ;;  %v1040_v5 = vunpack.c.l.bf16 %v1035_v1  ;;  %v1041_v6 = vunpack.c.h.bf16 %v1035_v1  ;;  %v1037_v7 = vld [vmem:[#allocation4 + $0x18] sm:$0xff] }
 0x132   : > { %v1042_v8 = vunpack.c.l.bf16 %v1036_v2  ;;  %v1043_v9 = vunpack.c.h.bf16 %v1036_v2  ;;  %v1044_v10 = vunpack.c.l.bf16 %v1037_v7  ;;  %v1045_v11 = vunpack.c.h.bf16 %v1037_v7 }
 0x133   : > { %1049 = vst [vmem:[#allocation2 + $0x30] sm:$0xff] %v1038_v3  ;;  %1050 = vst [vmem:[#allocation2] sm:$0xff] %v1039_v4 }
 0x134   : > { %1051 = vst [vmem:[#allocation2 + $0x18] sm:$0xff] %v1040_v5  ;;  %1052 = vst [vmem:[#allocation2 + $0x10] sm:$0xff] %v1041_v6 }
 0x135   : > { %1053 = vst [vmem:[#allocation2 + $0x8] sm:$0xff] %v1042_v8  ;;  %1054 = vst [vmem:[#allocation2 + $0x20] sm:$0xff] %v1043_v9 }
 0x136   : > { %1055 = vst [vmem:[#allocation2 + $0x28] sm:$0xff] %v1044_v10  ;;  %1056 = vst [vmem:[#allocation2 + $0x38] sm:$0xff] %v1045_v11 }
 0x137 PF: > { %v13249_v12 = vld [vmem:[%s15406_s1 + $0x2a4] ss:$48 sps:$4 sm:$0xff]   ;;  %v13253_v14 = vld [vmem:[%s15406_s1 + $0x2a0] ss:$48 sps:$4 sm:$0xff]   ;;  %vm15053_vm0 = vmmov 0   ;;  %vm4002_vm1 = vcmask 523264  }
 0x138   : > { %v13251_v13 = vld [vmem:[%s15406_s1 + $0x8a4] ss:$48 sps:$4 sm:$0xff]   ;;  %3440 = vmatprep.subr.bf16.mxu0 %v13249_v12  ;;  %v13254_v15 = vld [vmem:[%s15406_s1 + $0x8a0] ss:$48 sps:$4 sm:$0xff]   ;;  %s15054_s21 = smov 64   ;;  %vm4123_vm2 = vcmask 1043456  }
 0x139   : > { %3483 = vmatprep.subr.bf16.mxu1 %v13251_v13  ;;  %v13255_v16 = vld [vmem:[%s15406_s1 + $0x244] ss:$48 sps:$4 sm:$0xff]   ;;  %3441 = vmatpush1.bf16.msra.mxu0 %v13253_v14  ;;  %v13259_v18 = vld [vmem:[%s15406_s1 + $0x240] ss:$48 sps:$4 sm:$0xff]   ;;  %vm4095_vm3 = vcmask 64512   ;;  %vm4449_vm4 = vcmask 1048064  }
 0x13a   : > { %3484 = vmatpush1.bf16.msra.mxu1 %v13254_v15  ;;  %v13257_v17 = vld [vmem:[%s15406_s1 + $0x844] ss:$48 sps:$4 sm:$0xff]   ;;  %3442 = vmatprep.subr.bf16.mxu0 %v13255_v16  ;;  %v13260_v19 = vld [vmem:[%s15406_s1 + $0x840] ss:$48 sps:$4 sm:$0xff]   ;;  %s17379_s28 = sld [smem:[#allocation32_spill]] }
 0x13b   : > { %3485 = vmatprep.subr.bf16.mxu1 %v13257_v17  ;;  %v13261_v20 = vld [vmem:[%s15406_s1 + $0x1e4] ss:$48 sps:$4 sm:$0xff]   ;;  %v13265_v22 = vld [vmem:[%s15406_s1 + $0x1e0] ss:$48 sps:$4 sm:$0xff]  }
 0x13c   : > { %v13263_v21 = vld [vmem:[%s15406_s1 + $0x7e4] ss:$48 sps:$4 sm:$0xff]   ;;  %v13266_v23 = vld [vmem:[%s15406_s1 + $0x7e0] ss:$48 sps:$4 sm:$0xff]  }
 0x13d   : > { %3443 = vmatpush1.bf16.msra.mxu0 %v13259_v18  ;;  %v13267_v24 = vld [vmem:[%s15406_s1 + $0x184] ss:$48 sps:$4 sm:$0xff]   ;;  %v13271_v26 = vld [vmem:[%s15406_s1 + $0x180] ss:$48 sps:$4 sm:$0xff]  }
 0x13e   : > { %3486 = vmatpush1.bf16.msra.mxu1 %v13260_v19  ;;  %3444 = vmatprep.subr.bf16.mxu0 %v13261_v20  ;;  %v13269_v25 = vld [vmem:[%s15406_s1 + $0x784] ss:$48 sps:$4 sm:$0xff]   ;;  %v13272_v27 = vld [vmem:[%s15406_s1 + $0x780] ss:$48 sps:$4 sm:$0xff]  }
 0x13f   : > { %3487 = vmatprep.subr.bf16.mxu1 %v13263_v21  ;;  %v13273_v28 = vld [vmem:[%s15406_s1 + $0x124] ss:$48 sps:$4 sm:$0xff]   ;;  %v13277_v30 = vld [vmem:[%s15406_s1 + $0x120] ss:$48 sps:$4 sm:$0xff]  }
 0x140   : > { %v13275_v29 = vld [vmem:[%s15406_s1 + $0x724] ss:$48 sps:$4 sm:$0xff]   ;;  %v13278_v31 = vld [vmem:[%s15406_s1 + $0x720] ss:$48 sps:$4 sm:$0xff]   ;;  %p12765_p2 = scmp.ne.s32.totalorder %s17379_s28, 1 }
 0x141   : > { %3445 = vmatpush1.bf16.msra.mxu0 %v13265_v22  ;;  %v13279_v32 = vld [vmem:[%s15406_s1 + $0xc4] ss:$48 sps:$4 sm:$0xff]   ;;  %v13283_v34 = vld [vmem:[%s15406_s1 + $0xc0] ss:$48 sps:$4 sm:$0xff]   ;;  %v13347_v22 = vld [vmem:[%s15406_s1 + $0x2ac] ss:$48 sps:$4 sm:$0xff]  }
 0x142   : > { %3488 = vmatpush1.bf16.msra.mxu1 %v13266_v23  ;;  %3446 = vmatprep.subr.bf16.mxu0 %v13267_v24  ;;  %v13281_v33 = vld [vmem:[%s15406_s1 + $0x6c4] ss:$48 sps:$4 sm:$0xff]   ;;  %v13284_v35 = vld [vmem:[%s15406_s1 + $0x6c0] ss:$48 sps:$4 sm:$0xff]   ;;  %v13350_v23 = vld [vmem:[%s15406_s1 + $0x8ac] ss:$48 sps:$4 sm:$0xff]  }
 0x143   : > { %3489 = vmatprep.subr.bf16.mxu1 %v13269_v25  ;;  %v13285_v36 = vld [vmem:[%s15406_s1 + $0x64] ss:$48 sps:$4 sm:$0xff]   ;;  %v13289_v38 = vld [vmem:[%s15406_s1 + $0x60] ss:$48 sps:$4 sm:$0xff]  }
 0x144   : > { %v13287_v37 = vld [vmem:[%s15406_s1 + $0x664] ss:$48 sps:$4 sm:$0xff]   ;;  %v13290_v39 = vld [vmem:[%s15406_s1 + $0x660] ss:$48 sps:$4 sm:$0xff]  }
 0x145   : > { %3447 = vmatpush1.bf16.msra.mxu0 %v13271_v26  ;;  %v13291_v40 = vld [vmem:[%s15406_s1 + $0x4] ss:$48 sps:$4 sm:$0xff]   ;;  %v13295_v42 = vld [vmem:[%s15406_s1] ss:$48 sps:$4 sm:$0xff]   ;;  %v13345_v26 = vld [vmem:[%s15406_s1 + $0x2a8] ss:$48 sps:$4 sm:$0xff]  }
 0x146   : > { %3490 = vmatpush1.bf16.msra.mxu1 %v13272_v27  ;;  %3448 = vmatprep.subr.bf16.mxu0 %v13273_v28  ;;  %v13293_v41 = vld [vmem:[%s15406_s1 + $0x604] ss:$48 sps:$4 sm:$0xff]   ;;  %v13296_v43 = vld [vmem:[%s15406_s1 + $0x600] ss:$48 sps:$4 sm:$0xff]   ;;  %v13348_v27 = vld [vmem:[%s15406_s1 + $0x8a8] ss:$48 sps:$4 sm:$0xff]  }
 0x147   : > { %3491 = vmatprep.subr.bf16.mxu1 %v13275_v29  ;;  %v13297_v44 = vld [vmem:[%s15406_s1 + $0x5a4] ss:$48 sps:$4 sm:$0xff]   ;;  %v13301_v46 = vld [vmem:[%s15406_s1 + $0x5a0] ss:$48 sps:$4 sm:$0xff]   ;;  %v13353_v28 = vld [vmem:[%s15406_s1 + $0x24c] ss:$48 sps:$4 sm:$0xff]  }
 0x148   : > { %v13299_v45 = vld [vmem:[%s15406_s1 + $0xba4] ss:$48 sps:$4 sm:$0xff]   ;;  %v13302_v47 = vld [vmem:[%s15406_s1 + $0xba0] ss:$48 sps:$4 sm:$0xff]   ;;  %v13356_v29 = vld [vmem:[%s15406_s1 + $0x84c] ss:$48 sps:$4 sm:$0xff]  }
 0x149   : > { %3449 = vmatpush1.bf16.msra.mxu0 %v13277_v30  ;;  %v13303_v48 = vld [vmem:[%s15406_s1 + $0x544] ss:$48 sps:$4 sm:$0xff]   ;;  %v13307_v50 = vld [vmem:[%s15406_s1 + $0x540] ss:$48 sps:$4 sm:$0xff]   ;;  %v13351_v30 = vld [vmem:[%s15406_s1 + $0x248] ss:$48 sps:$4 sm:$0xff]  }
 0x14a   : > { %3492 = vmatpush1.bf16.msra.mxu1 %v13278_v31  ;;  %3450 = vmatprep.subr.bf16.mxu0 %v13279_v32  ;;  %v13305_v49 = vld [vmem:[%s15406_s1 + $0xb44] ss:$48 sps:$4 sm:$0xff]   ;;  %v13308_v51 = vld [vmem:[%s15406_s1 + $0xb40] ss:$48 sps:$4 sm:$0xff]   ;;  %v13354_v31 = vld [vmem:[%s15406_s1 + $0x848] ss:$48 sps:$4 sm:$0xff]  }
 0x14b   : > { %3493 = vmatprep.subr.bf16.mxu1 %v13281_v33  ;;  %v13309_v52 = vld [vmem:[%s15406_s1 + $0x4e4] ss:$48 sps:$4 sm:$0xff]   ;;  %v13313_v54 = vld [vmem:[%s15406_s1 + $0x4e0] ss:$48 sps:$4 sm:$0xff]   ;;  %v13359_v32 = vld [vmem:[%s15406_s1 + $0x1ec] ss:$48 sps:$4 sm:$0xff]  }
 0x14c   : > { %v13311_v53 = vld [vmem:[%s15406_s1 + $0xae4] ss:$48 sps:$4 sm:$0xff]   ;;  %v13314_v55 = vld [vmem:[%s15406_s1 + $0xae0] ss:$48 sps:$4 sm:$0xff]   ;;  %v13362_v33 = vld [vmem:[%s15406_s1 + $0x7ec] ss:$48 sps:$4 sm:$0xff]  }
 0x14d   : > { %3451 = vmatpush1.bf16.msra.mxu0 %v13283_v34  ;;  %v13315_v56 = vld [vmem:[%s15406_s1 + $0x484] ss:$48 sps:$4 sm:$0xff]   ;;  %v13319_v62 = vld [vmem:[%s15406_s1 + $0x480] ss:$48 sps:$4 sm:$0xff]   ;;  %v13357_v34 = vld [vmem:[%s15406_s1 + $0x1e8] ss:$48 sps:$4 sm:$0xff]  }
 0x14e   : > { %3494 = vmatpush1.bf16.msra.mxu1 %v13284_v35  ;;  %3452 = vmatprep.subr.bf16.mxu0 %v13285_v36  ;;  %v13317_v57 = vld [vmem:[%s15406_s1 + $0xa84] ss:$48 sps:$4 sm:$0xff]   ;;  %v13320_v63 = vld [vmem:[%s15406_s1 + $0xa80] ss:$48 sps:$4 sm:$0xff]   ;;  %v13360_v35 = vld [vmem:[%s15406_s1 + $0x7e8] ss:$48 sps:$4 sm:$0xff]  }
 0x14f   : > { %3495 = vmatprep.subr.bf16.mxu1 %v13287_v37  ;;  %v1061_v58 = vld [vmem:[#allocation2] sm:$0xff]  ;;  %v1063_v60 = vld [vmem:[#allocation2 + $0x10] sm:$0xff]  ;;  %v1067_v61 = vld [vmem:[#allocation2 + $0x38] sm:$0xff] }
 0x150   : > { %v1065_v59 = vld [vmem:[#allocation2 + $0x20] sm:$0xff]  ;;  %v15490_v2 = vpack.c.bf16 %v1067_v61, %v1063_v60  ;;  %v1060_v18 = vld [vmem:[#allocation2 + $0x30] sm:$0xff]  ;;  %v1064_v19 = vld [vmem:[#allocation2 + $0x8] sm:$0xff] }
 0x151   : > { %3453 = vmatpush1.bf16.msra.mxu0 %v13289_v38  ;;  %v13321_v0 = vld [vmem:[%s15406_s1 + $0x424] ss:$48 sps:$4 sm:$0xff]   ;;  %v15488_v1 = vpack.c.bf16 %v1065_v59, %v1061_v58  ;;  %v13325_v4 = vld [vmem:[%s15406_s1 + $0x420] ss:$48 sps:$4 sm:$0xff]   ;;  %v15511_v24 = vpack.c.bf16 %v1064_v19, %v1060_v18  ;;  %v13365_v36 = vld [vmem:[%s15406_s1 + $0x18c] ss:$48 sps:$4 sm:$0xff]  }
 0x152   : > { %3496 = vmatpush1.bf16.msra.mxu1 %v13290_v39  ;;  %3454 = vmatprep.subr.bf16.mxu0 %v13291_v40  ;;  %v13323_v3 = vld [vmem:[%s15406_s1 + $0xa24] ss:$48 sps:$4 sm:$0xff]   ;;  %v13326_v5 = vld [vmem:[%s15406_s1 + $0xa20] ss:$48 sps:$4 sm:$0xff]   ;;  %v13368_v37 = vld [vmem:[%s15406_s1 + $0x78c] ss:$48 sps:$4 sm:$0xff]  }
 0x153   : > { %3497 = vmatprep.subr.bf16.mxu1 %v13293_v41  ;;  %3472 = vmatprep.mubr.bf16.mxu0 %v15488_v1  ;;  %v13327_v6 = vld [vmem:[%s15406_s1 + $0x3c4] ss:$48 sps:$4 sm:$0xff]   ;;  %v13331_v8 = vld [vmem:[%s15406_s1 + $0x3c0] ss:$48 sps:$4 sm:$0xff]   ;;  %v13363_v38 = vld [vmem:[%s15406_s1 + $0x188] ss:$48 sps:$4 sm:$0xff]  }
 0x154   : > { %3515 = vmatprep.mubr.bf16.mxu1 %v15490_v2  ;;  %v13329_v7 = vld [vmem:[%s15406_s1 + $0x9c4] ss:$48 sps:$4 sm:$0xff]   ;;  %v13332_v9 = vld [vmem:[%s15406_s1 + $0x9c0] ss:$48 sps:$4 sm:$0xff]   ;;  %v13366_v39 = vld [vmem:[%s15406_s1 + $0x788] ss:$48 sps:$4 sm:$0xff]  }
 0x155   : > { %3455 = vmatpush1.bf16.msra.mxu0 %v13295_v42  ;;  %v13333_v10 = vld [vmem:[%s15406_s1 + $0x364] ss:$48 sps:$4 sm:$0xff]   ;;  %v13337_v12 = vld [vmem:[%s15406_s1 + $0x360] ss:$48 sps:$4 sm:$0xff]   ;;  %v13371_v40 = vld [vmem:[%s15406_s1 + $0x12c] ss:$48 sps:$4 sm:$0xff]  }
 0x156   : > { %3498 = vmatpush1.bf16.msra.mxu1 %v13296_v43  ;;  %3456 = vmatprep.subr.bf16.mxu0 %v13297_v44  ;;  %v13335_v11 = vld [vmem:[%s15406_s1 + $0x964] ss:$48 sps:$4 sm:$0xff]   ;;  %v13338_v13 = vld [vmem:[%s15406_s1 + $0x960] ss:$48 sps:$4 sm:$0xff]   ;;  %v13374_v41 = vld [vmem:[%s15406_s1 + $0x72c] ss:$48 sps:$4 sm:$0xff]  }
 0x157   : > { %3499 = vmatprep.subr.bf16.mxu1 %v13299_v45  ;;  %v13339_v14 = vld [vmem:[%s15406_s1 + $0x304] ss:$48 sps:$4 sm:$0xff]   ;;  %v13343_v16 = vld [vmem:[%s15406_s1 + $0x300] ss:$48 sps:$4 sm:$0xff]   ;;  %v13369_v42 = vld [vmem:[%s15406_s1 + $0x128] ss:$48 sps:$4 sm:$0xff]  }
 0x158   : > { %v13341_v15 = vld [vmem:[%s15406_s1 + $0x904] ss:$48 sps:$4 sm:$0xff]   ;;  %v13344_v17 = vld [vmem:[%s15406_s1 + $0x900] ss:$48 sps:$4 sm:$0xff]   ;;  %v13372_v43 = vld [vmem:[%s15406_s1 + $0x728] ss:$48 sps:$4 sm:$0xff]  }
 0x159   : > { %3457 = vmatpush2.bf16.msra.mxu0 %v13301_v46  ;;  %v1062_v20 = vld [vmem:[#allocation2 + $0x18] sm:$0xff]  ;;  %v1066_v21 = vld [vmem:[#allocation2 + $0x28] sm:$0xff] }
 0x15a   : > { %3500 = vmatpush2.bf16.msra.mxu1 %v13302_v47  ;;  %3458 = vmatprep.subr.bf16.mxu0 %v13303_v48  ;;  %v15513_v25 = vpack.c.bf16 %v1066_v21, %v1062_v20  ;;  %v13377_v44 = vld [vmem:[%s15406_s1 + $0xcc] ss:$48 sps:$4 sm:$0xff]   ;;  %v13375_v46 = vld [vmem:[%s15406_s1 + $0xc8] ss:$48 sps:$4 sm:$0xff]  }
 0x15b   : > { %3501 = vmatprep.subr.bf16.mxu1 %v13305_v49  ;;  %v13380_v45 = vld [vmem:[%s15406_s1 + $0x6cc] ss:$48 sps:$4 sm:$0xff]   ;;  %v13378_v47 = vld [vmem:[%s15406_s1 + $0x6c8] ss:$48 sps:$4 sm:$0xff]  }
 0x15c   : > { %v13383_v48 = vld [vmem:[%s15406_s1 + $0x6c] ss:$48 sps:$4 sm:$0xff]   ;;  %v13393_v58 = vld [vmem:[%s15406_s1 + $0x5a8] ss:$48 sps:$4 sm:$0xff]  }
 0x15d   : > { %3459 = vmatpush2.bf16.msra.mxu0 %v13307_v50  ;;  %v13386_v49 = vld [vmem:[%s15406_s1 + $0x66c] ss:$48 sps:$4 sm:$0xff]   ;;  %v13381_v50 = vld [vmem:[%s15406_s1 + $0x68] ss:$48 sps:$4 sm:$0xff]  }
 0x15e   : > { %3502 = vmatpush2.bf16.msra.mxu1 %v13308_v51  ;;  %3460 = vmatprep.subr.bf16.mxu0 %v13309_v52  ;;  %v13384_v51 = vld [vmem:[%s15406_s1 + $0x668] ss:$48 sps:$4 sm:$0xff]   ;;  %v13389_v52 = vld [vmem:[%s15406_s1 + $0xc] ss:$48 sps:$4 sm:$0xff]  }
 0x15f   : > { %3503 = vmatprep.subr.bf16.mxu1 %v13311_v53  ;;  %v13392_v53 = vld [vmem:[%s15406_s1 + $0x60c] ss:$48 sps:$4 sm:$0xff]   ;;  %v13396_v59 = vld [vmem:[%s15406_s1 + $0xba8] ss:$48 sps:$4 sm:$0xff]  }
 0x160   : > { %v13401_v60 = vld [vmem:[%s15406_s1 + $0x54c] ss:$48 sps:$4 sm:$0xff]   ;;  %v13429_v20 = vld [vmem:[%s15406_s1 + $0x368] ss:$48 sps:$4 sm:$0xff]  }
 0x161   : > { %3461 = vmatpush2.bf16.msra.mxu0 %v13313_v54  ;;  %v13387_v54 = vld [vmem:[%s15406_s1 + $0x8] ss:$48 sps:$4 sm:$0xff]   ;;  %v13404_v61 = vld [vmem:[%s15406_s1 + $0xb4c] ss:$48 sps:$4 sm:$0xff]  }
 0x162   : > { %3504 = vmatpush2.bf16.msra.mxu1 %v13314_v55  ;;  %3462 = vmatprep.subr.bf16.mxu0 %v13315_v56  ;;  %v13390_v55 = vld [vmem:[%s15406_s1 + $0x608] ss:$48 sps:$4 sm:$0xff]   ;;  %v13395_v56 = vld [vmem:[%s15406_s1 + $0x5ac] ss:$48 sps:$4 sm:$0xff]  }
 0x163   : > { %3505 = vmatprep.subr.bf16.mxu1 %v13317_v57  ;;  %v13398_v57 = vld [vmem:[%s15406_s1 + $0xbac] ss:$48 sps:$4 sm:$0xff]   ;;  %v13432_v21 = vld [vmem:[%s15406_s1 + $0x968] ss:$48 sps:$4 sm:$0xff]  }
 0x164   : > { %v13431_v18 = vld [vmem:[%s15406_s1 + $0x36c] ss:$48 sps:$4 sm:$0xff]  }
 0x165   : > { %3463 = vmatpush2.bf16.msra.mxu0 %v13319_v62  ;;  %v13399_v62 = vld [vmem:[%s15406_s1 + $0x548] ss:$48 sps:$4 sm:$0xff]   ;;  %v13434_v19 = vld [vmem:[%s15406_s1 + $0x96c] ss:$48 sps:$4 sm:$0xff]  }
 0x166   : > { %3506 = vmatpush2.bf16.msra.mxu1 %v13320_v63  ;;  %3464 = vmatprep.subr.bf16.mxu0 %v13321_v0  ;;  %v13402_v63 = vld [vmem:[%s15406_s1 + $0xb48] ss:$48 sps:$4 sm:$0xff]   ;;  %v13407_v0 = vld [vmem:[%s15406_s1 + $0x4ec] ss:$48 sps:$4 sm:$0xff]  }
 0x167   : > { %3507 = vmatprep.subr.bf16.mxu1 %v13323_v3  ;;  %v13410_v3 = vld [vmem:[%s15406_s1 + $0xaec] ss:$48 sps:$4 sm:$0xff]  }
 0x169   : > { %3465 = vmatpush2.bf16.msra.mxu0 %v13325_v4  ;;  %v13405_v4 = vld [vmem:[%s15406_s1 + $0x4e8] ss:$48 sps:$4 sm:$0xff]  }
 0x16a   : > { %3508 = vmatpush2.bf16.msra.mxu1 %v13326_v5  ;;  %3466 = vmatprep.subr.bf16.mxu0 %v13327_v6  ;;  %v13408_v5 = vld [vmem:[%s15406_s1 + $0xae8] ss:$48 sps:$4 sm:$0xff]   ;;  %v13413_v6 = vld [vmem:[%s15406_s1 + $0x48c] ss:$48 sps:$4 sm:$0xff]  }
 0x16b   : > { %3509 = vmatprep.subr.bf16.mxu1 %v13329_v7  ;;  %v13416_v7 = vld [vmem:[%s15406_s1 + $0xa8c] ss:$48 sps:$4 sm:$0xff]  }
 0x16d   : > { %3467 = vmatpush2.bf16.msra.mxu0 %v13331_v8  ;;  %v13411_v8 = vld [vmem:[%s15406_s1 + $0x488] ss:$48 sps:$4 sm:$0xff]  }
 0x16e   : > { %3510 = vmatpush2.bf16.msra.mxu1 %v13332_v9  ;;  %3468 = vmatprep.subr.bf16.mxu0 %v13333_v10  ;;  %v13414_v9 = vld [vmem:[%s15406_s1 + $0xa88] ss:$48 sps:$4 sm:$0xff]   ;;  %v13419_v10 = vld [vmem:[%s15406_s1 + $0x42c] ss:$48 sps:$4 sm:$0xff]  }
 0x16f   : > { %3511 = vmatprep.subr.bf16.mxu1 %v13335_v11  ;;  %v13422_v11 = vld [vmem:[%s15406_s1 + $0xa2c] ss:$48 sps:$4 sm:$0xff]  }
 0x171   : > { %3469 = vmatpush2.bf16.msra.mxu0 %v13337_v12  ;;  %v13417_v12 = vld [vmem:[%s15406_s1 + $0x428] ss:$48 sps:$4 sm:$0xff]  }
 0x172   : > { %3512 = vmatpush2.bf16.msra.mxu1 %v13338_v13  ;;  %3470 = vmatprep.subr.bf16.mxu0 %v13339_v14  ;;  %v13420_v13 = vld [vmem:[%s15406_s1 + $0xa28] ss:$48 sps:$4 sm:$0xff]   ;;  %v13425_v14 = vld [vmem:[%s15406_s1 + $0x3cc] ss:$48 sps:$4 sm:$0xff]  }
 0x173   : > { %3513 = vmatprep.subr.bf16.mxu1 %v13341_v15  ;;  %v13428_v15 = vld [vmem:[%s15406_s1 + $0x9cc] ss:$48 sps:$4 sm:$0xff]  }
 0x175   : > { %3471 = vmatpush2.bf16.msra.mxu0 %v13343_v16  ;;  %v13423_v16 = vld [vmem:[%s15406_s1 + $0x3c8] ss:$48 sps:$4 sm:$0xff]  }
 0x176   : > { %3514 = vmatpush2.bf16.msra.mxu1 %v13344_v17  ;;  %3526 = vmatprep.subr.bf16.mxu0 %v13347_v22  ;;  %v13426_v17 = vld [vmem:[%s15406_s1 + $0x9c8] ss:$48 sps:$4 sm:$0xff]   ;;  %v13437_v22 = vld [vmem:[%s15406_s1 + $0x30c] ss:$48 sps:$4 sm:$0xff]  }
 0x177   : > { %3569 = vmatprep.subr.bf16.mxu1 %v13350_v23  ;;  %v13440_v23 = vld [vmem:[%s15406_s1 + $0x90c] ss:$48 sps:$4 sm:$0xff]  }
 0x178   : > { %3473 = vmatmul.mubr.bf16.vlgmr.msra.gmra.mxu0 %v15511_v24 }
 0x179   : > { %3516 = vmatmul.mubr.bf16.vlgmr.msra.gmra.mxu1 %v15513_v25  ;;  %3527 = vmatpush1.bf16.msra.mxu0 %v13345_v26  ;;  %v13435_v26 = vld [vmem:[%s15406_s1 + $0x308] ss:$48 sps:$4 sm:$0xff]  }
 0x17a   : > { %3570 = vmatpush1.bf16.msra.mxu1 %v13348_v27  ;;  %3528 = vmatprep.subr.bf16.mxu0 %v13353_v28  ;;  %v13438_v27 = vld [vmem:[%s15406_s1 + $0x908] ss:$48 sps:$4 sm:$0xff]   ;;  %v13443_v28 = vld [vmem:[%s15406_s1 + $0x2b4] ss:$48 sps:$4 sm:$0xff]  }
 0x17b   : > { %3571 = vmatprep.subr.bf16.mxu1 %v13356_v29  ;;  %3558 = vmatprep.mubr.bf16.mxu0 %v15488_v1  ;;  %v13446_v29 = vld [vmem:[%s15406_s1 + $0x8b4] ss:$48 sps:$4 sm:$0xff]  }
 0x17c   : > { %3601 = vmatprep.mubr.bf16.mxu1 %v15490_v2 }
 0x17d   : > { %3529 = vmatpush1.bf16.msra.mxu0 %v13351_v30  ;;  %v13441_v30 = vld [vmem:[%s15406_s1 + $0x2b0] ss:$48 sps:$4 sm:$0xff]  }
 0x17e   : > { %3572 = vmatpush1.bf16.msra.mxu1 %v13354_v31  ;;  %3530 = vmatprep.subr.bf16.mxu0 %v13359_v32  ;;  %v13444_v31 = vld [vmem:[%s15406_s1 + $0x8b0] ss:$48 sps:$4 sm:$0xff]   ;;  %v13449_v32 = vld [vmem:[%s15406_s1 + $0x254] ss:$48 sps:$4 sm:$0xff]  }
 0x17f   : > { %3573 = vmatprep.subr.bf16.mxu1 %v13362_v33  ;;  %v13452_v33 = vld [vmem:[%s15406_s1 + $0x854] ss:$48 sps:$4 sm:$0xff]  }
 0x181   : > { %3531 = vmatpush1.bf16.msra.mxu0 %v13357_v34  ;;  %v13447_v34 = vld [vmem:[%s15406_s1 + $0x250] ss:$48 sps:$4 sm:$0xff]  }
 0x182   : > { %3574 = vmatpush1.bf16.msra.mxu1 %v13360_v35  ;;  %3532 = vmatprep.subr.bf16.mxu0 %v13365_v36  ;;  %v13450_v35 = vld [vmem:[%s15406_s1 + $0x850] ss:$48 sps:$4 sm:$0xff]   ;;  %v13455_v36 = vld [vmem:[%s15406_s1 + $0x1f4] ss:$48 sps:$4 sm:$0xff]  }
 0x183   : > { %3575 = vmatprep.subr.bf16.mxu1 %v13368_v37  ;;  %v13458_v37 = vld [vmem:[%s15406_s1 + $0x7f4] ss:$48 sps:$4 sm:$0xff]  }
 0x185   : > { %3533 = vmatpush1.bf16.msra.mxu0 %v13363_v38  ;;  %v13453_v38 = vld [vmem:[%s15406_s1 + $0x1f0] ss:$48 sps:$4 sm:$0xff]  }
 0x186   : > { %3576 = vmatpush1.bf16.msra.mxu1 %v13366_v39  ;;  %3534 = vmatprep.subr.bf16.mxu0 %v13371_v40  ;;  %v13456_v39 = vld [vmem:[%s15406_s1 + $0x7f0] ss:$48 sps:$4 sm:$0xff]   ;;  %v13461_v40 = vld [vmem:[%s15406_s1 + $0x194] ss:$48 sps:$4 sm:$0xff]  }
 0x187   : > { %3577 = vmatprep.subr.bf16.mxu1 %v13374_v41  ;;  %v13464_v41 = vld [vmem:[%s15406_s1 + $0x794] ss:$48 sps:$4 sm:$0xff]  }
 0x189   : > { %3535 = vmatpush1.bf16.msra.mxu0 %v13369_v42  ;;  %v13459_v42 = vld [vmem:[%s15406_s1 + $0x190] ss:$48 sps:$4 sm:$0xff]  }
 0x18a   : > { %3578 = vmatpush1.bf16.msra.mxu1 %v13372_v43  ;;  %3536 = vmatprep.subr.bf16.mxu0 %v13377_v44  ;;  %v13462_v43 = vld [vmem:[%s15406_s1 + $0x790] ss:$48 sps:$4 sm:$0xff]   ;;  %v13467_v44 = vld [vmem:[%s15406_s1 + $0x134] ss:$48 sps:$4 sm:$0xff]  }
 0x18b   : > { %3579 = vmatprep.subr.bf16.mxu1 %v13380_v45  ;;  %v13470_v45 = vld [vmem:[%s15406_s1 + $0x734] ss:$48 sps:$4 sm:$0xff]  }
 0x18d   : > { %3537 = vmatpush1.bf16.msra.mxu0 %v13375_v46  ;;  %v13465_v46 = vld [vmem:[%s15406_s1 + $0x130] ss:$48 sps:$4 sm:$0xff]  }
 0x18e   : > { %3580 = vmatpush1.bf16.msra.mxu1 %v13378_v47  ;;  %3538 = vmatprep.subr.bf16.mxu0 %v13383_v48  ;;  %v13468_v47 = vld [vmem:[%s15406_s1 + $0x730] ss:$48 sps:$4 sm:$0xff]   ;;  %v13473_v48 = vld [vmem:[%s15406_s1 + $0xd4] ss:$48 sps:$4 sm:$0xff]  }
 0x18f   : > { %3581 = vmatprep.subr.bf16.mxu1 %v13386_v49  ;;  %v13476_v49 = vld [vmem:[%s15406_s1 + $0x6d4] ss:$48 sps:$4 sm:$0xff]  }
 0x191   : > { %3539 = vmatpush1.bf16.msra.mxu0 %v13381_v50  ;;  %v13471_v50 = vld [vmem:[%s15406_s1 + $0xd0] ss:$48 sps:$4 sm:$0xff]  }
 0x192   : > { %3582 = vmatpush1.bf16.msra.mxu1 %v13384_v51  ;;  %3540 = vmatprep.subr.bf16.mxu0 %v13389_v52  ;;  %v13474_v51 = vld [vmem:[%s15406_s1 + $0x6d0] ss:$48 sps:$4 sm:$0xff]   ;;  %v13479_v52 = vld [vmem:[%s15406_s1 + $0x74] ss:$48 sps:$4 sm:$0xff]  }
 0x193   : > { %3583 = vmatprep.subr.bf16.mxu1 %v13392_v53  ;;  %v13482_v53 = vld [vmem:[%s15406_s1 + $0x674] ss:$48 sps:$4 sm:$0xff]  }
 0x195   : > { %3541 = vmatpush1.bf16.msra.mxu0 %v13387_v54  ;;  %v13477_v54 = vld [vmem:[%s15406_s1 + $0x70] ss:$48 sps:$4 sm:$0xff]  }
 0x196   : > { %3584 = vmatpush1.bf16.msra.mxu1 %v13390_v55  ;;  %3542 = vmatprep.subr.bf16.mxu0 %v13395_v56  ;;  %v13480_v55 = vld [vmem:[%s15406_s1 + $0x670] ss:$48 sps:$4 sm:$0xff]   ;;  %v13485_v56 = vld [vmem:[%s15406_s1 + $0x14] ss:$48 sps:$4 sm:$0xff]  }
 0x197   : > { %3585 = vmatprep.subr.bf16.mxu1 %v13398_v57  ;;  %v13488_v57 = vld [vmem:[%s15406_s1 + $0x614] ss:$48 sps:$4 sm:$0xff]  }
 0x199   : > { %3543 = vmatpush2.bf16.msra.mxu0 %v13393_v58  ;;  %v13483_v58 = vld [vmem:[%s15406_s1 + $0x10] ss:$48 sps:$4 sm:$0xff]  }
 0x19a   : > { %3586 = vmatpush2.bf16.msra.mxu1 %v13396_v59  ;;  %3544 = vmatprep.subr.bf16.mxu0 %v13401_v60  ;;  %v13486_v59 = vld [vmem:[%s15406_s1 + $0x610] ss:$48 sps:$4 sm:$0xff]   ;;  %v13491_v60 = vld [vmem:[%s15406_s1 + $0x5b4] ss:$48 sps:$4 sm:$0xff]  }
 0x19b   : > { %3587 = vmatprep.subr.bf16.mxu1 %v13404_v61  ;;  %v13494_v61 = vld [vmem:[%s15406_s1 + $0xbb4] ss:$48 sps:$4 sm:$0xff]  }
 0x19d   : > { %3545 = vmatpush2.bf16.msra.mxu0 %v13399_v62  ;;  %v13489_v62 = vld [vmem:[%s15406_s1 + $0x5b0] ss:$48 sps:$4 sm:$0xff]  }
 0x19e   : > { %3588 = vmatpush2.bf16.msra.mxu1 %v13402_v63  ;;  %3546 = vmatprep.subr.bf16.mxu0 %v13407_v0  ;;  %v13492_v63 = vld [vmem:[%s15406_s1 + $0xbb0] ss:$48 sps:$4 sm:$0xff]   ;;  %v13497_v0 = vld [vmem:[%s15406_s1 + $0x554] ss:$48 sps:$4 sm:$0xff]  }
 0x19f   : > { %3589 = vmatprep.subr.bf16.mxu1 %v13410_v3  ;;  %v13500_v3 = vld [vmem:[%s15406_s1 + $0xb54] ss:$48 sps:$4 sm:$0xff]  }
 0x1a1   : > { %3547 = vmatpush2.bf16.msra.mxu0 %v13405_v4  ;;  %v13495_v4 = vld [vmem:[%s15406_s1 + $0x550] ss:$48 sps:$4 sm:$0xff]  }
 0x1a2   : > { %3590 = vmatpush2.bf16.msra.mxu1 %v13408_v5  ;;  %3548 = vmatprep.subr.bf16.mxu0 %v13413_v6  ;;  %v13498_v5 = vld [vmem:[%s15406_s1 + $0xb50] ss:$48 sps:$4 sm:$0xff]   ;;  %v13503_v6 = vld [vmem:[%s15406_s1 + $0x4f4] ss:$48 sps:$4 sm:$0xff]  }
 0x1a3   : > { %3591 = vmatprep.subr.bf16.mxu1 %v13416_v7  ;;  %v13506_v7 = vld [vmem:[%s15406_s1 + $0xaf4] ss:$48 sps:$4 sm:$0xff]  }
 0x1a5   : > { %3549 = vmatpush2.bf16.msra.mxu0 %v13411_v8  ;;  %v13501_v8 = vld [vmem:[%s15406_s1 + $0x4f0] ss:$48 sps:$4 sm:$0xff]  }
 0x1a6   : > { %3592 = vmatpush2.bf16.msra.mxu1 %v13414_v9  ;;  %3550 = vmatprep.subr.bf16.mxu0 %v13419_v10  ;;  %v13504_v9 = vld [vmem:[%s15406_s1 + $0xaf0] ss:$48 sps:$4 sm:$0xff]   ;;  %v13509_v10 = vld [vmem:[%s15406_s1 + $0x494] ss:$48 sps:$4 sm:$0xff]  }
 0x1a7   : > { %3593 = vmatprep.subr.bf16.mxu1 %v13422_v11  ;;  %v13512_v11 = vld [vmem:[%s15406_s1 + $0xa94] ss:$48 sps:$4 sm:$0xff]  }
 0x1a9   : > { %3551 = vmatpush2.bf16.msra.mxu0 %v13417_v12  ;;  %v13507_v12 = vld [vmem:[%s15406_s1 + $0x490] ss:$48 sps:$4 sm:$0xff]  }
 0x1aa   : > { %3594 = vmatpush2.bf16.msra.mxu1 %v13420_v13  ;;  %3552 = vmatprep.subr.bf16.mxu0 %v13425_v14  ;;  %v13510_v13 = vld [vmem:[%s15406_s1 + $0xa90] ss:$48 sps:$4 sm:$0xff]   ;;  %v13515_v14 = vld [vmem:[%s15406_s1 + $0x434] ss:$48 sps:$4 sm:$0xff]  }
 0x1ab   : > { %3595 = vmatprep.subr.bf16.mxu1 %v13428_v15  ;;  %v13518_v15 = vld [vmem:[%s15406_s1 + $0xa34] ss:$48 sps:$4 sm:$0xff]  }
 0x1ad   : > { %3553 = vmatpush2.bf16.msra.mxu0 %v13423_v16  ;;  %v13513_v16 = vld [vmem:[%s15406_s1 + $0x430] ss:$48 sps:$4 sm:$0xff]  }
 0x1ae   : > { %3596 = vmatpush2.bf16.msra.mxu1 %v13426_v17  ;;  %3554 = vmatprep.subr.bf16.mxu0 %v13431_v18  ;;  %v13516_v17 = vld [vmem:[%s15406_s1 + $0xa30] ss:$48 sps:$4 sm:$0xff]   ;;  %v13521_v18 = vld [vmem:[%s15406_s1 + $0x3d4] ss:$48 sps:$4 sm:$0xff]  }
 0x1af   : > { %3597 = vmatprep.subr.bf16.mxu1 %v13434_v19  ;;  %v13524_v19 = vld [vmem:[%s15406_s1 + $0x9d4] ss:$48 sps:$4 sm:$0xff]  }
 0x1b1   : > { %3555 = vmatpush2.bf16.msra.mxu0 %v13429_v20  ;;  %v13519_v20 = vld [vmem:[%s15406_s1 + $0x3d0] ss:$48 sps:$4 sm:$0xff]  }
 0x1b2   : > { %3598 = vmatpush2.bf16.msra.mxu1 %v13432_v21  ;;  %3556 = vmatprep.subr.bf16.mxu0 %v13437_v22  ;;  %v13522_v21 = vld [vmem:[%s15406_s1 + $0x9d0] ss:$48 sps:$4 sm:$0xff]   ;;  %v13527_v22 = vld [vmem:[%s15406_s1 + $0x374] ss:$48 sps:$4 sm:$0xff]  }
 0x1b3   : > { %3599 = vmatprep.subr.bf16.mxu1 %v13440_v23  ;;  %v13530_v23 = vld [vmem:[%s15406_s1 + $0x974] ss:$48 sps:$4 sm:$0xff]  }
 0x1b5   : > { %3557 = vmatpush2.bf16.msra.mxu0 %v13435_v26  ;;  %v13525_v26 = vld [vmem:[%s15406_s1 + $0x370] ss:$48 sps:$4 sm:$0xff]  }
 0x1b6   : > { %3600 = vmatpush2.bf16.msra.mxu1 %v13438_v27  ;;  %3612 = vmatprep.subr.bf16.mxu0 %v13443_v28  ;;  %v13528_v27 = vld [vmem:[%s15406_s1 + $0x970] ss:$48 sps:$4 sm:$0xff]   ;;  %v13533_v28 = vld [vmem:[%s15406_s1 + $0x314] ss:$48 sps:$4 sm:$0xff]  }
 0x1b7   : > { %3655 = vmatprep.subr.bf16.mxu1 %v13446_v29  ;;  %v13536_v29 = vld [vmem:[%s15406_s1 + $0x914] ss:$48 sps:$4 sm:$0xff]  }
 0x1b8   : > { %3559 = vmatmul.mubr.bf16.vlgmr.msra.gmra.mxu0 %v15511_v24 }
 0x1b9   : > { %3602 = vmatmul.mubr.bf16.vlgmr.msra.gmra.mxu1 %v15513_v25  ;;  %3613 = vmatpush1.bf16.msra.mxu0 %v13441_v30  ;;  %v13531_v30 = vld [vmem:[%s15406_s1 + $0x310] ss:$48 sps:$4 sm:$0xff]  }
 0x1ba   : > { %3656 = vmatpush1.bf16.msra.mxu1 %v13444_v31  ;;  %3614 = vmatprep.subr.bf16.mxu0 %v13449_v32  ;;  %v13534_v31 = vld [vmem:[%s15406_s1 + $0x910] ss:$48 sps:$4 sm:$0xff]   ;;  %v13539_v32 = vld [vmem:[%s15406_s1 + $0x2bc] ss:$48 sps:$4 sm:$0xff]  }
 0x1bb   : > { %3657 = vmatprep.subr.bf16.mxu1 %v13452_v33  ;;  %3644 = vmatprep.mubr.bf16.mxu0 %v15488_v1  ;;  %v13542_v33 = vld [vmem:[%s15406_s1 + $0x8bc] ss:$48 sps:$4 sm:$0xff]  }
 0x1bc   : > { %3687 = vmatprep.mubr.bf16.mxu1 %v15490_v2 }
 0x1bd   : > { %3615 = vmatpush1.bf16.msra.mxu0 %v13447_v34  ;;  %v13537_v34 = vld [vmem:[%s15406_s1 + $0x2b8] ss:$48 sps:$4 sm:$0xff]  }
 0x1be   : > { %3658 = vmatpush1.bf16.msra.mxu1 %v13450_v35  ;;  %3616 = vmatprep.subr.bf16.mxu0 %v13455_v36  ;;  %v13540_v35 = vld [vmem:[%s15406_s1 + $0x8b8] ss:$48 sps:$4 sm:$0xff]   ;;  %v13545_v36 = vld [vmem:[%s15406_s1 + $0x25c] ss:$48 sps:$4 sm:$0xff]  }
 0x1bf   : > { %3659 = vmatprep.subr.bf16.mxu1 %v13458_v37  ;;  %v13548_v37 = vld [vmem:[%s15406_s1 + $0x85c] ss:$48 sps:$4 sm:$0xff]  }
 0x1c1   : > { %3617 = vmatpush1.bf16.msra.mxu0 %v13453_v38  ;;  %v13543_v38 = vld [vmem:[%s15406_s1 + $0x258] ss:$48 sps:$4 sm:$0xff]  }
 0x1c2   : > { %3660 = vmatpush1.bf16.msra.mxu1 %v13456_v39  ;;  %3618 = vmatprep.subr.bf16.mxu0 %v13461_v40  ;;  %v13546_v39 = vld [vmem:[%s15406_s1 + $0x858] ss:$48 sps:$4 sm:$0xff]   ;;  %v13551_v40 = vld [vmem:[%s15406_s1 + $0x1fc] ss:$48 sps:$4 sm:$0xff]  }
 0x1c3   : > { %3661 = vmatprep.subr.bf16.mxu1 %v13464_v41  ;;  %v13554_v41 = vld [vmem:[%s15406_s1 + $0x7fc] ss:$48 sps:$4 sm:$0xff]  }
 0x1c5   : > { %3619 = vmatpush1.bf16.msra.mxu0 %v13459_v42  ;;  %v13549_v42 = vld [vmem:[%s15406_s1 + $0x1f8] ss:$48 sps:$4 sm:$0xff]  }
 0x1c6   : > { %3662 = vmatpush1.bf16.msra.mxu1 %v13462_v43  ;;  %3620 = vmatprep.subr.bf16.mxu0 %v13467_v44  ;;  %v13552_v43 = vld [vmem:[%s15406_s1 + $0x7f8] ss:$48 sps:$4 sm:$0xff]   ;;  %v13557_v44 = vld [vmem:[%s15406_s1 + $0x19c] ss:$48 sps:$4 sm:$0xff]  }
 0x1c7   : > { %3663 = vmatprep.subr.bf16.mxu1 %v13470_v45  ;;  %v13560_v45 = vld [vmem:[%s15406_s1 + $0x79c] ss:$48 sps:$4 sm:$0xff]  }
 0x1c9   : > { %3621 = vmatpush1.bf16.msra.mxu0 %v13465_v46  ;;  %v13555_v46 = vld [vmem:[%s15406_s1 + $0x198] ss:$48 sps:$4 sm:$0xff]  }
 0x1ca   : > { %3664 = vmatpush1.bf16.msra.mxu1 %v13468_v47  ;;  %3622 = vmatprep.subr.bf16.mxu0 %v13473_v48  ;;  %v13558_v47 = vld [vmem:[%s15406_s1 + $0x798] ss:$48 sps:$4 sm:$0xff]   ;;  %v13563_v48 = vld [vmem:[%s15406_s1 + $0x13c] ss:$48 sps:$4 sm:$0xff]  }
 0x1cb   : > { %3665 = vmatprep.subr.bf16.mxu1 %v13476_v49  ;;  %v13566_v49 = vld [vmem:[%s15406_s1 + $0x73c] ss:$48 sps:$4 sm:$0xff]  }
 0x1cd   : > { %3623 = vmatpush1.bf16.msra.mxu0 %v13471_v50  ;;  %v13561_v50 = vld [vmem:[%s15406_s1 + $0x138] ss:$48 sps:$4 sm:$0xff]  }
 0x1ce   : > { %3666 = vmatpush1.bf16.msra.mxu1 %v13474_v51  ;;  %3624 = vmatprep.subr.bf16.mxu0 %v13479_v52  ;;  %v13564_v51 = vld [vmem:[%s15406_s1 + $0x738] ss:$48 sps:$4 sm:$0xff]   ;;  %v13569_v52 = vld [vmem:[%s15406_s1 + $0xdc] ss:$48 sps:$4 sm:$0xff]  }
 0x1cf   : > { %3667 = vmatprep.subr.bf16.mxu1 %v13482_v53  ;;  %v13572_v53 = vld [vmem:[%s15406_s1 + $0x6dc] ss:$48 sps:$4 sm:$0xff]  }
 0x1d1   : > { %3625 = vmatpush1.bf16.msra.mxu0 %v13477_v54  ;;  %v13567_v54 = vld [vmem:[%s15406_s1 + $0xd8] ss:$48 sps:$4 sm:$0xff]  }
 0x1d2   : > { %3668 = vmatpush1.bf16.msra.mxu1 %v13480_v55  ;;  %3626 = vmatprep.subr.bf16.mxu0 %v13485_v56  ;;  %v13570_v55 = vld [vmem:[%s15406_s1 + $0x6d8] ss:$48 sps:$4 sm:$0xff]   ;;  %v13575_v56 = vld [vmem:[%s15406_s1 + $0x7c] ss:$48 sps:$4 sm:$0xff]  }
 0x1d3   : > { %3669 = vmatprep.subr.bf16.mxu1 %v13488_v57  ;;  %v13578_v57 = vld [vmem:[%s15406_s1 + $0x67c] ss:$48 sps:$4 sm:$0xff]  }
 0x1d5   : > { %3627 = vmatpush1.bf16.msra.mxu0 %v13483_v58  ;;  %v13573_v58 = vld [vmem:[%s15406_s1 + $0x78] ss:$48 sps:$4 sm:$0xff]  }
 0x1d6   : > { %3670 = vmatpush1.bf16.msra.mxu1 %v13486_v59  ;;  %3628 = vmatprep.subr.bf16.mxu0 %v13491_v60  ;;  %v13576_v59 = vld [vmem:[%s15406_s1 + $0x678] ss:$48 sps:$4 sm:$0xff]   ;;  %v13581_v60 = vld [vmem:[%s15406_s1 + $0x1c] ss:$48 sps:$4 sm:$0xff]  }
 0x1d7   : > { %3671 = vmatprep.subr.bf16.mxu1 %v13494_v61  ;;  %v13584_v61 = vld [vmem:[%s15406_s1 + $0x61c] ss:$48 sps:$4 sm:$0xff]  }
 0x1d9   : > { %3629 = vmatpush2.bf16.msra.mxu0 %v13489_v62  ;;  %v13579_v62 = vld [vmem:[%s15406_s1 + $0x18] ss:$48 sps:$4 sm:$0xff]  }
 0x1da   : > { %3672 = vmatpush2.bf16.msra.mxu1 %v13492_v63  ;;  %3630 = vmatprep.subr.bf16.mxu0 %v13497_v0  ;;  %v13582_v63 = vld [vmem:[%s15406_s1 + $0x618] ss:$48 sps:$4 sm:$0xff]   ;;  %v13587_v0 = vld [vmem:[%s15406_s1 + $0x5bc] ss:$48 sps:$4 sm:$0xff]  }
 0x1db   : > { %3673 = vmatprep.subr.bf16.mxu1 %v13500_v3  ;;  %v13590_v3 = vld [vmem:[%s15406_s1 + $0xbbc] ss:$48 sps:$4 sm:$0xff]  }
 0x1dd   : > { %3631 = vmatpush2.bf16.msra.mxu0 %v13495_v4  ;;  %v13585_v4 = vld [vmem:[%s15406_s1 + $0x5b8] ss:$48 sps:$4 sm:$0xff]  }
 0x1de   : > { %3674 = vmatpush2.bf16.msra.mxu1 %v13498_v5  ;;  %3632 = vmatprep.subr.bf16.mxu0 %v13503_v6  ;;  %v13588_v5 = vld [vmem:[%s15406_s1 + $0xbb8] ss:$48 sps:$4 sm:$0xff]   ;;  %v13593_v6 = vld [vmem:[%s15406_s1 + $0x55c] ss:$48 sps:$4 sm:$0xff]  }
 0x1df   : > { %3675 = vmatprep.subr.bf16.mxu1 %v13506_v7  ;;  %v13596_v7 = vld [vmem:[%s15406_s1 + $0xb5c] ss:$48 sps:$4 sm:$0xff]  }
 0x1e1   : > { %3633 = vmatpush2.bf16.msra.mxu0 %v13501_v8  ;;  %v13591_v8 = vld [vmem:[%s15406_s1 + $0x558] ss:$48 sps:$4 sm:$0xff]  }
 0x1e2   : > { %3676 = vmatpush2.bf16.msra.mxu1 %v13504_v9  ;;  %3634 = vmatprep.subr.bf16.mxu0 %v13509_v10  ;;  %v13594_v9 = vld [vmem:[%s15406_s1 + $0xb58] ss:$48 sps:$4 sm:$0xff]   ;;  %v13599_v10 = vld [vmem:[%s15406_s1 + $0x4fc] ss:$48 sps:$4 sm:$0xff]  }
 0x1e3   : > { %3677 = vmatprep.subr.bf16.mxu1 %v13512_v11  ;;  %v13602_v11 = vld [vmem:[%s15406_s1 + $0xafc] ss:$48 sps:$4 sm:$0xff]  }
 0x1e5   : > { %3635 = vmatpush2.bf16.msra.mxu0 %v13507_v12  ;;  %v13597_v12 = vld [vmem:[%s15406_s1 + $0x4f8] ss:$48 sps:$4 sm:$0xff]  }
 0x1e6   : > { %3678 = vmatpush2.bf16.msra.mxu1 %v13510_v13  ;;  %3636 = vmatprep.subr.bf16.mxu0 %v13515_v14  ;;  %v13600_v13 = vld [vmem:[%s15406_s1 + $0xaf8] ss:$48 sps:$4 sm:$0xff]   ;;  %v13605_v14 = vld [vmem:[%s15406_s1 + $0x49c] ss:$48 sps:$4 sm:$0xff]  }
 0x1e7   : > { %3679 = vmatprep.subr.bf16.mxu1 %v13518_v15  ;;  %v13608_v15 = vld [vmem:[%s15406_s1 + $0xa9c] ss:$48 sps:$4 sm:$0xff]  }
 0x1e9   : > { %3637 = vmatpush2.bf16.msra.mxu0 %v13513_v16  ;;  %v13603_v16 = vld [vmem:[%s15406_s1 + $0x498] ss:$48 sps:$4 sm:$0xff]  }
 0x1ea   : > { %3680 = vmatpush2.bf16.msra.mxu1 %v13516_v17  ;;  %3638 = vmatprep.subr.bf16.mxu0 %v13521_v18  ;;  %v13606_v17 = vld [vmem:[%s15406_s1 + $0xa98] ss:$48 sps:$4 sm:$0xff]   ;;  %v13611_v18 = vld [vmem:[%s15406_s1 + $0x43c] ss:$48 sps:$4 sm:$0xff]  }
 0x1eb   : > { %3681 = vmatprep.subr.bf16.mxu1 %v13524_v19  ;;  %v13614_v19 = vld [vmem:[%s15406_s1 + $0xa3c] ss:$48 sps:$4 sm:$0xff]  }
 0x1ed   : > { %3639 = vmatpush2.bf16.msra.mxu0 %v13519_v20  ;;  %v13609_v20 = vld [vmem:[%s15406_s1 + $0x438] ss:$48 sps:$4 sm:$0xff]  }
 0x1ee   : > { %3682 = vmatpush2.bf16.msra.mxu1 %v13522_v21  ;;  %3640 = vmatprep.subr.bf16.mxu0 %v13527_v22  ;;  %v13612_v21 = vld [vmem:[%s15406_s1 + $0xa38] ss:$48 sps:$4 sm:$0xff]   ;;  %v13617_v22 = vld [vmem:[%s15406_s1 + $0x3dc] ss:$48 sps:$4 sm:$0xff]  }
 0x1ef   : > { %3683 = vmatprep.subr.bf16.mxu1 %v13530_v23  ;;  %v13620_v23 = vld [vmem:[%s15406_s1 + $0x9dc] ss:$48 sps:$4 sm:$0xff]  }
 0x1f1   : > { %3641 = vmatpush2.bf16.msra.mxu0 %v13525_v26  ;;  %v13615_v26 = vld [vmem:[%s15406_s1 + $0x3d8] ss:$48 sps:$4 sm:$0xff]  }
 0x1f2   : > { %3684 = vmatpush2.bf16.msra.mxu1 %v13528_v27  ;;  %3642 = vmatprep.subr.bf16.mxu0 %v13533_v28  ;;  %v13618_v27 = vld [vmem:[%s15406_s1 + $0x9d8] ss:$48 sps:$4 sm:$0xff]   ;;  %v13623_v28 = vld [vmem:[%s15406_s1 + $0x37c] ss:$48 sps:$4 sm:$0xff]  }
 0x1f3   : > { %3685 = vmatprep.subr.bf16.mxu1 %v13536_v29  ;;  %v13626_v29 = vld [vmem:[%s15406_s1 + $0x97c] ss:$48 sps:$4 sm:$0xff]  }
 0x1f5   : > { %3643 = vmatpush2.bf16.msra.mxu0 %v13531_v30  ;;  %v1460_v30 = vlaneseq }
 0x1f6   : > { %3686 = vmatpush2.bf16.msra.mxu1 %v13534_v31  ;;  %3698 = vmatprep.subr.bf16.mxu0 %v13539_v32  ;;  %v13621_v31 = vld [vmem:[%s15406_s1 + $0x378] ss:$48 sps:$4 sm:$0xff]  }
 0x1f7   : > { %3741 = vmatprep.subr.bf16.mxu1 %v13542_v33  ;;  %v13624_v32 = vld [vmem:[%s15406_s1 + $0x978] ss:$48 sps:$4 sm:$0xff]   ;;  %v13629_v33 = vld [vmem:[%s15406_s1 + $0x31c] ss:$48 sps:$4 sm:$0xff]  }
 0x1f8   : > { %3645 = vmatmul.mubr.bf16.vlgmr.msra.gmra.mxu0 %v15511_v24 }
 0x1f9   : > { %3688 = vmatmul.mubr.bf16.vlgmr.msra.gmra.mxu1 %v15513_v25  ;;  %3699 = vmatpush1.bf16.msra.mxu0 %v13537_v34  ;;  %v13632_v34 = vld [vmem:[%s15406_s1 + $0x91c] ss:$48 sps:$4 sm:$0xff]  }
 0x1fa   : > { %3742 = vmatpush1.bf16.msra.mxu1 %v13540_v35  ;;  %3700 = vmatprep.subr.bf16.mxu0 %v13545_v36  ;;  %v15715_v35 = vshrl.u32 %v1460_v30, 7  ;;  %v13627_v36 = vld [vmem:[%s15406_s1 + $0x318] ss:$48 sps:$4 sm:$0xff]   ;;  %v13696_v30 = vld [vmem:[%s15406_s1 + $0xb00] ss:$48 sps:$4 sm:$0xff]  }
 0x1fb   : > { %3743 = vmatprep.subr.bf16.mxu1 %v13548_v37  ;;  %3730 = vmatprep.mubr.bf16.mxu0 %v15488_v1  ;;  %v13630_v37 = vld [vmem:[%s15406_s1 + $0x918] ss:$48 sps:$4 sm:$0xff]  }
 0x1fc   : > { %3773 = vmatprep.mubr.bf16.mxu1 %v15490_v2 }
 0x1fd   : > { %3701 = vmatpush1.bf16.msra.mxu0 %v13543_v38  ;;  %v13635_v38 = vld [vmem:[%s15406_s1 + $0x2c4] ss:$48 sps:$4 sm:$0xff]  }
 0x1fe   : > { %3744 = vmatpush1.bf16.msra.mxu1 %v13546_v39  ;;  %3702 = vmatprep.subr.bf16.mxu0 %v13551_v40  ;;  %v13638_v39 = vld [vmem:[%s15406_s1 + $0x8c4] ss:$48 sps:$4 sm:$0xff]  }
 0x1ff   : > { %3745 = vmatprep.subr.bf16.mxu1 %v13554_v41  ;;  %v15722_v40 = vld [vmem:[%s15414_s24] sm:$0xff]  ;;  %v15725_v41 = vsub.s32 1, %v15715_v35 }
 0x201   : > { %3703 = vmatpush1.bf16.msra.mxu0 %v13549_v42  ;;  %v13633_v42 = vld [vmem:[%s15406_s1 + $0x2c0] ss:$48 sps:$4 sm:$0xff]  }
 0x202   : > { %3746 = vmatpush1.bf16.msra.mxu1 %v13552_v43  ;;  %3704 = vmatprep.subr.bf16.mxu0 %v13557_v44  ;;  %v13636_v43 = vld [vmem:[%s15406_s1 + $0x8c0] ss:$48 sps:$4 sm:$0xff]   ;;  %v13641_v44 = vld [vmem:[%s15406_s1 + $0x264] ss:$48 sps:$4 sm:$0xff]  }
 0x203   : > { %3747 = vmatprep.subr.bf16.mxu1 %v13560_v45  ;;  %v13644_v45 = vld [vmem:[%s15406_s1 + $0x864] ss:$48 sps:$4 sm:$0xff]  }
 0x205   : > { %3705 = vmatpush1.bf16.msra.mxu0 %v13555_v46  ;;  %v15733_v46 = vrot.slane %v15722_v40, %v15725_v41 }
 0x206   : > { %3748 = vmatpush1.bf16.msra.mxu1 %v13558_v47  ;;  %3706 = vmatprep.subr.bf16.mxu0 %v13563_v48  ;;  %v13639_v47 = vld [vmem:[%s15406_s1 + $0x260] ss:$48 sps:$4 sm:$0xff]  }
 0x207   : > { %3749 = vmatprep.subr.bf16.mxu1 %v13566_v49  ;;  %v13642_v48 = vld [vmem:[%s15406_s1 + $0x860] ss:$48 sps:$4 sm:$0xff]  }
 0x209   : > { %3707 = vmatpush1.bf16.msra.mxu0 %v13561_v50 }
 0x20a   : > { %3750 = vmatpush1.bf16.msra.mxu1 %v13564_v51  ;;  %3708 = vmatprep.subr.bf16.mxu0 %v13569_v52  ;;  %v13647_v51 = vld [vmem:[%s15406_s1 + $0x204] ss:$48 sps:$4 sm:$0xff]  }
 0x20b   : > { %3751 = vmatprep.subr.bf16.mxu1 %v13572_v53  ;;  %v13650_v52 = vld [vmem:[%s15406_s1 + $0x804] ss:$48 sps:$4 sm:$0xff]  }
 0x20d   : > { %3709 = vmatpush1.bf16.msra.mxu0 %v13567_v54 }
 0x20e   : > { %3752 = vmatpush1.bf16.msra.mxu1 %v13570_v55  ;;  %3710 = vmatprep.subr.bf16.mxu0 %v13575_v56  ;;  %v13645_v55 = vld [vmem:[%s15406_s1 + $0x200] ss:$48 sps:$4 sm:$0xff]  }
 0x20f   : > { %3753 = vmatprep.subr.bf16.mxu1 %v13578_v57  ;;  %v13648_v56 = vld [vmem:[%s15406_s1 + $0x800] ss:$48 sps:$4 sm:$0xff]  }
 0x211   : > { %3711 = vmatpush1.bf16.msra.mxu0 %v13573_v58  ;;  %v13653_v58 = vld [vmem:[%s15406_s1 + $0x1a4] ss:$48 sps:$4 sm:$0xff]  }
 0x212   : > { %3754 = vmatpush1.bf16.msra.mxu1 %v13576_v59  ;;  %3712 = vmatprep.subr.bf16.mxu0 %v13581_v60  ;;  %v13656_v59 = vld [vmem:[%s15406_s1 + $0x7a4] ss:$48 sps:$4 sm:$0xff]  }
 0x213   : > { %3755 = vmatprep.subr.bf16.mxu1 %v13584_v61  ;;  %v13651_v61 = vld [vmem:[%s15406_s1 + $0x1a0] ss:$48 sps:$4 sm:$0xff]  }
 0x215   : > { %3713 = vmatpush1.bf16.msra.mxu0 %v13579_v62  ;;  %v13654_v62 = vld [vmem:[%s15406_s1 + $0x7a0] ss:$48 sps:$4 sm:$0xff]  }
 0x216   : > { %3756 = vmatpush1.bf16.msra.mxu1 %v13582_v63  ;;  %3714 = vmatprep.subr.bf16.mxu0 %v13587_v0  ;;  %v13659_v63 = vld [vmem:[%s15406_s1 + $0x144] ss:$48 sps:$4 sm:$0xff]  }
 0x217   : > { %3757 = vmatprep.subr.bf16.mxu1 %v13590_v3  ;;  %v13662_v0 = vld [vmem:[%s15406_s1 + $0x744] ss:$48 sps:$4 sm:$0xff]   ;;  %v13657_v3 = vld [vmem:[%s15406_s1 + $0x140] ss:$48 sps:$4 sm:$0xff]  }
 0x219   : > { %3715 = vmatpush2.bf16.msra.mxu0 %v13585_v4  ;;  %v13660_v4 = vld [vmem:[%s15406_s1 + $0x740] ss:$48 sps:$4 sm:$0xff]  }
 0x21a   : > { %3758 = vmatpush2.bf16.msra.mxu1 %v13588_v5  ;;  %3716 = vmatprep.subr.bf16.mxu0 %v13593_v6  ;;  %v13665_v5 = vld [vmem:[%s15406_s1 + $0xe4] ss:$48 sps:$4 sm:$0xff]  }
 0x21b   : > { %3759 = vmatprep.subr.bf16.mxu1 %v13596_v7  ;;  %v13668_v6 = vld [vmem:[%s15406_s1 + $0x6e4] ss:$48 sps:$4 sm:$0xff]   ;;  %v13663_v7 = vld [vmem:[%s15406_s1 + $0xe0] ss:$48 sps:$4 sm:$0xff]  }
 0x21d   : > { %3717 = vmatpush2.bf16.msra.mxu0 %v13591_v8  ;;  %v13666_v8 = vld [vmem:[%s15406_s1 + $0x6e0] ss:$48 sps:$4 sm:$0xff]  }
 0x21e   : > { %3760 = vmatpush2.bf16.msra.mxu1 %v13594_v9  ;;  %3718 = vmatprep.subr.bf16.mxu0 %v13599_v10  ;;  %v13671_v9 = vld [vmem:[%s15406_s1 + $0x84] ss:$48 sps:$4 sm:$0xff]  }
 0x21f   : > { %3761 = vmatprep.subr.bf16.mxu1 %v13602_v11  ;;  %v13674_v10 = vld [vmem:[%s15406_s1 + $0x684] ss:$48 sps:$4 sm:$0xff]   ;;  %v13669_v11 = vld [vmem:[%s15406_s1 + $0x80] ss:$48 sps:$4 sm:$0xff]  }
 0x221   : > { %3719 = vmatpush2.bf16.msra.mxu0 %v13597_v12  ;;  %v13672_v12 = vld [vmem:[%s15406_s1 + $0x680] ss:$48 sps:$4 sm:$0xff]  }
 0x222   : > { %3762 = vmatpush2.bf16.msra.mxu1 %v13600_v13  ;;  %3720 = vmatprep.subr.bf16.mxu0 %v13605_v14  ;;  %v13677_v13 = vld [vmem:[%s15406_s1 + $0x24] ss:$48 sps:$4 sm:$0xff]  }
 0x223   : > { %3763 = vmatprep.subr.bf16.mxu1 %v13608_v15  ;;  %v13680_v14 = vld [vmem:[%s15406_s1 + $0x624] ss:$48 sps:$4 sm:$0xff]   ;;  %v13675_v15 = vld [vmem:[%s15406_s1 + $0x20] ss:$48 sps:$4 sm:$0xff]  }
 0x225   : > { %3721 = vmatpush2.bf16.msra.mxu0 %v13603_v16  ;;  %v13678_v16 = vld [vmem:[%s15406_s1 + $0x620] ss:$48 sps:$4 sm:$0xff]  }
 0x226   : > { %3764 = vmatpush2.bf16.msra.mxu1 %v13606_v17  ;;  %3722 = vmatprep.subr.bf16.mxu0 %v13611_v18  ;;  %v13683_v17 = vld [vmem:[%s15406_s1 + $0x5c4] ss:$48 sps:$4 sm:$0xff]  }
 0x227   : > { %3765 = vmatprep.subr.bf16.mxu1 %v13614_v19  ;;  %v13686_v18 = vld [vmem:[%s15406_s1 + $0xbc4] ss:$48 sps:$4 sm:$0xff]   ;;  %v13681_v19 = vld [vmem:[%s15406_s1 + $0x5c0] ss:$48 sps:$4 sm:$0xff]  }
 0x229   : > { %3723 = vmatpush2.bf16.msra.mxu0 %v13609_v20  ;;  %v13684_v20 = vld [vmem:[%s15406_s1 + $0xbc0] ss:$48 sps:$4 sm:$0xff]  }
 0x22a   : > { %3766 = vmatpush2.bf16.msra.mxu1 %v13612_v21  ;;  %3724 = vmatprep.subr.bf16.mxu0 %v13617_v22  ;;  %v13689_v21 = vld [vmem:[%s15406_s1 + $0x564] ss:$48 sps:$4 sm:$0xff]  }
 0x22b   : > { %3767 = vmatprep.subr.bf16.mxu1 %v13620_v23  ;;  %v13692_v22 = vld [vmem:[%s15406_s1 + $0xb64] ss:$48 sps:$4 sm:$0xff]   ;;  %v13687_v23 = vld [vmem:[%s15406_s1 + $0x560] ss:$48 sps:$4 sm:$0xff]  }
 0x22d   : > { %3725 = vmatpush2.bf16.msra.mxu0 %v13615_v26  ;;  %v13690_v26 = vld [vmem:[%s15406_s1 + $0xb60] ss:$48 sps:$4 sm:$0xff]  }
 0x22e   : > { %3768 = vmatpush2.bf16.msra.mxu1 %v13618_v27  ;;  %3726 = vmatprep.subr.bf16.mxu0 %v13623_v28  ;;  %v13695_v27 = vld [vmem:[%s15406_s1 + $0x504] ss:$48 sps:$4 sm:$0xff]  }
 0x22f   : > { %3769 = vmatprep.subr.bf16.mxu1 %v13626_v29  ;;  %v13698_v28 = vld [vmem:[%s15406_s1 + $0xb04] ss:$48 sps:$4 sm:$0xff]   ;;  %v13693_v29 = vld [vmem:[%s15406_s1 + $0x500] ss:$48 sps:$4 sm:$0xff]  }
 0x231   : > { %3727 = vmatpush2.bf16.msra.mxu0 %v13621_v31  ;;  %v13701_v31 = vld [vmem:[%s15406_s1 + $0x4a4] ss:$48 sps:$4 sm:$0xff]  }
 0x232   : > { %3770 = vmatpush2.bf16.msra.mxu1 %v13624_v32  ;;  %3728 = vmatprep.subr.bf16.mxu0 %v13629_v33  ;;  %v13704_v32 = vld [vmem:[%s15406_s1 + $0xaa4] ss:$48 sps:$4 sm:$0xff]   ;;  %v13699_v33 = vld [vmem:[%s15406_s1 + $0x4a0] ss:$48 sps:$4 sm:$0xff]  }
 0x233   : > { %3771 = vmatprep.subr.bf16.mxu1 %v13632_v34  ;;  %v13702_v34 = vld [vmem:[%s15406_s1 + $0xaa0] ss:$48 sps:$4 sm:$0xff]  }
 0x235   : > { %3729 = vmatpush2.bf16.msra.mxu0 %v13627_v36  ;;  %v13707_v36 = vld [vmem:[%s15406_s1 + $0x444] ss:$48 sps:$4 sm:$0xff]  }
 0x236   : > { %3772 = vmatpush2.bf16.msra.mxu1 %v13630_v37  ;;  %3784 = vmatprep.subr.bf16.mxu0 %v13635_v38  ;;  %v13710_v37 = vld [vmem:[%s15406_s1 + $0xa44] ss:$48 sps:$4 sm:$0xff]   ;;  %v13705_v38 = vld [vmem:[%s15406_s1 + $0x440] ss:$48 sps:$4 sm:$0xff]  }
 0x237   : > { %3827 = vmatprep.subr.bf16.mxu1 %v13638_v39  ;;  %v13708_v39 = vld [vmem:[%s15406_s1 + $0xa40] ss:$48 sps:$4 sm:$0xff]  }
 0x238   : > { %v15737_v49 = vpop.f32.mrf.mxu0  ;;  %3731 = vmatmul.mubr.bf16.vlgmr.msra.gmra.mxu0 %v15511_v24 }
 0x239   : > { %v15739_v50 = vpop.f32.mrf.mxu1  ;;  %3774 = vmatmul.mubr.bf16.vlgmr.msra.gmra.mxu1 %v15513_v25  ;;  %3785 = vmatpush1.bf16.msra.mxu0 %v13633_v42  ;;  %v13713_v42 = vld [vmem:[%s15406_s1 + $0x3e4] ss:$48 sps:$4 sm:$0xff]  }
 0x23a   : > { %3828 = vmatpush1.bf16.msra.mxu1 %v13636_v43  ;;  %v3476_v53 = vpop.f32.mrf.mxu0  ;;  %3786 = vmatprep.subr.bf16.mxu0 %v13641_v44  ;;  %v13716_v43 = vld [vmem:[%s15406_s1 + $0x9e4] ss:$48 sps:$4 sm:$0xff]   ;;  %v13711_v44 = vld [vmem:[%s15406_s1 + $0x3e0] ss:$48 sps:$4 sm:$0xff]  }
 0x23b   : > { %3829 = vmatprep.subr.bf16.mxu1 %v13644_v45  ;;  %v3477_v54 = vadd.f32 %v3476_v53, %v15733_v46  ;;  %3816 = vmatprep.mubr.bf16.mxu0 %v15488_v1  ;;  %v3519_v57 = vpop.f32.mrf.mxu1  ;;  %v13714_v45 = vld [vmem:[%s15406_s1 + $0x9e0] ss:$48 sps:$4 sm:$0xff]   ;;  %v13725_v53 = vld [vmem:[%s15406_s1 + $0x324] ss:$48 sps:$4 sm:$0xff]  }
 0x23c   : > { %3859 = vmatprep.mubr.bf16.mxu1 %v15490_v2 }
 0x23d   : > { %v15752_v60 = vadd.f32 %v3519_v57, %v3477_v54  ;;  %3787 = vmatpush1.bf16.msra.mxu0 %v13639_v47  ;;  %v13719_v47 = vld [vmem:[%s15406_s1 + $0x384] ss:$48 sps:$4 sm:$0xff]   ;;  %v13731_v57 = vld [vmem:[%s15406_s1 + $0x2cc] ss:$48 sps:$4 sm:$0xff]  }
 0x23e   : > { %3830 = vmatpush1.bf16.msra.mxu1 %v13642_v48  ;;  %3788 = vmatprep.subr.bf16.mxu0 %v13647_v51  ;;  %v13722_v48 = vld [vmem:[%s15406_s1 + $0x984] ss:$48 sps:$4 sm:$0xff]   ;;  %v13717_v51 = vld [vmem:[%s15406_s1 + $0x380] ss:$48 sps:$4 sm:$0xff]  }
 0x23f   : > { %3831 = vmatprep.subr.bf16.mxu1 %v13650_v52  ;;  %v13720_v52 = vld [vmem:[%s15406_s1 + $0x980] ss:$48 sps:$4 sm:$0xff]   ;;  %v13728_v54 = vld [vmem:[%s15406_s1 + $0x924] ss:$48 sps:$4 sm:$0xff]  }
 0x241   : > { %3789 = vmatpush1.bf16.msra.mxu0 %v13645_v55  ;;  %v13723_v55 = vld [vmem:[%s15406_s1 + $0x320] ss:$48 sps:$4 sm:$0xff]  }
 0x242   : > { %3832 = vmatpush1.bf16.msra.mxu1 %v13648_v56  ;;  %3790 = vmatprep.subr.bf16.mxu0 %v13653_v58  ;;  %v13726_v56 = vld [vmem:[%s15406_s1 + $0x920] ss:$48 sps:$4 sm:$0xff]   ;;  %v13734_v58 = vld [vmem:[%s15406_s1 + $0x8cc] ss:$48 sps:$4 sm:$0xff]  }
 0x243   : > { %3833 = vmatprep.subr.bf16.mxu1 %v13656_v59  ;;  %v15807_v59 = vsub.s32 2, %v15715_v35 }
 0x245   : > { %3791 = vmatpush1.bf16.msra.mxu0 %v13651_v61  ;;  %v15809_v61 = vpop.f32.mrf.mxu0 }
 0x246   : > { %3834 = vmatpush1.bf16.msra.mxu1 %v13654_v62  ;;  %3792 = vmatprep.subr.bf16.mxu0 %v13659_v63  ;;  %v15811_v62 = vpop.f32.mrf.mxu1  ;;  %v15814_v63 = vsub.s32 3, %v15715_v35 }
 0x247   : > { %3835 = vmatprep.subr.bf16.mxu1 %v13662_v0  ;;  %v13729_v0 = vld [vmem:[%s15406_s1 + $0x2c8] ss:$48 sps:$4 sm:$0xff]  }
 0x249   : > { %3793 = vmatpush1.bf16.msra.mxu0 %v13657_v3  ;;  %v13732_v3 = vld [vmem:[%s15406_s1 + $0x8c8] ss:$48 sps:$4 sm:$0xff]  }
 0x24a   : > { %3836 = vmatpush1.bf16.msra.mxu1 %v13660_v4  ;;  %3794 = vmatprep.subr.bf16.mxu0 %v13665_v5  ;;  %v13737_v4 = vld [vmem:[%s15406_s1 + $0x26c] ss:$48 sps:$4 sm:$0xff]  }
 0x24b   : > { %3837 = vmatprep.subr.bf16.mxu1 %v13668_v6  ;;  %v13740_v5 = vld [vmem:[%s15406_s1 + $0x86c] ss:$48 sps:$4 sm:$0xff]   ;;  %v1471_v6 = vrot.slane %v15722_v40, %v15807_v59 }
 0x24d   : > { %3795 = vmatpush1.bf16.msra.mxu0 %v13663_v7  ;;  %v15822_v7 = vpop.f32.mrf.mxu0 }
 0x24e   : > { %3838 = vmatpush1.bf16.msra.mxu1 %v13666_v8  ;;  %3796 = vmatprep.subr.bf16.mxu0 %v13671_v9  ;;  %v15824_v8 = vpop.f32.mrf.mxu1  ;;  %v15828_v9 = vrot.slane %v15722_v40, %v15814_v63 }
 0x24f   : > { %3839 = vmatprep.subr.bf16.mxu1 %v13674_v10  ;;  %v13735_v10 = vld [vmem:[%s15406_s1 + $0x268] ss:$48 sps:$4 sm:$0xff]  }
 0x251   : > { %3797 = vmatpush1.bf16.msra.mxu0 %v13669_v11  ;;  %v13738_v11 = vld [vmem:[%s15406_s1 + $0x868] ss:$48 sps:$4 sm:$0xff]  }
 0x252   : > { %3840 = vmatpush1.bf16.msra.mxu1 %v13672_v12  ;;  %3798 = vmatprep.subr.bf16.mxu0 %v13677_v13 }
 0x253   : > { %3841 = vmatprep.subr.bf16.mxu1 %v13680_v14  ;;  %v13743_v14 = vld [vmem:[%s15406_s1 + $0x20c] ss:$48 sps:$4 sm:$0xff]  }
 0x255   : > { %3799 = vmatpush1.bf16.msra.mxu0 %v13675_v15  ;;  %v13746_v15 = vld [vmem:[%s15406_s1 + $0x80c] ss:$48 sps:$4 sm:$0xff]  }
 0x256   : > { %3842 = vmatpush1.bf16.msra.mxu1 %v13678_v16  ;;  %3800 = vmatprep.subr.bf16.mxu0 %v13683_v17 }
 0x257   : > { %3843 = vmatprep.subr.bf16.mxu1 %v13686_v18 }
 0x259   : > { %3801 = vmatpush2.bf16.msra.mxu0 %v13681_v19 }
 0x25a   : > { %3844 = vmatpush2.bf16.msra.mxu1 %v13684_v20  ;;  %3802 = vmatprep.subr.bf16.mxu0 %v13689_v21  ;;  %v13741_v20 = vld [vmem:[%s15406_s1 + $0x208] ss:$48 sps:$4 sm:$0xff]  }
 0x25b   : > { %3845 = vmatprep.subr.bf16.mxu1 %v13692_v22  ;;  %v13744_v21 = vld [vmem:[%s15406_s1 + $0x808] ss:$48 sps:$4 sm:$0xff]  }
 0x25d   : > { %3803 = vmatpush2.bf16.msra.mxu0 %v13687_v23  ;;  %v13749_v23 = vld [vmem:[%s15406_s1 + $0x1ac] ss:$48 sps:$4 sm:$0xff]  }
 0x25e   : > { %3846 = vmatpush2.bf16.msra.mxu1 %v13690_v26  ;;  %3804 = vmatprep.subr.bf16.mxu0 %v13695_v27  ;;  %v13752_v26 = vld [vmem:[%s15406_s1 + $0x7ac] ss:$48 sps:$4 sm:$0xff]  }
 0x25f   : > { %3847 = vmatprep.subr.bf16.mxu1 %v13698_v28 }
 0x261   : > { %3805 = vmatpush2.bf16.msra.mxu0 %v13693_v29 }
 0x262   : > { %3848 = vmatpush2.bf16.msra.mxu1 %v13696_v30  ;;  %3806 = vmatprep.subr.bf16.mxu0 %v13701_v31  ;;  %v13755_v31 = vld [vmem:[%s15406_s1 + $0x14c] ss:$48 sps:$4 sm:$0xff]  }
 0x263   : > { %3849 = vmatprep.subr.bf16.mxu1 %v13704_v32  ;;  %v13758_v32 = vld [vmem:[%s15406_s1 + $0x74c] ss:$48 sps:$4 sm:$0xff]  }
 0x265   : > { %3807 = vmatpush2.bf16.msra.mxu0 %v13699_v33  ;;  %v13753_v33 = vld [vmem:[%s15406_s1 + $0x148] ss:$48 sps:$4 sm:$0xff]  }
 0x266   : > { %3850 = vmatpush2.bf16.msra.mxu1 %v13702_v34  ;;  %3808 = vmatprep.subr.bf16.mxu0 %v13707_v36  ;;  %v13756_v34 = vld [vmem:[%s15406_s1 + $0x748] ss:$48 sps:$4 sm:$0xff]   ;;  %v13761_v36 = vld [vmem:[%s15406_s1 + $0xec] ss:$48 sps:$4 sm:$0xff]  }
 0x267   : > { %3851 = vmatprep.subr.bf16.mxu1 %v13710_v37  ;;  %v13764_v37 = vld [vmem:[%s15406_s1 + $0x6ec] ss:$48 sps:$4 sm:$0xff]  }
 0x269   : > { %3809 = vmatpush2.bf16.msra.mxu0 %v13705_v38  ;;  %v13759_v38 = vld [vmem:[%s15406_s1 + $0xe8] ss:$48 sps:$4 sm:$0xff]  }
 0x26a   : > { %3852 = vmatpush2.bf16.msra.mxu1 %v13708_v39  ;;  %3810 = vmatprep.subr.bf16.mxu0 %v13713_v42  ;;  %v13762_v39 = vld [vmem:[%s15406_s1 + $0x6e8] ss:$48 sps:$4 sm:$0xff]   ;;  %v13767_v42 = vld [vmem:[%s15406_s1 + $0x8c] ss:$48 sps:$4 sm:$0xff]  }
 0x26b   : > { %3853 = vmatprep.subr.bf16.mxu1 %v13716_v43  ;;  %v13770_v43 = vld [vmem:[%s15406_s1 + $0x68c] ss:$48 sps:$4 sm:$0xff]  }
 0x26d   : > { %3811 = vmatpush2.bf16.msra.mxu0 %v13711_v44  ;;  %v13765_v44 = vld [vmem:[%s15406_s1 + $0x88] ss:$48 sps:$4 sm:$0xff]  }
 0x26e   : > { %3854 = vmatpush2.bf16.msra.mxu1 %v13714_v45  ;;  %3812 = vmatprep.subr.bf16.mxu0 %v13719_v47  ;;  %v13768_v45 = vld [vmem:[%s15406_s1 + $0x688] ss:$48 sps:$4 sm:$0xff]   ;;  %v13773_v47 = vld [vmem:[%s15406_s1 + $0x2c] ss:$48 sps:$4 sm:$0xff]  }
 0x26f   : > { %3855 = vmatprep.subr.bf16.mxu1 %v13722_v48  ;;  %v13776_v48 = vld [vmem:[%s15406_s1 + $0x62c] ss:$48 sps:$4 sm:$0xff]  }
 0x271   : > { %3813 = vmatpush2.bf16.msra.mxu0 %v13717_v51  ;;  %v13771_v51 = vld [vmem:[%s15406_s1 + $0x28] ss:$48 sps:$4 sm:$0xff]  }
 0x272   : > { %3856 = vmatpush2.bf16.msra.mxu1 %v13720_v52  ;;  %3814 = vmatprep.subr.bf16.mxu0 %v13725_v53  ;;  %v13774_v52 = vld [vmem:[%s15406_s1 + $0x628] ss:$48 sps:$4 sm:$0xff]   ;;  %v13779_v53 = vld [vmem:[%s15406_s1 + $0x5cc] ss:$48 sps:$4 sm:$0xff]  }
 0x273   : > { %3857 = vmatprep.subr.bf16.mxu1 %v13728_v54  ;;  %v13782_v54 = vld [vmem:[%s15406_s1 + $0xbcc] ss:$48 sps:$4 sm:$0xff]  }
 0x275   : > { %3815 = vmatpush2.bf16.msra.mxu0 %v13723_v55  ;;  %v13777_v55 = vld [vmem:[%s15406_s1 + $0x5c8] ss:$48 sps:$4 sm:$0xff]  }
 0x276   : > { %3858 = vmatpush2.bf16.msra.mxu1 %v13726_v56  ;;  %3870 = vmatprep.subr.bf16.mxu0 %v13731_v57  ;;  %v13780_v56 = vld [vmem:[%s15406_s1 + $0xbc8] ss:$48 sps:$4 sm:$0xff]   ;;  %v13785_v57 = vld [vmem:[%s15406_s1 + $0x56c] ss:$48 sps:$4 sm:$0xff]  }
 0x277   : > { %3913 = vmatprep.subr.bf16.mxu1 %v13734_v58  ;;  %v13788_v58 = vld [vmem:[%s15406_s1 + $0xb6c] ss:$48 sps:$4 sm:$0xff]  }
 0x278   : > { %v3560_v12 = vpop.f32.mrf.mxu0  ;;  %3817 = vmatmul.mubr.bf16.vlgmr.msra.gmra.mxu0 %v15511_v24 }
 0x279   : > { %v3603_v13 = vpop.f32.mrf.mxu1  ;;  %3860 = vmatmul.mubr.bf16.vlgmr.msra.gmra.mxu1 %v15513_v25  ;;  %v3561_v16 = vadd.f32 %v3560_v12, %v1471_v6  ;;  %3871 = vmatpush1.bf16.msra.mxu0 %v13729_v0  ;;  %v13783_v0 = vld [vmem:[%s15406_s1 + $0x568] ss:$48 sps:$4 sm:$0xff]   ;;  %v13800_v12 = vld [vmem:[%s15406_s1 + $0xaac] ss:$48 sps:$4 sm:$0xff]  }
 0x27a   : > { %3914 = vmatpush1.bf16.msra.mxu1 %v13732_v3  ;;  %v3562_v17 = vpop.f32.mrf.mxu0  ;;  %3872 = vmatprep.subr.bf16.mxu0 %v13737_v4  ;;  %v13786_v3 = vld [vmem:[%s15406_s1 + $0xb68] ss:$48 sps:$4 sm:$0xff]   ;;  %v13791_v4 = vld [vmem:[%s15406_s1 + $0x50c] ss:$48 sps:$4 sm:$0xff]  }
 0x27b   : > { %v3605_v40 = vpop.f32.mrf.mxu1  ;;  %3915 = vmatprep.subr.bf16.mxu1 %v13740_v5  ;;  %v15836_v18 = vadd.f32 %v3603_v13, %v3561_v16  ;;  %v3563_v19 = vadd.f32 %v3562_v17, %v15828_v9  ;;  %3902 = vmatprep.mubr.bf16.mxu0 %v15488_v1  ;;  %v13747_v1 = vld [vmem:[%s15406_s1 + $0x1a8] ss:$48 sps:$4 sm:$0xff]   ;;  %v13794_v5 = vld [vmem:[%s15406_s1 + $0xb0c] ss:$48 sps:$4 sm:$0xff]  }
 0x27c   : > { %3945 = vmatprep.mubr.bf16.mxu1 %v15490_v2  ;;  %v3564_v22 = vpop.f32.mrf.mxu0  ;;  %v13750_v2 = vld [vmem:[%s15406_s1 + $0x7a8] ss:$48 sps:$4 sm:$0xff]   ;;  %v13806_v16 = vld [vmem:[%s15406_s1 + $0xa4c] ss:$48 sps:$4 sm:$0xff]  }
 0x27d   : > { %v15845_v27 = vadd.f32 %v3605_v40, %v3563_v19  ;;  %v3565_v28 = vadd.f32 %v3564_v22, %v1471_v6  ;;  %3873 = vmatpush1.bf16.msra.mxu0 %v13735_v10  ;;  %v3607_v29 = vpop.f32.mrf.mxu1  ;;  %v13789_v6 = vld [vmem:[%s15406_s1 + $0x508] ss:$48 sps:$4 sm:$0xff]   ;;  %v13809_v19 = vld [vmem:[%s15406_s1 + $0x3ec] ss:$48 sps:$4 sm:$0xff]  }
 0x27e   : > { %3916 = vmatpush1.bf16.msra.mxu1 %v13738_v11  ;;  %3874 = vmatprep.subr.bf16.mxu0 %v13743_v14  ;;  %v13792_v10 = vld [vmem:[%s15406_s1 + $0xb08] ss:$48 sps:$4 sm:$0xff]   ;;  %v13797_v11 = vld [vmem:[%s15406_s1 + $0x4ac] ss:$48 sps:$4 sm:$0xff]  }
 0x27f   : > { %3917 = vmatprep.subr.bf16.mxu1 %v13746_v15  ;;  %v15847_v30 = vadd.f32 %v3607_v29, %v3565_v28  ;;  %v13795_v13 = vld [vmem:[%s15406_s1 + $0x4a8] ss:$48 sps:$4 sm:$0xff]   ;;  %v13803_v15 = vld [vmem:[%s15406_s1 + $0x44c] ss:$48 sps:$4 sm:$0xff]  }
 0x280   : > { %v13798_v14 = vld [vmem:[%s15406_s1 + $0xaa8] ss:$48 sps:$4 sm:$0xff]  }
 0x281   : > { %3875 = vmatpush1.bf16.msra.mxu0 %v13741_v20  ;;  %v13801_v17 = vld [vmem:[%s15406_s1 + $0x448] ss:$48 sps:$4 sm:$0xff]   ;;  %v13812_v20 = vld [vmem:[%s15406_s1 + $0x9ec] ss:$48 sps:$4 sm:$0xff]  }
 0x282   : > { %3918 = vmatpush1.bf16.msra.mxu1 %v13744_v21  ;;  %3876 = vmatprep.subr.bf16.mxu0 %v13749_v23  ;;  %v13804_v40 = vld [vmem:[%s15406_s1 + $0xa48] ss:$48 sps:$4 sm:$0xff]   ;;  %v13815_v23 = vld [vmem:[%s15406_s1 + $0x38c] ss:$48 sps:$4 sm:$0xff]  }
 0x283   : > { %3919 = vmatprep.subr.bf16.mxu1 %v13752_v26  ;;  %v13807_v21 = vld [vmem:[%s15406_s1 + $0x3e8] ss:$48 sps:$4 sm:$0xff]   ;;  %v13818_v26 = vld [vmem:[%s15406_s1 + $0x98c] ss:$48 sps:$4 sm:$0xff]  }
 0x284   : > { %v13810_v22 = vld [vmem:[%s15406_s1 + $0x9e8] ss:$48 sps:$4 sm:$0xff]  }
 0x285   : > { %3877 = vmatpush1.bf16.msra.mxu0 %v13747_v1  ;;  %v13813_v28 = vld [vmem:[%s15406_s1 + $0x388] ss:$48 sps:$4 sm:$0xff]   ;;  %v13821_v1 = vld [vmem:[%s15406_s1 + $0x32c] ss:$48 sps:$4 sm:$0xff]  }
 0x286   : > { %3920 = vmatpush1.bf16.msra.mxu1 %v13750_v2  ;;  %3878 = vmatprep.subr.bf16.mxu0 %v13755_v31  ;;  %v13816_v29 = vld [vmem:[%s15406_s1 + $0x988] ss:$48 sps:$4 sm:$0xff]   ;;  %v13824_v2 = vld [vmem:[%s15406_s1 + $0x92c] ss:$48 sps:$4 sm:$0xff]  }
 0x287   : > { %3921 = vmatprep.subr.bf16.mxu1 %v13758_v32  ;;  %v13819_v31 = vld [vmem:[%s15406_s1 + $0x328] ss:$48 sps:$4 sm:$0xff]  }
 0x288   : > { %v13822_v32 = vld [vmem:[%s15406_s1 + $0x928] ss:$48 sps:$4 sm:$0xff]  }
 0x289   : > { %3879 = vmatpush1.bf16.msra.mxu0 %v13753_v33  ;;  %v15900_v33 = vsub.s32 0, %v15715_v35 }
 0x28a   : > { %3922 = vmatpush1.bf16.msra.mxu1 %v13756_v34  ;;  %3880 = vmatprep.subr.bf16.mxu0 %v13761_v36  ;;  %v1478_v34 = vsub.s32 4, %v15715_v35  ;;  %v1482_v36 = vsub.s32 5, %v15715_v35 }
 0x28b   : > { %3923 = vmatprep.subr.bf16.mxu1 %v13764_v37  ;;  %v14473_v37 = vld [vmem:[%s15414_s24] sm:$0xff] }
 0x28d   : > { %3881 = vmatpush1.bf16.msra.mxu0 %v13759_v38  ;;  %v1463_v38 = vrot.slane %v14473_v37, %v15900_v33 }
 0x28e   : > { %3924 = vmatpush1.bf16.msra.mxu1 %v13762_v39  ;;  %3882 = vmatprep.subr.bf16.mxu0 %v13767_v42  ;;  %v1479_v39 = vrot.slane %v14473_v37, %v1478_v34  ;;  %v15908_v42 = vpop.f32.mrf.mxu0 }
 0x28f   : > { %3925 = vmatprep.subr.bf16.mxu1 %v13770_v43  ;;  %v15910_v43 = vpop.f32.mrf.mxu1 }
 0x291   : > { %3883 = vmatpush1.bf16.msra.mxu0 %v13765_v44  ;;  %v15052_v44 = vmov 0.0  }
 0x292   : > { %3926 = vmatpush1.bf16.msra.mxu1 %v13768_v45  ;;  %3884 = vmatprep.subr.bf16.mxu0 %v13773_v47  ;;  %v15916_v45 = vrot.slane %v14473_v37, %v1482_v36  ;;  %v3475_v47 = vadd.f32 %v15737_v49, %v1463_v38 }
 0x293   : > { %3927 = vmatprep.subr.bf16.mxu1 %v13776_v48 }
 0x294   : > { %v3518_v49 = vadd.f32 %v15739_v50, %v3475_v47 }
 0x295   : > { %3885 = vmatpush1.bf16.msra.mxu0 %v13771_v51 }
 0x296   : > { %3928 = vmatpush1.bf16.msra.mxu1 %v13774_v52  ;;  %3886 = vmatprep.subr.bf16.mxu0 %v13779_v53 }
 0x297   : > { %3929 = vmatprep.subr.bf16.mxu1 %v13782_v54 }
 0x299   : > { %3887 = vmatpush2.bf16.msra.mxu0 %v13777_v55 }
 0x29a   : > { %3930 = vmatpush2.bf16.msra.mxu1 %v13780_v56  ;;  %3888 = vmatprep.subr.bf16.mxu0 %v13785_v57 }
 0x29b   : > { %3931 = vmatprep.subr.bf16.mxu1 %v13788_v58 }
 0x29d   : > { %3889 = vmatpush2.bf16.msra.mxu0 %v13783_v0 }
 0x29e   : > { %3932 = vmatpush2.bf16.msra.mxu1 %v13786_v3  ;;  %3890 = vmatprep.subr.bf16.mxu0 %v13791_v4 }
 0x29f   : > { %3933 = vmatprep.subr.bf16.mxu1 %v13794_v5 }
 0x2a1   : > { %3891 = vmatpush2.bf16.msra.mxu0 %v13789_v6  ;;  %v3956_v6 = vmul.f32 0.125, %v3518_v49 }
 0x2a2   : > { %3934 = vmatpush2.bf16.msra.mxu1 %v13792_v10  ;;  %3892 = vmatprep.subr.bf16.mxu0 %v13797_v11 }
 0x2a3   : > { %3935 = vmatprep.subr.bf16.mxu1 %v13800_v12 }
 0x2a5   : > { %3893 = vmatpush2.bf16.msra.mxu0 %v13795_v13  ;;  %v1486_v13 = vsub.s32 6, %v15715_v35 }
 0x2a6   : > { %3936 = vmatpush2.bf16.msra.mxu1 %v13798_v14  ;;  %3894 = vmatprep.subr.bf16.mxu0 %v13803_v15  ;;  %v1490_v14 = vsub.s32 7, %v15715_v35  ;;  %v14248_v35 = vld [vmem:[%s15425_s29 + $0x128] ss:$16 sps:$4 sm:$0xff]  }
 0x2a7   : > { %3937 = vmatprep.subr.bf16.mxu1 %v13806_v16  ;;  %v1487_v15 = vrot.slane %v14473_v37, %v1486_v13 }
 0x2a9   : > { %3895 = vmatpush2.bf16.msra.mxu0 %v13801_v17 }
 0x2aa   : > { %3938 = vmatpush2.bf16.msra.mxu1 %v13804_v40  ;;  %3896 = vmatprep.subr.bf16.mxu0 %v13809_v19  ;;  %v15961_v40 = vrot.slane %v14473_v37, %v1490_v14 }
 0x2ab   : > { %3939 = vmatprep.subr.bf16.mxu1 %v13812_v20 }
 0x2ad   : > { %3897 = vmatpush2.bf16.msra.mxu0 %v13807_v21 }
 0x2ae   : > { %3940 = vmatpush2.bf16.msra.mxu1 %v13810_v22  ;;  %3898 = vmatprep.subr.bf16.mxu0 %v13815_v23 }
 0x2af   : > { %3941 = vmatprep.subr.bf16.mxu1 %v13818_v26 }
 0x2b1   : > { %3899 = vmatpush2.bf16.msra.mxu0 %v13813_v28 }
 0x2b2   : > { %3942 = vmatpush2.bf16.msra.mxu1 %v13816_v29  ;;  %3900 = vmatprep.subr.bf16.mxu0 %v13821_v1 }
 0x2b3   : > { %3943 = vmatprep.subr.bf16.mxu1 %v13824_v2 }
 0x2b5   : > { %3901 = vmatpush2.bf16.msra.mxu0 %v13819_v31 }
 0x2b6   : > { %3944 = vmatpush2.bf16.msra.mxu1 %v13822_v32  ;;  %12921 = vmatprep.subr.bf16.mxu0 %v15052_v44 }
 0x2b7   : > { %12927 = vmatprep.subr.bf16.mxu1 %v15052_v44 }
 0x2b8   : > { %v3646_v48 = vpop.f32.mrf.mxu0  ;;  %3903 = vmatmul.mubr.bf16.vlgmr.msra.gmra.mxu0 %v15511_v24  ;;  %v3479_v24 = vadd.f32 %v15809_v61, %v1463_v38  ;;  %v15938_v61 = vpack.c.bf16 %v3956_v6, %v3956_v6  ;;  %v1457_v38 = vld [vmem:[%s15414_s24 + $0x8] sm:$0xf] }
 0x2b9   : > { %v3689_v51 = vpop.f32.mrf.mxu1  ;;  %3946 = vmatmul.mubr.bf16.vlgmr.msra.gmra.mxu1 %v15513_v25  ;;  %v3647_v52 = vadd.f32 %v3646_v48, %v1479_v39  ;;  %12923 = vmatprep.mubr.msk.bf16.mxu0 %vm15053_vm0, %v15052_v44  ;;  %v1495_v37 = vrot.slane %v1457_v38, %v15900_v33  ;;  %v1499_v48 = vrot.slane %v1457_v38, %v15725_v41 }
 0x2ba   : > { %12929 = vmatprep.mubr.msk.bf16.mxu1 %vm15053_vm0, %v15052_v44  ;;  %v3648_v53 = vpop.f32.mrf.mxu0  ;;  %v3522_v10 = vadd.f32 %v15811_v62, %v3479_v24 }
 0x2bb   : > { %v3691_v54 = vpop.f32.mrf.mxu1  ;;  %v3690_v55 = vadd.f32 %v3689_v51, %v3647_v52  ;;  %v3649_v56 = vadd.f32 %v3648_v53, %v15916_v45 }
 0x2bc   : > { %v3650_v57 = vpop.f32.mrf.mxu0  ;;  %v3960_v12 = vmul.f32 0.125, %v3522_v10 }
 0x2bd   : > { %v15928_v25 = vpack.c.bf16 %v3690_v55, %v3690_v55  ;;  %v15930_v58 = vadd.f32 %v3691_v54, %v3649_v56  ;;  %v3651_v0 = vadd.f32 %v3650_v57, %v1479_v39  ;;  %v3693_v3 = vpop.f32.mrf.mxu1 }
 0x2be   : > { %v15945_v62 = vpack.c.bf16 %v3960_v12, %v3960_v12  ;;  %v15955_v16 = vpop.f32.mrf.mxu0 }
 0x2bf   : > { %v4007_v4 = vsel %vm4002_vm1, %v15928_v25, 0  ;;  %v3694_v5 = vadd.f32 %v3693_v3, %v3651_v0  ;;  %v15957_v17 = vpop.f32.mrf.mxu1 }
 0x2c0   : > { %12922 = vmatpush3.bf16.xpose.msra.mxu0 %v4007_v4 }
 0x2c1   : > { %v3976_v11 = vpack.c.bf16 %v3694_v5, %v3694_v5  ;;  %12933 = vmatprep.subr.bf16.mxu0 %v15052_v44 }
 0x2c3   : > { %v4053_v50 = vsel %vm4002_vm1, %v3976_v11, 0  ;;  %4271 = vrot.lane.b32.xlu1 %v3976_v11, %s15054_s21 }
 0x2c4   : > { %12928 = vmatpush3.bf16.xpose.msra.mxu1 %v4053_v50 }
 0x2c5   : > { %12939 = vmatprep.subr.bf16.mxu1 %v15052_v44 }
 0x2c7   : > { %12924 = vmatmul.mubr.msk.bf16.vlgmr.msra.gmra.mxu0 %vm4002_vm1, %v15938_v61 }
 0x2c8   : > { %12935 = vmatprep.mubr.msk.bf16.mxu0 %vm15053_vm0, %v15052_v44 }
 0x2cb   : > { %12930 = vmatmul.mubr.msk.bf16.vlgmr.msra.gmra.mxu1 %vm4002_vm1, %v15945_v62 }
 0x2cc   : > { %12941 = vmatprep.mubr.msk.bf16.mxu1 %vm15053_vm0, %v15052_v44 }
 0x2f8   : > { %v3732_v19 = vpop.f32.mrf.mxu0 }
 0x2f9   : > { %v3775_v20 = vpop.f32.mrf.mxu1  ;;  %v3733_v21 = vadd.f32 %v3732_v19, %v1487_v15 }
 0x2fa   : > { %v3734_v22 = vpop.f32.mrf.mxu0 }
 0x2fb   : > { %v3777_v23 = vpop.f32.mrf.mxu1  ;;  %v3735_v26 = vadd.f32 %v3734_v22, %v15961_v40  ;;  %v15964_v28 = vadd.f32 %v3775_v20, %v3733_v21  ;;  %v1503_v20 = vrot.slane %v1457_v38, %v15807_v59  ;;  %v1507_v21 = vrot.slane %v1457_v38, %v15814_v63  ;;  %v16001_v38 = vld [vmem:[#allocation7] ss:$0 sm:$0xff] }
 0x2fc   : > { %v3736_v29 = vpop.f32.mrf.mxu0 }
 0x2fd   : > { %v3737_v1 = vadd.f32 %v3736_v29, %v1487_v15  ;;  %v15966_v2 = vadd.f32 %v3777_v23, %v3735_v26  ;;  %v3779_v31 = vpop.f32.mrf.mxu1 }
 0x2fe   : > { %v15972_v39 = vpop.f32.mrf.mxu0 }
 0x2ff   : > { %v15968_v32 = vadd.f32 %v3779_v31, %v3737_v1  ;;  %v15974_v47 = vpop.f32.mrf.mxu1 }
 0x338   : > { %v3818_v51 = vpop.f32.mrf.mxu0 }
 0x339   : > { %v3861_v52 = vpop.f32.mrf.mxu1  ;;  %v3819_v53 = vadd.f32 %v3818_v51, %v1495_v37 }
 0x33a   : > { %v3820_v54 = vpop.f32.mrf.mxu0 }
 0x33b   : > { %v3863_v55 = vpop.f32.mrf.mxu1  ;;  %v3821_v56 = vadd.f32 %v3820_v54, %v1499_v48  ;;  %v3862_v49 = vadd.f32 %v3861_v52, %v3819_v53 }
 0x33c   : > { %v3822_v57 = vpop.f32.mrf.mxu0 }
 0x33d   : > { %v3865_v24 = vpop.f32.mrf.mxu1  ;;  %v15977_v0 = vpack.c.bf16 %v3862_v49, %v3862_v49  ;;  %v3823_v3 = vadd.f32 %v3822_v57, %v1495_v37  ;;  %v15979_v4 = vadd.f32 %v3863_v55, %v3821_v56 }
 0x33e   : > { %v3824_v5 = vpop.f32.mrf.mxu0 }
 0x33f   : > { %v3867_v6 = vpop.f32.mrf.mxu1  ;;  %v4125_v10 = vsel %vm4123_vm2, %v15977_v0, 0  ;;  %v3825_v11 = vadd.f32 %v3824_v5, %v1499_v48  ;;  %v3866_v50 = vadd.f32 %v3865_v24, %v3823_v3 }
 0x340   : > { %12934 = vmatpush3.bf16.msra.mxu0 %v4125_v10 }
 0x341   : > { %v15983_v12 = vpack.c.bf16 %v3866_v50, %v3866_v50  ;;  %v15985_v15 = vadd.f32 %v3867_v6, %v3825_v11  ;;  %12945 = vmatprep.subr.bf16.mxu0 %v15052_v44  ;;  %v16004_v6 = vld [vmem:[#allocation7 + $0x1] ss:$0 sm:$0xff] }
 0x343   : > { %v4171_v19 = vsel %vm4123_vm2, %v15983_v12, 0 }
 0x344   : > { %12940 = vmatpush3.bf16.msra.mxu1 %v4171_v19 }
 0x345   : > { %12951 = vmatprep.subr.bf16.mxu1 %v15052_v44 }
 0x378   : > { %v3904_v22 = vpop.f32.mrf.mxu0 }
 0x379   : > { %v3947_v23 = vpop.f32.mrf.mxu1  ;;  %v3905_v26 = vadd.f32 %v3904_v22, %v1503_v20 }
 0x37a   : > { %v3906_v29 = vpop.f32.mrf.mxu0 }
 0x37b   : > { %v3949_v1 = vpop.f32.mrf.mxu1  ;;  %v3907_v31 = vadd.f32 %v3906_v29, %v1507_v21  ;;  %v15993_v37 = vadd.f32 %v3947_v23, %v3905_v26 }
 0x37c   : > { %v3908_v48 = vpop.f32.mrf.mxu0 }
 0x37d   : > { %v3951_v51 = vpop.f32.mrf.mxu1  ;;  %v3909_v52 = vadd.f32 %v3908_v48, %v1503_v20  ;;  %v15995_v53 = vadd.f32 %v3949_v1, %v3907_v31 }
 0x37e   : > { %v3910_v54 = vpop.f32.mrf.mxu0 }
 0x37f   : > { %v3953_v55 = vpop.f32.mrf.mxu1  ;;  %v3911_v56 = vadd.f32 %v3910_v54, %v1507_v21  ;;  %v15997_v49 = vadd.f32 %v3951_v51, %v3909_v52 }
 0x381   : > { %v15999_v57 = vadd.f32 %v3953_v55, %v3911_v56 }
 0x387   : > { %v4043_v24 = vpop.f32.mrf.mxu0 }
 0x388   : > { %v4044_v3 = vadd.f32 %v16001_v38, %v4043_v24 }
 0x389   : > { %v12925_v5 = vpop.f32.mrf.mxu0 }
 0x38a   : > { %v4096_v10 = vsel %vm4095_vm3, %v4044_v3, -inf }
 0x38b   : > { %v4089_v11 = vpop.f32.mrf.mxu1  ;;  %4097 = vmax.xlane.f32.xlu0 %v4096_v10  ;;  %v4046_v50 = vpop.f32.mrf.mxu0 }
 0x38c   : > { %v4090_v19 = vadd.f32 %v16004_v6, %v4089_v11 }
 0x38d   : > { %v12926_v20 = vpop.f32.mrf.mxu0  ;;  %v12931_v21 = vpop.f32.mrf.mxu1 }
 0x38e   : > { %v4099_v22 = vsel %vm4095_vm3, %v4090_v19, -inf }
 0x38f   : > { %v4092_v23 = vpop.f32.mrf.mxu1  ;;  %4100 = vmax.xlane.f32.xlu0 %v4099_v22 }
 0x391   : > { %v12932_v26 = vpop.f32.mrf.mxu1 }
 0x3a5   : > { %4219 = vrot.lane.b32.xlu0 %v15928_v25, %s15054_s21  ;;  %v4272_v25 = vpop.permute.xlu1 %4271 }
 0x414   : > { %v4098_v29 = vpop.xlane.xlu0 %4097 }
 0x415   : > { %v4102_v1 = vsub.f32 %v4044_v3, %v4098_v29 }
 0x417   : > { %v4104_v31 = vmul.f32 1.442695, %v4102_v1 }
 0x418   : > { %v4101_v48 = vpop.xlane.xlu0 %4100 }
 0x419   : > { %14401 = vpow2.f32 %v4104_v31  ;;  %v4103_v51 = vsub.f32 %v4090_v19, %v4101_v48 }
 0x41b   : > { %v4106_v52 = vmul.f32 1.442695, %v4103_v51 }
 0x41c   : > { %v4220_v50 = vpop.permute.xlu0 %4219 }
 0x41d   : > { %14403 = vpow2.f32 %v4106_v52  ;;  %v4225_v21 = vsel %vm4002_vm1, %v4220_v50, 0 }
 0x426   : > { %v14402_v54 = vpop.eup %14401 }
 0x427   : > { %v4108_v55 = vsel %vm4095_vm3, %v14402_v54, 0.0 }
 0x428   : > { %4109 = vadd.xlane.f32.xlu1 %v4108_v55 }
 0x42a   : > { %v14404_v56 = vpop.eup %14403 }
 0x42b   : > { %v4111_v24 = vsel %vm4095_vm3, %v14404_v56, 0.0 }
 0x42c   : > { %4112 = vadd.xlane.f32.xlu1 %v4111_v24 }
 0x43d   : > { %4216 = vrot.lane.b32.xlu1 %v15938_v61, %s15054_s21 }
 0x441   : > { %4268 = vrot.lane.b32.xlu1 %v15945_v62, %s15054_s21  ;;  %v4277_v62 = vsel %vm4002_vm1, %v4272_v25, 0 }
 0x4b1   : > { %v4110_v3 = vpop.xlane.xlu1 %4109 }
 0x4b2   : > { %14405 = vrcp.f32 %v4110_v3 }
 0x4b5   : > { %v4113_v5 = vpop.xlane.xlu1 %4112 }
 0x4b6   : > { %14407 = vrcp.f32 %v4113_v5 }
 0x4b9   : > { %v4217_v23 = vpop.permute.xlu1 %4216 }
 0x4bd   : > { %v4269_v26 = vpop.permute.xlu1 %4268 }
 0x4bf   : > { %v14406_v10 = vpop.eup %14405 }
 0x4c0   : > { %v4116_v11 = vmul.f32 %v14406_v10, %v14402_v54 }
 0x4c2   : > { %v4118_v19 = vpack.c.bf16 %v4116_v11, %v4116_v11 }
 0x4c3   : > { %v14408_v20 = vpop.eup %14407 }
 0x4c4   : > { %12936 = vmatmul.mubr.msk.bf16.vlgmr.msra.gmra.mxu0 %vm4095_vm3, %v4118_v19  ;;  %v4117_v22 = vmul.f32 %v14408_v20, %v14404_v56 }
 0x4c5   : > { %12946 = vmatpush3.bf16.xpose.msra.mxu0 %v4225_v21  ;;  %12947 = vmatprep.mubr.msk.bf16.mxu0 %vm15053_vm0, %v15052_v44 }
 0x4c6   : > { %v4119_v61 = vpack.c.bf16 %v4117_v22, %v4117_v22  ;;  %12957 = vmatprep.subr.bf16.mxu0 %v15052_v44 }
 0x4c8   : > { %12942 = vmatmul.mubr.msk.bf16.vlgmr.msra.gmra.mxu1 %vm4095_vm3, %v4119_v61 }
 0x4c9   : > { %12952 = vmatpush3.bf16.xpose.msra.mxu1 %v4277_v62  ;;  %12953 = vmatprep.mubr.msk.bf16.mxu1 %vm15053_vm0, %v15052_v44 }
 0x4ca   : > { %12963 = vmatprep.subr.bf16.mxu1 %v15052_v44 }
 0x4cc   : > { %12948 = vmatmul.mubr.msk.bf16.vlgmr.msra.gmra.mxu0 %vm4002_vm1, %v4217_v23 }
 0x4cd   : > { %12959 = vmatprep.mubr.msk.bf16.mxu0 %vm15053_vm0, %v15052_v44 }
 0x4d0   : > { %12954 = vmatmul.mubr.msk.bf16.vlgmr.msra.gmra.mxu1 %vm4002_vm1, %v4269_v26 }
 0x4d1   : > { %12965 = vmatprep.mubr.msk.bf16.mxu1 %vm15053_vm0, %v15052_v44 }
 0x584   : > { %v4161_v29 = vpop.f32.mrf.mxu0 }
 0x585   : > { %4213 = vst.msk [vmem:[#allocation3] sm:$0xff] %vm4002_vm1, %v4161_v29 }
 0x586   : > { %v12937_v1 = vpop.f32.mrf.mxu0 }
 0x588   : > { %v4164_v31 = vpop.f32.mrf.mxu0  ;;  %v4207_v48 = vpop.f32.mrf.mxu1 }
 0x589   : > { %4214 = vst.msk [vmem:[#allocation3 + $0x20] sm:$0xff] %vm4002_vm1, %v4207_v48 }
 0x58a   : > { %v12938_v51 = vpop.f32.mrf.mxu0  ;;  %v12943_v52 = vpop.f32.mrf.mxu1 }
 0x58c   : > { %v4210_v54 = vpop.f32.mrf.mxu1  ;;  %v4261_v55 = vpop.f32.mrf.mxu0 }
 0x58d   : > { %v4262_v56 = vadd.f32 %v16001_v38, %v4261_v55 }
 0x58e   : > { %v12944_v24 = vpop.f32.mrf.mxu1  ;;  %v12949_v25 = vpop.f32.mrf.mxu0 }
 0x58f   : > { %v4319_v3 = vsel %vm4095_vm3, %v4262_v56, -inf }
 0x590   : > { %v4313_v5 = vpop.f32.mrf.mxu1  ;;  %4320 = vmax.xlane.f32.xlu0 %v4319_v3  ;;  %v4264_v10 = vpop.f32.mrf.mxu0  ;;  %v3653_v3 = vadd.f32 %v15955_v16, %v15916_v45 }
 0x591   : > { %v4314_v11 = vadd.f32 %v16004_v6, %v4313_v5  ;;  %v16053_v10 = vpack.c.bf16 %v15930_v58, %v15930_v58  ;;  %v3957_v58 = vmul.f32 0.125, %v15752_v60 }
 0x592   : > { %v12950_v50 = vpop.f32.mrf.mxu0  ;;  %v12955_v19 = vpop.f32.mrf.mxu1 }
 0x593   : > { %v4322_v20 = vsel %vm4095_vm3, %v4314_v11, -inf  ;;  %v3481_v50 = vadd.f32 %v15822_v7, %v15733_v46  ;;  %v16068_v46 = vpack.c.bf16 %v15979_v4, %v15979_v4 }
 0x594   : > { %4323 = vmax.xlane.f32.xlu1 %v4322_v20  ;;  %v4316_v21 = vpop.f32.mrf.mxu1 }
 0x595   : > { %v4456_v21 = vsel %vm4002_vm1, %v16053_v10, 0  ;;  %v3524_v16 = vadd.f32 %v15824_v8, %v3481_v50  ;;  %v4572_v60 = vsel %vm4123_vm2, %v16068_v46, 0  ;;  %v16079_v8 = vpack.c.bf16 %v15985_v15, %v15985_v15 }
 0x596   : > { %v12956_v22 = vpop.f32.mrf.mxu1 }
 0x5a5   : > { %4393 = vrot.lane.b32.xlu1 %v15983_v12, %s15054_s21 }
 0x619   : > { %v4321_v61 = vpop.xlane.xlu0 %4320 }
 0x61a   : > { %v4325_v62 = vsub.f32 %v4262_v56, %v4321_v61  ;;  %v3965_v61 = vpack.c.bf16 %v3957_v58, %v3957_v58 }
 0x61c   : > { %v4327_v23 = vmul.f32 1.442695, %v4325_v62  ;;  %v3961_v62 = vmul.f32 0.125, %v3524_v16 }
 0x61d   : > { %v4324_v26 = vpop.xlane.xlu1 %4323 }
 0x61e   : > { %14409 = vpow2.f32 %v4327_v23  ;;  %v4326_v29 = vsub.f32 %v4314_v11, %v4324_v26  ;;  %v3969_v4 = vpack.c.bf16 %v3961_v62, %v3961_v62  ;;  %v4618_v23 = vsel %vm4123_vm2, %v16079_v8, 0 }
 0x620   : > { %v4329_v1 = vmul.f32 1.442695, %v4326_v29 }
 0x621   : > { %v4394_v31 = vpop.permute.xlu1 %4393 }
 0x622   : > { %14411 = vpow2.f32 %v4329_v1  ;;  %v4399_v48 = vsel %vm4123_vm2, %v4394_v31, 0 }
 0x623   : > { %12964 = vmatpush3.bf16.msra.mxu1 %v4399_v48 }
 0x624   : > { %12975 = vmatprep.subr.bf16.mxu1 %v15052_v44 }
 0x62b   : > { %v14410_v51 = vpop.eup %14409 }
 0x62c   : > { %v4331_v52 = vsel %vm4095_vm3, %v14410_v51, 0.0 }
 0x62d   : > { %4332 = vadd.xlane.f32.xlu0 %v4331_v52 }
 0x62f   : > { %v14412_v54 = vpop.eup %14411 }
 0x630   : > { %v4334_v12 = vsel %vm4095_vm3, %v14412_v54, 0.0 }
 0x631   : > { %4335 = vadd.xlane.f32.xlu0 %v4334_v12 }
 0x647   : > { %4344 = vrot.lane.b32.xlu0 %v15977_v0, %s15054_s21  ;;  %v3696_v0 = vadd.f32 %v15957_v17, %v3653_v3 }
 0x649   : > { %v3977_v22 = vpack.c.bf16 %v3696_v0, %v3696_v0 }
 0x64b   : > { %v4502_v7 = vsel %vm4002_vm1, %v3977_v22, 0 }
 0x6b6   : > { %v4333_v55 = vpop.xlane.xlu0 %4332 }
 0x6b7   : > { %14413 = vrcp.f32 %v4333_v55 }
 0x6ba   : > { %v4336_v56 = vpop.xlane.xlu0 %4335 }
 0x6bb   : > { %14415 = vrcp.f32 %v4336_v56 }
 0x6be   : > { %v4345_v24 = vpop.permute.xlu0 %4344 }
 0x6bf   : > { %v4350_v25 = vsel %vm4123_vm2, %v4345_v24, 0 }
 0x6c0   : > { %12958 = vmatpush3.bf16.msra.mxu0 %v4350_v25 }
 0x6c1   : > { %12969 = vmatprep.subr.bf16.mxu0 %v15052_v44 }
 0x6c4   : > { %v14414_v5 = vpop.eup %14413 }
 0x6c5   : > { %v4339_v11 = vmul.f32 %v14414_v5, %v14410_v51 }
 0x6c7   : > { %v4341_v19 = vpack.c.bf16 %v4339_v11, %v4339_v11 }
 0x6c8   : > { %v14416_v20 = vpop.eup %14415 }
 0x6c9   : > { %12960 = vmatmul.mubr.msk.bf16.vlgmr.msra.gmra.mxu0 %vm4095_vm3, %v4341_v19  ;;  %v4340_v45 = vmul.f32 %v14416_v20, %v14412_v54 }
 0x6ca   : > { %12970 = vmatpush3.bf16.xpose.msra.mxu0 %v4456_v21  ;;  %12971 = vmatprep.mubr.msk.bf16.mxu0 %vm15053_vm0, %v15052_v44 }
 0x6cb   : > { %v4342_v17 = vpack.c.bf16 %v4340_v45, %v4340_v45  ;;  %12981 = vmatprep.subr.bf16.mxu0 %v15052_v44 }
 0x6cd   : > { %12966 = vmatmul.mubr.msk.bf16.vlgmr.msra.gmra.mxu1 %vm4095_vm3, %v4342_v17 }
 0x6ce   : > { %12976 = vmatpush3.bf16.xpose.msra.mxu1 %v4502_v7  ;;  %12977 = vmatprep.mubr.msk.bf16.mxu1 %vm15053_vm0, %v15052_v44 }
 0x6cf   : > { %12987 = vmatprep.subr.bf16.mxu1 %v15052_v44 }
 0x6d1   : > { %12972 = vmatmul.mubr.msk.bf16.vlgmr.msra.gmra.mxu0 %vm4002_vm1, %v3965_v61 }
 0x6d2   : > { %12982 = vmatpush3.bf16.msra.mxu0 %v4572_v60  ;;  %12983 = vmatprep.mubr.msk.bf16.mxu0 %vm15053_vm0, %v15052_v44 }
 0x6d3   : > { %12993 = vmatprep.subr.bf16.mxu0 %v15052_v44 }
 0x6d5   : > { %12978 = vmatmul.mubr.msk.bf16.vlgmr.msra.gmra.mxu1 %vm4002_vm1, %v3969_v4 }
 0x6d6   : > { %12988 = vmatpush3.bf16.msra.mxu1 %v4618_v23  ;;  %12989 = vmatprep.mubr.msk.bf16.mxu1 %vm15053_vm0, %v15052_v44 }
 0x6d7   : > { %12999 = vmatprep.subr.bf16.mxu1 %v15052_v44 }
 0x789   : > { %v16091_v15 = vpop.f32.mrf.mxu0 }
 0x78b   : > { %v12961_v26 = vpop.f32.mrf.mxu0 }
 0x78d   : > { %v4389_v29 = vpop.f32.mrf.mxu0  ;;  %v16093_v1 = vpop.f32.mrf.mxu1 }
 0x78f   : > { %v12962_v31 = vpop.f32.mrf.mxu0  ;;  %v12967_v48 = vpop.f32.mrf.mxu1 }
 0x791   : > { %v4438_v51 = vpop.f32.mrf.mxu1  ;;  %v4492_v52 = vpop.f32.mrf.mxu0 }
 0x792   : > { %v4493_v54 = vadd.f32 %v16001_v38, %v4492_v52 }
 0x793   : > { %v12968_v12 = vpop.f32.mrf.mxu1  ;;  %v12973_v55 = vpop.f32.mrf.mxu0 }
 0x794   : > { %v4544_v56 = vsel %vm4095_vm3, %v4493_v54, -inf }
 0x795   : > { %v4538_v24 = vpop.f32.mrf.mxu1  ;;  %4545 = vmax.xlane.f32.xlu1 %v4544_v56  ;;  %v4495_v25 = vpop.f32.mrf.mxu0 }
 0x796   : > { %v4539_v3 = vadd.f32 %v16004_v6, %v4538_v24 }
 0x797   : > { %v12974_v5 = vpop.f32.mrf.mxu0  ;;  %v12979_v0 = vpop.f32.mrf.mxu1 }
 0x798   : > { %v4547_v11 = vsel %vm4095_vm3, %v4539_v3, -inf }
 0x799   : > { %4548 = vmax.xlane.f32.xlu0 %v4547_v11  ;;  %v4541_v50 = vpop.f32.mrf.mxu1 }
 0x79b   : > { %v12980_v19 = vpop.f32.mrf.mxu1 }
 0x7a6   : > { %4718 = vrot.lane.b32.xlu1 %v3977_v22, %s15054_s21 }
 0x81e   : > { %v4546_v20 = vpop.xlane.xlu1 %4545 }
 0x81f   : > { %v4550_v21 = vsub.f32 %v4493_v54, %v4546_v20 }
 0x821   : > { %v4552_v45 = vmul.f32 1.442695, %v4550_v21 }
 0x822   : > { %v4549_v58 = vpop.xlane.xlu0 %4548  ;;  %v4719_v22 = vpop.permute.xlu1 %4718 }
 0x823   : > { %14417 = vpow2.f32 %v4552_v45  ;;  %v4551_v16 = vsub.f32 %v4539_v3, %v4549_v58 }
 0x825   : > { %v4554_v17 = vmul.f32 1.442695, %v4551_v16 }
 0x827   : > { %14419 = vpow2.f32 %v4554_v17 }
 0x830   : > { %v14418_v7 = vpop.eup %14417 }
 0x831   : > { %v4556_v62 = vsel %vm4095_vm3, %v14418_v7, 0.0 }
 0x832   : > { %4557 = vadd.xlane.f32.xlu0 %v4556_v62 }
 0x834   : > { %v14420_v60 = vpop.eup %14419 }
 0x835   : > { %v4559_v23 = vsel %vm4095_vm3, %v14420_v60, 0.0 }
 0x836   : > { %4560 = vadd.xlane.f32.xlu1 %v4559_v23 }
 0x847   : > { %4663 = vrot.lane.b32.xlu1 %v3965_v61, %s15054_s21 }
 0x848   : > { %4666 = vrot.lane.b32.xlu0 %v16053_v10, %s15054_s21 }
 0x84b   : > { %4715 = vrot.lane.b32.xlu1 %v3969_v4, %s15054_s21  ;;  %v4724_v4 = vsel %vm4002_vm1, %v4719_v22, 0 }
 0x8bb   : > { %v4558_v26 = vpop.xlane.xlu0 %4557 }
 0x8bc   : > { %14421 = vrcp.f32 %v4558_v26 }
 0x8bf   : > { %v4561_v29 = vpop.xlane.xlu1 %4560  ;;  %v4667_v51 = vpop.permute.xlu0 %4666 }
 0x8c0   : > { %14423 = vrcp.f32 %v4561_v29  ;;  %v4672_v12 = vsel %vm4002_vm1, %v4667_v51, 0 }
 0x8c3   : > { %v4664_v55 = vpop.permute.xlu1 %4663 }
 0x8c7   : > { %v4716_v56 = vpop.permute.xlu1 %4715 }
 0x8c9   : > { %v14422_v31 = vpop.eup %14421 }
 0x8ca   : > { %v4564_v48 = vmul.f32 %v14422_v31, %v14418_v7 }
 0x8cc   : > { %v4566_v52 = vpack.c.bf16 %v4564_v48, %v4564_v48 }
 0x8cd   : > { %v14424_v54 = vpop.eup %14423 }
 0x8ce   : > { %12984 = vmatmul.mubr.msk.bf16.vlgmr.msra.gmra.mxu0 %vm4095_vm3, %v4566_v52  ;;  %v4565_v61 = vmul.f32 %v14424_v54, %v14420_v60 }
 0x8cf   : > { %12994 = vmatpush3.bf16.xpose.msra.mxu0 %v4672_v12  ;;  %12995 = vmatprep.mubr.msk.bf16.mxu0 %vm15053_vm0, %v15052_v44 }
 0x8d0   : > { %v4567_v10 = vpack.c.bf16 %v4565_v61, %v4565_v61  ;;  %13005 = vmatprep.subr.bf16.mxu0 %v15052_v44 }
 0x8d2   : > { %12990 = vmatmul.mubr.msk.bf16.vlgmr.msra.gmra.mxu1 %vm4095_vm3, %v4567_v10 }
 0x8d3   : > { %13000 = vmatpush3.bf16.xpose.msra.mxu1 %v4724_v4  ;;  %13001 = vmatprep.mubr.msk.bf16.mxu1 %vm15053_vm0, %v15052_v44 }
 0x8d4   : > { %13011 = vmatprep.subr.bf16.mxu1 %v15052_v44 }
 0x8d6   : > { %12996 = vmatmul.mubr.msk.bf16.vlgmr.msra.gmra.mxu0 %vm4002_vm1, %v4664_v55 }
 0x8d7   : > { %13007 = vmatprep.mubr.msk.bf16.mxu0 %vm15053_vm0, %v15052_v44 }
 0x8da   : > { %13002 = vmatmul.mubr.msk.bf16.vlgmr.msra.gmra.mxu1 %vm4002_vm1, %v4716_v56 }
 0x8db   : > { %13013 = vmatprep.mubr.msk.bf16.mxu1 %vm15053_vm0, %v15052_v44 }
 0x98e   : > { %v4608_v24 = vpop.f32.mrf.mxu0 }
 0x98f   : > { %4660 = vst.msk [vmem:[#allocation3 + $0x8] sm:$0xff] %vm4002_vm1, %v4608_v24 }
 0x990   : > { %v12985_v25 = vpop.f32.mrf.mxu0 }
 0x992   : > { %v4611_v3 = vpop.f32.mrf.mxu0  ;;  %v4654_v5 = vpop.f32.mrf.mxu1 }
 0x993   : > { %4661 = vst.msk [vmem:[#allocation3 + $0x28] sm:$0xff] %vm4002_vm1, %v4654_v5 }
 0x994   : > { %v12986_v0 = vpop.f32.mrf.mxu0  ;;  %v12991_v11 = vpop.f32.mrf.mxu1 }
 0x995   : > { %v16140_v0 = vpack.c.bf16 %v15964_v28, %v15964_v28 }
 0x996   : > { %v4657_v50 = vpop.f32.mrf.mxu1  ;;  %v4708_v19 = vpop.f32.mrf.mxu0 }
 0x997   : > { %v4709_v20 = vadd.f32 %v16001_v38, %v4708_v19 }
 0x998   : > { %v12992_v21 = vpop.f32.mrf.mxu1  ;;  %v12997_v45 = vpop.f32.mrf.mxu0 }
 0x999   : > { %v4766_v58 = vsel %vm4095_vm3, %v4709_v20, -inf  ;;  %v3958_v45 = vmul.f32 0.125, %v15836_v18 }
 0x99a   : > { %v4760_v16 = vpop.f32.mrf.mxu1  ;;  %4767 = vmax.xlane.f32.xlu0 %v4766_v58  ;;  %v4711_v17 = vpop.f32.mrf.mxu0 }
 0x99b   : > { %v4761_v7 = vadd.f32 %v16004_v6, %v4760_v16  ;;  %v16154_v16 = vpack.c.bf16 %v15993_v37, %v15993_v37  ;;  %v3962_v17 = vmul.f32 0.125, %v15847_v30 }
 0x99c   : > { %v12998_v62 = vpop.f32.mrf.mxu0  ;;  %v13003_v60 = vpop.f32.mrf.mxu1 }
 0x99d   : > { %v4769_v23 = vsel %vm4095_vm3, %v4761_v7, -inf  ;;  %v5018_v18 = vsel %vm4123_vm2, %v16154_v16, 0  ;;  %v3970_v37 = vpack.c.bf16 %v3962_v17, %v3962_v17 }
 0x99e   : > { %4770 = vmax.xlane.f32.xlu1 %v4769_v23  ;;  %v4763_v22 = vpop.f32.mrf.mxu1 }
 0x9a0   : > { %v13004_v26 = vpop.f32.mrf.mxu1 }
 0x9af   : > { %4840 = vrot.lane.b32.xlu1 %v16079_v8, %s15054_s21 }
 0xa23   : > { %v4768_v29 = vpop.xlane.xlu0 %4767 }
 0xa24   : > { %v4772_v31 = vsub.f32 %v4709_v20, %v4768_v29  ;;  %v3978_v20 = vpack.c.bf16 %v15968_v32, %v15968_v32  ;;  %v3966_v32 = vpack.c.bf16 %v3958_v45, %v3958_v45 }
 0xa26   : > { %v4774_v48 = vmul.f32 1.442695, %v4772_v31  ;;  %v4948_v58 = vsel %vm4002_vm1, %v3978_v20, 0 }
 0xa27   : > { %v4771_v51 = vpop.xlane.xlu1 %4770 }
 0xa28   : > { %14425 = vpow2.f32 %v4774_v48  ;;  %v4773_v52 = vsub.f32 %v4761_v7, %v4771_v51  ;;  %v16165_v7 = vpack.c.bf16 %v15997_v49, %v15997_v49 }
 0xa2a   : > { %v4776_v54 = vmul.f32 1.442695, %v4773_v52  ;;  %v5064_v30 = vsel %vm4123_vm2, %v16165_v7, 0 }
 0xa2b   : > { %v4841_v12 = vpop.permute.xlu1 %4840 }
 0xa2c   : > { %14427 = vpow2.f32 %v4776_v54  ;;  %v4846_v61 = vsel %vm4123_vm2, %v4841_v12, 0 }
 0xa2d   : > { %13012 = vmatpush3.bf16.msra.mxu1 %v4846_v61 }
 0xa2e   : > { %13023 = vmatprep.subr.bf16.mxu1 %v15052_v44 }
 0xa35   : > { %v14426_v10 = vpop.eup %14425 }
 0xa36   : > { %v4778_v4 = vsel %vm4095_vm3, %v14426_v10, 0.0 }
 0xa37   : > { %4779 = vadd.xlane.f32.xlu0 %v4778_v4 }
 0xa39   : > { %v14428_v55 = vpop.eup %14427 }
 0xa3a   : > { %v4781_v8 = vsel %vm4095_vm3, %v14428_v55, 0.0 }
 0xa3b   : > { %4782 = vadd.xlane.f32.xlu0 %v4781_v8 }
 0xa51   : > { %4791 = vrot.lane.b32.xlu0 %v16068_v46, %s15054_s21  ;;  %v4902_v46 = vsel %vm4002_vm1, %v16140_v0, 0 }
 0xac0   : > { %v4780_v56 = vpop.xlane.xlu0 %4779 }
 0xac1   : > { %14429 = vrcp.f32 %v4780_v56 }
 0xac4   : > { %v4783_v24 = vpop.xlane.xlu0 %4782 }
 0xac5   : > { %14431 = vrcp.f32 %v4783_v24 }
 0xac8   : > { %v4792_v25 = vpop.permute.xlu0 %4791 }
 0xac9   : > { %v4797_v3 = vsel %vm4123_vm2, %v4792_v25, 0 }
 0xaca   : > { %13006 = vmatpush3.bf16.msra.mxu0 %v4797_v3 }
 0xacb   : > { %13017 = vmatprep.subr.bf16.mxu0 %v15052_v44 }
 0xace   : > { %v14430_v5 = vpop.eup %14429 }
 0xacf   : > { %v4786_v11 = vmul.f32 %v14430_v5, %v14426_v10 }
 0xad1   : > { %v4788_v50 = vpack.c.bf16 %v4786_v11, %v4786_v11 }
 0xad2   : > { %v14432_v19 = vpop.eup %14431 }
 0xad3   : > { %13008 = vmatmul.mubr.msk.bf16.vlgmr.msra.gmra.mxu0 %vm4095_vm3, %v4788_v50  ;;  %v4787_v21 = vmul.f32 %v14432_v19, %v14428_v55 }
 0xad4   : > { %13018 = vmatpush3.bf16.xpose.msra.mxu0 %v4902_v46  ;;  %13019 = vmatprep.mubr.msk.bf16.mxu0 %vm15053_vm0, %v15052_v44 }
 0xad5   : > { %v4789_v28 = vpack.c.bf16 %v4787_v21, %v4787_v21  ;;  %13029 = vmatprep.subr.bf16.mxu0 %v15052_v44 }
 0xad7   : > { %13014 = vmatmul.mubr.msk.bf16.vlgmr.msra.gmra.mxu1 %vm4095_vm3, %v4789_v28 }
 0xad8   : > { %13024 = vmatpush3.bf16.xpose.msra.mxu1 %v4948_v58  ;;  %13025 = vmatprep.mubr.msk.bf16.mxu1 %vm15053_vm0, %v15052_v44 }
 0xad9   : > { %13035 = vmatprep.subr.bf16.mxu1 %v15052_v44 }
 0xadb   : > { %13020 = vmatmul.mubr.msk.bf16.vlgmr.msra.gmra.mxu0 %vm4002_vm1, %v3966_v32 }
 0xadc   : > { %13030 = vmatpush3.bf16.msra.mxu0 %v5018_v18  ;;  %13031 = vmatprep.mubr.msk.bf16.mxu0 %vm15053_vm0, %v15052_v44 }
 0xadd   : > { %13041 = vmatprep.subr.bf16.mxu0 %v15052_v44 }
 0xadf   : > { %13026 = vmatmul.mubr.msk.bf16.vlgmr.msra.gmra.mxu1 %vm4002_vm1, %v3970_v37 }
 0xae0   : > { %13036 = vmatpush3.bf16.msra.mxu1 %v5064_v30  ;;  %13037 = vmatprep.mubr.msk.bf16.mxu1 %vm15053_vm0, %v15052_v44 }
 0xae1   : > { %13047 = vmatprep.subr.bf16.mxu1 %v15052_v44 }
 0xb93   : > { %v16177_v49 = vpop.f32.mrf.mxu0 }
 0xb95   : > { %v13009_v62 = vpop.f32.mrf.mxu0 }
 0xb97   : > { %v4836_v60 = vpop.f32.mrf.mxu0  ;;  %v16179_v23 = vpop.f32.mrf.mxu1 }
 0xb99   : > { %v13010_v22 = vpop.f32.mrf.mxu0  ;;  %v13015_v26 = vpop.f32.mrf.mxu1 }
 0xb9b   : > { %v4885_v29 = vpop.f32.mrf.mxu1  ;;  %v4938_v31 = vpop.f32.mrf.mxu0 }
 0xb9c   : > { %v4939_v48 = vadd.f32 %v16001_v38, %v4938_v31 }
 0xb9d   : > { %v13016_v51 = vpop.f32.mrf.mxu1  ;;  %v13021_v52 = vpop.f32.mrf.mxu0 }
 0xb9e   : > { %v4990_v54 = vsel %vm4095_vm3, %v4939_v48, -inf }
 0xb9f   : > { %v4984_v12 = vpop.f32.mrf.mxu1  ;;  %4991 = vmax.xlane.f32.xlu1 %v4990_v54  ;;  %v4941_v61 = vpop.f32.mrf.mxu0 }
 0xba0   : > { %v4985_v10 = vadd.f32 %v16004_v6, %v4984_v12 }
 0xba1   : > { %v13022_v4 = vpop.f32.mrf.mxu0  ;;  %v13027_v55 = vpop.f32.mrf.mxu1 }
 0xba2   : > { %v4993_v8 = vsel %vm4095_vm3, %v4985_v10, -inf }
 0xba3   : > { %4994 = vmax.xlane.f32.xlu0 %v4993_v8  ;;  %v4987_v56 = vpop.f32.mrf.mxu1 }
 0xba5   : > { %v13028_v24 = vpop.f32.mrf.mxu1 }
 0xbb0   : > { %5164 = vrot.lane.b32.xlu1 %v3978_v20, %s15054_s21 }
 0xc28   : > { %v4992_v25 = vpop.xlane.xlu1 %4991 }
 0xc29   : > { %v4996_v3 = vsub.f32 %v4939_v48, %v4992_v25 }
 0xc2b   : > { %v4998_v5 = vmul.f32 1.442695, %v4996_v3 }
 0xc2c   : > { %v4995_v11 = vpop.xlane.xlu0 %4994  ;;  %v5165_v20 = vpop.permute.xlu1 %5164 }
 0xc2d   : > { %14433 = vpow2.f32 %v4998_v5  ;;  %v4997_v50 = vsub.f32 %v4985_v10, %v4995_v11 }
 0xc2f   : > { %v5000_v19 = vmul.f32 1.442695, %v4997_v50 }
 0xc31   : > { %14435 = vpow2.f32 %v5000_v19 }
 0xc3a   : > { %v14434_v46 = vpop.eup %14433 }
 0xc3b   : > { %v5002_v21 = vsel %vm4095_vm3, %v14434_v46, 0.0 }
 0xc3c   : > { %5003 = vadd.xlane.f32.xlu0 %v5002_v21 }
 0xc3e   : > { %v14436_v45 = vpop.eup %14435 }
 0xc3f   : > { %v5005_v28 = vsel %vm4095_vm3, %v14436_v45, 0.0 }
 0xc40   : > { %5006 = vadd.xlane.f32.xlu1 %v5005_v28 }
 0xc51   : > { %5109 = vrot.lane.b32.xlu1 %v3966_v32, %s15054_s21 }
 0xc52   : > { %5112 = vrot.lane.b32.xlu0 %v16140_v0, %s15054_s21 }
 0xc55   : > { %5161 = vrot.lane.b32.xlu1 %v3970_v37, %s15054_s21  ;;  %v5170_v37 = vsel %vm4002_vm1, %v5165_v20, 0 }
 0xcc5   : > { %v5004_v58 = vpop.xlane.xlu0 %5003 }
 0xcc6   : > { %14437 = vrcp.f32 %v5004_v58 }
 0xcc9   : > { %v5007_v17 = vpop.xlane.xlu1 %5006  ;;  %v5113_v62 = vpop.permute.xlu0 %5112 }
 0xcca   : > { %14439 = vrcp.f32 %v5007_v17  ;;  %v5118_v26 = vsel %vm4002_vm1, %v5113_v62, 0 }
 0xccd   : > { %v5110_v29 = vpop.permute.xlu1 %5109 }
 0xcd1   : > { %v5162_v31 = vpop.permute.xlu1 %5161 }
 0xcd3   : > { %v14438_v18 = vpop.eup %14437 }
 0xcd4   : > { %v5010_v30 = vmul.f32 %v14438_v18, %v14434_v46 }
 0xcd6   : > { %v5012_v60 = vpack.c.bf16 %v5010_v30, %v5010_v30 }
 0xcd7   : > { %v14440_v22 = vpop.eup %14439 }
 0xcd8   : > { %13032 = vmatmul.mubr.msk.bf16.vlgmr.msra.gmra.mxu0 %vm4095_vm3, %v5012_v60  ;;  %v5011_v32 = vmul.f32 %v14440_v22, %v14436_v45 }
 0xcd9   : > { %13042 = vmatpush3.bf16.xpose.msra.mxu0 %v5118_v26  ;;  %13043 = vmatprep.mubr.msk.bf16.mxu0 %vm15053_vm0, %v15052_v44 }
 0xcda   : > { %v5013_v0 = vpack.c.bf16 %v5011_v32, %v5011_v32  ;;  %13053 = vmatprep.subr.bf16.mxu0 %v15052_v44 }
 0xcdc   : > { %13038 = vmatmul.mubr.msk.bf16.vlgmr.msra.gmra.mxu1 %vm4095_vm3, %v5013_v0 }
 0xcdd   : > { %13048 = vmatpush3.bf16.xpose.msra.mxu1 %v5170_v37  ;;  %13049 = vmatprep.mubr.msk.bf16.mxu1 %vm15053_vm0, %v15052_v44 }
 0xcde   : > { %13059 = vmatprep.subr.bf16.mxu1 %v15052_v44 }
 0xce0   : > { %13044 = vmatmul.mubr.msk.bf16.vlgmr.msra.gmra.mxu0 %vm4002_vm1, %v5110_v29 }
 0xce1   : > { %13055 = vmatprep.mubr.msk.bf16.mxu0 %vm15053_vm0, %v15052_v44 }
 0xce4   : > { %13050 = vmatmul.mubr.msk.bf16.vlgmr.msra.gmra.mxu1 %vm4002_vm1, %v5162_v31  ;;  %v3739_v31 = vadd.f32 %v15972_v39, %v15961_v40 }
 0xce5   : > { %13061 = vmatprep.mubr.msk.bf16.mxu1 %vm15053_vm0, %v15052_v44 }
 0xd98   : > { %v5054_v48 = vpop.f32.mrf.mxu0 }
 0xd99   : > { %5106 = vst.msk [vmem:[#allocation3 + $0x10] sm:$0xff] %vm4002_vm1, %v5054_v48 }
 0xd9a   : > { %v13033_v51 = vpop.f32.mrf.mxu0 }
 0xd9b   : > { %v16228_v51 = vpack.c.bf16 %v15966_v2, %v15966_v2  ;;  %v3959_v2 = vmul.f32 0.125, %v15845_v27 }
 0xd9c   : > { %v5057_v52 = vpop.f32.mrf.mxu0  ;;  %v5100_v54 = vpop.f32.mrf.mxu1 }
 0xd9d   : > { %5107 = vst.msk [vmem:[#allocation3 + $0x30] sm:$0xff] %vm4002_vm1, %v5100_v54  ;;  %v3567_v54 = vadd.f32 %v15908_v42, %v15828_v9  ;;  %v16243_v9 = vpack.c.bf16 %v15995_v53, %v15995_v53 }
 0xd9e   : > { %v13034_v12 = vpop.f32.mrf.mxu0  ;;  %v13039_v61 = vpop.f32.mrf.mxu1 }
 0xd9f   : > { %v3610_v39 = vadd.f32 %v15910_v43, %v3567_v54  ;;  %v5464_v27 = vsel %vm4123_vm2, %v16243_v9, 0  ;;  %v16254_v43 = vpack.c.bf16 %v15999_v57, %v15999_v57 }
 0xda0   : > { %v5103_v10 = vpop.f32.mrf.mxu1  ;;  %v5154_v4 = vpop.f32.mrf.mxu0 }
 0xda1   : > { %v5155_v55 = vadd.f32 %v16001_v38, %v5154_v4  ;;  %v5348_v10 = vsel %vm4002_vm1, %v16228_v51, 0 }
 0xda2   : > { %v13040_v8 = vpop.f32.mrf.mxu1  ;;  %v13045_v56 = vpop.f32.mrf.mxu0 }
 0xda3   : > { %v5212_v24 = vsel %vm4095_vm3, %v5155_v55, -inf  ;;  %v3963_v8 = vmul.f32 0.125, %v3610_v39  ;;  %v5510_v56 = vsel %vm4123_vm2, %v16254_v43, 0 }
 0xda4   : > { %v5206_v25 = vpop.f32.mrf.mxu1  ;;  %5213 = vmax.xlane.f32.xlu0 %v5212_v24  ;;  %v5157_v3 = vpop.f32.mrf.mxu0 }
 0xda5   : > { %v5207_v5 = vadd.f32 %v16004_v6, %v5206_v25  ;;  %v3971_v53 = vpack.c.bf16 %v3963_v8, %v3963_v8 }
 0xda6   : > { %v13046_v11 = vpop.f32.mrf.mxu0  ;;  %v13051_v50 = vpop.f32.mrf.mxu1 }
 0xda7   : > { %v5215_v19 = vsel %vm4095_vm3, %v5207_v5, -inf }
 0xda8   : > { %5216 = vmax.xlane.f32.xlu1 %v5215_v19  ;;  %v5209_v46 = vpop.f32.mrf.mxu1 }
 0xdaa   : > { %v13052_v21 = vpop.f32.mrf.mxu1 }
 0xdb9   : > { %5286 = vrot.lane.b32.xlu1 %v16165_v7, %s15054_s21 }
 0xe2d   : > { %v5214_v45 = vpop.xlane.xlu0 %5213 }
 0xe2e   : > { %v5218_v28 = vsub.f32 %v5155_v55, %v5214_v45  ;;  %v3967_v55 = vpack.c.bf16 %v3959_v2, %v3959_v2 }
 0xe30   : > { %v5220_v20 = vmul.f32 1.442695, %v5218_v28 }
 0xe31   : > { %v5217_v58 = vpop.xlane.xlu1 %5216 }
 0xe32   : > { %14441 = vpow2.f32 %v5220_v20  ;;  %v5219_v17 = vsub.f32 %v5207_v5, %v5217_v58 }
 0xe34   : > { %v5222_v18 = vmul.f32 1.442695, %v5219_v17 }
 0xe35   : > { %v5287_v30 = vpop.permute.xlu1 %5286 }
 0xe36   : > { %14443 = vpow2.f32 %v5222_v18  ;;  %v5292_v62 = vsel %vm4123_vm2, %v5287_v30, 0 }
 0xe37   : > { %13060 = vmatpush3.bf16.msra.mxu1 %v5292_v62 }
 0xe38   : > { %13071 = vmatprep.subr.bf16.mxu1 %v15052_v44 }
 0xe3f   : > { %v14442_v60 = vpop.eup %14441 }
 0xe40   : > { %v5224_v22 = vsel %vm4095_vm3, %v14442_v60, 0.0 }
 0xe41   : > { %5225 = vadd.xlane.f32.xlu0 %v5224_v22 }
 0xe43   : > { %v14444_v26 = vpop.eup %14443 }
 0xe44   : > { %v5227_v7 = vsel %vm4095_vm3, %v14444_v26, 0.0 }
 0xe45   : > { %5228 = vadd.xlane.f32.xlu0 %v5227_v7 }
 0xe5b   : > { %5237 = vrot.lane.b32.xlu0 %v16154_v16, %s15054_s21  ;;  %v3782_v16 = vadd.f32 %v15974_v47, %v3739_v31 }
 0xe5d   : > { %v3979_v4 = vpack.c.bf16 %v3782_v16, %v3782_v16 }
 0xe5f   : > { %v5394_v42 = vsel %vm4002_vm1, %v3979_v4, 0 }
 0xeca   : > { %v5226_v32 = vpop.xlane.xlu0 %5225 }
 0xecb   : > { %14445 = vrcp.f32 %v5226_v32 }
 0xece   : > { %v5229_v0 = vpop.xlane.xlu0 %5228 }
 0xecf   : > { %14447 = vrcp.f32 %v5229_v0 }
 0xed2   : > { %v5238_v37 = vpop.permute.xlu0 %5237 }
 0xed3   : > { %v5243_v29 = vsel %vm4123_vm2, %v5238_v37, 0 }
 0xed4   : > { %13054 = vmatpush3.bf16.msra.mxu0 %v5243_v29 }
 0xed5   : > { %13065 = vmatprep.subr.bf16.mxu0 %v15052_v44 }
 0xed8   : > { %v14446_v48 = vpop.eup %14445 }
 0xed9   : > { %v5232_v52 = vmul.f32 %v14446_v48, %v14442_v60 }
 0xedb   : > { %v5234_v12 = vpack.c.bf16 %v5232_v52, %v5232_v52 }
 0xedc   : > { %v14448_v61 = vpop.eup %14447 }
 0xedd   : > { %13056 = vmatmul.mubr.msk.bf16.vlgmr.msra.gmra.mxu0 %vm4095_vm3, %v5234_v12  ;;  %v5233_v40 = vmul.f32 %v14448_v61, %v14444_v26 }
 0xede   : > { %13066 = vmatpush3.bf16.xpose.msra.mxu0 %v5348_v10  ;;  %13067 = vmatprep.mubr.msk.bf16.mxu0 %vm15053_vm0, %v15052_v44 }
 0xedf   : > { %v5235_v47 = vpack.c.bf16 %v5233_v40, %v5233_v40  ;;  %13077 = vmatprep.subr.bf16.mxu0 %v15052_v44 }
 0xee1   : > { %13062 = vmatmul.mubr.msk.bf16.vlgmr.msra.gmra.mxu1 %vm4095_vm3, %v5235_v47 }
 0xee2   : > { %13072 = vmatpush3.bf16.xpose.msra.mxu1 %v5394_v42  ;;  %13073 = vmatprep.mubr.msk.bf16.mxu1 %vm15053_vm0, %v15052_v44 }
 0xee3   : > { %13083 = vmatprep.subr.bf16.mxu1 %v15052_v44 }
 0xee5   : > { %13068 = vmatmul.mubr.msk.bf16.vlgmr.msra.gmra.mxu0 %vm4002_vm1, %v3967_v55 }
 0xee6   : > { %13078 = vmatpush3.bf16.msra.mxu0 %v5464_v27  ;;  %13079 = vmatprep.mubr.msk.bf16.mxu0 %vm15053_vm0, %v15052_v44 }
 0xee7   : > { %13089 = vmatprep.subr.bf16.mxu0 %v15052_v44 }
 0xee9   : > { %13074 = vmatmul.mubr.msk.bf16.vlgmr.msra.gmra.mxu1 %vm4002_vm1, %v3971_v53 }
 0xeea   : > { %13084 = vmatpush3.bf16.msra.mxu1 %v5510_v56  ;;  %13085 = vmatprep.mubr.msk.bf16.mxu1 %vm15053_vm0, %v15052_v44 }
 0xeeb   : > { %13095 = vmatprep.subr.bf16.mxu1 %v15052_v44 }
 0xf9d   : > { %v16266_v57 = vpop.f32.mrf.mxu0 }
 0xf9f   : > { %v13057_v24 = vpop.f32.mrf.mxu0 }
 0xfa1   : > { %v5282_v25 = vpop.f32.mrf.mxu0  ;;  %v16268_v3 = vpop.f32.mrf.mxu1 }
 0xfa3   : > { %v13058_v5 = vpop.f32.mrf.mxu0  ;;  %v13063_v11 = vpop.f32.mrf.mxu1 }
 0xfa5   : > { %v5331_v50 = vpop.f32.mrf.mxu1  ;;  %v5384_v19 = vpop.f32.mrf.mxu0 }
 0xfa6   : > { %v5385_v46 = vadd.f32 %v16001_v38, %v5384_v19  ;;  %v14474_v50 = vld [vmem:[#allocation7] ss:$0 sm:$0xff] }
 0xfa7   : > { %v13064_v21 = vpop.f32.mrf.mxu1  ;;  %v13069_v45 = vpop.f32.mrf.mxu0 }
 0xfa8   : > { %v5436_v28 = vsel %vm4095_vm3, %v5385_v46, -inf }
 0xfa9   : > { %v5430_v20 = vpop.f32.mrf.mxu1  ;;  %5437 = vmax.xlane.f32.xlu1 %v5436_v28  ;;  %v5387_v58 = vpop.f32.mrf.mxu0 }
 0xfaa   : > { %v5431_v17 = vadd.f32 %v16004_v6, %v5430_v20  ;;  %v14475_v20 = vld [vmem:[#allocation7 + $0x1] ss:$0 sm:$0xff] }
 0xfab   : > { %v13070_v18 = vpop.f32.mrf.mxu0  ;;  %v13075_v30 = vpop.f32.mrf.mxu1 }
 0xfac   : > { %v5439_v62 = vsel %vm4095_vm3, %v5431_v17, -inf }
 0xfad   : > { %5440 = vmax.xlane.f32.xlu0 %v5439_v62  ;;  %v5433_v60 = vpop.f32.mrf.mxu1 }
 0xfaf   : > { %v13076_v22 = vpop.f32.mrf.mxu1 }
 0xfba   : > { %5610 = vrot.lane.b32.xlu1 %v3979_v4, %s15054_s21 }
0x1032   : > { %v5438_v26 = vpop.xlane.xlu1 %5437 }
0x1033   : > { %v5442_v38 = vsub.f32 %v5385_v46, %v5438_v26 }
0x1035   : > { %v5444_v7 = vmul.f32 1.442695, %v5442_v38 }
0x1036   : > { %v5441_v32 = vpop.xlane.xlu0 %5440  ;;  %v5611_v16 = vpop.permute.xlu1 %5610 }
0x1037   : > { %14449 = vpow2.f32 %v5444_v7  ;;  %v5443_v0 = vsub.f32 %v5431_v17, %v5441_v32  ;;  %v5616_v47 = vsel %vm4002_vm1, %v5611_v16, 0 }
0x1039   : > { %v5446_v37 = vmul.f32 1.442695, %v5443_v0 }
0x103b   : > { %14451 = vpow2.f32 %v5446_v37 }
0x1044   : > { %v14450_v29 = vpop.eup %14449 }
0x1045   : > { %v5448_v6 = vsel %vm4095_vm3, %v14450_v29, 0.0 }
0x1046   : > { %5449 = vadd.xlane.f32.xlu0 %v5448_v6 }
0x1048   : > { %v14452_v31 = vpop.eup %14451 }
0x1049   : > { %v5451_v48 = vsel %vm4095_vm3, %v14452_v31, 0.0 }
0x104a   : > { %5452 = vadd.xlane.f32.xlu1 %v5451_v48 }
0x105b   : > { %5555 = vrot.lane.b32.xlu1 %v3967_v55, %s15054_s21 }
0x105c   : > { %5558 = vrot.lane.b32.xlu0 %v16228_v51, %s15054_s21 }
0x105f   : > { %5607 = vrot.lane.b32.xlu1 %v3971_v53, %s15054_s21 }
0x10cf   : > { %v5450_v52 = vpop.xlane.xlu0 %5449 }
0x10d0   : > { %14453 = vrcp.f32 %v5450_v52 }
0x10d3   : > { %v5453_v54 = vpop.xlane.xlu1 %5452  ;;  %v5559_v10 = vpop.permute.xlu0 %5558 }
0x10d4   : > { %14455 = vrcp.f32 %v5453_v54  ;;  %v5564_v2 = vsel %vm4002_vm1, %v5559_v10, 0  ;;  %v13827_v54 = vld [vmem:[%s15416_s19 + $0xe4] ss:$16 sps:$4 sm:$0xff]  }
0x10d7   : > { %v5556_v42 = vpop.permute.xlu1 %5555 }
0x10db   : > { %v5608_v55 = vpop.permute.xlu1 %5607 }
0x10dd   : > { %v14454_v12 = vpop.eup %14453 }
0x10de   : > { %v5456_v61 = vmul.f32 %v14454_v12, %v14450_v29 }
0x10e0   : > { %v5458_v4 = vpack.c.bf16 %v5456_v61, %v5456_v61 }
0x10e1   : > { %v14456_v40 = vpop.eup %14455 }
0x10e2   : > { %13080 = vmatmul.mubr.msk.bf16.vlgmr.msra.gmra.mxu0 %vm4095_vm3, %v5458_v4  ;;  %v5457_v39 = vmul.f32 %v14456_v40, %v14452_v31 }
0x10e3   : > { %13090 = vmatpush3.bf16.xpose.msra.mxu0 %v5564_v2  ;;  %13091 = vmatprep.mubr.msk.bf16.mxu0 %vm15053_vm0, %v15052_v44 }
0x10e4   : > { %v5459_v51 = vpack.c.bf16 %v5457_v39, %v5457_v39  ;;  %13101 = vmatprep.subr.bf16.mxu0 %v15052_v44 }
0x10e6   : > { %13086 = vmatmul.mubr.msk.bf16.vlgmr.msra.gmra.mxu1 %vm4095_vm3, %v5459_v51  ;;  %v13830_v51 = vld [vmem:[%s15416_s19 + $0xc4] ss:$16 sps:$4 sm:$0xff]  }
0x10e7   : > { %13096 = vmatpush3.bf16.xpose.msra.mxu1 %v5616_v47  ;;  %13097 = vmatprep.mubr.msk.bf16.mxu1 %vm15053_vm0, %v15052_v44 }
0x10e8   : > { %13107 = vmatprep.subr.bf16.mxu1 %v15052_v44 }
0x10ea   : > { %13092 = vmatmul.mubr.msk.bf16.vlgmr.msra.gmra.mxu0 %vm4002_vm1, %v5556_v42 }
0x10eb   : > { %13103 = vmatprep.mubr.msk.bf16.mxu0 %vm15053_vm0, %v15052_v44 }
0x10ee   : > { %13098 = vmatmul.mubr.msk.bf16.vlgmr.msra.gmra.mxu1 %vm4002_vm1, %v5608_v55 }
0x10ef   : > { %13109 = vmatprep.mubr.msk.bf16.mxu1 %vm15053_vm0, %v15052_v44 }
0x11a2   : > { %v5500_v8 = vpop.f32.mrf.mxu0 }
0x11a3   : > { %5552 = vst.msk [vmem:[#allocation3 + $0x18] sm:$0xff] %vm4002_vm1, %v5500_v8  ;;  %v13828_v8 = vld [vmem:[%s15416_s19 + $0xc0] ss:$16 sps:$4 sm:$0xff]  }
0x11a4   : > { %v13081_v27 = vpop.f32.mrf.mxu0 }
0x11a6   : > { %v5503_v53 = vpop.f32.mrf.mxu0  ;;  %v5546_v56 = vpop.f32.mrf.mxu1 }
0x11a7   : > { %5553 = vst.msk [vmem:[#allocation3 + $0x38] sm:$0xff] %vm4002_vm1, %v5546_v56  ;;  %v13833_v53 = vld [vmem:[%s15416_s19 + $0xa4] ss:$16 sps:$4 sm:$0xff]   ;;  %v13831_v56 = vld [vmem:[%s15416_s19 + $0xa0] ss:$16 sps:$4 sm:$0xff]  }
0x11a8   : > { %v13082_v24 = vpop.f32.mrf.mxu0  ;;  %v13087_v25 = vpop.f32.mrf.mxu1 }
0x11a9   : > { %v13836_v24 = vld [vmem:[%s15416_s19 + $0x84] ss:$16 sps:$4 sm:$0xff]   ;;  %v13834_v25 = vld [vmem:[%s15416_s19 + $0x80] ss:$16 sps:$4 sm:$0xff]  }
0x11aa   : > { %v5549_v5 = vpop.f32.mrf.mxu1  ;;  %v5600_v11 = vpop.f32.mrf.mxu0 }
0x11ab   : > { %v5601_v19 = vadd.f32 %v14474_v50, %v5600_v11  ;;  %v13839_v5 = vld [vmem:[%s15416_s19 + $0x64] ss:$16 sps:$4 sm:$0xff]   ;;  %v13837_v11 = vld [vmem:[%s15416_s19 + $0x60] ss:$16 sps:$4 sm:$0xff]  }
0x11ac   : > { %v13088_v46 = vpop.f32.mrf.mxu1  ;;  %v13093_v21 = vpop.f32.mrf.mxu0  ;;  %v13842_v50 = vld [vmem:[%s15416_s19 + $0x44] ss:$16 sps:$4 sm:$0xff]  }
0x11ad   : > { %v5658_v45 = vsel %vm4095_vm3, %v5601_v19, -inf  ;;  %v13845_v46 = vld [vmem:[%s15416_s19 + $0x24] ss:$16 sps:$4 sm:$0xff]   ;;  %v13843_v21 = vld [vmem:[%s15416_s19 + $0x20] ss:$16 sps:$4 sm:$0xff]  }
0x11ae   : > { %v5652_v28 = vpop.f32.mrf.mxu1  ;;  %5659 = vmax.xlane.f32.xlu0 %v5658_v45  ;;  %v5603_v44 = vpop.f32.mrf.mxu0  ;;  %v13848_v45 = vld [vmem:[%s15416_s19 + $0x4] ss:$16 sps:$4 sm:$0xff]  }
0x11af   : > { %v5653_v58 = vadd.f32 %v14475_v20, %v5652_v28  ;;  %v13846_v28 = vld [vmem:[%s15416_s19] ss:$16 sps:$4 sm:$0xff]   ;;  %v13851_v44 = vld [vmem:[%s15416_s19 + $0x1e4] ss:$16 sps:$4 sm:$0xff]  }
0x11b0   : > { %v13094_v17 = vpop.f32.mrf.mxu0  ;;  %v13099_v18 = vpop.f32.mrf.mxu1  ;;  %v13849_v20 = vld [vmem:[%s15416_s19 + $0x1e0] ss:$16 sps:$4 sm:$0xff]  }
0x11b1   : > { %v5661_v30 = vsel %vm4095_vm3, %v5653_v58, -inf  ;;  %v13852_v17 = vld [vmem:[%s15416_s19 + $0x1c0] ss:$16 sps:$4 sm:$0xff]   ;;  %v13857_v18 = vld [vmem:[%s15416_s19 + $0x1a4] ss:$16 sps:$4 sm:$0xff]  }
0x11b2   : > { %5662 = vmax.xlane.f32.xlu1 %v5661_v30  ;;  %v5655_v62 = vpop.f32.mrf.mxu1  ;;  %v13855_v30 = vld [vmem:[%s15416_s19 + $0x1a0] ss:$16 sps:$4 sm:$0xff]  }
0x11b3   : > { %v13860_v62 = vld [vmem:[%s15416_s19 + $0x184] ss:$16 sps:$4 sm:$0xff]  }
0x11b4   : > { %v13100_v60 = vpop.f32.mrf.mxu1 }
0x11b5   : > { %v13858_v60 = vld [vmem:[%s15416_s19 + $0x180] ss:$16 sps:$4 sm:$0xff]  }
0x11c3   : > { %5732 = vrot.lane.b32.xlu1 %v16254_v43, %s15054_s21 }
0x11c7   : > { %4890 = vrot.lane.b32.xlu1 %v16177_v49, %s15054_s21 }
0x11cb   : > { %4892 = vrot.lane.b32.xlu1 %v16179_v23, %s15054_s21 }
0x11cf   : > { %4445 = vrot.lane.b32.xlu1 %v16093_v1, %s15054_s21 }
0x1237   : > { %v5660_v22 = vpop.xlane.xlu0 %5659 }
0x1238   : > { %v5664_v26 = vsub.f32 %v5601_v19, %v5660_v22  ;;  %v13840_v19 = vld [vmem:[%s15416_s19 + $0x40] ss:$16 sps:$4 sm:$0xff]   ;;  %v13863_v22 = vld [vmem:[%s15416_s19 + $0x164] ss:$16 sps:$4 sm:$0xff]  }
0x123a   : > { %v5666_v38 = vmul.f32 1.442695, %v5664_v26  ;;  %v13861_v26 = vld [vmem:[%s15416_s19 + $0x160] ss:$16 sps:$4 sm:$0xff]  }
0x123b   : > { %v5663_v7 = vpop.xlane.xlu1 %5662 }
0x123c   : > { %14457 = vpow2.f32 %v5666_v38  ;;  %v5665_v32 = vsub.f32 %v5653_v58, %v5663_v7  ;;  %v13854_v58 = vld [vmem:[%s15416_s19 + $0x1c4] ss:$16 sps:$4 sm:$0xff]   ;;  %v13864_v7 = vld [vmem:[%s15416_s19 + $0x140] ss:$16 sps:$4 sm:$0xff]  }
0x123d   : > { %v13866_v38 = vld [vmem:[%s15416_s19 + $0x144] ss:$16 sps:$4 sm:$0xff]  }
0x123e   : > { %v5668_v0 = vmul.f32 1.442695, %v5665_v32  ;;  %v13869_v32 = vld [vmem:[%s15416_s19 + $0x124] ss:$16 sps:$4 sm:$0xff]  }
0x123f   : > { %v5733_v37 = vpop.permute.xlu1 %5732 }
0x1240   : > { %14459 = vpow2.f32 %v5668_v0  ;;  %v5738_v43 = vsel %vm4123_vm2, %v5733_v37, 0  ;;  %v13867_v0 = vld [vmem:[%s15416_s19 + $0x120] ss:$16 sps:$4 sm:$0xff]   ;;  %v13872_v37 = vld [vmem:[%s15416_s19 + $0x104] ss:$16 sps:$4 sm:$0xff]  }
0x1241   : > { %13108 = vmatpush3.bf16.msra.mxu1 %v5738_v43  ;;  %v13870_v43 = vld [vmem:[%s15416_s19 + $0x100] ss:$16 sps:$4 sm:$0xff]  }
0x1243   : > { %v4891_v49 = vpop.permute.xlu1 %4890 }
0x1244   : > { %4896 = vst.msk [vmem:[#allocation3 + $0x8] sm:$0xff] %vm4449_vm4, %v4891_v49  ;;  %v13875_v49 = vld [vmem:[%s15416_s19 + $0xec] ss:$16 sps:$4 sm:$0xff]  }
0x1247   : > { %v4893_v23 = vpop.permute.xlu1 %4892 }
0x1248   : > { %4897 = vst.msk [vmem:[#allocation3 + $0x28] sm:$0xff] %vm4449_vm4, %v4893_v23 }
0x1249   : > { %v14458_v1 = vpop.eup %14457 }
0x124a   : > { %v5670_v29 = vsel %vm4095_vm3, %v14458_v1, 0.0 }
0x124b   : > { %v4446_v6 = vpop.permute.xlu1 %4445  ;;  %5671 = vadd.xlane.f32.xlu0 %v5670_v29  ;;  %v5791_v39 = vld [vmem:[#allocation3 + $0x8] sm:$0xff]  ;;  %v13873_v29 = vld [vmem:[%s15416_s19 + $0xe8] ss:$16 sps:$4 sm:$0xff]  }
0x124c   : > { %4451 = vst.msk [vmem:[#allocation3 + $0x20] sm:$0xff] %vm4449_vm4, %v4446_v6 }
0x124d   : > { %v14460_v31 = vpop.eup %14459 }
0x124e   : > { %v5673_v48 = vsel %vm4095_vm3, %v14460_v31, 0.0 }
0x124f   : > { %5674 = vadd.xlane.f32.xlu0 %v5673_v48  ;;  %v5795_v40 = vld [vmem:[#allocation3 + $0x28] sm:$0xff]  ;;  %v13876_v48 = vld [vmem:[%s15416_s19 + $0xc8] ss:$16 sps:$4 sm:$0xff]  }
0x1250   : > { %v16324_v42 = vpack.c.bf16 %v5795_v40, %v5791_v39  ;;  %v13893_v40 = vld [vmem:[%s15416_s19 + $0x2c] ss:$16 sps:$4 sm:$0xff]   ;;  %v13894_v39 = vld [vmem:[%s15416_s19 + $0x8] ss:$16 sps:$4 sm:$0xff]  }
0x1265   : > { %5683 = vrot.lane.b32.xlu0 %v16243_v9, %s15054_s21 }
0x1269   : > { %4443 = vrot.lane.b32.xlu0 %v16091_v15, %s15054_s21  ;;  %v13825_v15 = vld [vmem:[%s15416_s19 + $0xe0] ss:$16 sps:$4 sm:$0xff]  }
0x12d4   : > { %v5672_v16 = vpop.xlane.xlu0 %5671 }
0x12d5   : > { %14461 = vrcp.f32 %v5672_v16  ;;  %v13881_v16 = vld [vmem:[%s15416_s19 + $0xac] ss:$16 sps:$4 sm:$0xff]  }
0x12d8   : > { %v5675_v52 = vpop.xlane.xlu0 %5674 }
0x12d9   : > { %14463 = vrcp.f32 %v5675_v52  ;;  %v13879_v52 = vld [vmem:[%s15416_s19 + $0xa8] ss:$16 sps:$4 sm:$0xff]  }
0x12dc   : > { %v5684_v12 = vpop.permute.xlu0 %5683 }
0x12dd   : > { %v5689_v61 = vsel %vm4123_vm2, %v5684_v12, 0  ;;  %v13882_v12 = vld [vmem:[%s15416_s19 + $0x88] ss:$16 sps:$4 sm:$0xff]  }
0x12de   : > { %13102 = vmatpush3.bf16.msra.mxu0 %v5689_v61  ;;  %v13887_v61 = vld [vmem:[%s15416_s19 + $0x6c] ss:$16 sps:$4 sm:$0xff]  }
0x12df   : > { %6592 = vmatprep.subr.bf16.mxu0 %v13827_v54  ;;  %v13884_v54 = vld [vmem:[%s15416_s19 + $0x8c] ss:$16 sps:$4 sm:$0xff]  }
0x12e0   : > { %v4444_v10 = vpop.permute.xlu0 %4443 }
0x12e1   : > { %4450 = vst.msk [vmem:[#allocation3] sm:$0xff] %vm4449_vm4, %v4444_v10  ;;  %v13885_v10 = vld [vmem:[%s15416_s19 + $0x68] ss:$16 sps:$4 sm:$0xff]  }
0x12e2   : > { %v14462_v9 = vpop.eup %14461 }
0x12e3   : > { %v5678_v4 = vmul.f32 %v14462_v9, %v14458_v1  ;;  %v5794_v1 = vld [vmem:[#allocation3 + $0x20] sm:$0xff] }
0x12e4   : > { %v13890_v9 = vld [vmem:[%s15416_s19 + $0x4c] ss:$16 sps:$4 sm:$0xff]  }
0x12e5   : > { %v5680_v2 = vpack.c.bf16 %v5678_v4, %v5678_v4  ;;  %v13888_v4 = vld [vmem:[%s15416_s19 + $0x48] ss:$16 sps:$4 sm:$0xff]  }
0x12e6   : > { %v14464_v47 = vpop.eup %14463 }
0x12e7   : > { %13104 = vmatmul.mubr.msk.bf16.vlgmr.msra.gmra.mxu0 %vm4095_vm3, %v5680_v2  ;;  %v5679_v55 = vmul.f32 %v14464_v47, %v14460_v31  ;;  %v13878_v31 = vld [vmem:[%s15416_s19 + $0xcc] ss:$16 sps:$4 sm:$0xff]   ;;  %v13897_v47 = vld [vmem:[%s15416_s19 + $0x1e8] ss:$16 sps:$4 sm:$0xff]  }
0x12e8   : > { %6593 = vmatpush1.bf16.msra.mxu0 %v13825_v15  ;;  %6624 = vmatprep.mubr.bf16.mxu0 %v16324_v42  ;;  %v5790_v23 = vld [vmem:[#allocation3] sm:$0xff] }
0x12e9   : > { %6594 = vmatprep.subr.bf16.mxu0 %v13830_v51  ;;  %v5681_v27 = vpack.c.bf16 %v5679_v55, %v5679_v55  ;;  %v16360_v6 = vpack.c.bf16 %v5794_v1, %v5790_v23  ;;  %v13891_v15 = vld [vmem:[%s15416_s19 + $0x28] ss:$16 sps:$4 sm:$0xff]   ;;  %v13896_v2 = vld [vmem:[%s15416_s19 + $0xc] ss:$16 sps:$4 sm:$0xff]   ;;  %v13948_v23 = vld [vmem:[%s15416_s19 + $0x3c0] ss:$16 sps:$4 sm:$0xff]  }
0x12ea   : > { %v13899_v51 = vld [vmem:[%s15416_s19 + $0x1ec] ss:$16 sps:$4 sm:$0xff]   ;;  %v13900_v55 = vld [vmem:[%s15416_s19 + $0x1c8] ss:$16 sps:$4 sm:$0xff]   ;;  %v13953_v1 = vld [vmem:[%s15416_s19 + $0x3a4] ss:$16 sps:$4 sm:$0xff]  }
0x12eb   : > { %13110 = vmatmul.mubr.msk.bf16.vlgmr.msra.gmra.mxu1 %vm4095_vm3, %v5681_v27  ;;  %v13903_v27 = vld [vmem:[%s15416_s19 + $0x1a8] ss:$16 sps:$4 sm:$0xff]  }
0x12ec   : > { %6595 = vmatpush1.bf16.msra.mxu0 %v13828_v8  ;;  %v13905_v8 = vld [vmem:[%s15416_s19 + $0x1ac] ss:$16 sps:$4 sm:$0xff]  }
0x12ed   : > { %6596 = vmatprep.subr.bf16.mxu0 %v13833_v53  ;;  %v13908_v53 = vld [vmem:[%s15416_s19 + $0x18c] ss:$16 sps:$4 sm:$0xff]  }
0x12f0   : > { %6597 = vmatpush1.bf16.msra.mxu0 %v13831_v56  ;;  %v13906_v56 = vld [vmem:[%s15416_s19 + $0x188] ss:$16 sps:$4 sm:$0xff]  }
0x12f1   : > { %6598 = vmatprep.subr.bf16.mxu0 %v13836_v24  ;;  %v13911_v24 = vld [vmem:[%s15416_s19 + $0x16c] ss:$16 sps:$4 sm:$0xff]  }
0x12f4   : > { %6599 = vmatpush1.bf16.msra.mxu0 %v13834_v25  ;;  %v13909_v25 = vld [vmem:[%s15416_s19 + $0x168] ss:$16 sps:$4 sm:$0xff]  }
0x12f5   : > { %6600 = vmatprep.subr.bf16.mxu0 %v13839_v5  ;;  %v13914_v5 = vld [vmem:[%s15416_s19 + $0x14c] ss:$16 sps:$4 sm:$0xff]  }
0x12f8   : > { %6601 = vmatpush1.bf16.msra.mxu0 %v13837_v11  ;;  %v13912_v11 = vld [vmem:[%s15416_s19 + $0x148] ss:$16 sps:$4 sm:$0xff]  }
0x12f9   : > { %6602 = vmatprep.subr.bf16.mxu0 %v13842_v50  ;;  %v13917_v50 = vld [vmem:[%s15416_s19 + $0x12c] ss:$16 sps:$4 sm:$0xff]  }
0x12fc   : > { %6603 = vmatpush1.bf16.msra.mxu0 %v13840_v19  ;;  %v13915_v19 = vld [vmem:[%s15416_s19 + $0x128] ss:$16 sps:$4 sm:$0xff]  }
0x12fd   : > { %6604 = vmatprep.subr.bf16.mxu0 %v13845_v46  ;;  %v13920_v46 = vld [vmem:[%s15416_s19 + $0x10c] ss:$16 sps:$4 sm:$0xff]  }
0x1300   : > { %6605 = vmatpush1.bf16.msra.mxu0 %v13843_v21  ;;  %v13918_v21 = vld [vmem:[%s15416_s19 + $0x108] ss:$16 sps:$4 sm:$0xff]  }
0x1301   : > { %6606 = vmatprep.subr.bf16.mxu0 %v13848_v45  ;;  %v13923_v45 = vld [vmem:[%s15416_s19 + $0x2e4] ss:$16 sps:$4 sm:$0xff]  }
0x1302   : > { %6635 = vmatprep.subr.bf16.mxu1 %v13923_v45  ;;  %v13975_v45 = vld [vmem:[%s15416_s19 + $0x2a8] ss:$16 sps:$4 sm:$0xff]  }
0x1304   : > { %6607 = vmatpush1.bf16.msra.mxu0 %v13846_v28  ;;  %v13921_v28 = vld [vmem:[%s15416_s19 + $0x2e0] ss:$16 sps:$4 sm:$0xff]  }
0x1305   : > { %6608 = vmatprep.subr.bf16.mxu0 %v13851_v44  ;;  %6636 = vmatpush1.bf16.msra.mxu1 %v13921_v28  ;;  %v13924_v44 = vld [vmem:[%s15416_s19 + $0x2c0] ss:$16 sps:$4 sm:$0xff]   ;;  %v13980_v28 = vld [vmem:[%s15416_s19 + $0x28c] ss:$16 sps:$4 sm:$0xff]  }
0x1308   : > { %6609 = vmatpush2.bf16.msra.mxu0 %v13849_v20  ;;  %v13926_v20 = vld [vmem:[%s15416_s19 + $0x2c4] ss:$16 sps:$4 sm:$0xff]  }
0x1309   : > { %6610 = vmatprep.subr.bf16.mxu0 %v13854_v58  ;;  %v13929_v58 = vld [vmem:[%s15416_s19 + $0x2a4] ss:$16 sps:$4 sm:$0xff]   ;;  %6637 = vmatprep.subr.bf16.mxu1 %v13926_v20  ;;  %v13983_v20 = vld [vmem:[%s15416_s19 + $0x26c] ss:$16 sps:$4 sm:$0xff]  }
0x130a   : > { %6638 = vmatpush1.bf16.msra.mxu1 %v13924_v44  ;;  %v13978_v44 = vld [vmem:[%s15416_s19 + $0x288] ss:$16 sps:$4 sm:$0xff]  }
0x130b   : > { %6639 = vmatprep.subr.bf16.mxu1 %v13929_v58  ;;  %v13981_v58 = vld [vmem:[%s15416_s19 + $0x268] ss:$16 sps:$4 sm:$0xff]  }
0x130c   : > { %6611 = vmatpush2.bf16.msra.mxu0 %v13852_v17  ;;  %v13927_v17 = vld [vmem:[%s15416_s19 + $0x2a0] ss:$16 sps:$4 sm:$0xff]  }
0x130d   : > { %6612 = vmatprep.subr.bf16.mxu0 %v13857_v18  ;;  %v13932_v18 = vld [vmem:[%s15416_s19 + $0x284] ss:$16 sps:$4 sm:$0xff]  }
0x130e   : > { %6640 = vmatpush1.bf16.msra.mxu1 %v13927_v17  ;;  %v13986_v17 = vld [vmem:[%s15416_s19 + $0x24c] ss:$16 sps:$4 sm:$0xff]  }
0x130f   : > { %6641 = vmatprep.subr.bf16.mxu1 %v13932_v18  ;;  %v13984_v18 = vld [vmem:[%s15416_s19 + $0x248] ss:$16 sps:$4 sm:$0xff]  }
0x1310   : > { %6613 = vmatpush2.bf16.msra.mxu0 %v13855_v30  ;;  %v13930_v30 = vld [vmem:[%s15416_s19 + $0x280] ss:$16 sps:$4 sm:$0xff]  }
0x1311   : > { %6614 = vmatprep.subr.bf16.mxu0 %v13860_v62  ;;  %v13935_v62 = vld [vmem:[%s15416_s19 + $0x264] ss:$16 sps:$4 sm:$0xff]  }
0x1312   : > { %6642 = vmatpush1.bf16.msra.mxu1 %v13930_v30  ;;  %v13989_v30 = vld [vmem:[%s15416_s19 + $0x22c] ss:$16 sps:$4 sm:$0xff]  }
0x1313   : > { %6643 = vmatprep.subr.bf16.mxu1 %v13935_v62  ;;  %v13987_v62 = vld [vmem:[%s15416_s19 + $0x228] ss:$16 sps:$4 sm:$0xff]  }
0x1314   : > { %6615 = vmatpush2.bf16.msra.mxu0 %v13858_v60  ;;  %v13933_v60 = vld [vmem:[%s15416_s19 + $0x260] ss:$16 sps:$4 sm:$0xff]  }
0x1315   : > { %6616 = vmatprep.subr.bf16.mxu0 %v13863_v22  ;;  %v13938_v22 = vld [vmem:[%s15416_s19 + $0x244] ss:$16 sps:$4 sm:$0xff]  }
0x1316   : > { %6644 = vmatpush1.bf16.msra.mxu1 %v13933_v60  ;;  %v13992_v60 = vld [vmem:[%s15416_s19 + $0x20c] ss:$16 sps:$4 sm:$0xff]  }
0x1317   : > { %6645 = vmatprep.subr.bf16.mxu1 %v13938_v22  ;;  %v13990_v22 = vld [vmem:[%s15416_s19 + $0x208] ss:$16 sps:$4 sm:$0xff]  }
0x1318   : > { %6617 = vmatpush2.bf16.msra.mxu0 %v13861_v26  ;;  %v13936_v26 = vld [vmem:[%s15416_s19 + $0x240] ss:$16 sps:$4 sm:$0xff]  }
0x1319   : > { %6618 = vmatprep.subr.bf16.mxu0 %v13866_v38  ;;  %v13941_v38 = vld [vmem:[%s15416_s19 + $0x224] ss:$16 sps:$4 sm:$0xff]  }
0x131a   : > { %6646 = vmatpush1.bf16.msra.mxu1 %v13936_v26  ;;  %v13995_v26 = vld [vmem:[%s15416_s19 + $0x3ec] ss:$16 sps:$4 sm:$0xff]  }
0x131b   : > { %6647 = vmatprep.subr.bf16.mxu1 %v13941_v38  ;;  %v13993_v38 = vld [vmem:[%s15416_s19 + $0x3e8] ss:$16 sps:$4 sm:$0xff]  }
0x131c   : > { %6619 = vmatpush2.bf16.msra.mxu0 %v13864_v7  ;;  %v13939_v7 = vld [vmem:[%s15416_s19 + $0x220] ss:$16 sps:$4 sm:$0xff]  }
0x131d   : > { %6620 = vmatprep.subr.bf16.mxu0 %v13869_v32  ;;  %v13944_v32 = vld [vmem:[%s15416_s19 + $0x204] ss:$16 sps:$4 sm:$0xff]  }
0x131e   : > { %6648 = vmatpush1.bf16.msra.mxu1 %v13939_v7  ;;  %v13998_v7 = vld [vmem:[%s15416_s19 + $0x3cc] ss:$16 sps:$4 sm:$0xff]  }
0x131f   : > { %6649 = vmatprep.subr.bf16.mxu1 %v13944_v32  ;;  %v13996_v32 = vld [vmem:[%s15416_s19 + $0x3c8] ss:$16 sps:$4 sm:$0xff]  }
0x1320   : > { %6621 = vmatpush2.bf16.msra.mxu0 %v13867_v0  ;;  %v13942_v0 = vld [vmem:[%s15416_s19 + $0x200] ss:$16 sps:$4 sm:$0xff]  }
0x1321   : > { %6622 = vmatprep.subr.bf16.mxu0 %v13872_v37  ;;  %v13947_v37 = vld [vmem:[%s15416_s19 + $0x3e4] ss:$16 sps:$4 sm:$0xff]  }
0x1322   : > { %6650 = vmatpush1.bf16.msra.mxu1 %v13942_v0  ;;  %v14001_v0 = vld [vmem:[%s15416_s19 + $0x3ac] ss:$16 sps:$4 sm:$0xff]  }
0x1323   : > { %6651 = vmatprep.subr.bf16.mxu1 %v13947_v37  ;;  %v13999_v37 = vld [vmem:[%s15416_s19 + $0x3a8] ss:$16 sps:$4 sm:$0xff]  }
0x1324   : > { %6623 = vmatpush2.bf16.msra.mxu0 %v13870_v43  ;;  %v13945_v43 = vld [vmem:[%s15416_s19 + $0x3e0] ss:$16 sps:$4 sm:$0xff]  }
0x1325   : > { %6678 = vmatprep.subr.bf16.mxu0 %v13875_v49  ;;  %v13950_v49 = vld [vmem:[%s15416_s19 + $0x3c4] ss:$16 sps:$4 sm:$0xff]  }
0x1326   : > { %6652 = vmatpush2.bf16.msra.mxu1 %v13945_v43  ;;  %v14004_v43 = vld [vmem:[%s15416_s19 + $0x38c] ss:$16 sps:$4 sm:$0xff]  }
0x1327   : > { %6625 = vmatmul.mubr.bf16.vlgmr.msra.gmra.mxu0 %v16360_v6  ;;  %6653 = vmatprep.subr.bf16.mxu1 %v13950_v49  ;;  %v14002_v49 = vld [vmem:[%s15416_s19 + $0x388] ss:$16 sps:$4 sm:$0xff]  }
0x1328   : > { %6679 = vmatpush1.bf16.msra.mxu0 %v13873_v29  ;;  %6710 = vmatprep.mubr.bf16.mxu0 %v16324_v42  ;;  %v13902_v42 = vld [vmem:[%s15416_s19 + $0x1cc] ss:$16 sps:$4 sm:$0xff]   ;;  %v13951_v29 = vld [vmem:[%s15416_s19 + $0x3a0] ss:$16 sps:$4 sm:$0xff]  }
0x1329   : > { %6680 = vmatprep.subr.bf16.mxu0 %v13878_v31  ;;  %v13954_v31 = vld [vmem:[%s15416_s19 + $0x380] ss:$16 sps:$4 sm:$0xff]  }
0x132a   : > { %6654 = vmatpush2.bf16.msra.mxu1 %v13948_v23  ;;  %v14007_v23 = vld [vmem:[%s15416_s19 + $0x36c] ss:$16 sps:$4 sm:$0xff]  }
0x132b   : > { %6655 = vmatprep.subr.bf16.mxu1 %v13953_v1  ;;  %v14005_v1 = vld [vmem:[%s15416_s19 + $0x368] ss:$16 sps:$4 sm:$0xff]  }
0x132c   : > { %6681 = vmatpush1.bf16.msra.mxu0 %v13876_v48  ;;  %v13957_v48 = vld [vmem:[%s15416_s19 + $0x360] ss:$16 sps:$4 sm:$0xff]  }
0x132d   : > { %6682 = vmatprep.subr.bf16.mxu0 %v13881_v16  ;;  %v13959_v16 = vld [vmem:[%s15416_s19 + $0x364] ss:$16 sps:$4 sm:$0xff]  }
0x132e   : > { %6656 = vmatpush2.bf16.msra.mxu1 %v13951_v29  ;;  %v14010_v29 = vld [vmem:[%s15416_s19 + $0x34c] ss:$16 sps:$4 sm:$0xff]  }
0x1330   : > { %6683 = vmatpush1.bf16.msra.mxu0 %v13879_v52  ;;  %v13960_v52 = vld [vmem:[%s15416_s19 + $0x340] ss:$16 sps:$4 sm:$0xff]  }
0x1331   : > { %6684 = vmatprep.subr.bf16.mxu0 %v13884_v54  ;;  %v13962_v54 = vld [vmem:[%s15416_s19 + $0x344] ss:$16 sps:$4 sm:$0xff]  }
0x1334   : > { %6685 = vmatpush1.bf16.msra.mxu0 %v13882_v12  ;;  %v13963_v12 = vld [vmem:[%s15416_s19 + $0x320] ss:$16 sps:$4 sm:$0xff]  }
0x1335   : > { %6686 = vmatprep.subr.bf16.mxu0 %v13887_v61  ;;  %v13965_v61 = vld [vmem:[%s15416_s19 + $0x324] ss:$16 sps:$4 sm:$0xff]  }
0x1338   : > { %6687 = vmatpush1.bf16.msra.mxu0 %v13885_v10 }
0x1339   : > { %6688 = vmatprep.subr.bf16.mxu0 %v13890_v9  ;;  %v13968_v9 = vld [vmem:[%s15416_s19 + $0x304] ss:$16 sps:$4 sm:$0xff]  }
0x133c   : > { %6689 = vmatpush1.bf16.msra.mxu0 %v13888_v4  ;;  %v13966_v4 = vld [vmem:[%s15416_s19 + $0x300] ss:$16 sps:$4 sm:$0xff]  }
0x133d   : > { %6690 = vmatprep.subr.bf16.mxu0 %v13893_v40 }
0x1340   : > { %6691 = vmatpush1.bf16.msra.mxu0 %v13891_v15 }
0x1341   : > { %6692 = vmatprep.subr.bf16.mxu0 %v13896_v2 }
0x1344   : > { %6693 = vmatpush1.bf16.msra.mxu0 %v13894_v39  ;;  %v13971_v39 = vld [vmem:[%s15416_s19 + $0x2ec] ss:$16 sps:$4 sm:$0xff]  }
0x1345   : > { %6694 = vmatprep.subr.bf16.mxu0 %v13899_v51 }
0x1348   : > { %6695 = vmatpush2.bf16.msra.mxu0 %v13897_v47 }
0x1349   : > { %6696 = vmatprep.subr.bf16.mxu0 %v13902_v42 }
0x134c   : > { %6697 = vmatpush2.bf16.msra.mxu0 %v13900_v55 }
0x134d   : > { %6698 = vmatprep.subr.bf16.mxu0 %v13905_v8 }
0x1350   : > { %6699 = vmatpush2.bf16.msra.mxu0 %v13903_v27 }
0x1351   : > { %6700 = vmatprep.subr.bf16.mxu0 %v13908_v53 }
0x1354   : > { %6701 = vmatpush2.bf16.msra.mxu0 %v13906_v56 }
0x1355   : > { %6702 = vmatprep.subr.bf16.mxu0 %v13911_v24 }
0x1358   : > { %6703 = vmatpush2.bf16.msra.mxu0 %v13909_v25  ;;  %v13969_v25 = vld [vmem:[%s15416_s19 + $0x2e8] ss:$16 sps:$4 sm:$0xff]  }
0x1359   : > { %6704 = vmatprep.subr.bf16.mxu0 %v13914_v5 }
0x135c   : > { %6705 = vmatpush2.bf16.msra.mxu0 %v13912_v11 }
0x135d   : > { %6706 = vmatprep.subr.bf16.mxu0 %v13917_v50 }
0x1360   : > { %6707 = vmatpush2.bf16.msra.mxu0 %v13915_v19  ;;  %v13974_v19 = vld [vmem:[%s15416_s19 + $0x2cc] ss:$16 sps:$4 sm:$0xff]  }
0x1361   : > { %6708 = vmatprep.subr.bf16.mxu0 %v13920_v46  ;;  %v13972_v46 = vld [vmem:[%s15416_s19 + $0x2c8] ss:$16 sps:$4 sm:$0xff]  }
0x1364   : > { %6709 = vmatpush2.bf16.msra.mxu0 %v13918_v21  ;;  %v13977_v21 = vld [vmem:[%s15416_s19 + $0x2ac] ss:$16 sps:$4 sm:$0xff]  }
0x1367   : > { %6711 = vmatmul.mubr.bf16.vlgmr.msra.gmra.mxu0 %v16360_v6  ;;  %v13956_v6 = vld [vmem:[%s15416_s19 + $0x384] ss:$16 sps:$4 sm:$0xff]  }
0x1368   : > { %6657 = vmatprep.subr.bf16.mxu1 %v13956_v6  ;;  %v14008_v6 = vld [vmem:[%s15416_s19 + $0x348] ss:$16 sps:$4 sm:$0xff]  }
0x1369   : > { %6658 = vmatpush2.bf16.msra.mxu1 %v13954_v31  ;;  %v14013_v31 = vld [vmem:[%s15416_s19 + $0x32c] ss:$16 sps:$4 sm:$0xff]  }
0x136a   : > { %6659 = vmatprep.subr.bf16.mxu1 %v13959_v16  ;;  %v14016_v16 = vld [vmem:[%s15416_s19 + $0x30c] ss:$16 sps:$4 sm:$0xff]  }
0x136d   : > { %6660 = vmatpush2.bf16.msra.mxu1 %v13957_v48  ;;  %v14011_v48 = vld [vmem:[%s15416_s19 + $0x328] ss:$16 sps:$4 sm:$0xff]  }
0x136e   : > { %6661 = vmatprep.subr.bf16.mxu1 %v13962_v54 }
0x1371   : > { %6662 = vmatpush2.bf16.msra.mxu1 %v13960_v52  ;;  %v14014_v52 = vld [vmem:[%s15416_s19 + $0x308] ss:$16 sps:$4 sm:$0xff]  }
0x1372   : > { %6663 = vmatprep.subr.bf16.mxu1 %v13965_v61 }
0x1375   : > { %6664 = vmatpush2.bf16.msra.mxu1 %v13963_v12 }
0x1376   : > { %6665 = vmatprep.subr.bf16.mxu1 %v13968_v9 }
0x1379   : > { %6666 = vmatpush2.bf16.msra.mxu1 %v13966_v4  ;;  %v5930_v4 = vld [vmem:[%s841_s12] sm:$0xf] }
0x137a   : > { %6721 = vmatprep.subr.bf16.mxu1 %v13971_v39  ;;  %v5935_v39 = vrot.slane %v5930_v4, %v15900_v33 }
0x13a7   : > { %v5725_v10 = vpop.f32.mrf.mxu0 }
0x13a8   : > { %5782 = vrot.lane.b32.xlu0 %v5725_v10, %s15054_s21 }
0x13a9   : > { %v13105_v40 = vpop.f32.mrf.mxu0 }
0x13ab   : > { %v5728_v15 = vpop.f32.mrf.mxu0  ;;  %v5774_v2 = vpop.f32.mrf.mxu1 }
0x13ac   : > { %5784 = vrot.lane.b32.xlu1 %v5774_v2, %s15054_s21  ;;  %5336 = vrot.lane.b32.xlu0 %v16266_v57, %s15054_s21  ;;  %v5939_v15 = vrot.slane %v5930_v4, %v15725_v41 }
0x13ad   : > { %v13106_v51 = vpop.f32.mrf.mxu0  ;;  %v13111_v47 = vpop.f32.mrf.mxu1 }
0x13af   : > { %v5777_v42 = vpop.f32.mrf.mxu1 }
0x13b0   : > { %5338 = vrot.lane.b32.xlu1 %v16268_v3, %s15054_s21 }
0x13b1   : > { %v13112_v55 = vpop.f32.mrf.mxu1 }
0x13e7   : > { %v6626_v54 = vpop.f32.mrf.mxu0 }
0x13e8   : > { %v6627_v55 = vadd.f32 %v6626_v54, %v5935_v39  ;;  %v14483_v54 = vld [vmem:[#allocation2 + $0x38] sm:$0xff] }
0x13e9   : > { %v6628_v12 = vpop.f32.mrf.mxu0 }
0x13ea   : > { %v6629_v47 = vadd.f32 %v6628_v12, %v5939_v15 }
0x13eb   : > { %v6630_v61 = vpop.f32.mrf.mxu0 }
0x13ed   : > { %v6632_v9 = vpop.f32.mrf.mxu0 }
0x141a   : > { %v5783_v8 = vpop.permute.xlu0 %5782 }
0x141b   : > { %5788 = vst.msk [vmem:[#allocation3 + $0x18] sm:$0xff] %vm4449_vm4, %v5783_v8  ;;  %v5943_v8 = vrot.slane %v5930_v4, %v15807_v59 }
0x141e   : > { %v5785_v27 = vpop.permute.xlu1 %5784  ;;  %v5337_v53 = vpop.permute.xlu0 %5336 }
0x141f   : > { %5789 = vst.msk [vmem:[#allocation3 + $0x38] sm:$0xff] %vm4449_vm4, %v5785_v27  ;;  %5342 = vst.msk [vmem:[#allocation3 + $0x10] sm:$0xff] %vm4449_vm4, %v5337_v53 }
0x1422   : > { %v5339_v57 = vpop.permute.xlu1 %5338  ;;  %v5793_v56 = vld [vmem:[#allocation3 + $0x18] sm:$0xff] }
0x1423   : > { %5343 = vst.msk [vmem:[#allocation3 + $0x30] sm:$0xff] %vm4449_vm4, %v5339_v57  ;;  %v6633_v57 = vadd.f32 %v6632_v9, %v5939_v15  ;;  %v6945_v9 = vld [vmem:[%s15421_s20 + $0x1c0] sm:$0xff] }
0x1426   : > { %v5797_v24 = vld [vmem:[#allocation3 + $0x38] sm:$0xff]  ;;  %v5792_v5 = vld [vmem:[#allocation3 + $0x10] sm:$0xff] }
0x1427   : > { %v5801_v3 = vpack.c.bf16 %v5797_v24, %v5793_v56  ;;  %v6712_v2 = vpop.f32.mrf.mxu0  ;;  %v5947_v56 = vrot.slane %v5930_v4, %v15814_v63  ;;  %v6949_v4 = vld [vmem:[%s15421_s20 + $0x1e0] sm:$0xff] }
0x1428   : > { %v12309_v15 = vcombine.low %v6945_v9, %v6949_v4 }
0x1429   : > { %6667 = vmatprep.mubr.bf16.mxu1 %v5801_v3  ;;  %v6714_v42 = vpop.f32.mrf.mxu0 }
0x142a   : > { %v5796_v11 = vld [vmem:[#allocation3 + $0x30] sm:$0xff] }
0x142b   : > { %v16439_v50 = vpack.c.bf16 %v5796_v11, %v5792_v5  ;;  %v6716_v24 = vpop.f32.mrf.mxu0  ;;  %v6713_v5 = vadd.f32 %v6712_v2, %v5943_v8  ;;  %v14476_v11 = vld [vmem:[#allocation2] sm:$0xff]  ;;  %v12310_v2 = vcombine.high %v6945_v9, %v6949_v4  ;;  %v6901_v9 = vld [vmem:[%s15421_s20 + $0x60] sm:$0xff] }
0x142c   : > { %v7025_v4 = vld [vmem:[%s15421_s20 + $0x440] sm:$0xff] }
0x142d   : > { %6668 = vmatmul.mubr.bf16.vlgmr.msra.gmra.mxu1 %v16439_v50  ;;  %8467 = vmatprep.subr.bf16.mxu0 %v12310_v2 }
0x142e   : > { %6722 = vmatpush1.bf16.msra.mxu1 %v13969_v25  ;;  %6753 = vmatprep.mubr.bf16.mxu1 %v5801_v3  ;;  %v6631_v25 = vadd.f32 %v6630_v61, %v5935_v39  ;;  %v7077_v39 = vld [vmem:[%s15421_s20 + $0x5e0] sm:$0xff] }
0x142f   : > { %6723 = vmatprep.subr.bf16.mxu1 %v13974_v19  ;;  %8468 = vmatpush1.bf16.msra.mxu0 %v12309_v15 }
0x1432   : > { %6724 = vmatpush1.bf16.msra.mxu1 %v13972_v46 }
0x1433   : > { %6725 = vmatprep.subr.bf16.mxu1 %v13977_v21  ;;  %v6715_v21 = vadd.f32 %v6714_v42, %v5947_v56 }
0x1436   : > { %6726 = vmatpush1.bf16.msra.mxu1 %v13975_v45  ;;  %v6718_v45 = vpop.f32.mrf.mxu0 }
0x1437   : > { %6727 = vmatprep.subr.bf16.mxu1 %v13980_v28  ;;  %v14477_v28 = vld [vmem:[#allocation2 + $0x30] sm:$0xff] }
0x143a   : > { %6728 = vmatpush1.bf16.msra.mxu1 %v13978_v44 }
0x143b   : > { %6729 = vmatprep.subr.bf16.mxu1 %v13983_v20 }
0x143e   : > { %6730 = vmatpush1.bf16.msra.mxu1 %v13981_v58 }
0x143f   : > { %6731 = vmatprep.subr.bf16.mxu1 %v13986_v17  ;;  %v6717_v17 = vadd.f32 %v6716_v24, %v5943_v8  ;;  %v6933_v24 = vld [vmem:[%s15421_s20 + $0x160] sm:$0xff] }
0x1442   : > { %6732 = vmatpush1.bf16.msra.mxu1 %v13984_v18 }
0x1443   : > { %6733 = vmatprep.subr.bf16.mxu1 %v13989_v30 }
0x1446   : > { %6734 = vmatpush1.bf16.msra.mxu1 %v13987_v62  ;;  %v14478_v62 = vld [vmem:[#allocation2 + $0x20] sm:$0xff] }
0x1447   : > { %6735 = vmatprep.subr.bf16.mxu1 %v13992_v60 }
0x144a   : > { %6736 = vmatpush1.bf16.msra.mxu1 %v13990_v22  ;;  %v14479_v22 = vld [vmem:[#allocation2 + $0x18] sm:$0xff] }
0x144b   : > { %6737 = vmatprep.subr.bf16.mxu1 %v13995_v26 }
0x144e   : > { %6738 = vmatpush2.bf16.msra.mxu1 %v13993_v38 }
0x144f   : > { %6739 = vmatprep.subr.bf16.mxu1 %v13998_v7  ;;  %v6719_v7 = vadd.f32 %v6718_v45, %v5947_v56  ;;  %v6925_v45 = vld [vmem:[%s15421_s20 + $0x120] sm:$0xff] }
0x1452   : > { %6740 = vmatpush2.bf16.msra.mxu1 %v13996_v32 }
0x1453   : > { %6741 = vmatprep.subr.bf16.mxu1 %v14001_v0  ;;  %v14480_v0 = vld [vmem:[#allocation2 + $0x8] sm:$0xff] }
0x1456   : > { %6742 = vmatpush2.bf16.msra.mxu1 %v13999_v37 }
0x1457   : > { %6743 = vmatprep.subr.bf16.mxu1 %v14004_v43  ;;  %v14481_v43 = vld [vmem:[#allocation2 + $0x10] sm:$0xff] }
0x145a   : > { %6744 = vmatpush2.bf16.msra.mxu1 %v14002_v49 }
0x145b   : > { %6745 = vmatprep.subr.bf16.mxu1 %v14007_v23 }
0x145e   : > { %6746 = vmatpush2.bf16.msra.mxu1 %v14005_v1 }
0x145f   : > { %6747 = vmatprep.subr.bf16.mxu1 %v14010_v29 }
0x1462   : > { %6748 = vmatpush2.bf16.msra.mxu1 %v14008_v6 }
0x1463   : > { %6749 = vmatprep.subr.bf16.mxu1 %v14013_v31  ;;  %v14482_v31 = vld [vmem:[#allocation2 + $0x28] sm:$0xff] }
0x1466   : > { %6750 = vmatpush2.bf16.msra.mxu1 %v14011_v48 }
0x1467   : > { %6751 = vmatprep.subr.bf16.mxu1 %v14016_v16 }
0x146a   : > { %6752 = vmatpush2.bf16.msra.mxu1 %v14014_v52 }
0x146d   : > { %6754 = vmatmul.mubr.bf16.vlgmr.msra.gmra.mxu1 %v16439_v50 }
0x14ed   : > { %v6669_v10 = vpop.f32.mrf.mxu1 }
0x14ee   : > { %v6670_v3 = vadd.f32 %v6669_v10, %v6627_v55 }
0x14ef   : > { %v6671_v40 = vpop.f32.mrf.mxu1 }
0x14f0   : > { %v6672_v27 = vadd.f32 %v6671_v40, %v6629_v47  ;;  %v16481_v44 = vadd.f32 %v14477_v28, %v6670_v3  ;;  %v7073_v40 = vld [vmem:[%s15421_s20 + $0x5c0] sm:$0xff] }
0x14f1   : > { %v6673_v51 = vpop.f32.mrf.mxu1  ;;  %v6941_v47 = vld [vmem:[%s15421_s20 + $0x1a0] sm:$0xff]  ;;  %v12437_v42 = vcombine.low %v7073_v40, %v7077_v39  ;;  %v12438_v55 = vcombine.high %v7073_v40, %v7077_v39 }
0x14f2   : > { %v16479_v50 = vadd.f32 %v14476_v11, %v6672_v27  ;;  %v6674_v20 = vadd.f32 %v6673_v51, %v6631_v25  ;;  %v6937_v51 = vld [vmem:[%s15421_s20 + $0x180] sm:$0xff] }
0x14f3   : > { %v6675_v53 = vpop.f32.mrf.mxu1  ;;  %v12302_v8 = vcombine.high %v6937_v51, %v6941_v47  ;;  %v7065_v27 = vld [vmem:[%s15421_s20 + $0x580] sm:$0xff]  ;;  %8510 = vmatprep.subr.bf16.mxu1 %v12438_v55 }
0x14f4   : > { %v6676_v19 = vadd.f32 %v6675_v53, %v6633_v57  ;;  %v6774_v30 = vadd.f32 %v16479_v50, %v16481_v44  ;;  %v16489_v37 = vadd.f32 %v14480_v0, %v6674_v20  ;;  %v7069_v53 = vld [vmem:[%s15421_s20 + $0x5a0] sm:$0xff]  ;;  %8511 = vmatpush1.bf16.msra.mxu1 %v12437_v42 }
0x14f5   : > { %v6929_v57 = vld [vmem:[%s15421_s20 + $0x140] sm:$0xff]  ;;  %v12430_v56 = vcombine.high %v7065_v27, %v7069_v53  ;;  %8469 = vmatprep.subr.bf16.mxu0 %v12302_v8  ;;  %v12429_v11 = vcombine.low %v7065_v27, %v7069_v53 }
0x14f6   : > { %v16485_v60 = vadd.f32 %v14478_v62, %v6676_v19  ;;  %v7057_v3 = vld [vmem:[%s15421_s20 + $0x540] sm:$0xff]  ;;  %v12294_v19 = vcombine.high %v6929_v57, %v6933_v24 }
0x14f7   : > { %v7061_v25 = vld [vmem:[%s15421_s20 + $0x560] sm:$0xff]  ;;  %8512 = vmatprep.subr.bf16.mxu1 %v12430_v56 }
0x14f8   : > { %v6779_v6 = vadd.f32 %v16485_v60, %v16489_v37  ;;  %v7049_v28 = vld [vmem:[%s15421_s20 + $0x500] sm:$0xff]  ;;  %8513 = vmatpush1.bf16.msra.mxu1 %v12429_v11 }
0x14f9   : > { %v7053_v20 = vld [vmem:[%s15421_s20 + $0x520] sm:$0xff] }
0x14fa   : > { %v6913_v62 = vld [vmem:[%s15421_s20 + $0xc0] sm:$0xff]  ;;  %v12413_v0 = vcombine.low %v7049_v28, %v7053_v20 }
0x14fb   : > { %v7029_v40 = vld [vmem:[%s15421_s20 + $0x460] sm:$0xff] }
0x14fc   : > { %v6893_v42 = vld [vmem:[%s15421_s20 + $0x20] sm:$0xff]  ;;  %v12389_v53 = vcombine.low %v7025_v4, %v7029_v40 }
0x14fd   : > { %v7017_v55 = vld [vmem:[%s15421_s20 + $0x400] sm:$0xff] }
0x14fe   : > { %v7021_v8 = vld [vmem:[%s15421_s20 + $0x420] sm:$0xff] }
0x14ff   : > { %v12382_v56 = vcombine.high %v7017_v55, %v7021_v8 }
0x152d   : > { %v6755_v46 = vpop.f32.mrf.mxu1 }
0x152e   : > { %v6756_v58 = vadd.f32 %v6755_v46, %v6713_v5  ;;  %v12301_v5 = vcombine.low %v6937_v51, %v6941_v47  ;;  %v12422_v46 = vcombine.high %v7057_v3, %v7061_v25  ;;  %v12390_v51 = vcombine.high %v7025_v4, %v7029_v40  ;;  %v6889_v47 = vld [vmem:[%s15421_s20] sm:$0xff] }
0x152f   : > { %v6757_v18 = vpop.f32.mrf.mxu1  ;;  %v12253_v11 = vcombine.low %v6889_v47, %v6893_v42 }
0x1530   : > { %v16487_v26 = vadd.f32 %v14479_v22, %v6756_v58  ;;  %v6758_v38 = vadd.f32 %v6757_v18, %v6715_v21  ;;  %v6921_v21 = vld [vmem:[%s15421_s20 + $0x100] sm:$0xff]  ;;  %8470 = vmatpush1.bf16.msra.mxu0 %v12301_v5  ;;  %v12293_v58 = vcombine.low %v6929_v57, %v6933_v24  ;;  %8514 = vmatprep.subr.bf16.mxu1 %v12422_v46 }
0x1531   : > { %v6759_v32 = vpop.f32.mrf.mxu1  ;;  %8471 = vmatprep.subr.bf16.mxu0 %v12294_v19  ;;  %v12286_v18 = vcombine.high %v6921_v21, %v6925_v45  ;;  %v6917_v22 = vld [vmem:[%s15421_s20 + $0xe0] sm:$0xff]  ;;  %v12254_v57 = vcombine.high %v6889_v47, %v6893_v42  ;;  %v12381_v19 = vcombine.low %v7017_v55, %v7021_v8 }
0x1532   : > { %v16491_v49 = vadd.f32 %v14481_v43, %v6758_v38  ;;  %v6760_v23 = vadd.f32 %v6759_v32, %v6717_v17  ;;  %v6775_v1 = vadd.f32 %v6774_v30, %v16487_v26  ;;  %v12421_v17 = vcombine.low %v7057_v3, %v7061_v25  ;;  %v7041_v38 = vld [vmem:[%s15421_s20 + $0x4c0] sm:$0xff] }
0x1533   : > { %v6761_v29 = vpop.f32.mrf.mxu1  ;;  %v12414_v30 = vcombine.high %v7049_v28, %v7053_v20  ;;  %v12285_v32 = vcombine.low %v6921_v21, %v6925_v45  ;;  %v12278_v43 = vcombine.high %v6913_v62, %v6917_v22  ;;  %v7009_v24 = vld [vmem:[%s15421_s20 + $0x3c0] sm:$0xff] }
0x1534   : > { %v16496_v48 = vadd.f32 %v14482_v31, %v6760_v23  ;;  %v6762_v16 = vadd.f32 %v6761_v29, %v6719_v7  ;;  %v6776_v52 = vadd.f32 %v6775_v1, %v16491_v49  ;;  %v7045_v7 = vld [vmem:[%s15421_s20 + $0x4e0] sm:$0xff]  ;;  %8472 = vmatpush1.bf16.msra.mxu0 %v12293_v58  ;;  %8515 = vmatpush1.bf16.msra.mxu1 %v12421_v17 }
0x1535   : > { %8473 = vmatprep.subr.bf16.mxu0 %v12286_v18  ;;  %8516 = vmatprep.subr.bf16.mxu1 %v12414_v30  ;;  %v12406_v23 = vcombine.high %v7041_v38, %v7045_v7  ;;  %v6905_v1 = vld [vmem:[%s15421_s20 + $0x80] sm:$0xff] }
0x1536   : > { %v16499_v12 = vadd.f32 %v14483_v54, %v6762_v16  ;;  %6777 = vadd.xlane.f32.xlu0 %v6776_v52  ;;  %v6780_v61 = vadd.f32 %v6779_v6, %v16496_v48  ;;  %v6909_v29 = vld [vmem:[%s15421_s20 + $0xa0] sm:$0xff]  ;;  %v12277_v16 = vcombine.low %v6913_v62, %v6917_v22  ;;  %v12405_v52 = vcombine.low %v7041_v38, %v7045_v7 }
0x1537   : > { %v7033_v6 = vld [vmem:[%s15421_s20 + $0x480] sm:$0xff]  ;;  %v12270_v54 = vcombine.high %v6905_v1, %v6909_v29  ;;  %v12269_v15 = vcombine.low %v6905_v1, %v6909_v29 }
0x1538   : > { %v6781_v10 = vadd.f32 %v6780_v61, %v16499_v12  ;;  %v7037_v31 = vld [vmem:[%s15421_s20 + $0x4a0] sm:$0xff]  ;;  %8474 = vmatpush1.bf16.msra.mxu0 %v12285_v32  ;;  %8517 = vmatpush1.bf16.msra.mxu1 %v12413_v0 }
0x1539   : > { %8475 = vmatprep.subr.bf16.mxu0 %v12278_v43  ;;  %8518 = vmatprep.subr.bf16.mxu1 %v12406_v23  ;;  %v12398_v61 = vcombine.high %v7033_v6, %v7037_v31  ;;  %v12397_v2 = vcombine.low %v7033_v6, %v7037_v31  ;;  %v7013_v3 = vld [vmem:[%s15421_s20 + $0x3e0] sm:$0xff] }
0x153a   : > { %6782 = vadd.xlane.f32.xlu1 %v6781_v10  ;;  %v6897_v10 = vld [vmem:[%s15421_s20 + $0x40] sm:$0xff]  ;;  %v12374_v46 = vcombine.high %v7009_v24, %v7013_v3  ;;  %v12373_v45 = vcombine.low %v7009_v24, %v7013_v3 }
0x153b   : > { %v12262_v39 = vcombine.high %v6897_v10, %v6901_v9  ;;  %v12261_v27 = vcombine.low %v6897_v10, %v6901_v9  ;;  %v7137_v25 = vld [vmem:[%s15421_s20 + $0x7c0] sm:$0xff] }
0x153c   : > { %8476 = vmatpush1.bf16.msra.mxu0 %v12277_v16  ;;  %8519 = vmatpush1.bf16.msra.mxu1 %v12405_v52  ;;  %v7141_v5 = vld [vmem:[%s15421_s20 + $0x7e0] sm:$0xff] }
0x153d   : > { %8477 = vmatprep.subr.bf16.mxu0 %v12270_v54  ;;  %8520 = vmatprep.subr.bf16.mxu1 %v12398_v61  ;;  %v12502_v21 = vcombine.high %v7137_v25, %v7141_v5  ;;  %v12501_v28 = vcombine.low %v7137_v25, %v7141_v5  ;;  %v7001_v52 = vld [vmem:[%s15421_s20 + $0x380] sm:$0xff] }
0x153e   : > { %v7005_v54 = vld [vmem:[%s15421_s20 + $0x3a0] sm:$0xff] }
0x153f   : > { %v7129_v61 = vld [vmem:[%s15421_s20 + $0x780] sm:$0xff]  ;;  %v12366_v10 = vcombine.high %v7001_v52, %v7005_v54  ;;  %v12365_v4 = vcombine.low %v7001_v52, %v7005_v54 }
0x1540   : > { %8478 = vmatpush1.bf16.msra.mxu0 %v12269_v15  ;;  %8521 = vmatpush1.bf16.msra.mxu1 %v12397_v2  ;;  %v7133_v9 = vld [vmem:[%s15421_s20 + $0x7a0] sm:$0xff] }
0x1541   : > { %8479 = vmatprep.subr.bf16.mxu0 %v12262_v39  ;;  %8522 = vmatprep.subr.bf16.mxu1 %v12390_v51  ;;  %v12493_v40 = vcombine.low %v7129_v61, %v7133_v9  ;;  %v12494_v15 = vcombine.high %v7129_v61, %v7133_v9  ;;  %v6993_v2 = vld [vmem:[%s15421_s20 + $0x340] sm:$0xff] }
0x1542   : > { %v6997_v39 = vld [vmem:[%s15421_s20 + $0x360] sm:$0xff] }
0x1543   : > { %v7121_v51 = vld [vmem:[%s15421_s20 + $0x740] sm:$0xff]  ;;  %v12358_v47 = vcombine.high %v6993_v2, %v6997_v39  ;;  %v12357_v55 = vcombine.low %v6993_v2, %v6997_v39  ;;  %v16608_v39 = vld [vmem:[%s15421_s20 + $0x1c8] sm:$0xff] }
0x1544   : > { %8480 = vmatpush1.bf16.msra.mxu0 %v12261_v27  ;;  %8523 = vmatpush1.bf16.msra.mxu1 %v12389_v53  ;;  %v7125_v42 = vld [vmem:[%s15421_s20 + $0x760] sm:$0xff] }
0x1545   : > { %8481 = vmatprep.subr.bf16.mxu0 %v12254_v57  ;;  %8524 = vmatprep.subr.bf16.mxu1 %v12382_v56  ;;  %v12485_v8 = vcombine.low %v7121_v51, %v7125_v42  ;;  %v12486_v27 = vcombine.high %v7121_v51, %v7125_v42  ;;  %v6985_v53 = vld [vmem:[%s15421_s20 + $0x300] sm:$0xff]  ;;  %v16611_v51 = vld [vmem:[%s15421_s20 + $0x1e8] sm:$0xff] }
0x1546   : > { %v6989_v57 = vld [vmem:[%s15421_s20 + $0x320] sm:$0xff]  ;;  %v12312_v42 = vcombine.high %v16608_v39, %v16611_v51 }
0x1547   : > { %v7113_v56 = vld [vmem:[%s15421_s20 + $0x700] sm:$0xff]  ;;  %v12349_v24 = vcombine.low %v6985_v53, %v6989_v57  ;;  %v12350_v3 = vcombine.high %v6985_v53, %v6989_v57 }
0x1548   : > { %8482 = vmatpush1.bf16.msra.mxu0 %v12253_v11  ;;  %8525 = vmatpush1.bf16.msra.mxu1 %v12381_v19  ;;  %v7117_v25 = vld [vmem:[%s15421_s20 + $0x720] sm:$0xff] }
0x1549   : > { %8483 = vmatprep.subr.bf16.mxu0 %v12374_v46  ;;  %8526 = vmatprep.subr.bf16.mxu1 %v12502_v21  ;;  %v6977_v5 = vld [vmem:[%s15421_s20 + $0x2c0] sm:$0xff]  ;;  %v12477_v19 = vcombine.low %v7113_v56, %v7117_v25  ;;  %v12478_v46 = vcombine.high %v7113_v56, %v7117_v25 }
0x154a   : > { %v6981_v11 = vld [vmem:[%s15421_s20 + $0x2e0] sm:$0xff] }
0x154b   : > { %v12342_v21 = vcombine.high %v6977_v5, %v6981_v11  ;;  %v6957_v52 = vld [vmem:[%s15421_s20 + $0x220] sm:$0xff] }
0x154c   : > { %8484 = vmatpush2.bf16.msra.mxu0 %v12373_v45  ;;  %8527 = vmatpush2.bf16.msra.mxu1 %v12501_v28  ;;  %v7105_v45 = vld [vmem:[%s15421_s20 + $0x6c0] sm:$0xff] }
0x154d   : > { %8485 = vmatprep.subr.bf16.mxu0 %v12366_v10  ;;  %8528 = vmatprep.subr.bf16.mxu1 %v12494_v15  ;;  %v7109_v28 = vld [vmem:[%s15421_s20 + $0x6e0] sm:$0xff] }
0x154e   : > { %v7081_v54 = vld [vmem:[%s15421_s20 + $0x600] sm:$0xff] }
0x154f   : > { %v7085_v61 = vld [vmem:[%s15421_s20 + $0x620] sm:$0xff] }
0x1550   : > { %8486 = vmatpush2.bf16.msra.mxu0 %v12365_v4  ;;  %8529 = vmatpush2.bf16.msra.mxu1 %v12493_v40  ;;  %v12446_v40 = vcombine.high %v7081_v54, %v7085_v61  ;;  %v12445_v2 = vcombine.low %v7081_v54, %v7085_v61 }
0x1551   : > { %8487 = vmatprep.subr.bf16.mxu0 %v12358_v47  ;;  %8530 = vmatprep.subr.bf16.mxu1 %v12486_v27  ;;  %v16614_v47 = vld [vmem:[%s15421_s20 + $0x5c8] sm:$0xff] }
0x1554   : > { %8488 = vmatpush2.bf16.msra.mxu0 %v12357_v55  ;;  %8531 = vmatpush2.bf16.msra.mxu1 %v12485_v8  ;;  %v16619_v55 = vld [vmem:[%s15421_s20 + $0x5e8] sm:$0xff]  ;;  %v12311_v8 = vcombine.low %v16608_v39, %v16611_v51 }
0x1555   : > { %8489 = vmatprep.subr.bf16.mxu0 %v12350_v3  ;;  %8532 = vmatprep.subr.bf16.mxu1 %v12478_v46  ;;  %v12439_v27 = vcombine.low %v16614_v47, %v16619_v55  ;;  %v12440_v53 = vcombine.high %v16614_v47, %v16619_v55  ;;  %v6773_v46 = vld [vmem:[%s859_s14] sm:$0xf]  ;;  %v6926_v39 = vld [vmem:[%s15421_s20 + $0x128] sm:$0xff] }
0x1556   : > { %v7050_v51 = vld [vmem:[%s15421_s20 + $0x508] sm:$0xff] }
0x1558   : > { %8490 = vmatpush2.bf16.msra.mxu0 %v12349_v24  ;;  %8533 = vmatpush2.bf16.msra.mxu1 %v12477_v19 }
0x1559   : > { %8491 = vmatprep.subr.bf16.mxu0 %v12342_v21 }
0x15bf   : > { %v6778_v20 = vpop.xlane.xlu0 %6777 }
0x15c0   : > { %v6785_v58 = vmul.f32 0.001953125, %v6778_v20  ;;  %v6969_v20 = vld [vmem:[%s15421_s20 + $0x280] sm:$0xff] }
0x15c2   : > { %v16540_v17 = vsub.f32 %v16481_v44, %v6785_v58  ;;  %v16543_v18 = vsub.f32 %v16479_v50, %v6785_v58  ;;  %v16546_v30 = vsub.f32 %v16487_v26, %v6785_v58  ;;  %v16549_v22 = vsub.f32 %v16491_v49, %v6785_v58 }
0x15c3   : > { %v6783_v62 = vpop.xlane.xlu1 %6782  ;;  %v12470_v58 = vcombine.high %v7105_v45, %v7109_v28 }
0x15c4   : > { %v6786_v38 = vmul.f32 0.001953125, %v6783_v62  ;;  %v6795_v7 = vmul.f32 %v16540_v17, %v16540_v17  ;;  %v6796_v32 = vmul.f32 %v16543_v18, %v16543_v18  ;;  %v6797_v44 = vmul.f32 %v16546_v30, %v16546_v30  ;;  %v6973_v62 = vld [vmem:[%s15421_s20 + $0x2a0] sm:$0xff] }
0x15c5   : > { %v6798_v43 = vmul.f32 %v16549_v22, %v16549_v22  ;;  %8534 = vmatprep.subr.bf16.mxu1 %v12470_v58 }
0x15c6   : > { %v16558_v50 = vsub.f32 %v16489_v37, %v6786_v38  ;;  %v16561_v26 = vsub.f32 %v16485_v60, %v6786_v38  ;;  %v6803_v0 = vadd.f32 %v6796_v32, %v6795_v7  ;;  %v16564_v49 = vsub.f32 %v16496_v48, %v6786_v38  ;;  %v7101_v7 = vld [vmem:[%s15421_s20 + $0x6a0] sm:$0xff] }
0x15c7   : > { %v16569_v1 = vsub.f32 %v16499_v12, %v6786_v38  ;;  %v7097_v38 = vld [vmem:[%s15421_s20 + $0x680] sm:$0xff]  ;;  %v12341_v32 = vcombine.low %v6977_v5, %v6981_v11  ;;  %v6772_v11 = vld [vmem:[%s850_s0] sm:$0xf] }
0x15c8   : > { %v6804_v23 = vadd.f32 %v6803_v0, %v6797_v44  ;;  %v6799_v37 = vmul.f32 %v16558_v50, %v16558_v50  ;;  %v6800_v60 = vmul.f32 %v16561_v26, %v16561_v26  ;;  %v6801_v48 = vmul.f32 %v16564_v49, %v16564_v49 }
0x15c9   : > { %v6802_v31 = vmul.f32 %v16569_v1, %v16569_v1  ;;  %v12469_v44 = vcombine.low %v7105_v45, %v7109_v28  ;;  %v12334_v0 = vcombine.high %v6969_v20, %v6973_v62  ;;  %8492 = vmatpush2.bf16.msra.mxu0 %v12341_v32  ;;  %v6835_v45 = vrot.slane %v6772_v11, %v15725_v41 }
0x15ca   : > { %v6805_v29 = vadd.f32 %v6804_v23, %v6798_v43  ;;  %v6808_v6 = vadd.f32 %v6800_v60, %v6799_v37  ;;  %v12462_v43 = vcombine.high %v7097_v38, %v7101_v7  ;;  %v6961_v23 = vld [vmem:[%s15421_s20 + $0x240] sm:$0xff] }
0x15cb   : > { %v6965_v37 = vld [vmem:[%s15421_s20 + $0x260] sm:$0xff]  ;;  %8535 = vmatpush2.bf16.msra.mxu1 %v12469_v44  ;;  %8493 = vmatprep.subr.bf16.mxu0 %v12334_v0  ;;  %v6864_v44 = vrot.slane %v6773_v46, %v15725_v41  ;;  %v6872_v0 = vrot.slane %v6773_v46, %v15814_v63 }
0x15cc   : > { %6806 = vadd.xlane.f32.xlu0 %v6805_v29  ;;  %v6809_v16 = vadd.f32 %v6808_v6, %v6801_v48  ;;  %v7089_v60 = vld [vmem:[%s15421_s20 + $0x640] sm:$0xff]  ;;  %v12333_v48 = vcombine.low %v6969_v20, %v6973_v62  ;;  %v12461_v6 = vcombine.low %v7097_v38, %v7101_v7  ;;  %8536 = vmatprep.subr.bf16.mxu1 %v12462_v43 }
0x15cd   : > { %v7093_v29 = vld [vmem:[%s15421_s20 + $0x660] sm:$0xff]  ;;  %v12325_v10 = vcombine.low %v6961_v23, %v6965_v37  ;;  %v6843_v20 = vrot.slane %v6772_v11, %v15814_v63  ;;  %v6831_v62 = vrot.slane %v6772_v11, %v15900_v33  ;;  %v6839_v7 = vrot.slane %v6772_v11, %v15807_v59  ;;  %v7062_v11 = vld [vmem:[%s15421_s20 + $0x568] sm:$0xff] }
0x15ce   : > { %v6810_v12 = vadd.f32 %v6809_v16, %v6802_v31  ;;  %v12326_v31 = vcombine.high %v6961_v23, %v6965_v37  ;;  %v12454_v16 = vcombine.high %v7089_v60, %v7093_v29  ;;  %8494 = vmatpush2.bf16.msra.mxu0 %v12333_v48  ;;  %v12453_v9 = vcombine.low %v7089_v60, %v7093_v29 }
0x15cf   : > { %8537 = vmatpush2.bf16.msra.mxu1 %v12461_v6  ;;  %v6868_v43 = vrot.slane %v6773_v46, %v15807_v59 }
0x15d0   : > { %6811 = vadd.xlane.f32.xlu0 %v6810_v12  ;;  %v6953_v12 = vld [vmem:[%s15421_s20 + $0x200] sm:$0xff]  ;;  %8495 = vmatprep.subr.bf16.mxu0 %v12326_v31 }
0x15d1   : > { %v12318_v4 = vcombine.high %v6953_v12, %v6957_v52  ;;  %8538 = vmatprep.subr.bf16.mxu1 %v12454_v16  ;;  %v12317_v15 = vcombine.low %v6953_v12, %v6957_v52 }
0x15d2   : > { %8496 = vmatpush2.bf16.msra.mxu0 %v12325_v10 }
0x15d3   : > { %8539 = vmatpush2.bf16.msra.mxu1 %v12453_v9  ;;  %8497 = vmatprep.subr.bf16.mxu0 %v12318_v4  ;;  %v6942_v4 = vld [vmem:[%s15421_s20 + $0x1a8] sm:$0xff] }
0x15d4   : > { %8540 = vmatprep.subr.bf16.mxu1 %v12446_v40  ;;  %v7066_v40 = vld [vmem:[%s15421_s20 + $0x588] sm:$0xff] }
0x15d6   : > { %8498 = vmatpush2.bf16.msra.mxu0 %v12317_v15  ;;  %v7070_v15 = vld [vmem:[%s15421_s20 + $0x5a8] sm:$0xff] }
0x15d7   : > { %8541 = vmatpush2.bf16.msra.mxu1 %v12445_v2  ;;  %8553 = vmatprep.subr.bf16.mxu0 %v12312_v42 }
0x15d8   : > { %8596 = vmatprep.subr.bf16.mxu1 %v12440_v53 }
0x1655   : > { %v6807_v57 = vpop.xlane.xlu0 %6806 }
0x1656   : > { %v6813_v56 = vmul.f32 0.001953125, %v6807_v57 }
0x1658   : > { %v6815_v24 = vadd.f32 1e-05, %v6813_v56  ;;  %v6930_v56 = vld [vmem:[%s15421_s20 + $0x148] sm:$0xff] }
0x1659   : > { %v6812_v3 = vpop.xlane.xlu0 %6811 }
0x165a   : > { %14465 = vrsqrt.f32 %v6815_v24  ;;  %v6814_v25 = vmul.f32 0.001953125, %v6812_v3  ;;  %v12432_v3 = vcombine.high %v7066_v40, %v7070_v15 }
0x165c   : > { %v6816_v5 = vadd.f32 1e-05, %v6814_v25  ;;  %v6934_v25 = vld [vmem:[%s15421_s20 + $0x168] sm:$0xff] }
0x165d   : > { %v12295_v47 = vcombine.low %v6930_v56, %v6934_v25 }
0x165e   : > { %14467 = vrsqrt.f32 %v6816_v5  ;;  %v7058_v5 = vld [vmem:[%s15421_s20 + $0x548] sm:$0xff] }
0x165f   : > { %v12423_v55 = vcombine.low %v7058_v5, %v7062_v11 }
0x1667   : > { %v14466_v19 = vpop.eup %14465 }
0x1668   : > { %v6820_v21 = vmul.f32 %v14466_v19, %v16543_v18  ;;  %v6822_v28 = vmul.f32 %v14466_v19, %v16549_v22  ;;  %v6819_v58 = vmul.f32 %v14466_v19, %v16540_v17  ;;  %v6821_v38 = vmul.f32 %v14466_v19, %v16546_v30 }
0x1669   : > { %v6860_v18 = vrot.slane %v6773_v46, %v15900_v33  ;;  %v12431_v46 = vcombine.low %v7066_v40, %v7070_v15  ;;  %v6890_v15 = vld [vmem:[%s15421_s20 + $0x8] sm:$0xff] }
0x166a   : > { %v6849_v23 = vmul.f32 %v6835_v45, %v6820_v21  ;;  %v6851_v37 = vmul.f32 %v6843_v20, %v6822_v28  ;;  %v6848_v60 = vmul.f32 %v6831_v62, %v6819_v58  ;;  %v6850_v48 = vmul.f32 %v6839_v7, %v6821_v38  ;;  %v6922_v28 = vld [vmem:[%s15421_s20 + $0x108] sm:$0xff] }
0x166b   : > { %v14468_v32 = vpop.eup %14467  ;;  %v12296_v21 = vcombine.high %v6930_v56, %v6934_v25  ;;  %v6914_v58 = vld [vmem:[%s15421_s20 + $0xc8] sm:$0xff] }
0x166c   : > { %v6824_v22 = vmul.f32 %v14468_v32, %v16561_v26  ;;  %v6826_v17 = vmul.f32 %v14468_v32, %v16569_v1  ;;  %v6823_v30 = vmul.f32 %v14468_v32, %v16558_v50  ;;  %v6825_v29 = vmul.f32 %v14468_v32, %v16564_v49  ;;  %v6938_v50 = vld [vmem:[%s15421_s20 + $0x188] sm:$0xff] }
0x166d   : > { %v16647_v52 = vadd.f32 %v6864_v44, %v6849_v23  ;;  %v16651_v1 = vadd.f32 %v6872_v0, %v6851_v37  ;;  %v16656_v61 = vadd.f32 %v6860_v18, %v6848_v60  ;;  %v16660_v10 = vadd.f32 %v6868_v43, %v6850_v48  ;;  %v7042_v38 = vld [vmem:[%s15421_s20 + $0x4c8] sm:$0xff] }
0x166e   : > { %v6853_v6 = vmul.f32 %v6835_v45, %v6824_v22  ;;  %v6855_v31 = vmul.f32 %v6843_v20, %v6826_v17  ;;  %v6852_v16 = vmul.f32 %v6831_v62, %v6823_v30  ;;  %v6854_v12 = vmul.f32 %v6839_v7, %v6825_v29  ;;  %v6918_v62 = vld [vmem:[%s15421_s20 + $0xe8] sm:$0xff] }
0x166f   : > { %v12304_v24 = vcombine.high %v6938_v50, %v6942_v4  ;;  %v12303_v19 = vcombine.low %v6938_v50, %v6942_v4  ;;  %v12424_v45 = vcombine.high %v7058_v5, %v7062_v11  ;;  %v7046_v7 = vld [vmem:[%s15421_s20 + $0x4e8] sm:$0xff]  ;;  %v12287_v32 = vcombine.low %v6922_v28, %v6926_v39 }
0x1670   : > { %v16649_v26 = vadd.f32 %v6864_v44, %v6853_v6  ;;  %v16653_v54 = vadd.f32 %v6872_v0, %v6855_v31  ;;  %v16658_v49 = vadd.f32 %v6860_v18, %v6852_v16  ;;  %v16662_v9 = vadd.f32 %v6868_v43, %v6854_v12  ;;  %v6906_v43 = vld [vmem:[%s15421_s20 + $0x88] sm:$0xff] }
0x1671   : > { %v12280_v0 = vcombine.high %v6914_v58, %v6918_v62  ;;  %v12408_v18 = vcombine.high %v7042_v38, %v7046_v7  ;;  %v6910_v22 = vld [vmem:[%s15421_s20 + $0xa8] sm:$0xff]  ;;  %v12279_v37 = vcombine.low %v6914_v58, %v6918_v62  ;;  %v12407_v30 = vcombine.low %v7042_v38, %v7046_v7 }
0x1672   : > { %v16669_v2 = vpack.c.bf16 %v16649_v26, %v16647_v52  ;;  %v16673_v42 = vpack.c.bf16 %v16653_v54, %v16651_v1  ;;  %v16677_v53 = vpack.c.bf16 %v16658_v49, %v16656_v61  ;;  %v16681_v57 = vpack.c.bf16 %v16662_v9, %v16660_v10  ;;  %v7034_v23 = vld [vmem:[%s15421_s20 + $0x488] sm:$0xff] }
0x1673   : > { %v7038_v17 = vld [vmem:[%s15421_s20 + $0x4a8] sm:$0xff]  ;;  %v12272_v60 = vcombine.high %v6906_v43, %v6910_v22  ;;  %v12271_v12 = vcombine.low %v6906_v43, %v6910_v22 }
0x1674   : > { %8499 = vmatprep.mubr.bf16.mxu0 %v16669_v2  ;;  %8542 = vmatprep.mubr.bf16.mxu1 %v16673_v42  ;;  %v12400_v29 = vcombine.high %v7034_v23, %v7038_v17  ;;  %v6898_v48 = vld [vmem:[%s15421_s20 + $0x48] sm:$0xff]  ;;  %v12399_v50 = vcombine.low %v7034_v23, %v7038_v17 }
0x1675   : > { %8500 = vmatmul.mubr.bf16.vlgmr.msra.gmra.mxu0 %v16677_v53  ;;  %8543 = vmatmul.mubr.bf16.vlgmr.msra.gmra.mxu1 %v16681_v57  ;;  %v6902_v6 = vld [vmem:[%s15421_s20 + $0x68] sm:$0xff] }
0x1676   : > { %8554 = vmatpush1.bf16.msra.mxu0 %v12311_v8  ;;  %8597 = vmatpush1.bf16.msra.mxu1 %v12439_v27  ;;  %v7054_v8 = vld [vmem:[%s15421_s20 + $0x528] sm:$0xff]  ;;  %v12288_v27 = vcombine.high %v6922_v28, %v6926_v39  ;;  %v12264_v4 = vcombine.high %v6898_v48, %v6902_v6  ;;  %v12263_v25 = vcombine.low %v6898_v48, %v6902_v6 }
0x1677   : > { %8585 = vmatprep.mubr.bf16.mxu0 %v16669_v2  ;;  %8628 = vmatprep.mubr.bf16.mxu1 %v16673_v42  ;;  %v12416_v20 = vcombine.high %v7050_v51, %v7054_v8  ;;  %v12415_v44 = vcombine.low %v7050_v51, %v7054_v8  ;;  %v7026_v31 = vld [vmem:[%s15421_s20 + $0x448] sm:$0xff] }
0x1678   : > { %8555 = vmatprep.subr.bf16.mxu0 %v12304_v24  ;;  %8598 = vmatprep.subr.bf16.mxu1 %v12432_v3  ;;  %v7030_v16 = vld [vmem:[%s15421_s20 + $0x468] sm:$0xff] }
0x1679   : > { %v12392_v40 = vcombine.high %v7026_v31, %v7030_v16  ;;  %v6894_v56 = vld [vmem:[%s15421_s20 + $0x28] sm:$0xff]  ;;  %v12391_v5 = vcombine.low %v7026_v31, %v7030_v16 }
0x167a   : > { %8556 = vmatpush1.bf16.msra.mxu0 %v12303_v19  ;;  %8599 = vmatpush1.bf16.msra.mxu1 %v12431_v46  ;;  %v7018_v24 = vld [vmem:[%s15421_s20 + $0x408] sm:$0xff]  ;;  %v12256_v11 = vcombine.high %v6890_v15, %v6894_v56  ;;  %v12255_v39 = vcombine.low %v6890_v15, %v6894_v56 }
0x167b   : > { %8557 = vmatprep.subr.bf16.mxu0 %v12296_v21  ;;  %8600 = vmatprep.subr.bf16.mxu1 %v12424_v45  ;;  %v7022_v3 = vld [vmem:[%s15421_s20 + $0x428] sm:$0xff] }
0x167c   : > { %v12384_v19 = vcombine.high %v7018_v24, %v7022_v3  ;;  %v7010_v46 = vld [vmem:[%s15421_s20 + $0x3c8] sm:$0xff]  ;;  %v12383_v51 = vcombine.low %v7018_v24, %v7022_v3 }
0x167d   : > { %v7014_v21 = vld [vmem:[%s15421_s20 + $0x3e8] sm:$0xff] }
0x167e   : > { %8558 = vmatpush1.bf16.msra.mxu0 %v12295_v47  ;;  %8601 = vmatpush1.bf16.msra.mxu1 %v12423_v55  ;;  %v7138_v45 = vld [vmem:[%s15421_s20 + $0x7c8] sm:$0xff]  ;;  %v12376_v8 = vcombine.high %v7010_v46, %v7014_v21  ;;  %v12375_v62 = vcombine.low %v7010_v46, %v7014_v21 }
0x167f   : > { %8559 = vmatprep.subr.bf16.mxu0 %v12288_v27  ;;  %8602 = vmatprep.subr.bf16.mxu1 %v12416_v20  ;;  %v7142_v28 = vld [vmem:[%s15421_s20 + $0x7e8] sm:$0xff] }
0x1680   : > { %v12504_v47 = vcombine.high %v7138_v45, %v7142_v28  ;;  %v7002_v55 = vld [vmem:[%s15421_s20 + $0x388] sm:$0xff]  ;;  %v12503_v38 = vcombine.low %v7138_v45, %v7142_v28 }
0x1681   : > { %v7006_v27 = vld [vmem:[%s15421_s20 + $0x3a8] sm:$0xff] }
0x1682   : > { %8560 = vmatpush1.bf16.msra.mxu0 %v12287_v32  ;;  %8603 = vmatpush1.bf16.msra.mxu1 %v12415_v44  ;;  %v7130_v20 = vld [vmem:[%s15421_s20 + $0x788] sm:$0xff]  ;;  %v12368_v7 = vcombine.high %v7002_v55, %v7006_v27  ;;  %v12367_v22 = vcombine.low %v7002_v55, %v7006_v27 }
0x1683   : > { %8561 = vmatprep.subr.bf16.mxu0 %v12280_v0  ;;  %8604 = vmatprep.subr.bf16.mxu1 %v12408_v18  ;;  %v7134_v58 = vld [vmem:[%s15421_s20 + $0x7a8] sm:$0xff] }
0x1684   : > { %v12496_v32 = vcombine.high %v7130_v20, %v7134_v58  ;;  %v6994_v44 = vld [vmem:[%s15421_s20 + $0x348] sm:$0xff]  ;;  %v12495_v23 = vcombine.low %v7130_v20, %v7134_v58 }
0x1685   : > { %v6998_v0 = vld [vmem:[%s15421_s20 + $0x368] sm:$0xff] }
0x1686   : > { %8562 = vmatpush1.bf16.msra.mxu0 %v12279_v37  ;;  %8605 = vmatpush1.bf16.msra.mxu1 %v12407_v30  ;;  %v7122_v18 = vld [vmem:[%s15421_s20 + $0x748] sm:$0xff]  ;;  %v12360_v17 = vcombine.high %v6994_v44, %v6998_v0  ;;  %v12359_v6 = vcombine.low %v6994_v44, %v6998_v0 }
0x1687   : > { %8563 = vmatprep.subr.bf16.mxu0 %v12272_v60  ;;  %8606 = vmatprep.subr.bf16.mxu1 %v12400_v29  ;;  %v7126_v43 = vld [vmem:[%s15421_s20 + $0x768] sm:$0xff] }
0x1688   : > { %v12488_v37 = vcombine.high %v7122_v18, %v7126_v43  ;;  %v6986_v30 = vld [vmem:[%s15421_s20 + $0x308] sm:$0xff]  ;;  %v12487_v31 = vcombine.low %v7122_v18, %v7126_v43 }
0x1689   : > { %v6990_v60 = vld [vmem:[%s15421_s20 + $0x328] sm:$0xff] }
0x168a   : > { %8564 = vmatpush1.bf16.msra.mxu0 %v12271_v12  ;;  %8607 = vmatpush1.bf16.msra.mxu1 %v12399_v50  ;;  %v7114_v29 = vld [vmem:[%s15421_s20 + $0x708] sm:$0xff]  ;;  %v12352_v16 = vcombine.high %v6986_v30, %v6990_v60  ;;  %v12351_v56 = vcombine.low %v6986_v30, %v6990_v60  ;;  %v7079_v30 = vld [vmem:[%s15421_s20 + $0x5f0] sm:$0xff] }
0x168b   : > { %8565 = vmatprep.subr.bf16.mxu0 %v12264_v4  ;;  %8608 = vmatprep.subr.bf16.mxu1 %v12392_v40  ;;  %v7118_v48 = vld [vmem:[%s15421_s20 + $0x728] sm:$0xff] }
0x168c   : > { %v12480_v12 = vcombine.high %v7114_v29, %v7118_v48  ;;  %v6978_v50 = vld [vmem:[%s15421_s20 + $0x2c8] sm:$0xff]  ;;  %v12479_v24 = vcombine.low %v7114_v29, %v7118_v48 }
0x168d   : > { %v6982_v4 = vld [vmem:[%s15421_s20 + $0x2e8] sm:$0xff] }
0x168e   : > { %8566 = vmatpush1.bf16.msra.mxu0 %v12263_v25  ;;  %8609 = vmatpush1.bf16.msra.mxu1 %v12391_v5  ;;  %v7106_v40 = vld [vmem:[%s15421_s20 + $0x6c8] sm:$0xff]  ;;  %v12344_v3 = vcombine.high %v6978_v50, %v6982_v4  ;;  %v12343_v21 = vcombine.low %v6978_v50, %v6982_v4  ;;  %v7071_v50 = vld [vmem:[%s15421_s20 + $0x5b0] sm:$0xff] }
0x168f   : > { %8567 = vmatprep.subr.bf16.mxu0 %v12256_v11  ;;  %8610 = vmatprep.subr.bf16.mxu1 %v12384_v19  ;;  %v7110_v15 = vld [vmem:[%s15421_s20 + $0x6e8] sm:$0xff] }
0x1690   : > { %v12472_v25 = vcombine.high %v7106_v40, %v7110_v15  ;;  %v6970_v5 = vld [vmem:[%s15421_s20 + $0x288] sm:$0xff]  ;;  %v12471_v45 = vcombine.low %v7106_v40, %v7110_v15 }
0x1691   : > { %v6974_v11 = vld [vmem:[%s15421_s20 + $0x2a8] sm:$0xff] }
0x1692   : > { %8568 = vmatpush1.bf16.msra.mxu0 %v12255_v39  ;;  %8611 = vmatpush1.bf16.msra.mxu1 %v12383_v51  ;;  %v7098_v19 = vld [vmem:[%s15421_s20 + $0x688] sm:$0xff]  ;;  %v12336_v28 = vcombine.high %v6970_v5, %v6974_v11  ;;  %v12335_v27 = vcombine.low %v6970_v5, %v6974_v11  ;;  %v7063_v5 = vld [vmem:[%s15421_s20 + $0x570] sm:$0xff] }
0x1693   : > { %8569 = vmatprep.subr.bf16.mxu0 %v12376_v8  ;;  %8612 = vmatprep.subr.bf16.mxu1 %v12504_v47  ;;  %v7102_v46 = vld [vmem:[%s15421_s20 + $0x6a8] sm:$0xff] }
0x1694   : > { %v12464_v39 = vcombine.high %v7098_v19, %v7102_v46  ;;  %v6962_v51 = vld [vmem:[%s15421_s20 + $0x248] sm:$0xff]  ;;  %v12463_v20 = vcombine.low %v7098_v19, %v7102_v46 }
0x1695   : > { %v6966_v8 = vld [vmem:[%s15421_s20 + $0x268] sm:$0xff] }
0x1696   : > { %8570 = vmatpush2.bf16.msra.mxu0 %v12375_v62  ;;  %8613 = vmatpush2.bf16.msra.mxu1 %v12503_v38  ;;  %v7090_v47 = vld [vmem:[%s15421_s20 + $0x648] sm:$0xff]  ;;  %v12328_v58 = vcombine.high %v6962_v51, %v6966_v8  ;;  %v12327_v0 = vcombine.low %v6962_v51, %v6966_v8  ;;  %v7055_v51 = vld [vmem:[%s15421_s20 + $0x530] sm:$0xff] }
0x1697   : > { %8571 = vmatprep.subr.bf16.mxu0 %v12368_v7  ;;  %8614 = vmatprep.subr.bf16.mxu1 %v12496_v32  ;;  %v7094_v55 = vld [vmem:[%s15421_s20 + $0x668] sm:$0xff] }
0x1698   : > { %v12456_v62 = vcombine.high %v7090_v47, %v7094_v55  ;;  %v6954_v38 = vld [vmem:[%s15421_s20 + $0x208] sm:$0xff]  ;;  %v12455_v18 = vcombine.low %v7090_v47, %v7094_v55 }
0x1699   : > { %v6958_v7 = vld [vmem:[%s15421_s20 + $0x228] sm:$0xff] }
0x169a   : > { %8572 = vmatpush2.bf16.msra.mxu0 %v12367_v22  ;;  %8615 = vmatpush2.bf16.msra.mxu1 %v12495_v23  ;;  %v7082_v32 = vld [vmem:[%s15421_s20 + $0x608] sm:$0xff]  ;;  %v12320_v43 = vcombine.high %v6954_v38, %v6958_v7  ;;  %v6947_v23 = vld [vmem:[%s15421_s20 + $0x1d0] sm:$0xff]  ;;  %v12319_v60 = vcombine.low %v6954_v38, %v6958_v7 }
0x169b   : > { %8573 = vmatprep.subr.bf16.mxu0 %v12360_v17  ;;  %8616 = vmatprep.subr.bf16.mxu1 %v12488_v37  ;;  %v7086_v44 = vld [vmem:[%s15421_s20 + $0x628] sm:$0xff]  ;;  %v6951_v17 = vld [vmem:[%s15421_s20 + $0x1f0] sm:$0xff] }
0x169c   : > { %v12448_v22 = vcombine.high %v7082_v32, %v7086_v44  ;;  %v7075_v37 = vld [vmem:[%s15421_s20 + $0x5d0] sm:$0xff]  ;;  %v12447_v29 = vcombine.low %v7082_v32, %v7086_v44  ;;  %v12314_v48 = vcombine.high %v6947_v23, %v6951_v17  ;;  %v12313_v4 = vcombine.low %v6947_v23, %v6951_v17 }
0x169d   : > { %v12441_v40 = vcombine.low %v7075_v37, %v7079_v30  ;;  %v7047_v38 = vld [vmem:[%s15421_s20 + $0x4f0] sm:$0xff] }
0x169e   : > { %8574 = vmatpush2.bf16.msra.mxu0 %v12359_v6  ;;  %8617 = vmatpush2.bf16.msra.mxu1 %v12487_v31  ;;  %v12442_v6 = vcombine.high %v7075_v37, %v7079_v30  ;;  %v6939_v31 = vld [vmem:[%s15421_s20 + $0x190] sm:$0xff] }
0x169f   : > { %8575 = vmatprep.subr.bf16.mxu0 %v12352_v16  ;;  %8618 = vmatprep.subr.bf16.mxu1 %v12480_v12  ;;  %v6943_v16 = vld [vmem:[%s15421_s20 + $0x1b0] sm:$0xff] }
0x16a0   : > { %v7067_v12 = vld [vmem:[%s15421_s20 + $0x590] sm:$0xff]  ;;  %v12306_v15 = vcombine.high %v6939_v31, %v6943_v16  ;;  %v12305_v11 = vcombine.low %v6939_v31, %v6943_v16 }
0x16a1   : > { %v12433_v19 = vcombine.low %v7067_v12, %v7071_v50  ;;  %v7039_v23 = vld [vmem:[%s15421_s20 + $0x4b0] sm:$0xff] }
0x16a2   : > { %8576 = vmatpush2.bf16.msra.mxu0 %v12351_v56  ;;  %8619 = vmatpush2.bf16.msra.mxu1 %v12479_v24  ;;  %v12434_v56 = vcombine.high %v7067_v12, %v7071_v50  ;;  %v6931_v24 = vld [vmem:[%s15421_s20 + $0x150] sm:$0xff] }
0x16a3   : > { %8577 = vmatprep.subr.bf16.mxu0 %v12344_v3  ;;  %8620 = vmatprep.subr.bf16.mxu1 %v12472_v25  ;;  %v6935_v3 = vld [vmem:[%s15421_s20 + $0x170] sm:$0xff] }
0x16a4   : > { %v7059_v25 = vld [vmem:[%s15421_s20 + $0x550] sm:$0xff]  ;;  %v12298_v46 = vcombine.high %v6931_v24, %v6935_v3  ;;  %v12297_v8 = vcombine.low %v6931_v24, %v6935_v3 }
0x16a5   : > { %v12425_v47 = vcombine.low %v7059_v25, %v7063_v5  ;;  %v7031_v31 = vld [vmem:[%s15421_s20 + $0x470] sm:$0xff] }
0x16a6   : > { %8578 = vmatpush2.bf16.msra.mxu0 %v12343_v21  ;;  %8621 = vmatpush2.bf16.msra.mxu1 %v12471_v45  ;;  %v12426_v21 = vcombine.high %v7059_v25, %v7063_v5  ;;  %v6923_v45 = vld [vmem:[%s15421_s20 + $0x110] sm:$0xff] }
0x16a7   : > { %8579 = vmatprep.subr.bf16.mxu0 %v12336_v28  ;;  %8622 = vmatprep.subr.bf16.mxu1 %v12464_v39  ;;  %v6927_v28 = vld [vmem:[%s15421_s20 + $0x130] sm:$0xff] }
0x16a8   : > { %v7051_v39 = vld [vmem:[%s15421_s20 + $0x510] sm:$0xff]  ;;  %v12290_v55 = vcombine.high %v6923_v45, %v6927_v28  ;;  %v12289_v7 = vcombine.low %v6923_v45, %v6927_v28 }
0x16a9   : > { %v12417_v32 = vcombine.low %v7051_v39, %v7055_v51  ;;  %v7023_v24 = vld [vmem:[%s15421_s20 + $0x430] sm:$0xff] }
0x16aa   : > { %8580 = vmatpush2.bf16.msra.mxu0 %v12335_v27  ;;  %8623 = vmatpush2.bf16.msra.mxu1 %v12463_v20  ;;  %v12418_v27 = vcombine.high %v7051_v39, %v7055_v51  ;;  %v6915_v20 = vld [vmem:[%s15421_s20 + $0xd0] sm:$0xff] }
0x16ab   : > { %8581 = vmatprep.subr.bf16.mxu0 %v12328_v58  ;;  %8624 = vmatprep.subr.bf16.mxu1 %v12456_v62  ;;  %v6919_v58 = vld [vmem:[%s15421_s20 + $0xf0] sm:$0xff] }
0x16ac   : > { %v7043_v62 = vld [vmem:[%s15421_s20 + $0x4d0] sm:$0xff]  ;;  %v12282_v44 = vcombine.high %v6915_v20, %v6919_v58  ;;  %v12281_v17 = vcombine.low %v6915_v20, %v6919_v58 }
0x16ad   : > { %v12409_v37 = vcombine.low %v7043_v62, %v7047_v38  ;;  %v7143_v45 = vld [vmem:[%s15421_s20 + $0x7f0] sm:$0xff] }
0x16ae   : > { %8582 = vmatpush2.bf16.msra.mxu0 %v12327_v0  ;;  %8625 = vmatpush2.bf16.msra.mxu1 %v12455_v18  ;;  %v12410_v0 = vcombine.high %v7043_v62, %v7047_v38  ;;  %v6907_v18 = vld [vmem:[%s15421_s20 + $0x90] sm:$0xff] }
0x16af   : > { %8583 = vmatprep.subr.bf16.mxu0 %v12320_v43  ;;  %8626 = vmatprep.subr.bf16.mxu1 %v12448_v22  ;;  %v6911_v43 = vld [vmem:[%s15421_s20 + $0xb0] sm:$0xff] }
0x16b0   : > { %v7035_v22 = vld [vmem:[%s15421_s20 + $0x490] sm:$0xff]  ;;  %v12274_v30 = vcombine.high %v6907_v18, %v6911_v43  ;;  %v12273_v16 = vcombine.low %v6907_v18, %v6911_v43 }
0x16b1   : > { %v12401_v12 = vcombine.low %v7035_v22, %v7039_v23  ;;  %v7135_v20 = vld [vmem:[%s15421_s20 + $0x7b0] sm:$0xff] }
0x16b2   : > { %8584 = vmatpush2.bf16.msra.mxu0 %v12319_v60  ;;  %8627 = vmatpush2.bf16.msra.mxu1 %v12447_v29  ;;  %v12402_v60 = vcombine.high %v7035_v22, %v7039_v23  ;;  %v6899_v29 = vld [vmem:[%s15421_s20 + $0x50] sm:$0xff] }
0x16b3   : > { %8639 = vmatprep.subr.bf16.mxu0 %v12314_v48  ;;  %8682 = vmatprep.subr.bf16.mxu1 %v12442_v6  ;;  %v6903_v48 = vld [vmem:[%s15421_s20 + $0x70] sm:$0xff] }
0x16b4   : > { %v7027_v6 = vld [vmem:[%s15421_s20 + $0x450] sm:$0xff]  ;;  %v12266_v50 = vcombine.high %v6899_v29, %v6903_v48  ;;  %v12265_v3 = vcombine.low %v6899_v29, %v6903_v48 }
0x16b5   : > { %8586 = vmatmul.mubr.bf16.vlgmr.msra.gmra.mxu0 %v16677_v53  ;;  %8629 = vmatmul.mubr.bf16.vlgmr.msra.gmra.mxu1 %v16681_v57  ;;  %v12393_v25 = vcombine.low %v7027_v6, %v7031_v31  ;;  %v7127_v18 = vld [vmem:[%s15421_s20 + $0x770] sm:$0xff] }
0x16b6   : > { %8640 = vmatpush1.bf16.msra.mxu0 %v12313_v4  ;;  %8671 = vmatprep.mubr.bf16.mxu0 %v16669_v2  ;;  %v12394_v4 = vcombine.high %v7027_v6, %v7031_v31  ;;  %v7119_v29 = vld [vmem:[%s15421_s20 + $0x730] sm:$0xff] }
0x16b7   : > { %8683 = vmatpush1.bf16.msra.mxu1 %v12441_v40  ;;  %8714 = vmatprep.mubr.bf16.mxu1 %v16673_v42  ;;  %v6891_v40 = vld [vmem:[%s15421_s20 + $0x10] sm:$0xff] }
0x16b8   : > { %8641 = vmatprep.subr.bf16.mxu0 %v12306_v15  ;;  %8684 = vmatprep.subr.bf16.mxu1 %v12434_v56  ;;  %v6895_v15 = vld [vmem:[%s15421_s20 + $0x30] sm:$0xff] }
0x16b9   : > { %v7019_v56 = vld [vmem:[%s15421_s20 + $0x410] sm:$0xff]  ;;  %v12258_v5 = vcombine.high %v6891_v40, %v6895_v15  ;;  %v12257_v28 = vcombine.low %v6891_v40, %v6895_v15 }
0x16ba   : > { %8642 = vmatpush1.bf16.msra.mxu0 %v12305_v11  ;;  %v12386_v11 = vcombine.high %v7019_v56, %v7023_v24  ;;  %v12385_v39 = vcombine.low %v7019_v56, %v7023_v24  ;;  %v7111_v40 = vld [vmem:[%s15421_s20 + $0x6f0] sm:$0xff] }
0x16bb   : > { %8685 = vmatpush1.bf16.msra.mxu1 %v12433_v19  ;;  %8643 = vmatprep.subr.bf16.mxu0 %v12298_v46  ;;  %v7011_v19 = vld [vmem:[%s15421_s20 + $0x3d0] sm:$0xff] }
0x16bc   : > { %8686 = vmatprep.subr.bf16.mxu1 %v12426_v21  ;;  %v7015_v46 = vld [vmem:[%s15421_s20 + $0x3f0] sm:$0xff] }
0x16bd   : > { %v7139_v21 = vld [vmem:[%s15421_s20 + $0x7d0] sm:$0xff]  ;;  %v12378_v51 = vcombine.high %v7011_v19, %v7015_v46  ;;  %v12377_v58 = vcombine.low %v7011_v19, %v7015_v46 }
0x16be   : > { %8644 = vmatpush1.bf16.msra.mxu0 %v12297_v8  ;;  %v12506_v8 = vcombine.high %v7139_v21, %v7143_v45  ;;  %v12505_v62 = vcombine.low %v7139_v21, %v7143_v45  ;;  %v7103_v19 = vld [vmem:[%s15421_s20 + $0x6b0] sm:$0xff] }
0x16bf   : > { %8687 = vmatpush1.bf16.msra.mxu1 %v12425_v47  ;;  %8645 = vmatprep.subr.bf16.mxu0 %v12290_v55  ;;  %v7003_v47 = vld [vmem:[%s15421_s20 + $0x390] sm:$0xff] }
0x16c0   : > { %8688 = vmatprep.subr.bf16.mxu1 %v12418_v27  ;;  %v7007_v55 = vld [vmem:[%s15421_s20 + $0x3b0] sm:$0xff] }
0x16c1   : > { %v7131_v27 = vld [vmem:[%s15421_s20 + $0x790] sm:$0xff]  ;;  %v12370_v38 = vcombine.high %v7003_v47, %v7007_v55  ;;  %v12369_v43 = vcombine.low %v7003_v47, %v7007_v55 }
0x16c2   : > { %8646 = vmatpush1.bf16.msra.mxu0 %v12289_v7  ;;  %v12498_v7 = vcombine.high %v7131_v27, %v7135_v20  ;;  %v12497_v22 = vcombine.low %v7131_v27, %v7135_v20  ;;  %v7095_v47 = vld [vmem:[%s15421_s20 + $0x670] sm:$0xff] }
0x16c3   : > { %8689 = vmatpush1.bf16.msra.mxu1 %v12417_v32  ;;  %8647 = vmatprep.subr.bf16.mxu0 %v12282_v44  ;;  %v6995_v32 = vld [vmem:[%s15421_s20 + $0x350] sm:$0xff] }
0x16c4   : > { %8690 = vmatprep.subr.bf16.mxu1 %v12410_v0  ;;  %v6999_v44 = vld [vmem:[%s15421_s20 + $0x370] sm:$0xff] }
0x16c5   : > { %v7123_v0 = vld [vmem:[%s15421_s20 + $0x750] sm:$0xff]  ;;  %v12362_v23 = vcombine.high %v6995_v32, %v6999_v44  ;;  %v12361_v48 = vcombine.low %v6995_v32, %v6999_v44 }
0x16c6   : > { %8648 = vmatpush1.bf16.msra.mxu0 %v12281_v17  ;;  %v12490_v17 = vcombine.high %v7123_v0, %v7127_v18  ;;  %v12489_v6 = vcombine.low %v7123_v0, %v7127_v18  ;;  %v7087_v32 = vld [vmem:[%s15421_s20 + $0x630] sm:$0xff] }
0x16c7   : > { %8691 = vmatpush1.bf16.msra.mxu1 %v12409_v37  ;;  %8649 = vmatprep.subr.bf16.mxu0 %v12274_v30  ;;  %v6987_v37 = vld [vmem:[%s15421_s20 + $0x310] sm:$0xff] }
0x16c8   : > { %8692 = vmatprep.subr.bf16.mxu1 %v12402_v60  ;;  %v6991_v30 = vld [vmem:[%s15421_s20 + $0x330] sm:$0xff] }
0x16c9   : > { %v7115_v60 = vld [vmem:[%s15421_s20 + $0x710] sm:$0xff]  ;;  %v12354_v31 = vcombine.high %v6987_v37, %v6991_v30  ;;  %v12353_v15 = vcombine.low %v6987_v37, %v6991_v30  ;;  %v7080_v37 = vld [vmem:[%s15421_s20 + $0x5f8] sm:$0xff] }
0x16ca   : > { %8650 = vmatpush1.bf16.msra.mxu0 %v12273_v16  ;;  %v12482_v16 = vcombine.high %v7115_v60, %v7119_v29  ;;  %v12481_v56 = vcombine.low %v7115_v60, %v7119_v29 }
0x16cb   : > { %8693 = vmatpush1.bf16.msra.mxu1 %v12401_v12  ;;  %8651 = vmatprep.subr.bf16.mxu0 %v12266_v50  ;;  %v6979_v12 = vld [vmem:[%s15421_s20 + $0x2d0] sm:$0xff] }
0x16cc   : > { %8694 = vmatprep.subr.bf16.mxu1 %v12394_v4  ;;  %v6983_v50 = vld [vmem:[%s15421_s20 + $0x2f0] sm:$0xff] }
0x16cd   : > { %v7107_v4 = vld [vmem:[%s15421_s20 + $0x6d0] sm:$0xff]  ;;  %v12346_v24 = vcombine.high %v6979_v12, %v6983_v50  ;;  %v12345_v46 = vcombine.low %v6979_v12, %v6983_v50  ;;  %v7068_v12 = vld [vmem:[%s15421_s20 + $0x598] sm:$0xff] }
0x16ce   : > { %8652 = vmatpush1.bf16.msra.mxu0 %v12265_v3  ;;  %v12474_v3 = vcombine.high %v7107_v4, %v7111_v40  ;;  %v12473_v21 = vcombine.low %v7107_v4, %v7111_v40  ;;  %v7072_v50 = vld [vmem:[%s15421_s20 + $0x5b8] sm:$0xff] }
0x16cf   : > { %8695 = vmatpush1.bf16.msra.mxu1 %v12393_v25  ;;  %8653 = vmatprep.subr.bf16.mxu0 %v12258_v5  ;;  %v6971_v25 = vld [vmem:[%s15421_s20 + $0x290] sm:$0xff] }
0x16d0   : > { %8696 = vmatprep.subr.bf16.mxu1 %v12386_v11  ;;  %v6975_v5 = vld [vmem:[%s15421_s20 + $0x2b0] sm:$0xff] }
0x16d1   : > { %v7099_v11 = vld [vmem:[%s15421_s20 + $0x690] sm:$0xff]  ;;  %v12338_v45 = vcombine.high %v6971_v25, %v6975_v5  ;;  %v12337_v55 = vcombine.low %v6971_v25, %v6975_v5  ;;  %v7064_v25 = vld [vmem:[%s15421_s20 + $0x578] sm:$0xff] }
0x16d2   : > { %8654 = vmatpush1.bf16.msra.mxu0 %v12257_v28  ;;  %v12466_v28 = vcombine.high %v7099_v11, %v7103_v19  ;;  %v12465_v27 = vcombine.low %v7099_v11, %v7103_v19  ;;  %v12435_v11 = vcombine.low %v7068_v12, %v7072_v50 }
0x16d3   : > { %8697 = vmatpush1.bf16.msra.mxu1 %v12385_v39  ;;  %8655 = vmatprep.subr.bf16.mxu0 %v12378_v51  ;;  %v6963_v39 = vld [vmem:[%s15421_s20 + $0x250] sm:$0xff] }
0x16d4   : > { %8698 = vmatprep.subr.bf16.mxu1 %v12506_v8  ;;  %v6967_v51 = vld [vmem:[%s15421_s20 + $0x270] sm:$0xff] }
0x16d5   : > { %v7091_v8 = vld [vmem:[%s15421_s20 + $0x650] sm:$0xff]  ;;  %v12330_v20 = vcombine.high %v6963_v39, %v6967_v51  ;;  %v12329_v44 = vcombine.low %v6963_v39, %v6967_v51  ;;  %v7056_v39 = vld [vmem:[%s15421_s20 + $0x538] sm:$0xff] }
0x16d6   : > { %8656 = vmatpush2.bf16.msra.mxu0 %v12377_v58  ;;  %v12458_v58 = vcombine.high %v7091_v8, %v7095_v47  ;;  %v12457_v0 = vcombine.low %v7091_v8, %v7095_v47  ;;  %v6916_v47 = vld [vmem:[%s15421_s20 + $0xd8] sm:$0xff] }
0x16d7   : > { %8699 = vmatpush2.bf16.msra.mxu1 %v12505_v62  ;;  %8657 = vmatprep.subr.bf16.mxu0 %v12370_v38  ;;  %v6955_v62 = vld [vmem:[%s15421_s20 + $0x210] sm:$0xff] }
0x16d8   : > { %8700 = vmatprep.subr.bf16.mxu1 %v12498_v7  ;;  %v6959_v38 = vld [vmem:[%s15421_s20 + $0x230] sm:$0xff] }
0x16d9   : > { %v7083_v7 = vld [vmem:[%s15421_s20 + $0x610] sm:$0xff]  ;;  %v12322_v18 = vcombine.high %v6955_v62, %v6959_v38  ;;  %v12321_v30 = vcombine.low %v6955_v62, %v6959_v38 }
0x16da   : > { %8658 = vmatpush2.bf16.msra.mxu0 %v12369_v43  ;;  %v12450_v43 = vcombine.high %v7083_v7, %v7087_v32  ;;  %v12449_v60 = vcombine.low %v7083_v7, %v7087_v32  ;;  %v6908_v32 = vld [vmem:[%s15421_s20 + $0x98] sm:$0xff] }
0x16db   : > { %8701 = vmatpush2.bf16.msra.mxu1 %v12497_v22  ;;  %8659 = vmatprep.subr.bf16.mxu0 %v12362_v23  ;;  %v6948_v22 = vld [vmem:[%s15421_s20 + $0x1d8] sm:$0xff] }
0x16dc   : > { %8702 = vmatprep.subr.bf16.mxu1 %v12490_v17  ;;  %v6952_v23 = vld [vmem:[%s15421_s20 + $0x1f8] sm:$0xff] }
0x16dd   : > { %v7076_v17 = vld [vmem:[%s15421_s20 + $0x5d8] sm:$0xff]  ;;  %v12316_v29 = vcombine.high %v6948_v22, %v6952_v23 }
0x16de   : > { %8660 = vmatpush2.bf16.msra.mxu0 %v12361_v48  ;;  %v12444_v48 = vcombine.high %v7076_v17, %v7080_v37  ;;  %v12443_v4 = vcombine.low %v7076_v17, %v7080_v37  ;;  %v6900_v37 = vld [vmem:[%s15421_s20 + $0x58] sm:$0xff] }
0x16df   : > { %8703 = vmatpush2.bf16.msra.mxu1 %v12489_v6  ;;  %8661 = vmatprep.subr.bf16.mxu0 %v12354_v31  ;;  %v6940_v6 = vld [vmem:[%s15421_s20 + $0x198] sm:$0xff] }
0x16e0   : > { %8704 = vmatprep.subr.bf16.mxu1 %v12482_v16  ;;  %v6944_v31 = vld [vmem:[%s15421_s20 + $0x1b8] sm:$0xff]  ;;  %v12315_v16 = vcombine.low %v6948_v22, %v6952_v23 }
0x16e1   : > { %v12308_v40 = vcombine.high %v6940_v6, %v6944_v31  ;;  %v12307_v5 = vcombine.low %v6940_v6, %v6944_v31 }
0x16e2   : > { %8662 = vmatpush2.bf16.msra.mxu0 %v12353_v15  ;;  %v6932_v15 = vld [vmem:[%s15421_s20 + $0x158] sm:$0xff] }
0x16e3   : > { %8705 = vmatpush2.bf16.msra.mxu1 %v12481_v56  ;;  %8663 = vmatprep.subr.bf16.mxu0 %v12346_v24  ;;  %v6936_v56 = vld [vmem:[%s15421_s20 + $0x178] sm:$0xff]  ;;  %v12436_v24 = vcombine.high %v7068_v12, %v7072_v50 }
0x16e4   : > { %8706 = vmatprep.subr.bf16.mxu1 %v12474_v3  ;;  %v7060_v3 = vld [vmem:[%s15421_s20 + $0x558] sm:$0xff]  ;;  %v12300_v19 = vcombine.high %v6932_v15, %v6936_v56  ;;  %v12299_v51 = vcombine.low %v6932_v15, %v6936_v56 }
0x16e5   : > { %v6892_v12 = vld [vmem:[%s15421_s20 + $0x18] sm:$0xff] }
0x16e6   : > { %8664 = vmatpush2.bf16.msra.mxu0 %v12345_v46  ;;  %v12428_v46 = vcombine.high %v7060_v3, %v7064_v25  ;;  %v6896_v50 = vld [vmem:[%s15421_s20 + $0x38] sm:$0xff] }
0x16e7   : > { %8707 = vmatpush2.bf16.msra.mxu1 %v12473_v21  ;;  %8665 = vmatprep.subr.bf16.mxu0 %v12338_v45  ;;  %v6924_v21 = vld [vmem:[%s15421_s20 + $0x118] sm:$0xff] }
0x16e8   : > { %8708 = vmatprep.subr.bf16.mxu1 %v12466_v28  ;;  %v6928_v45 = vld [vmem:[%s15421_s20 + $0x138] sm:$0xff] }
0x16e9   : > { %v7052_v28 = vld [vmem:[%s15421_s20 + $0x518] sm:$0xff]  ;;  %v12292_v8 = vcombine.high %v6924_v21, %v6928_v45 }
0x16ea   : > { %8666 = vmatpush2.bf16.msra.mxu0 %v12337_v55  ;;  %v6920_v55 = vld [vmem:[%s15421_s20 + $0xf8] sm:$0xff]  ;;  %v12419_v62 = vcombine.low %v7052_v28, %v7056_v39 }
0x16eb   : > { %8709 = vmatpush2.bf16.msra.mxu1 %v12465_v27  ;;  %8667 = vmatprep.subr.bf16.mxu0 %v12330_v20  ;;  %v7044_v27 = vld [vmem:[%s15421_s20 + $0x4d8] sm:$0xff]  ;;  %v12284_v38 = vcombine.high %v6916_v47, %v6920_v55 }
0x16ec   : > { %8710 = vmatprep.subr.bf16.mxu1 %v12458_v58  ;;  %v7048_v20 = vld [vmem:[%s15421_s20 + $0x4f8] sm:$0xff]  ;;  %v12291_v58 = vcombine.low %v6924_v21, %v6928_v45 }
0x16ed   : > { %v12412_v7 = vcombine.high %v7044_v27, %v7048_v20  ;;  %v12411_v22 = vcombine.low %v7044_v27, %v7048_v20  ;;  %v6996_v20 = vld [vmem:[%s15421_s20 + $0x358] sm:$0xff] }
0x16ee   : > { %8668 = vmatpush2.bf16.msra.mxu0 %v12329_v44  ;;  %v6912_v44 = vld [vmem:[%s15421_s20 + $0xb8] sm:$0xff] }
0x16ef   : > { %8711 = vmatpush2.bf16.msra.mxu1 %v12457_v0  ;;  %8669 = vmatprep.subr.bf16.mxu0 %v12322_v18  ;;  %v7036_v0 = vld [vmem:[%s15421_s20 + $0x498] sm:$0xff]  ;;  %v12276_v23 = vcombine.high %v6908_v32, %v6912_v44 }
0x16f0   : > { %8712 = vmatprep.subr.bf16.mxu1 %v12450_v43  ;;  %v7040_v18 = vld [vmem:[%s15421_s20 + $0x4b8] sm:$0xff]  ;;  %v12283_v43 = vcombine.low %v6916_v47, %v6920_v55 }
0x16f1   : > { %v12404_v17 = vcombine.high %v7036_v0, %v7040_v18  ;;  %v12403_v6 = vcombine.low %v7036_v0, %v7040_v18  ;;  %v6988_v18 = vld [vmem:[%s15421_s20 + $0x318] sm:$0xff] }
0x16f2   : > { %8670 = vmatpush2.bf16.msra.mxu0 %v12321_v30  ;;  %v6904_v30 = vld [vmem:[%s15421_s20 + $0x78] sm:$0xff] }
0x16f3   : > { %8713 = vmatpush2.bf16.msra.mxu1 %v12449_v60  ;;  %8725 = vmatprep.subr.bf16.mxu0 %v12316_v29  ;;  %v7028_v60 = vld [vmem:[%s15421_s20 + $0x458] sm:$0xff]  ;;  %v12268_v31 = vcombine.high %v6900_v37, %v6904_v30  ;;  %v12267_v15 = vcombine.low %v6900_v37, %v6904_v30 }
0x16f4   : > { %8768 = vmatprep.subr.bf16.mxu1 %v12444_v48  ;;  %v7032_v29 = vld [vmem:[%s15421_s20 + $0x478] sm:$0xff]  ;;  %v12275_v48 = vcombine.low %v6908_v32, %v6912_v44 }
0x16f5   : > { %8672 = vmatmul.mubr.bf16.vlgmr.msra.gmra.mxu0 %v16677_v53  ;;  %v12395_v56 = vcombine.low %v7028_v60, %v7032_v29 }
0x16f6   : > { %8715 = vmatmul.mubr.bf16.vlgmr.msra.gmra.mxu1 %v16681_v57  ;;  %8726 = vmatpush1.bf16.msra.mxu0 %v12315_v16  ;;  %v12396_v16 = vcombine.high %v7028_v60, %v7032_v29  ;;  %v6980_v29 = vld [vmem:[%s15421_s20 + $0x2d8] sm:$0xff] }
0x16f7   : > { %8757 = vmatprep.mubr.bf16.mxu0 %v16669_v2  ;;  %8769 = vmatpush1.bf16.msra.mxu1 %v12443_v4  ;;  %v12427_v2 = vcombine.low %v7060_v3, %v7064_v25  ;;  %v7020_v4 = vld [vmem:[%s15421_s20 + $0x418] sm:$0xff] }
0x16f8   : > { %8800 = vmatprep.mubr.bf16.mxu1 %v16673_v42  ;;  %8727 = vmatprep.subr.bf16.mxu0 %v12308_v40  ;;  %v12420_v42 = vcombine.high %v7052_v28, %v7056_v39  ;;  %v7024_v40 = vld [vmem:[%s15421_s20 + $0x438] sm:$0xff] }
0x16f9   : > { %8770 = vmatprep.subr.bf16.mxu1 %v12436_v24  ;;  %v12260_v24 = vcombine.high %v6892_v12, %v6896_v50  ;;  %v12388_v3 = vcombine.high %v7020_v4, %v7024_v40  ;;  %v7012_v25 = vld [vmem:[%s15421_s20 + $0x3d8] sm:$0xff]  ;;  %v12387_v21 = vcombine.low %v7020_v4, %v7024_v40 }
0x16fa   : > { %8728 = vmatpush1.bf16.msra.mxu0 %v12307_v5  ;;  %v7016_v5 = vld [vmem:[%s15421_s20 + $0x3f8] sm:$0xff] }
0x16fb   : > { %8771 = vmatpush1.bf16.msra.mxu1 %v12435_v11  ;;  %8729 = vmatprep.subr.bf16.mxu0 %v12300_v19  ;;  %v7140_v11 = vld [vmem:[%s15421_s20 + $0x7d8] sm:$0xff]  ;;  %v12380_v45 = vcombine.high %v7012_v25, %v7016_v5 }
0x16fc   : > { %8772 = vmatprep.subr.bf16.mxu1 %v12428_v46  ;;  %v7144_v19 = vld [vmem:[%s15421_s20 + $0x7f8] sm:$0xff]  ;;  %v12259_v46 = vcombine.low %v6892_v12, %v6896_v50 }
0x16fd   : > { %v12508_v28 = vcombine.high %v7140_v11, %v7144_v19  ;;  %v7004_v39 = vld [vmem:[%s15421_s20 + $0x398] sm:$0xff]  ;;  %v12507_v47 = vcombine.low %v7140_v11, %v7144_v19 }
0x16fe   : > { %8730 = vmatpush1.bf16.msra.mxu0 %v12299_v51  ;;  %v7008_v51 = vld [vmem:[%s15421_s20 + $0x3b8] sm:$0xff] }
0x16ff   : > { %8773 = vmatpush1.bf16.msra.mxu1 %v12427_v2  ;;  %8731 = vmatprep.subr.bf16.mxu0 %v12292_v8  ;;  %v7132_v2 = vld [vmem:[%s15421_s20 + $0x798] sm:$0xff]  ;;  %v12372_v55 = vcombine.high %v7004_v39, %v7008_v51 }
0x1700   : > { %8774 = vmatprep.subr.bf16.mxu1 %v12420_v42  ;;  %v7136_v8 = vld [vmem:[%s15421_s20 + $0x7b8] sm:$0xff]  ;;  %v12379_v42 = vcombine.low %v7012_v25, %v7016_v5 }
0x1701   : > { %v12500_v27 = vcombine.high %v7132_v2, %v7136_v8  ;;  %v12499_v32 = vcombine.low %v7132_v2, %v7136_v8  ;;  %v6972_v40 = vld [vmem:[%s15421_s20 + $0x298] sm:$0xff] }
0x1702   : > { %8732 = vmatpush1.bf16.msra.mxu0 %v12291_v58  ;;  %v7000_v58 = vld [vmem:[%s15421_s20 + $0x378] sm:$0xff] }
0x1703   : > { %8775 = vmatpush1.bf16.msra.mxu1 %v12419_v62  ;;  %8733 = vmatprep.subr.bf16.mxu0 %v12284_v38  ;;  %v7124_v62 = vld [vmem:[%s15421_s20 + $0x758] sm:$0xff]  ;;  %v12364_v44 = vcombine.high %v6996_v20, %v7000_v58 }
0x1704   : > { %8776 = vmatprep.subr.bf16.mxu1 %v12412_v7  ;;  %v7128_v38 = vld [vmem:[%s15421_s20 + $0x778] sm:$0xff]  ;;  %v12371_v7 = vcombine.low %v7004_v39, %v7008_v51 }
0x1705   : > { %v12492_v0 = vcombine.high %v7124_v62, %v7128_v38  ;;  %v12491_v37 = vcombine.low %v7124_v62, %v7128_v38  ;;  %v6964_v19 = vld [vmem:[%s15421_s20 + $0x258] sm:$0xff] }
0x1706   : > { %8734 = vmatpush1.bf16.msra.mxu0 %v12283_v43  ;;  %v6992_v43 = vld [vmem:[%s15421_s20 + $0x338] sm:$0xff] }
0x1707   : > { %8777 = vmatpush1.bf16.msra.mxu1 %v12411_v22  ;;  %8735 = vmatprep.subr.bf16.mxu0 %v12276_v23  ;;  %v7116_v22 = vld [vmem:[%s15421_s20 + $0x718] sm:$0xff]  ;;  %v12356_v30 = vcombine.high %v6988_v18, %v6992_v43 }
0x1708   : > { %8778 = vmatprep.subr.bf16.mxu1 %v12404_v17  ;;  %v7120_v23 = vld [vmem:[%s15421_s20 + $0x738] sm:$0xff]  ;;  %v12363_v17 = vcombine.low %v6996_v20, %v7000_v58 }
0x1709   : > { %v12484_v60 = vcombine.high %v7116_v22, %v7120_v23  ;;  %v12483_v12 = vcombine.low %v7116_v22, %v7120_v23  ;;  %v6956_v8 = vld [vmem:[%s15421_s20 + $0x218] sm:$0xff]  ;;  %v14032_v22 = vld [vmem:[%s15425_s29 + $0x2e0] ss:$16 sps:$4 sm:$0xff]  }
0x170a   : > { %8736 = vmatpush1.bf16.msra.mxu0 %v12275_v48  ;;  %v6984_v48 = vld [vmem:[%s15421_s20 + $0x2f8] sm:$0xff] }
0x170b   : > { %8779 = vmatpush1.bf16.msra.mxu1 %v12403_v6  ;;  %8737 = vmatprep.subr.bf16.mxu0 %v12268_v31  ;;  %v7108_v6 = vld [vmem:[%s15421_s20 + $0x6d8] sm:$0xff]  ;;  %v12348_v50 = vcombine.high %v6980_v29, %v6984_v48 }
0x170c   : > { %8780 = vmatprep.subr.bf16.mxu1 %v12396_v16  ;;  %v7112_v31 = vld [vmem:[%s15421_s20 + $0x6f8] sm:$0xff]  ;;  %v12355_v16 = vcombine.low %v6988_v18, %v6992_v43  ;;  %v16891_v18 = vld [vmem:[%s15423_s18] sm:$0xff] }
0x170d   : > { %v12476_v4 = vcombine.high %v7108_v6, %v7112_v31  ;;  %v12475_v25 = vcombine.low %v7108_v6, %v7112_v31  ;;  %v14022_v43 = vld [vmem:[%s15425_s29 + $0xc4] ss:$16 sps:$4 sm:$0xff]   ;;  %v7154_v23 = vrot.slane %v16891_v18, %v15725_v41  ;;  %v14038_v31 = vld [vmem:[%s15425_s29 + $0x2c0] ss:$16 sps:$4 sm:$0xff]  }
0x170e   : > { %8738 = vmatpush1.bf16.msra.mxu0 %v12267_v15  ;;  %v6976_v15 = vld [vmem:[%s15421_s20 + $0x2b8] sm:$0xff]  ;;  %v14025_v6 = vld [vmem:[%s15425_s29 + $0xa4] ss:$16 sps:$4 sm:$0xff]  }
0x170f   : > { %8781 = vmatpush1.bf16.msra.mxu1 %v12395_v56  ;;  %8739 = vmatprep.subr.bf16.mxu0 %v12260_v24  ;;  %v7100_v56 = vld [vmem:[%s15421_s20 + $0x698] sm:$0xff]  ;;  %v12340_v5 = vcombine.high %v6972_v40, %v6976_v15 }
0x1710   : > { %8782 = vmatprep.subr.bf16.mxu1 %v12388_v3  ;;  %v7104_v24 = vld [vmem:[%s15421_s20 + $0x6b8] sm:$0xff]  ;;  %v12347_v3 = vcombine.low %v6980_v29, %v6984_v48 }
0x1711   : > { %v12468_v11 = vcombine.high %v7100_v56, %v7104_v24  ;;  %v12467_v39 = vcombine.low %v7100_v56, %v7104_v24 }
0x1712   : > { %8740 = vmatpush1.bf16.msra.mxu0 %v12259_v46  ;;  %v6968_v46 = vld [vmem:[%s15421_s20 + $0x278] sm:$0xff] }
0x1713   : > { %8783 = vmatpush1.bf16.msra.mxu1 %v12387_v21  ;;  %8741 = vmatprep.subr.bf16.mxu0 %v12380_v45  ;;  %v7092_v21 = vld [vmem:[%s15421_s20 + $0x658] sm:$0xff]  ;;  %v12332_v51 = vcombine.high %v6964_v19, %v6968_v46 }
0x1714   : > { %8784 = vmatprep.subr.bf16.mxu1 %v12508_v28  ;;  %v7096_v45 = vld [vmem:[%s15421_s20 + $0x678] sm:$0xff]  ;;  %v12339_v28 = vcombine.low %v6972_v40, %v6976_v15  ;;  %v14028_v40 = vld [vmem:[%s15425_s29 + $0x84] ss:$16 sps:$4 sm:$0xff]   ;;  %v14044_v15 = vld [vmem:[%s15425_s29 + $0x2a0] ss:$16 sps:$4 sm:$0xff]  }
0x1715   : > { %v12460_v2 = vcombine.high %v7092_v21, %v7096_v45  ;;  %v12459_v20 = vcombine.low %v7092_v21, %v7096_v45 }
0x1716   : > { %8742 = vmatpush2.bf16.msra.mxu0 %v12379_v42  ;;  %v6960_v42 = vld [vmem:[%s15421_s20 + $0x238] sm:$0xff] }
0x1717   : > { %8785 = vmatpush2.bf16.msra.mxu1 %v12507_v47  ;;  %8743 = vmatprep.subr.bf16.mxu0 %v12372_v55  ;;  %v7084_v47 = vld [vmem:[%s15421_s20 + $0x618] sm:$0xff]  ;;  %v12324_v58 = vcombine.high %v6956_v8, %v6960_v42  ;;  %v12323_v38 = vcombine.low %v6956_v8, %v6960_v42  ;;  %v14056_v8 = vld [vmem:[%s15425_s29 + $0x260] ss:$16 sps:$4 sm:$0xff]   ;;  %v14064_v42 = vld [vmem:[%s15425_s29 + $0x244] ss:$16 sps:$4 sm:$0xff]  }
0x1718   : > { %8786 = vmatprep.subr.bf16.mxu1 %v12500_v27  ;;  %v7088_v55 = vld [vmem:[%s15421_s20 + $0x638] sm:$0xff]  ;;  %v12331_v27 = vcombine.low %v6964_v19, %v6968_v46  ;;  %v14031_v19 = vld [vmem:[%s15425_s29 + $0x64] ss:$16 sps:$4 sm:$0xff]   ;;  %v14050_v46 = vld [vmem:[%s15425_s29 + $0x280] ss:$16 sps:$4 sm:$0xff]  }
0x1719   : > { %v12452_v62 = vcombine.high %v7084_v47, %v7088_v55 }
0x171a   : > { %8744 = vmatpush2.bf16.msra.mxu0 %v12371_v7  ;;  %v12451_v7 = vcombine.low %v7084_v47, %v7088_v55  ;;  %v14035_v47 = vld [vmem:[%s15425_s29 + $0x40] ss:$16 sps:$4 sm:$0xff]   ;;  %v14043_v55 = vld [vmem:[%s15425_s29 + $0x24] ss:$16 sps:$4 sm:$0xff]  }
0x171b   : > { %8787 = vmatpush2.bf16.msra.mxu1 %v12499_v32  ;;  %8745 = vmatprep.subr.bf16.mxu0 %v12364_v44  ;;  %v14019_v32 = vld [vmem:[%s15425_s29 + $0xe4] ss:$16 sps:$4 sm:$0xff]  }
0x171c   : > { %8788 = vmatprep.subr.bf16.mxu1 %v12492_v0  ;;  %v14034_v44 = vld [vmem:[%s15425_s29 + $0x2e4] ss:$16 sps:$4 sm:$0xff]   ;;  %v14017_v0 = vld [vmem:[%s15425_s29 + $0xe0] ss:$16 sps:$4 sm:$0xff]  }
0x171e   : > { %8746 = vmatpush2.bf16.msra.mxu0 %v12363_v17  ;;  %v14040_v17 = vld [vmem:[%s15425_s29 + $0x2c4] ss:$16 sps:$4 sm:$0xff]  }
0x171f   : > { %8789 = vmatpush2.bf16.msra.mxu1 %v12491_v37  ;;  %8747 = vmatprep.subr.bf16.mxu0 %v12356_v30 }
0x1720   : > { %8790 = vmatprep.subr.bf16.mxu1 %v12484_v60  ;;  %v14020_v60 = vld [vmem:[%s15425_s29 + $0xc0] ss:$16 sps:$4 sm:$0xff]  }
0x1722   : > { %8748 = vmatpush2.bf16.msra.mxu0 %v12355_v16 }
0x1723   : > { %8791 = vmatpush2.bf16.msra.mxu1 %v12483_v12  ;;  %8749 = vmatprep.subr.bf16.mxu0 %v12348_v50 }
0x1724   : > { %8792 = vmatprep.subr.bf16.mxu1 %v12476_v4 }
0x1726   : > { %8750 = vmatpush2.bf16.msra.mxu0 %v12347_v3  ;;  %v14052_v3 = vld [vmem:[%s15425_s29 + $0x284] ss:$16 sps:$4 sm:$0xff]  }
0x1727   : > { %8793 = vmatpush2.bf16.msra.mxu1 %v12475_v25  ;;  %8751 = vmatprep.subr.bf16.mxu0 %v12340_v5 }
0x1728   : > { %8794 = vmatprep.subr.bf16.mxu1 %v12468_v11  ;;  %v14026_v11 = vld [vmem:[%s15425_s29 + $0x80] ss:$16 sps:$4 sm:$0xff]  }
0x172a   : > { %8752 = vmatpush2.bf16.msra.mxu0 %v12339_v28  ;;  %v14058_v28 = vld [vmem:[%s15425_s29 + $0x264] ss:$16 sps:$4 sm:$0xff]  }
0x172b   : > { %8795 = vmatpush2.bf16.msra.mxu1 %v12467_v39  ;;  %8753 = vmatprep.subr.bf16.mxu0 %v12332_v51  ;;  %v14029_v51 = vld [vmem:[%s15425_s29 + $0x60] ss:$16 sps:$4 sm:$0xff]  }
0x172c   : > { %8796 = vmatprep.subr.bf16.mxu1 %v12460_v2  ;;  %v14037_v2 = vld [vmem:[%s15425_s29 + $0x44] ss:$16 sps:$4 sm:$0xff]  }
0x172e   : > { %8754 = vmatpush2.bf16.msra.mxu0 %v12331_v27  ;;  %v14062_v27 = vld [vmem:[%s15425_s29 + $0x240] ss:$16 sps:$4 sm:$0xff]  }
0x172f   : > { %8797 = vmatpush2.bf16.msra.mxu1 %v12459_v20  ;;  %8755 = vmatprep.subr.bf16.mxu0 %v12324_v58  ;;  %v14070_v20 = vld [vmem:[%s15425_s29 + $0x224] ss:$16 sps:$4 sm:$0xff]   ;;  %v14041_v58 = vld [vmem:[%s15425_s29 + $0x20] ss:$16 sps:$4 sm:$0xff]  }
0x1730   : > { %8798 = vmatprep.subr.bf16.mxu1 %v12452_v62  ;;  %v14049_v62 = vld [vmem:[%s15425_s29 + $0x4] ss:$16 sps:$4 sm:$0xff]  }
0x1732   : > { %8756 = vmatpush2.bf16.msra.mxu0 %v12323_v38  ;;  %v14068_v38 = vld [vmem:[%s15425_s29 + $0x220] ss:$16 sps:$4 sm:$0xff]  }
0x1733   : > { %8799 = vmatpush2.bf16.msra.mxu1 %v12451_v7  ;;  %10393 = vmatprep.subr.bf16.mxu0 %v14019_v32  ;;  %v14076_v7 = vld [vmem:[%s15425_s29 + $0x204] ss:$16 sps:$4 sm:$0xff]   ;;  %v14047_v32 = vld [vmem:[%s15425_s29] ss:$16 sps:$4 sm:$0xff]  }
0x1734   : > { %10436 = vmatprep.subr.bf16.mxu1 %v14034_v44  ;;  %v14055_v44 = vld [vmem:[%s15425_s29 + $0x1e4] ss:$16 sps:$4 sm:$0xff]  }
0x1735   : > { %8758 = vmatmul.mubr.bf16.vlgmr.msra.gmra.mxu0 %v16677_v53  ;;  %v16899_v37 = vpop.f32.mrf.mxu0  ;;  %v16901_v30 = vpop.f32.mrf.mxu1  ;;  %v14046_v53 = vld [vmem:[%s15425_s29 + $0x2a4] ss:$16 sps:$4 sm:$0xff]  }
0x1736   : > { %8801 = vmatmul.mubr.bf16.vlgmr.msra.gmra.mxu1 %v16681_v57  ;;  %10394 = vmatpush1.bf16.msra.mxu0 %v14017_v0  ;;  %v14023_v57 = vld [vmem:[%s15425_s29 + $0xa0] ss:$16 sps:$4 sm:$0xff]  }
0x1737   : > { %v8503_v29 = vpop.f32.mrf.mxu0  ;;  %v8546_v48 = vpop.f32.mrf.mxu1  ;;  %10395 = vmatprep.subr.bf16.mxu0 %v14022_v43  ;;  %10437 = vmatpush1.bf16.msra.mxu1 %v14032_v22  ;;  %v14074_v0 = vld [vmem:[%s15425_s29 + $0x200] ss:$16 sps:$4 sm:$0xff]   ;;  %v14082_v43 = vld [vmem:[%s15425_s29 + $0x3e4] ss:$16 sps:$4 sm:$0xff]  }
0x1738   : > { %v8504_v16 = vadd.f32 %v8503_v29, %v7154_v23  ;;  %10438 = vmatprep.subr.bf16.mxu1 %v14040_v17  ;;  %v14053_v22 = vld [vmem:[%s15425_s29 + $0x1e0] ss:$16 sps:$4 sm:$0xff]  }
0x1739   : > { %v16908_v12 = vpop.f32.mrf.mxu0  ;;  %v16910_v50 = vpop.f32.mrf.mxu1  ;;  %v14080_v17 = vld [vmem:[%s15425_s29 + $0x3e0] ss:$16 sps:$4 sm:$0xff]  }
0x173a   : > { %10396 = vmatpush1.bf16.msra.mxu0 %v14020_v60  ;;  %v8547_v56 = vadd.f32 %v8546_v48, %v8504_v16  ;;  %v14088_v60 = vld [vmem:[%s15425_s29 + $0x3c4] ss:$16 sps:$4 sm:$0xff]   ;;  %v14059_v29 = vld [vmem:[%s15425_s29 + $0x1c0] ss:$16 sps:$4 sm:$0xff]  }
0x173b   : > { %v8507_v4 = vpop.f32.mrf.mxu0  ;;  %10397 = vmatprep.subr.bf16.mxu0 %v14025_v6  ;;  %10439 = vmatpush1.bf16.msra.mxu1 %v14038_v31  ;;  %v8550_v25 = vpop.f32.mrf.mxu1  ;;  %v14067_v48 = vld [vmem:[%s15425_s29 + $0x1a4] ss:$16 sps:$4 sm:$0xff]   ;;  %v14086_v6 = vld [vmem:[%s15425_s29 + $0x3c0] ss:$16 sps:$4 sm:$0xff]  }
0x173c   : > { %v8508_v24 = vadd.f32 %v8507_v4, %v7154_v23  ;;  %10440 = vmatprep.subr.bf16.mxu1 %v14046_v53  ;;  %v8812_v21 = vmax.f32 %v8547_v56, 0.0  ;;  %v14061_v23 = vld [vmem:[%s15425_s29 + $0x1c4] ss:$16 sps:$4 sm:$0xff]   ;;  %v14065_v16 = vld [vmem:[%s15425_s29 + $0x1a0] ss:$16 sps:$4 sm:$0xff]  }
0x173d   : > { %v14094_v31 = vld [vmem:[%s15425_s29 + $0x3a4] ss:$16 sps:$4 sm:$0xff]   ;;  %v14098_v56 = vld [vmem:[%s15425_s29 + $0x380] ss:$16 sps:$4 sm:$0xff]  }
0x173e   : > { %v8551_v5 = vadd.f32 %v8550_v25, %v8508_v24  ;;  %10398 = vmatpush1.bf16.msra.mxu0 %v14023_v57  ;;  %v14073_v53 = vld [vmem:[%s15425_s29 + $0x184] ss:$16 sps:$4 sm:$0xff]   ;;  %v14092_v57 = vld [vmem:[%s15425_s29 + $0x3a0] ss:$16 sps:$4 sm:$0xff]  }
0x173f   : > { %10399 = vmatprep.subr.bf16.mxu0 %v14028_v40  ;;  %10441 = vmatpush1.bf16.msra.mxu1 %v14044_v15  ;;  %v14100_v4 = vld [vmem:[%s15425_s29 + $0x384] ss:$16 sps:$4 sm:$0xff]   ;;  %v14071_v40 = vld [vmem:[%s15425_s29 + $0x180] ss:$16 sps:$4 sm:$0xff]  }
0x1740   : > { %v8820_v45 = vmax.f32 %v8551_v5, 0.0  ;;  %10442 = vmatprep.subr.bf16.mxu1 %v14052_v3  ;;  %v14079_v15 = vld [vmem:[%s15425_s29 + $0x164] ss:$16 sps:$4 sm:$0xff]   ;;  %v14077_v3 = vld [vmem:[%s15425_s29 + $0x160] ss:$16 sps:$4 sm:$0xff]  }
0x1741   : > { %v14103_v24 = vld [vmem:[%s15425_s29 + $0x364] ss:$16 sps:$4 sm:$0xff]   ;;  %v14101_v5 = vld [vmem:[%s15425_s29 + $0x360] ss:$16 sps:$4 sm:$0xff]  }
0x1742   : > { %v16920_v39 = vpack.c.bf16 %v8820_v45, %v8812_v21  ;;  %10400 = vmatpush1.bf16.msra.mxu0 %v14026_v11  ;;  %v14085_v25 = vld [vmem:[%s15425_s29 + $0x144] ss:$16 sps:$4 sm:$0xff]  }
0x1743   : > { %10401 = vmatprep.subr.bf16.mxu0 %v14031_v19  ;;  %10443 = vmatpush1.bf16.msra.mxu1 %v14050_v46  ;;  %v14106_v11 = vld [vmem:[%s15425_s29 + $0x344] ss:$16 sps:$4 sm:$0xff]   ;;  %v7150_v19 = vrot.slane %v16891_v18, %v15900_v33  ;;  %v14083_v46 = vld [vmem:[%s15425_s29 + $0x140] ss:$16 sps:$4 sm:$0xff]  }
0x1744   : > { %10425 = vmatprep.mubr.bf16.mxu0 %v16920_v39  ;;  %10444 = vmatprep.subr.bf16.mxu1 %v14058_v28  ;;  %v14091_v45 = vld [vmem:[%s15425_s29 + $0x124] ss:$16 sps:$4 sm:$0xff]   ;;  %v14104_v28 = vld [vmem:[%s15425_s29 + $0x340] ss:$16 sps:$4 sm:$0xff]  }
0x1745   : > { %v8506_v21 = vadd.f32 %v16908_v12, %v7150_v19  ;;  %v14107_v12 = vld [vmem:[%s15425_s29 + $0x320] ss:$16 sps:$4 sm:$0xff]  }
0x1746   : > { %10402 = vmatpush1.bf16.msra.mxu0 %v14029_v51  ;;  %v14109_v51 = vld [vmem:[%s15425_s29 + $0x324] ss:$16 sps:$4 sm:$0xff]  }
0x1747   : > { %10403 = vmatprep.subr.bf16.mxu0 %v14037_v2  ;;  %10445 = vmatpush1.bf16.msra.mxu1 %v14056_v8  ;;  %v8502_v2 = vadd.f32 %v16899_v37, %v7150_v19  ;;  %v14089_v8 = vld [vmem:[%s15425_s29 + $0x120] ss:$16 sps:$4 sm:$0xff]  }
0x1748   : > { %10446 = vmatprep.subr.bf16.mxu1 %v14064_v42  ;;  %v8549_v42 = vadd.f32 %v16910_v50, %v8506_v21  ;;  %v14163_v50 = vld [vmem:[%s15425_s29 + $0x6e4] ss:$16 sps:$4 sm:$0xff]  }
0x174a   : > { %10404 = vmatpush1.bf16.msra.mxu0 %v14035_v47  ;;  %v14097_v47 = vld [vmem:[%s15425_s29 + $0x104] ss:$16 sps:$4 sm:$0xff]   ;;  %v8819_v37 = vmax.f32 %v8549_v42, 0.0 }
0x174b   : > { %10405 = vmatprep.subr.bf16.mxu0 %v14043_v55  ;;  %10447 = vmatpush1.bf16.msra.mxu1 %v14062_v27  ;;  %v14112_v55 = vld [vmem:[%s15425_s29 + $0x304] ss:$16 sps:$4 sm:$0xff]   ;;  %v8545_v27 = vadd.f32 %v16901_v30, %v8502_v2  ;;  %v14125_v2 = vld [vmem:[%s15425_s29 + $0x460] ss:$16 sps:$4 sm:$0xff]  }
0x174c   : > { %10448 = vmatprep.subr.bf16.mxu1 %v14070_v20  ;;  %v14095_v20 = vld [vmem:[%s15425_s29 + $0x100] ss:$16 sps:$4 sm:$0xff]   ;;  %v14118_v30 = vld [vmem:[%s15425_s29 + $0x4c4] ss:$16 sps:$4 sm:$0xff]  }
0x174e   : > { %10406 = vmatpush1.bf16.msra.mxu0 %v14041_v58  ;;  %v14110_v58 = vld [vmem:[%s15425_s29 + $0x300] ss:$16 sps:$4 sm:$0xff]  }
0x174f   : > { %10407 = vmatprep.subr.bf16.mxu0 %v14049_v62  ;;  %10449 = vmatpush1.bf16.msra.mxu1 %v14068_v38  ;;  %v14115_v62 = vld [vmem:[%s15425_s29 + $0x4e4] ss:$16 sps:$4 sm:$0xff]   ;;  %v8811_v38 = vmax.f32 %v8545_v27, 0.0  ;;  %v14167_v27 = vld [vmem:[%s15425_s29 + $0x6c0] ss:$16 sps:$4 sm:$0xff]  }
0x1750   : > { %10450 = vmatprep.subr.bf16.mxu1 %v14076_v7  ;;  %v14113_v7 = vld [vmem:[%s15425_s29 + $0x4e0] ss:$16 sps:$4 sm:$0xff]  }
0x1752   : > { %10408 = vmatpush1.bf16.msra.mxu0 %v14047_v32  ;;  %v16978_v32 = vpack.c.bf16 %v8819_v37, %v8811_v38  ;;  %v14175_v37 = vld [vmem:[%s15425_s29 + $0x6a4] ss:$16 sps:$4 sm:$0xff]  }
0x1753   : > { %10409 = vmatprep.subr.bf16.mxu0 %v14055_v44  ;;  %10451 = vmatpush1.bf16.msra.mxu1 %v14074_v0  ;;  %v7162_v44 = vrot.slane %v16891_v18, %v15814_v63  ;;  %v7158_v0 = vrot.slane %v16891_v18, %v15807_v59  ;;  %v14181_v38 = vld [vmem:[%s15425_s29 + $0x684] ss:$16 sps:$4 sm:$0xff]  }
0x1754   : > { %10452 = vmatprep.subr.bf16.mxu1 %v14082_v43 }
0x1756   : > { %10410 = vmatpush2.bf16.msra.mxu0 %v14053_v22 }
0x1757   : > { %10411 = vmatprep.subr.bf16.mxu0 %v14061_v23  ;;  %10453 = vmatpush2.bf16.msra.mxu1 %v14080_v17  ;;  %v14116_v23 = vld [vmem:[%s15425_s29 + $0x4c0] ss:$16 sps:$4 sm:$0xff]  }
0x1758   : > { %10454 = vmatprep.subr.bf16.mxu1 %v14088_v60 }
0x175a   : > { %10412 = vmatpush2.bf16.msra.mxu0 %v14059_v29  ;;  %v14121_v29 = vld [vmem:[%s15425_s29 + $0x4a4] ss:$16 sps:$4 sm:$0xff]  }
0x175b   : > { %10413 = vmatprep.subr.bf16.mxu0 %v14067_v48  ;;  %10455 = vmatpush2.bf16.msra.mxu1 %v14086_v6 }
0x175c   : > { %10456 = vmatprep.subr.bf16.mxu1 %v14094_v31 }
0x175e   : > { %10414 = vmatpush2.bf16.msra.mxu0 %v14065_v16 }
0x175f   : > { %10415 = vmatprep.subr.bf16.mxu0 %v14073_v53  ;;  %10457 = vmatpush2.bf16.msra.mxu1 %v14092_v57  ;;  %v14119_v57 = vld [vmem:[%s15425_s29 + $0x4a0] ss:$16 sps:$4 sm:$0xff]  }
0x1760   : > { %10458 = vmatprep.subr.bf16.mxu1 %v14100_v4 }
0x1762   : > { %10416 = vmatpush2.bf16.msra.mxu0 %v14071_v40  ;;  %v14124_v40 = vld [vmem:[%s15425_s29 + $0x484] ss:$16 sps:$4 sm:$0xff]  }
0x1763   : > { %10417 = vmatprep.subr.bf16.mxu0 %v14079_v15  ;;  %10459 = vmatpush2.bf16.msra.mxu1 %v14098_v56 }
0x1764   : > { %10460 = vmatprep.subr.bf16.mxu1 %v14103_v24 }
0x1766   : > { %10418 = vmatpush2.bf16.msra.mxu0 %v14077_v3 }
0x1767   : > { %10419 = vmatprep.subr.bf16.mxu0 %v14085_v25  ;;  %10461 = vmatpush2.bf16.msra.mxu1 %v14101_v5 }
0x1768   : > { %10462 = vmatprep.subr.bf16.mxu1 %v14106_v11  ;;  %v14122_v11 = vld [vmem:[%s15425_s29 + $0x480] ss:$16 sps:$4 sm:$0xff]  }
0x176a   : > { %10420 = vmatpush2.bf16.msra.mxu0 %v14083_v46  ;;  %v14127_v46 = vld [vmem:[%s15425_s29 + $0x464] ss:$16 sps:$4 sm:$0xff]  }
0x176b   : > { %10421 = vmatprep.subr.bf16.mxu0 %v14091_v45  ;;  %10463 = vmatpush2.bf16.msra.mxu1 %v14104_v28 }
0x176c   : > { %10464 = vmatprep.subr.bf16.mxu1 %v14109_v51 }
0x176e   : > { %10422 = vmatpush2.bf16.msra.mxu0 %v14089_v8  ;;  %v14161_v8 = vld [vmem:[%s15425_s29 + $0x6e0] ss:$16 sps:$4 sm:$0xff]  }
0x176f   : > { %10423 = vmatprep.subr.bf16.mxu0 %v14097_v47  ;;  %10465 = vmatpush2.bf16.msra.mxu1 %v14107_v12  ;;  %v14130_v47 = vld [vmem:[%s15425_s29 + $0x444] ss:$16 sps:$4 sm:$0xff]  }
0x1770   : > { %10466 = vmatprep.subr.bf16.mxu1 %v14112_v55  ;;  %v14169_v12 = vld [vmem:[%s15425_s29 + $0x6c4] ss:$16 sps:$4 sm:$0xff]   ;;  %v14128_v55 = vld [vmem:[%s15425_s29 + $0x440] ss:$16 sps:$4 sm:$0xff]  }
0x1772   : > { %10424 = vmatpush2.bf16.msra.mxu0 %v14095_v20  ;;  %v14133_v20 = vld [vmem:[%s15425_s29 + $0x424] ss:$16 sps:$4 sm:$0xff]  }
0x1773   : > { %10467 = vmatpush2.bf16.msra.mxu1 %v14110_v58  ;;  %10479 = vmatprep.subr.bf16.mxu0 %v14115_v62  ;;  %v14131_v58 = vld [vmem:[%s15425_s29 + $0x420] ss:$16 sps:$4 sm:$0xff]  }
0x1774   : > { %10522 = vmatprep.subr.bf16.mxu1 %v14163_v50  ;;  %v14173_v62 = vld [vmem:[%s15425_s29 + $0x6a0] ss:$16 sps:$4 sm:$0xff]   ;;  %v14136_v50 = vld [vmem:[%s15425_s29 + $0x404] ss:$16 sps:$4 sm:$0xff]  }
0x1775   : > { %v8587_v43 = vpop.f32.mrf.mxu0  ;;  %v8630_v22 = vpop.f32.mrf.mxu1  ;;  %10426 = vmatmul.mubr.bf16.vlgmr.msra.gmra.mxu0 %v16978_v32 }
0x1776   : > { %10480 = vmatpush1.bf16.msra.mxu0 %v14113_v7  ;;  %v8588_v6 = vadd.f32 %v8587_v43, %v7158_v0  ;;  %v14134_v7 = vld [vmem:[%s15425_s29 + $0x400] ss:$16 sps:$4 sm:$0xff]  }
0x1777   : > { %v8589_v17 = vpop.f32.mrf.mxu0  ;;  %v8632_v60 = vpop.f32.mrf.mxu1  ;;  %10481 = vmatprep.subr.bf16.mxu0 %v14118_v30  ;;  %v14179_v30 = vld [vmem:[%s15425_s29 + $0x680] ss:$16 sps:$4 sm:$0xff]  }
0x1778   : > { %v8590_v48 = vadd.f32 %v8589_v17, %v7162_v44  ;;  %v8631_v3 = vadd.f32 %v8630_v22, %v8588_v6  ;;  %v14137_v43 = vld [vmem:[%s15425_s29 + $0x5e0] ss:$16 sps:$4 sm:$0xff]   ;;  %v14193_v17 = vld [vmem:[%s15425_s29 + $0x644] ss:$16 sps:$4 sm:$0xff]  }
0x1779   : > { %v8591_v31 = vpop.f32.mrf.mxu0  ;;  %v8634_v16 = vpop.f32.mrf.mxu1  ;;  %v14185_v22 = vld [vmem:[%s15425_s29 + $0x660] ss:$16 sps:$4 sm:$0xff]   ;;  %v14199_v6 = vld [vmem:[%s15425_s29 + $0x624] ss:$16 sps:$4 sm:$0xff]  }
0x177a   : > { %v8592_v53 = vadd.f32 %v8591_v31, %v7158_v0  ;;  %10482 = vmatpush1.bf16.msra.mxu0 %v14116_v23  ;;  %v8633_v15 = vadd.f32 %v8632_v60, %v8590_v48  ;;  %v8813_v28 = vmax.f32 %v8631_v3, 0.0  ;;  %v14187_v0 = vld [vmem:[%s15425_s29 + $0x664] ss:$16 sps:$4 sm:$0xff]   ;;  %v14140_v60 = vld [vmem:[%s15425_s29 + $0x5c0] ss:$16 sps:$4 sm:$0xff]  }
0x177b   : > { %v8593_v4 = vpop.f32.mrf.mxu0  ;;  %10483 = vmatprep.subr.bf16.mxu0 %v14121_v29  ;;  %v8636_v25 = vpop.f32.mrf.mxu1  ;;  %v14142_v23 = vld [vmem:[%s15425_s29 + $0x5c4] ss:$16 sps:$4 sm:$0xff]   ;;  %v14191_v29 = vld [vmem:[%s15425_s29 + $0x640] ss:$16 sps:$4 sm:$0xff]  }
0x177c   : > { %v8635_v56 = vadd.f32 %v8634_v16, %v8592_v53  ;;  %v8594_v24 = vadd.f32 %v8593_v4, %v7162_v44  ;;  %v8814_v21 = vmax.f32 %v8633_v15, 0.0  ;;  %v14139_v44 = vld [vmem:[%s15425_s29 + $0x5e4] ss:$16 sps:$4 sm:$0xff]   ;;  %v14143_v31 = vld [vmem:[%s15425_s29 + $0x5a0] ss:$16 sps:$4 sm:$0xff]  }
0x177d   : > { %v14145_v48 = vld [vmem:[%s15425_s29 + $0x5a4] ss:$16 sps:$4 sm:$0xff]   ;;  %v14197_v16 = vld [vmem:[%s15425_s29 + $0x620] ss:$16 sps:$4 sm:$0xff]  }
0x177e   : > { %v8637_v5 = vadd.f32 %v8636_v25, %v8594_v24  ;;  %10484 = vmatpush1.bf16.msra.mxu0 %v14119_v57  ;;  %v8821_v19 = vmax.f32 %v8635_v56, 0.0  ;;  %v14148_v53 = vld [vmem:[%s15425_s29 + $0x584] ss:$16 sps:$4 sm:$0xff]   ;;  %v14146_v4 = vld [vmem:[%s15425_s29 + $0x580] ss:$16 sps:$4 sm:$0xff]  }
0x177f   : > { %10485 = vmatprep.subr.bf16.mxu0 %v14124_v40  ;;  %v14205_v57 = vld [vmem:[%s15425_s29 + $0x604] ss:$16 sps:$4 sm:$0xff]   ;;  %v14203_v40 = vld [vmem:[%s15425_s29 + $0x600] ss:$16 sps:$4 sm:$0xff]  }
0x1780   : > { %v8822_v45 = vmax.f32 %v8637_v5, 0.0  ;;  %v16996_v42 = vpack.c.bf16 %v8821_v19, %v8813_v28  ;;  %v14151_v15 = vld [vmem:[%s15425_s29 + $0x564] ss:$16 sps:$4 sm:$0xff]   ;;  %v14149_v24 = vld [vmem:[%s15425_s29 + $0x560] ss:$16 sps:$4 sm:$0xff]  }
0x1781   : > { %v14211_v56 = vld [vmem:[%s15425_s29 + $0x7e4] ss:$16 sps:$4 sm:$0xff]   ;;  %v14209_v3 = vld [vmem:[%s15425_s29 + $0x7e0] ss:$16 sps:$4 sm:$0xff]  }
0x1782   : > { %v16992_v51 = vpack.c.bf16 %v8822_v45, %v8814_v21  ;;  %10486 = vmatpush1.bf16.msra.mxu0 %v14122_v11  ;;  %v14154_v25 = vld [vmem:[%s15425_s29 + $0x544] ss:$16 sps:$4 sm:$0xff]   ;;  %v14152_v11 = vld [vmem:[%s15425_s29 + $0x540] ss:$16 sps:$4 sm:$0xff]  }
0x1783   : > { %10487 = vmatprep.subr.bf16.mxu0 %v14127_v46  ;;  %v14217_v5 = vld [vmem:[%s15425_s29 + $0x7c4] ss:$16 sps:$4 sm:$0xff]   ;;  %v14215_v19 = vld [vmem:[%s15425_s29 + $0x7c0] ss:$16 sps:$4 sm:$0xff]  }
0x1784   : > { %10468 = vmatprep.mubr.bf16.mxu1 %v16992_v51  ;;  %v14157_v46 = vld [vmem:[%s15425_s29 + $0x524] ss:$16 sps:$4 sm:$0xff]   ;;  %v14155_v45 = vld [vmem:[%s15425_s29 + $0x520] ss:$16 sps:$4 sm:$0xff]  }
0x1785   : > { %10469 = vmatmul.mubr.bf16.vlgmr.msra.gmra.mxu1 %v16996_v42  ;;  %v14223_v21 = vld [vmem:[%s15425_s29 + $0x7a4] ss:$16 sps:$4 sm:$0xff]   ;;  %v14221_v28 = vld [vmem:[%s15425_s29 + $0x7a0] ss:$16 sps:$4 sm:$0xff]  }
0x1786   : > { %10488 = vmatpush1.bf16.msra.mxu0 %v14125_v2  ;;  %10523 = vmatpush1.bf16.msra.mxu1 %v14161_v8  ;;  %v14160_v2 = vld [vmem:[%s15425_s29 + $0x504] ss:$16 sps:$4 sm:$0xff]  }
0x1787   : > { %10489 = vmatprep.subr.bf16.mxu0 %v14130_v47  ;;  %10524 = vmatprep.subr.bf16.mxu1 %v14169_v12  ;;  %v14229_v8 = vld [vmem:[%s15425_s29 + $0x784] ss:$16 sps:$4 sm:$0xff]   ;;  %v14158_v47 = vld [vmem:[%s15425_s29 + $0x500] ss:$16 sps:$4 sm:$0xff]  }
0x1788   : > { %v14227_v12 = vld [vmem:[%s15425_s29 + $0x780] ss:$16 sps:$4 sm:$0xff]  }
0x178a   : > { %10490 = vmatpush1.bf16.msra.mxu0 %v14128_v55  ;;  %10525 = vmatpush1.bf16.msra.mxu1 %v14167_v27  ;;  %v14166_v55 = vld [vmem:[%s15425_s29 + $0xec] ss:$16 sps:$4 sm:$0xff]   ;;  %v14235_v27 = vld [vmem:[%s15425_s29 + $0x764] ss:$16 sps:$4 sm:$0xff]  }
0x178b   : > { %10491 = vmatprep.subr.bf16.mxu0 %v14133_v20  ;;  %10526 = vmatprep.subr.bf16.mxu1 %v14175_v37  ;;  %v14233_v20 = vld [vmem:[%s15425_s29 + $0x760] ss:$16 sps:$4 sm:$0xff]   ;;  %v14241_v37 = vld [vmem:[%s15425_s29 + $0x744] ss:$16 sps:$4 sm:$0xff]  }
0x178e   : > { %10492 = vmatpush1.bf16.msra.mxu0 %v14131_v58  ;;  %10527 = vmatpush1.bf16.msra.mxu1 %v14173_v62  ;;  %v7170_v58 = vrot.slane %v16891_v18, %v1482_v36  ;;  %v7166_v62 = vrot.slane %v16891_v18, %v1478_v34  ;;  %v14253_v34 = vld [vmem:[%s15425_s29 + $0x704] ss:$16 sps:$4 sm:$0xff]  }
0x178f   : > { %10493 = vmatprep.subr.bf16.mxu0 %v14136_v50  ;;  %10528 = vmatprep.subr.bf16.mxu1 %v14181_v38 }
0x1792   : > { %10494 = vmatpush1.bf16.msra.mxu0 %v14134_v7  ;;  %10529 = vmatpush1.bf16.msra.mxu1 %v14179_v30  ;;  %v14239_v7 = vld [vmem:[%s15425_s29 + $0x740] ss:$16 sps:$4 sm:$0xff]  }
0x1793   : > { %10495 = vmatprep.subr.bf16.mxu0 %v14139_v44  ;;  %10530 = vmatprep.subr.bf16.mxu1 %v14187_v0  ;;  %v14247_v44 = vld [vmem:[%s15425_s29 + $0x724] ss:$16 sps:$4 sm:$0xff]  }
0x1796   : > { %10496 = vmatpush2.bf16.msra.mxu0 %v14137_v43  ;;  %10531 = vmatpush1.bf16.msra.mxu1 %v14185_v22 }
0x1797   : > { %10497 = vmatprep.subr.bf16.mxu0 %v14142_v23  ;;  %10532 = vmatprep.subr.bf16.mxu1 %v14193_v17 }
0x179a   : > { %10498 = vmatpush2.bf16.msra.mxu0 %v14140_v60  ;;  %10533 = vmatpush1.bf16.msra.mxu1 %v14191_v29  ;;  %v14245_v60 = vld [vmem:[%s15425_s29 + $0x720] ss:$16 sps:$4 sm:$0xff]  }
0x179b   : > { %10499 = vmatprep.subr.bf16.mxu0 %v14145_v48  ;;  %10534 = vmatprep.subr.bf16.mxu1 %v14199_v6 }
0x179e   : > { %10500 = vmatpush2.bf16.msra.mxu0 %v14143_v31  ;;  %10535 = vmatpush1.bf16.msra.mxu1 %v14197_v16 }
0x179f   : > { %10501 = vmatprep.subr.bf16.mxu0 %v14148_v53  ;;  %10536 = vmatprep.subr.bf16.mxu1 %v14205_v57 }
0x17a2   : > { %10502 = vmatpush2.bf16.msra.mxu0 %v14146_v4  ;;  %10537 = vmatpush1.bf16.msra.mxu1 %v14203_v40  ;;  %v14251_v4 = vld [vmem:[%s15425_s29 + $0x700] ss:$16 sps:$4 sm:$0xff]  }
0x17a3   : > { %10503 = vmatprep.subr.bf16.mxu0 %v14151_v15  ;;  %10538 = vmatprep.subr.bf16.mxu1 %v14211_v56  ;;  %v14259_v15 = vld [vmem:[%s15425_s29 + $0x2ec] ss:$16 sps:$4 sm:$0xff]  }
0x17a6   : > { %10504 = vmatpush2.bf16.msra.mxu0 %v14149_v24  ;;  %10539 = vmatpush2.bf16.msra.mxu1 %v14209_v3 }
0x17a7   : > { %10505 = vmatprep.subr.bf16.mxu0 %v14154_v25  ;;  %10540 = vmatprep.subr.bf16.mxu1 %v14217_v5  ;;  %v14164_v5 = vld [vmem:[%s15425_s29 + $0xe8] ss:$16 sps:$4 sm:$0xff]  }
0x17aa   : > { %10506 = vmatpush2.bf16.msra.mxu0 %v14152_v11  ;;  %10541 = vmatpush2.bf16.msra.mxu1 %v14215_v19  ;;  %v14172_v19 = vld [vmem:[%s15425_s29 + $0xcc] ss:$16 sps:$4 sm:$0xff]  }
0x17ab   : > { %10507 = vmatprep.subr.bf16.mxu0 %v14157_v46  ;;  %10542 = vmatprep.subr.bf16.mxu1 %v14223_v21  ;;  %v14170_v46 = vld [vmem:[%s15425_s29 + $0xc8] ss:$16 sps:$4 sm:$0xff]   ;;  %v14178_v21 = vld [vmem:[%s15425_s29 + $0xac] ss:$16 sps:$4 sm:$0xff]  }
0x17ae   : > { %10508 = vmatpush2.bf16.msra.mxu0 %v14155_v45  ;;  %10543 = vmatpush2.bf16.msra.mxu1 %v14221_v28  ;;  %v14176_v45 = vld [vmem:[%s15425_s29 + $0xa8] ss:$16 sps:$4 sm:$0xff]   ;;  %v14184_v28 = vld [vmem:[%s15425_s29 + $0x8c] ss:$16 sps:$4 sm:$0xff]  }
0x17af   : > { %10509 = vmatprep.subr.bf16.mxu0 %v14160_v2  ;;  %10544 = vmatprep.subr.bf16.mxu1 %v14229_v8  ;;  %v14182_v2 = vld [vmem:[%s15425_s29 + $0x88] ss:$16 sps:$4 sm:$0xff]   ;;  %v14190_v8 = vld [vmem:[%s15425_s29 + $0x6c] ss:$16 sps:$4 sm:$0xff]  }
0x17b2   : > { %10510 = vmatpush2.bf16.msra.mxu0 %v14158_v47  ;;  %10545 = vmatpush2.bf16.msra.mxu1 %v14227_v12  ;;  %v14188_v47 = vld [vmem:[%s15425_s29 + $0x68] ss:$16 sps:$4 sm:$0xff]  }
0x17b3   : > { %10565 = vmatprep.subr.bf16.mxu0 %v14166_v55  ;;  %10546 = vmatprep.subr.bf16.mxu1 %v14235_v27  ;;  %v14194_v12 = vld [vmem:[%s15425_s29 + $0x48] ss:$16 sps:$4 sm:$0xff]   ;;  %v14202_v55 = vld [vmem:[%s15425_s29 + $0x2c] ss:$16 sps:$4 sm:$0xff]  }
0x17b4   : > { %v14200_v27 = vld [vmem:[%s15425_s29 + $0x28] ss:$16 sps:$4 sm:$0xff]  }
0x17b5   : > { %v8673_v50 = vpop.f32.mrf.mxu0 }
0x17b6   : > { %v8716_v38 = vpop.f32.mrf.mxu1  ;;  %10547 = vmatpush2.bf16.msra.mxu1 %v14233_v20  ;;  %v8674_v22 = vadd.f32 %v8673_v50, %v7166_v62  ;;  %v14208_v20 = vld [vmem:[%s15425_s29 + $0xc] ss:$16 sps:$4 sm:$0xff]  }
0x17b7   : > { %v8675_v30 = vpop.f32.mrf.mxu0  ;;  %10548 = vmatprep.subr.bf16.mxu1 %v14241_v37  ;;  %v14206_v37 = vld [vmem:[%s15425_s29 + $0x8] ss:$16 sps:$4 sm:$0xff]   ;;  %v14220_v50 = vld [vmem:[%s15425_s29 + $0x1cc] ss:$16 sps:$4 sm:$0xff]  }
0x17b8   : > { %v8676_v0 = vadd.f32 %v8675_v30, %v7170_v58  ;;  %v8718_v43 = vpop.f32.mrf.mxu1  ;;  %v8717_v16 = vadd.f32 %v8716_v38, %v8674_v22  ;;  %v14218_v38 = vld [vmem:[%s15425_s29 + $0x1c8] ss:$16 sps:$4 sm:$0xff]  }
0x17b9   : > { %v8677_v23 = vpop.f32.mrf.mxu0  ;;  %v14224_v30 = vld [vmem:[%s15425_s29 + $0x1a8] ss:$16 sps:$4 sm:$0xff]  }
0x17ba   : > { %v8678_v17 = vadd.f32 %v8677_v23, %v7166_v62  ;;  %v8720_v36 = vpop.f32.mrf.mxu1  ;;  %10549 = vmatpush2.bf16.msra.mxu1 %v14239_v7  ;;  %v8719_v48 = vadd.f32 %v8718_v43, %v8676_v0  ;;  %v8815_v3 = vmax.f32 %v8717_v16, 0.0  ;;  %v14212_v62 = vld [vmem:[%s15425_s29 + $0x1e8] ss:$16 sps:$4 sm:$0xff]   ;;  %v14226_v7 = vld [vmem:[%s15425_s29 + $0x1ac] ss:$16 sps:$4 sm:$0xff]  }
0x17bb   : > { %v8679_v29 = vpop.f32.mrf.mxu0  ;;  %10550 = vmatprep.subr.bf16.mxu1 %v14247_v44  ;;  %v14232_v44 = vld [vmem:[%s15425_s29 + $0x18c] ss:$16 sps:$4 sm:$0xff]   ;;  %v14230_v0 = vld [vmem:[%s15425_s29 + $0x188] ss:$16 sps:$4 sm:$0xff]  }
0x17bc   : > { %v8721_v6 = vadd.f32 %v8720_v36, %v8678_v17  ;;  %v8680_v31 = vadd.f32 %v8679_v29, %v7170_v58  ;;  %v8722_v53 = vpop.f32.mrf.mxu1  ;;  %v8816_v56 = vmax.f32 %v8719_v48, 0.0  ;;  %v14214_v58 = vld [vmem:[%s15425_s29 + $0x1ec] ss:$16 sps:$4 sm:$0xff]   ;;  %v14236_v22 = vld [vmem:[%s15425_s29 + $0x168] ss:$16 sps:$4 sm:$0xff]   ;;  %v7178_v17 = vrot.slane %v16891_v18, %v1490_v14 }
0x17bd   : > { %v14238_v43 = vld [vmem:[%s15425_s29 + $0x16c] ss:$16 sps:$4 sm:$0xff]   ;;  %v7174_v36 = vrot.slane %v16891_v18, %v1486_v13 }
0x17be   : > { %v8723_v57 = vadd.f32 %v8722_v53, %v8680_v31  ;;  %10551 = vmatpush2.bf16.msra.mxu1 %v14245_v60  ;;  %v8823_v40 = vmax.f32 %v8721_v6, 0.0  ;;  %v14244_v23 = vld [vmem:[%s15425_s29 + $0x14c] ss:$16 sps:$4 sm:$0xff]  }
0x17bf   : > { %10552 = vmatprep.subr.bf16.mxu1 %v14253_v34  ;;  %v14242_v34 = vld [vmem:[%s15425_s29 + $0x148] ss:$16 sps:$4 sm:$0xff]   ;;  %v14250_v6 = vld [vmem:[%s15425_s29 + $0x12c] ss:$16 sps:$4 sm:$0xff]  }
0x17c0   : > { %v8824_v24 = vmax.f32 %v8723_v57, 0.0  ;;  %v17063_v11 = vpack.c.bf16 %v8823_v40, %v8815_v3  ;;  %v14256_v13 = vld [vmem:[%s15425_s29 + $0x10c] ss:$16 sps:$4 sm:$0xff]  }
0x17c2   : > { %v17060_v25 = vpack.c.bf16 %v8824_v24, %v8816_v56  ;;  %10553 = vmatpush2.bf16.msra.mxu1 %v14251_v4 }
0x17c3   : > { %10608 = vmatprep.subr.bf16.mxu1 %v14259_v15 }
0x17c4   : > { %10511 = vmatprep.mubr.bf16.mxu0 %v17060_v25 }
0x17c5   : > { %10512 = vmatmul.mubr.bf16.vlgmr.msra.gmra.mxu0 %v17063_v11 }
0x17c6   : > { %10566 = vmatpush1.bf16.msra.mxu0 %v14164_v5  ;;  %10597 = vmatprep.mubr.bf16.mxu0 %v16920_v39  ;;  %v14196_v39 = vld [vmem:[%s15425_s29 + $0x4c] ss:$16 sps:$4 sm:$0xff]  }
0x17c7   : > { %10567 = vmatprep.subr.bf16.mxu0 %v14172_v19  ;;  %v14254_v19 = vld [vmem:[%s15425_s29 + $0x108] ss:$16 sps:$4 sm:$0xff]  }
0x17ca   : > { %10568 = vmatpush1.bf16.msra.mxu0 %v14170_v46 }
0x17cb   : > { %10569 = vmatprep.subr.bf16.mxu0 %v14178_v21  ;;  %v14262_v21 = vld [vmem:[%s15425_s29 + $0x4ec] ss:$16 sps:$4 sm:$0xff]  }
0x17ce   : > { %10570 = vmatpush1.bf16.msra.mxu0 %v14176_v45 }
0x17cf   : > { %10571 = vmatprep.subr.bf16.mxu0 %v14184_v28 }
0x17d2   : > { %10572 = vmatpush1.bf16.msra.mxu0 %v14182_v2 }
0x17d3   : > { %10573 = vmatprep.subr.bf16.mxu0 %v14190_v8 }
0x17d6   : > { %10574 = vmatpush1.bf16.msra.mxu0 %v14188_v47  ;;  %v14257_v47 = vld [vmem:[%s15425_s29 + $0x2e8] ss:$16 sps:$4 sm:$0xff]  }
0x17d7   : > { %10575 = vmatprep.subr.bf16.mxu0 %v14196_v39  ;;  %v14260_v39 = vld [vmem:[%s15425_s29 + $0x4e8] ss:$16 sps:$4 sm:$0xff]  }
0x17da   : > { %10576 = vmatpush1.bf16.msra.mxu0 %v14194_v12 }
0x17db   : > { %10577 = vmatprep.subr.bf16.mxu0 %v14202_v55  ;;  %v14265_v55 = vld [vmem:[%s15425_s29 + $0x2cc] ss:$16 sps:$4 sm:$0xff]  }
0x17de   : > { %10578 = vmatpush1.bf16.msra.mxu0 %v14200_v27  ;;  %v14268_v27 = vld [vmem:[%s15425_s29 + $0x4cc] ss:$16 sps:$4 sm:$0xff]  }
0x17df   : > { %10579 = vmatprep.subr.bf16.mxu0 %v14208_v20  ;;  %v14263_v20 = vld [vmem:[%s15425_s29 + $0x2c8] ss:$16 sps:$4 sm:$0xff]  }
0x17e2   : > { %10580 = vmatpush1.bf16.msra.mxu0 %v14206_v37  ;;  %v14266_v37 = vld [vmem:[%s15425_s29 + $0x4c8] ss:$16 sps:$4 sm:$0xff]  }
0x17e3   : > { %10581 = vmatprep.subr.bf16.mxu0 %v14214_v58  ;;  %v14271_v58 = vld [vmem:[%s15425_s29 + $0x2ac] ss:$16 sps:$4 sm:$0xff]  }
0x17e6   : > { %10582 = vmatpush2.bf16.msra.mxu0 %v14212_v62  ;;  %v14274_v62 = vld [vmem:[%s15425_s29 + $0x4ac] ss:$16 sps:$4 sm:$0xff]  }
0x17e7   : > { %10583 = vmatprep.subr.bf16.mxu0 %v14220_v50  ;;  %v14272_v50 = vld [vmem:[%s15425_s29 + $0x4a8] ss:$16 sps:$4 sm:$0xff]  }
0x17ea   : > { %10584 = vmatpush2.bf16.msra.mxu0 %v14218_v38  ;;  %v14277_v38 = vld [vmem:[%s15425_s29 + $0x28c] ss:$16 sps:$4 sm:$0xff]  }
0x17eb   : > { %10585 = vmatprep.subr.bf16.mxu0 %v14226_v7  ;;  %v14278_v7 = vld [vmem:[%s15425_s29 + $0x488] ss:$16 sps:$4 sm:$0xff]  }
0x17ee   : > { %10586 = vmatpush2.bf16.msra.mxu0 %v14224_v30  ;;  %v14283_v30 = vld [vmem:[%s15425_s29 + $0x26c] ss:$16 sps:$4 sm:$0xff]  }
0x17ef   : > { %10587 = vmatprep.subr.bf16.mxu0 %v14232_v44  ;;  %v14286_v44 = vld [vmem:[%s15425_s29 + $0x46c] ss:$16 sps:$4 sm:$0xff]  }
0x17f2   : > { %10588 = vmatpush2.bf16.msra.mxu0 %v14230_v0  ;;  %v14281_v0 = vld [vmem:[%s15425_s29 + $0x268] ss:$16 sps:$4 sm:$0xff]  }
0x17f3   : > { %10589 = vmatprep.subr.bf16.mxu0 %v14238_v43  ;;  %v14284_v43 = vld [vmem:[%s15425_s29 + $0x468] ss:$16 sps:$4 sm:$0xff]  }
0x17f5   : > { %v8759_v60 = vpop.f32.mrf.mxu0 }
0x17f6   : > { %v8802_v29 = vpop.f32.mrf.mxu1  ;;  %10590 = vmatpush2.bf16.msra.mxu0 %v14236_v22  ;;  %v8760_v53 = vadd.f32 %v8759_v60, %v7174_v36  ;;  %v14289_v22 = vld [vmem:[%s15425_s29 + $0x24c] ss:$16 sps:$4 sm:$0xff]  }
0x17f7   : > { %v8761_v48 = vpop.f32.mrf.mxu0  ;;  %10591 = vmatprep.subr.bf16.mxu0 %v14244_v23  ;;  %v14292_v23 = vld [vmem:[%s15425_s29 + $0x44c] ss:$16 sps:$4 sm:$0xff]  }
0x17f8   : > { %v8762_v31 = vadd.f32 %v8761_v48, %v7178_v17  ;;  %v8804_v16 = vpop.f32.mrf.mxu1  ;;  %v8803_v24 = vadd.f32 %v8802_v29, %v8760_v53  ;;  %v14295_v60 = vld [vmem:[%s15425_s29 + $0x22c] ss:$16 sps:$4 sm:$0xff]   ;;  %v14296_v48 = vld [vmem:[%s15425_s29 + $0x428] ss:$16 sps:$4 sm:$0xff]  }
0x17f9   : > { %v8763_v57 = vpop.f32.mrf.mxu0  ;;  %v14298_v29 = vld [vmem:[%s15425_s29 + $0x42c] ss:$16 sps:$4 sm:$0xff]   ;;  %v14302_v53 = vld [vmem:[%s15425_s29 + $0x408] ss:$16 sps:$4 sm:$0xff]  }
0x17fa   : > { %v8764_v4 = vadd.f32 %v8763_v57, %v7174_v36  ;;  %v8806_v14 = vpop.f32.mrf.mxu1  ;;  %10592 = vmatpush2.bf16.msra.mxu0 %v14242_v34  ;;  %v8805_v18 = vadd.f32 %v8804_v16, %v8762_v31  ;;  %v8817_v2 = vmax.f32 %v8803_v24, 0.0  ;;  %v14290_v36 = vld [vmem:[%s15425_s29 + $0x448] ss:$16 sps:$4 sm:$0xff]   ;;  %v14304_v31 = vld [vmem:[%s15425_s29 + $0x40c] ss:$16 sps:$4 sm:$0xff]  }
0x17fb   : > { %v8765_v40 = vpop.f32.mrf.mxu0  ;;  %10593 = vmatprep.subr.bf16.mxu0 %v14250_v6  ;;  %v14293_v34 = vld [vmem:[%s15425_s29 + $0x228] ss:$16 sps:$4 sm:$0xff]   ;;  %v14301_v6 = vld [vmem:[%s15425_s29 + $0x20c] ss:$16 sps:$4 sm:$0xff]  }
0x17fc   : > { %v8807_v15 = vadd.f32 %v8806_v14, %v8764_v4  ;;  %v8766_v56 = vadd.f32 %v8765_v40, %v7178_v17  ;;  %v8808_v3 = vpop.f32.mrf.mxu1  ;;  %v8818_v45 = vmax.f32 %v8805_v18, 0.0  ;;  %v14287_v17 = vld [vmem:[%s15425_s29 + $0x248] ss:$16 sps:$4 sm:$0xff]   ;;  %v14307_v57 = vld [vmem:[%s15425_s29 + $0x3ec] ss:$16 sps:$4 sm:$0xff]  }
0x17fd   : > { %v14299_v16 = vld [vmem:[%s15425_s29 + $0x208] ss:$16 sps:$4 sm:$0xff]   ;;  %v14310_v4 = vld [vmem:[%s15425_s29 + $0x5ec] ss:$16 sps:$4 sm:$0xff]  }
0x17fe   : > { %v8809_v5 = vadd.f32 %v8808_v3, %v8766_v56  ;;  %10594 = vmatpush2.bf16.msra.mxu0 %v14248_v35  ;;  %v8825_v46 = vmax.f32 %v8807_v15, 0.0  ;;  %v14305_v14 = vld [vmem:[%s15425_s29 + $0x3e8] ss:$16 sps:$4 sm:$0xff]   ;;  %v14313_v40 = vld [vmem:[%s15425_s29 + $0x3cc] ss:$16 sps:$4 sm:$0xff]  }
0x17ff   : > { %10595 = vmatprep.subr.bf16.mxu0 %v14256_v13  ;;  %v14308_v35 = vld [vmem:[%s15425_s29 + $0x5e8] ss:$16 sps:$4 sm:$0xff]   ;;  %v14316_v13 = vld [vmem:[%s15425_s29 + $0x5cc] ss:$16 sps:$4 sm:$0xff]  }
0x1800   : > { %v8826_v28 = vmax.f32 %v8809_v5, 0.0  ;;  %v17109_v12 = vpack.c.bf16 %v8825_v46, %v8817_v2  ;;  %v14311_v18 = vld [vmem:[%s15425_s29 + $0x3c8] ss:$16 sps:$4 sm:$0xff]   ;;  %v14319_v56 = vld [vmem:[%s15425_s29 + $0x3ac] ss:$16 sps:$4 sm:$0xff]  }
0x1801   : > { %v14314_v15 = vld [vmem:[%s15425_s29 + $0x5c8] ss:$16 sps:$4 sm:$0xff]   ;;  %v14322_v24 = vld [vmem:[%s15425_s29 + $0x5ac] ss:$16 sps:$4 sm:$0xff]  }
0x1802   : > { %v17105_v8 = vpack.c.bf16 %v8826_v28, %v8818_v45  ;;  %10596 = vmatpush2.bf16.msra.mxu0 %v14254_v19  ;;  %v14317_v3 = vld [vmem:[%s15425_s29 + $0x3a8] ss:$16 sps:$4 sm:$0xff]   ;;  %v14325_v19 = vld [vmem:[%s15425_s29 + $0x38c] ss:$16 sps:$4 sm:$0xff]  }
0x1803   : > { %10651 = vmatprep.subr.bf16.mxu0 %v14262_v21  ;;  %v14320_v5 = vld [vmem:[%s15425_s29 + $0x5a8] ss:$16 sps:$4 sm:$0xff]   ;;  %v14328_v46 = vld [vmem:[%s15425_s29 + $0x58c] ss:$16 sps:$4 sm:$0xff]  }
0x1804   : > { %10554 = vmatprep.mubr.bf16.mxu1 %v17105_v8  ;;  %v14323_v21 = vld [vmem:[%s15425_s29 + $0x388] ss:$16 sps:$4 sm:$0xff]   ;;  %v14331_v28 = vld [vmem:[%s15425_s29 + $0x36c] ss:$16 sps:$4 sm:$0xff]  }
0x1805   : > { %10598 = vmatmul.mubr.bf16.vlgmr.msra.gmra.mxu0 %v16978_v32  ;;  %10555 = vmatmul.mubr.bf16.vlgmr.msra.gmra.mxu1 %v17109_v12  ;;  %v14269_v32 = vld [vmem:[%s15425_s29 + $0x2a8] ss:$16 sps:$4 sm:$0xff]   ;;  %v14334_v2 = vld [vmem:[%s15425_s29 + $0x56c] ss:$16 sps:$4 sm:$0xff]  }
0x1806   : > { %10609 = vmatpush1.bf16.msra.mxu1 %v14257_v47  ;;  %10652 = vmatpush1.bf16.msra.mxu0 %v14260_v39  ;;  %v14326_v45 = vld [vmem:[%s15425_s29 + $0x588] ss:$16 sps:$4 sm:$0xff]  }
0x1807   : > { %10683 = vmatprep.mubr.bf16.mxu0 %v17060_v25  ;;  %10640 = vmatprep.mubr.bf16.mxu1 %v16992_v51  ;;  %v14280_v25 = vld [vmem:[%s15425_s29 + $0x48c] ss:$16 sps:$4 sm:$0xff]   ;;  %v14275_v51 = vld [vmem:[%s15425_s29 + $0x288] ss:$16 sps:$4 sm:$0xff]  }
0x1808   : > { %10610 = vmatprep.subr.bf16.mxu1 %v14265_v55  ;;  %10653 = vmatprep.subr.bf16.mxu0 %v14268_v27  ;;  %v14329_v47 = vld [vmem:[%s15425_s29 + $0x368] ss:$16 sps:$4 sm:$0xff]   ;;  %v14337_v55 = vld [vmem:[%s15425_s29 + $0x34c] ss:$16 sps:$4 sm:$0xff]  }
0x1809   : > { %v14332_v39 = vld [vmem:[%s15425_s29 + $0x568] ss:$16 sps:$4 sm:$0xff]   ;;  %v14340_v27 = vld [vmem:[%s15425_s29 + $0x54c] ss:$16 sps:$4 sm:$0xff]  }
0x180a   : > { %10611 = vmatpush1.bf16.msra.mxu1 %v14263_v20  ;;  %10654 = vmatpush1.bf16.msra.mxu0 %v14266_v37  ;;  %v14335_v20 = vld [vmem:[%s15425_s29 + $0x348] ss:$16 sps:$4 sm:$0xff]  }
0x180b   : > { %10612 = vmatprep.subr.bf16.mxu1 %v14271_v58  ;;  %10655 = vmatprep.subr.bf16.mxu0 %v14274_v62  ;;  %v14338_v37 = vld [vmem:[%s15425_s29 + $0x548] ss:$16 sps:$4 sm:$0xff]   ;;  %v14343_v58 = vld [vmem:[%s15425_s29 + $0x32c] ss:$16 sps:$4 sm:$0xff]  }
0x180c   : > { %v14346_v62 = vld [vmem:[%s15425_s29 + $0x52c] ss:$16 sps:$4 sm:$0xff]  }
0x180e   : > { %10613 = vmatpush1.bf16.msra.mxu1 %v14269_v32  ;;  %10656 = vmatpush1.bf16.msra.mxu0 %v14272_v50  ;;  %v14341_v32 = vld [vmem:[%s15425_s29 + $0x328] ss:$16 sps:$4 sm:$0xff]  }
0x180f   : > { %10614 = vmatprep.subr.bf16.mxu1 %v14277_v38  ;;  %10657 = vmatprep.subr.bf16.mxu0 %v14280_v25  ;;  %v14344_v50 = vld [vmem:[%s15425_s29 + $0x528] ss:$16 sps:$4 sm:$0xff]   ;;  %v14349_v38 = vld [vmem:[%s15425_s29 + $0x30c] ss:$16 sps:$4 sm:$0xff]  }
0x1810   : > { %v14352_v25 = vld [vmem:[%s15425_s29 + $0x50c] ss:$16 sps:$4 sm:$0xff]  }
0x1812   : > { %10615 = vmatpush1.bf16.msra.mxu1 %v14275_v51  ;;  %10658 = vmatpush1.bf16.msra.mxu0 %v14278_v7  ;;  %v14347_v51 = vld [vmem:[%s15425_s29 + $0x308] ss:$16 sps:$4 sm:$0xff]  }
0x1813   : > { %10616 = vmatprep.subr.bf16.mxu1 %v14283_v30  ;;  %10659 = vmatprep.subr.bf16.mxu0 %v14286_v44  ;;  %v14350_v7 = vld [vmem:[%s15425_s29 + $0x508] ss:$16 sps:$4 sm:$0xff]   ;;  %v14355_v30 = vld [vmem:[%s15425_s29 + $0x6ec] ss:$16 sps:$4 sm:$0xff]  }
0x1814   : > { %v14353_v44 = vld [vmem:[%s15425_s29 + $0x6e8] ss:$16 sps:$4 sm:$0xff]  }
0x1816   : > { %10617 = vmatpush1.bf16.msra.mxu1 %v14281_v0  ;;  %10660 = vmatpush1.bf16.msra.mxu0 %v14284_v43  ;;  %v14358_v0 = vld [vmem:[%s15425_s29 + $0x6cc] ss:$16 sps:$4 sm:$0xff]   ;;  %v14356_v43 = vld [vmem:[%s15425_s29 + $0x6c8] ss:$16 sps:$4 sm:$0xff]  }
0x1817   : > { %10618 = vmatprep.subr.bf16.mxu1 %v14289_v22  ;;  %10661 = vmatprep.subr.bf16.mxu0 %v14292_v23  ;;  %v14361_v22 = vld [vmem:[%s15425_s29 + $0x6ac] ss:$16 sps:$4 sm:$0xff]   ;;  %v14359_v23 = vld [vmem:[%s15425_s29 + $0x6a8] ss:$16 sps:$4 sm:$0xff]  }
0x181a   : > { %10619 = vmatpush1.bf16.msra.mxu1 %v14287_v17  ;;  %10662 = vmatpush1.bf16.msra.mxu0 %v14290_v36  ;;  %v14364_v17 = vld [vmem:[%s15425_s29 + $0x68c] ss:$16 sps:$4 sm:$0xff]   ;;  %v14365_v36 = vld [vmem:[%s15425_s29 + $0x668] ss:$16 sps:$4 sm:$0xff]  }
0x181b   : > { %10620 = vmatprep.subr.bf16.mxu1 %v14295_v60  ;;  %10663 = vmatprep.subr.bf16.mxu0 %v14298_v29  ;;  %v14368_v60 = vld [vmem:[%s15425_s29 + $0x648] ss:$16 sps:$4 sm:$0xff]   ;;  %v14373_v29 = vld [vmem:[%s15425_s29 + $0x62c] ss:$16 sps:$4 sm:$0xff]  }
0x181e   : > { %10621 = vmatpush1.bf16.msra.mxu1 %v14293_v34  ;;  %10664 = vmatpush1.bf16.msra.mxu0 %v14296_v48  ;;  %v14371_v34 = vld [vmem:[%s15425_s29 + $0x628] ss:$16 sps:$4 sm:$0xff]   ;;  %v14376_v48 = vld [vmem:[%s15425_s29 + $0x60c] ss:$16 sps:$4 sm:$0xff]  }
0x181f   : > { %10622 = vmatprep.subr.bf16.mxu1 %v14301_v6  ;;  %10665 = vmatprep.subr.bf16.mxu0 %v14304_v31  ;;  %v14374_v6 = vld [vmem:[%s15425_s29 + $0x608] ss:$16 sps:$4 sm:$0xff]   ;;  %v14379_v31 = vld [vmem:[%s15425_s29 + $0x7ec] ss:$16 sps:$4 sm:$0xff]  }
0x1822   : > { %10623 = vmatpush1.bf16.msra.mxu1 %v14299_v16  ;;  %10666 = vmatpush1.bf16.msra.mxu0 %v14302_v53  ;;  %v14377_v16 = vld [vmem:[%s15425_s29 + $0x7e8] ss:$16 sps:$4 sm:$0xff]   ;;  %v14382_v53 = vld [vmem:[%s15425_s29 + $0x7cc] ss:$16 sps:$4 sm:$0xff]  }
0x1823   : > { %10624 = vmatprep.subr.bf16.mxu1 %v14307_v57  ;;  %10667 = vmatprep.subr.bf16.mxu0 %v14310_v4  ;;  %v14380_v57 = vld [vmem:[%s15425_s29 + $0x7c8] ss:$16 sps:$4 sm:$0xff]   ;;  %v14385_v4 = vld [vmem:[%s15425_s29 + $0x7ac] ss:$16 sps:$4 sm:$0xff]  }
0x1826   : > { %10625 = vmatpush2.bf16.msra.mxu1 %v14305_v14  ;;  %10668 = vmatpush2.bf16.msra.mxu0 %v14308_v35  ;;  %v14383_v14 = vld [vmem:[%s15425_s29 + $0x7a8] ss:$16 sps:$4 sm:$0xff]   ;;  %v14388_v35 = vld [vmem:[%s15425_s29 + $0x78c] ss:$16 sps:$4 sm:$0xff]  }
0x1827   : > { %10626 = vmatprep.subr.bf16.mxu1 %v14313_v40  ;;  %10669 = vmatprep.subr.bf16.mxu0 %v14316_v13  ;;  %v14386_v40 = vld [vmem:[%s15425_s29 + $0x788] ss:$16 sps:$4 sm:$0xff]   ;;  %v14391_v13 = vld [vmem:[%s15425_s29 + $0x76c] ss:$16 sps:$4 sm:$0xff]  }
0x182a   : > { %10627 = vmatpush2.bf16.msra.mxu1 %v14311_v18  ;;  %10670 = vmatpush2.bf16.msra.mxu0 %v14314_v15  ;;  %v14389_v18 = vld [vmem:[%s15425_s29 + $0x768] ss:$16 sps:$4 sm:$0xff]   ;;  %v14394_v15 = vld [vmem:[%s15425_s29 + $0x74c] ss:$16 sps:$4 sm:$0xff]  }
0x182b   : > { %10628 = vmatprep.subr.bf16.mxu1 %v14319_v56  ;;  %10671 = vmatprep.subr.bf16.mxu0 %v14322_v24  ;;  %v14392_v56 = vld [vmem:[%s15425_s29 + $0x748] ss:$16 sps:$4 sm:$0xff]   ;;  %v14397_v24 = vld [vmem:[%s15425_s29 + $0x72c] ss:$16 sps:$4 sm:$0xff]  }
0x182e   : > { %10629 = vmatpush2.bf16.msra.mxu1 %v14317_v3  ;;  %10672 = vmatpush2.bf16.msra.mxu0 %v14320_v5  ;;  %v14395_v3 = vld [vmem:[%s15425_s29 + $0x728] ss:$16 sps:$4 sm:$0xff]   ;;  %v14400_v5 = vld [vmem:[%s15425_s29 + $0x70c] ss:$16 sps:$4 sm:$0xff]  }
0x182f   : > { %10630 = vmatprep.subr.bf16.mxu1 %v14325_v19  ;;  %10673 = vmatprep.subr.bf16.mxu0 %v14328_v46  ;;  %v14398_v19 = vld [vmem:[%s15425_s29 + $0x708] ss:$16 sps:$4 sm:$0xff]  }
0x1832   : > { %10631 = vmatpush2.bf16.msra.mxu1 %v14323_v21  ;;  %10674 = vmatpush2.bf16.msra.mxu0 %v14326_v45 }
0x1833   : > { %10632 = vmatprep.subr.bf16.mxu1 %v14331_v28  ;;  %10675 = vmatprep.subr.bf16.mxu0 %v14334_v2 }
0x1835   : > { %v10427_v46 = vpop.f32.mrf.mxu0 }
0x1836   : > { %10633 = vmatpush2.bf16.msra.mxu1 %v14329_v47  ;;  %10676 = vmatpush2.bf16.msra.mxu0 %v14332_v39 }
0x1837   : > { %10634 = vmatprep.subr.bf16.mxu1 %v14337_v55  ;;  %10677 = vmatprep.subr.bf16.mxu0 %v14340_v27  ;;  %v10429_v21 = vpop.f32.mrf.mxu0 }
0x1839   : > { %v10431_v45 = vpop.f32.mrf.mxu0 }
0x183a   : > { %10635 = vmatpush2.bf16.msra.mxu1 %v14335_v20  ;;  %10678 = vmatpush2.bf16.msra.mxu0 %v14338_v37 }
0x183b   : > { %10636 = vmatprep.subr.bf16.mxu1 %v14343_v58  ;;  %10679 = vmatprep.subr.bf16.mxu0 %v14346_v62  ;;  %v10433_v2 = vpop.f32.mrf.mxu0 }
0x183e   : > { %10637 = vmatpush2.bf16.msra.mxu1 %v14341_v32  ;;  %10680 = vmatpush2.bf16.msra.mxu0 %v14344_v50 }
0x183f   : > { %10638 = vmatprep.subr.bf16.mxu1 %v14349_v38  ;;  %10681 = vmatprep.subr.bf16.mxu0 %v14352_v25 }
0x1842   : > { %10639 = vmatpush2.bf16.msra.mxu1 %v14347_v51  ;;  %10682 = vmatpush2.bf16.msra.mxu0 %v14350_v7 }
0x1843   : > { %10694 = vmatprep.subr.bf16.mxu1 %v14355_v30 }
0x1845   : > { %10641 = vmatmul.mubr.bf16.vlgmr.msra.gmra.mxu1 %v16996_v42  ;;  %10684 = vmatmul.mubr.bf16.vlgmr.msra.gmra.mxu0 %v17063_v11  ;;  %v14362_v42 = vld [vmem:[%s15425_s29 + $0x688] ss:$16 sps:$4 sm:$0xff]   ;;  %v14367_v11 = vld [vmem:[%s15425_s29 + $0x66c] ss:$16 sps:$4 sm:$0xff]   ;;  %v10470_v28 = vpop.f32.mrf.mxu1 }
0x1846   : > { %10695 = vmatpush1.bf16.msra.mxu1 %v14353_v44  ;;  %10726 = vmatprep.mubr.bf16.mxu1 %v17105_v8  ;;  %v14370_v8 = vld [vmem:[%s15425_s29 + $0x64c] ss:$16 sps:$4 sm:$0xff]  }
0x1847   : > { %10696 = vmatprep.subr.bf16.mxu1 %v14358_v0  ;;  %v10472_v47 = vpop.f32.mrf.mxu1 }
0x1849   : > { %v10474_v55 = vpop.f32.mrf.mxu1 }
0x184a   : > { %10697 = vmatpush1.bf16.msra.mxu1 %v14356_v43 }
0x184b   : > { %10698 = vmatprep.subr.bf16.mxu1 %v14361_v22  ;;  %v10476_v20 = vpop.f32.mrf.mxu1 }
0x184e   : > { %10699 = vmatpush1.bf16.msra.mxu1 %v14359_v23 }
0x184f   : > { %10700 = vmatprep.subr.bf16.mxu1 %v14364_v17 }
0x1852   : > { %10701 = vmatpush1.bf16.msra.mxu1 %v14362_v42 }
0x1853   : > { %10702 = vmatprep.subr.bf16.mxu1 %v14367_v11 }
0x1856   : > { %10703 = vmatpush1.bf16.msra.mxu1 %v14365_v36 }
0x1857   : > { %10704 = vmatprep.subr.bf16.mxu1 %v14370_v8 }
0x185a   : > { %10705 = vmatpush1.bf16.msra.mxu1 %v14368_v60 }
0x185b   : > { %10706 = vmatprep.subr.bf16.mxu1 %v14373_v29 }
0x185e   : > { %10707 = vmatpush1.bf16.msra.mxu1 %v14371_v34 }
0x185f   : > { %10708 = vmatprep.subr.bf16.mxu1 %v14376_v48 }
0x1862   : > { %10709 = vmatpush1.bf16.msra.mxu1 %v14374_v6 }
0x1863   : > { %10710 = vmatprep.subr.bf16.mxu1 %v14379_v31 }
0x1866   : > { %10711 = vmatpush2.bf16.msra.mxu1 %v14377_v16 }
0x1867   : > { %10712 = vmatprep.subr.bf16.mxu1 %v14382_v53 }
0x186a   : > { %10713 = vmatpush2.bf16.msra.mxu1 %v14380_v57 }
0x186b   : > { %10714 = vmatprep.subr.bf16.mxu1 %v14385_v4 }
0x186e   : > { %10715 = vmatpush2.bf16.msra.mxu1 %v14383_v14 }
0x186f   : > { %10716 = vmatprep.subr.bf16.mxu1 %v14388_v35 }
0x1872   : > { %10717 = vmatpush2.bf16.msra.mxu1 %v14386_v40 }
0x1873   : > { %10718 = vmatprep.subr.bf16.mxu1 %v14391_v13 }
0x1876   : > { %10719 = vmatpush2.bf16.msra.mxu1 %v14389_v18 }
0x1877   : > { %10720 = vmatprep.subr.bf16.mxu1 %v14394_v15 }
0x187a   : > { %10721 = vmatpush2.bf16.msra.mxu1 %v14392_v56 }
0x187b   : > { %10722 = vmatprep.subr.bf16.mxu1 %v14397_v24 }
0x187e   : > { %10723 = vmatpush2.bf16.msra.mxu1 %v14395_v3 }
0x187f   : > { %10724 = vmatprep.subr.bf16.mxu1 %v14400_v5 }
0x1882   : > { %10725 = vmatpush2.bf16.msra.mxu1 %v14398_v19 }
0x1885   : > { %10727 = vmatmul.mubr.bf16.vlgmr.msra.gmra.mxu1 %v17109_v12  ;;  %v10513_v39 = vpop.f32.mrf.mxu0  ;;  %v9091_v12 = vld [vmem:[%s895_s16] sm:$0xf] }
0x1886   : > { %v9100_v51 = vrot.slane %v9091_v12, %v15725_v41  ;;  %v9096_v30 = vrot.slane %v9091_v12, %v15900_v33  ;;  %v9104_v22 = vrot.slane %v9091_v12, %v15807_v59  ;;  %v9108_v36 = vrot.slane %v9091_v12, %v15814_v63 }
0x1887   : > { %v10515_v27 = vpop.f32.mrf.mxu0 }
0x1888   : > { %v10430_v43 = vadd.f32 %v10429_v21, %v9100_v51  ;;  %v10428_v23 = vadd.f32 %v10427_v46, %v9096_v30  ;;  %v10434_v34 = vadd.f32 %v10433_v2, %v9100_v51  ;;  %v10432_v6 = vadd.f32 %v10431_v45, %v9096_v30 }
0x1889   : > { %v10517_v37 = vpop.f32.mrf.mxu0 }
0x188a   : > { %v10473_v17 = vadd.f32 %v10472_v47, %v10430_v43  ;;  %v10471_v8 = vadd.f32 %v10470_v28, %v10428_v23  ;;  %v10477_v57 = vadd.f32 %v10476_v20, %v10434_v34  ;;  %v10475_v35 = vadd.f32 %v10474_v55, %v10432_v6 }
0x188b   : > { %v10519_v62 = vpop.f32.mrf.mxu0 }
0x188c   : > { %v10516_v60 = vadd.f32 %v10515_v27, %v10473_v17  ;;  %v10514_v31 = vadd.f32 %v10513_v39, %v10471_v8  ;;  %v10520_v18 = vadd.f32 %v10519_v62, %v10477_v57  ;;  %v10518_v24 = vadd.f32 %v10517_v37, %v10475_v35 }
0x18c5   : > { %v10556_v58 = vpop.f32.mrf.mxu1  ;;  %v10599_v50 = vpop.f32.mrf.mxu0 }
0x18c6   : > { %v10600_v48 = vadd.f32 %v10599_v50, %v9104_v22  ;;  %v10557_v40 = vadd.f32 %v10556_v58, %v10514_v31 }
0x18c7   : > { %v10558_v32 = vpop.f32.mrf.mxu1  ;;  %v10601_v25 = vpop.f32.mrf.mxu0 }
0x18c8   : > { %v10559_v16 = vadd.f32 %v10558_v32, %v10516_v60  ;;  %v10602_v4 = vadd.f32 %v10601_v25, %v9108_v36  ;;  %v10737_v28 = vadd.f32 %v10557_v40, %v16656_v61 }
0x18c9   : > { %v10560_v38 = vpop.f32.mrf.mxu1  ;;  %v10603_v44 = vpop.f32.mrf.mxu0 }
0x18ca   : > { %v10604_v15 = vadd.f32 %v10603_v44, %v9104_v22  ;;  %v10738_v3 = vadd.f32 %v10559_v16, %v16647_v52  ;;  %v10561_v2 = vadd.f32 %v10560_v38, %v10518_v24 }
0x18cb   : > { %v10562_v7 = vpop.f32.mrf.mxu1  ;;  %v10605_v42 = vpop.f32.mrf.mxu0 }
0x18cc   : > { %v10606_v19 = vadd.f32 %v10605_v42, %v9108_v36  ;;  %v10563_v46 = vadd.f32 %v10562_v7, %v10520_v18  ;;  %v10747_v58 = vadd.f32 %v10738_v3, %v10737_v28  ;;  %v10741_v25 = vadd.f32 %v10561_v2, %v16658_v49  ;;  %v10746_v2 = vld [vmem:[%s913_s15] sm:$0xf] }
0x18ce   : > { %v10742_v32 = vadd.f32 %v10563_v46, %v16649_v26 }
0x1905   : > { %v10642_v0 = vpop.f32.mrf.mxu1  ;;  %v10685_v29 = vpop.f32.mrf.mxu0 }
0x1906   : > { %v10643_v14 = vadd.f32 %v10642_v0, %v10600_v48  ;;  %v10752_v0 = vadd.f32 %v10742_v32, %v10741_v25 }
0x1907   : > { %v10644_v11 = vpop.f32.mrf.mxu1  ;;  %v10687_v13 = vpop.f32.mrf.mxu0 }
0x1908   : > { %v10645_v56 = vadd.f32 %v10644_v11, %v10602_v4  ;;  %v10686_v21 = vadd.f32 %v10685_v29, %v10643_v14 }
0x1909   : > { %v10646_v53 = vpop.f32.mrf.mxu1  ;;  %v10689_v47 = vpop.f32.mrf.mxu0 }
0x190a   : > { %v10647_v45 = vadd.f32 %v10646_v53, %v10604_v15  ;;  %v10688_v27 = vadd.f32 %v10687_v13, %v10645_v56 }
0x190b   : > { %v10648_v5 = vpop.f32.mrf.mxu1  ;;  %v10691_v12 = vpop.f32.mrf.mxu0 }
0x190c   : > { %v10649_v55 = vadd.f32 %v10648_v5, %v10606_v19  ;;  %v10690_v37 = vadd.f32 %v10689_v47, %v10647_v45 }
0x190e   : > { %v10692_v7 = vadd.f32 %v10691_v12, %v10649_v55 }
0x1945   : > { %v10728_v39 = vpop.f32.mrf.mxu1 }
0x1946   : > { %v10729_v20 = vadd.f32 %v10728_v39, %v10686_v21 }
0x1947   : > { %v10730_v62 = vpop.f32.mrf.mxu1 }
0x1948   : > { %v10739_v52 = vadd.f32 %v10729_v20, %v16660_v10  ;;  %v10731_v50 = vadd.f32 %v10730_v62, %v10688_v27  ;;  %v10836_v62 = vrot.slane %v10746_v2, %v15725_v41 }
0x1949   : > { %v10732_v51 = vpop.f32.mrf.mxu1 }
0x194a   : > { %v10740_v61 = vadd.f32 %v10731_v50, %v16651_v1  ;;  %v10733_v38 = vadd.f32 %v10732_v51, %v10690_v37  ;;  %v10748_v30 = vadd.f32 %v10747_v58, %v10739_v52  ;;  %v10832_v58 = vrot.slane %v10746_v2, %v15900_v33 }
0x194b   : > { %v10734_v44 = vpop.f32.mrf.mxu1  ;;  %v10844_v37 = vrot.slane %v10746_v2, %v15814_v63 }
0x194c   : > { %v10743_v43 = vadd.f32 %v10733_v38, %v16662_v9  ;;  %v10735_v22 = vadd.f32 %v10734_v44, %v10692_v7  ;;  %v10749_v23 = vadd.f32 %v10748_v30, %v10740_v61 }
0x194e   : > { %v10744_v26 = vadd.f32 %v10735_v22, %v16653_v54  ;;  %10750 = vadd.xlane.f32.xlu0 %v10749_v23  ;;  %v10753_v10 = vadd.f32 %v10752_v0, %v10743_v43 }
0x1950   : > { %v10754_v17 = vadd.f32 %v10753_v10, %v10744_v26 }
0x1952   : > { %10755 = vadd.xlane.f32.xlu1 %v10754_v17 }
0x19d7   : > { %v10751_v49 = vpop.xlane.xlu0 %10750 }
0x19d8   : > { %v10757_v42 = vmul.f32 0.001953125, %v10751_v49 }
0x19da   : > { %v10759_v11 = vsub.f32 %v10737_v28, %v10757_v42  ;;  %v10760_v36 = vsub.f32 %v10738_v3, %v10757_v42  ;;  %v10761_v8 = vsub.f32 %v10739_v52, %v10757_v42  ;;  %v10762_v60 = vsub.f32 %v10740_v61, %v10757_v42  ;;  %v10745_v28 = vld [vmem:[%s904_s13] sm:$0xf] }
0x19db   : > { %v10756_v1 = vpop.xlane.xlu1 %10755  ;;  %v10803_v47 = vrot.slane %v10745_v28, %v15900_v33  ;;  %v10807_v39 = vrot.slane %v10745_v28, %v15725_v41  ;;  %v10811_v27 = vrot.slane %v10745_v28, %v15807_v59  ;;  %v10815_v55 = vrot.slane %v10745_v28, %v15814_v63 }
0x19dc   : > { %v10758_v29 = vmul.f32 0.001953125, %v10756_v1  ;;  %v10767_v34 = vmul.f32 %v10759_v11, %v10759_v11  ;;  %v10768_v48 = vmul.f32 %v10760_v36, %v10760_v36  ;;  %v10769_v6 = vmul.f32 %v10761_v8, %v10761_v8 }
0x19dd   : > { %v10770_v54 = vmul.f32 %v10762_v60, %v10762_v60 }
0x19de   : > { %v10763_v9 = vsub.f32 %v10741_v25, %v10758_v29  ;;  %v10764_v31 = vsub.f32 %v10742_v32, %v10758_v29  ;;  %v10775_v16 = vadd.f32 %v10768_v48, %v10767_v34  ;;  %v10765_v53 = vsub.f32 %v10743_v43, %v10758_v29 }
0x19df   : > { %v10766_v4 = vsub.f32 %v10744_v26, %v10758_v29  ;;  %v10840_v32 = vrot.slane %v10746_v2, %v15807_v59 }
0x19e0   : > { %v10776_v57 = vadd.f32 %v10775_v16, %v10769_v6  ;;  %v10771_v14 = vmul.f32 %v10763_v9, %v10763_v9  ;;  %v10772_v35 = vmul.f32 %v10764_v31, %v10764_v31  ;;  %v10773_v13 = vmul.f32 %v10765_v53, %v10765_v53 }
0x19e1   : > { %v10774_v15 = vmul.f32 %v10766_v4, %v10766_v4 }
0x19e2   : > { %v10777_v40 = vadd.f32 %v10776_v57, %v10770_v54  ;;  %v10780_v18 = vadd.f32 %v10772_v35, %v10771_v14 }
0x19e4   : > { %10778 = vadd.xlane.f32.xlu0 %v10777_v40  ;;  %v10781_v56 = vadd.f32 %v10780_v18, %v10773_v13 }
0x19e6   : > { %v10782_v24 = vadd.f32 %v10781_v56, %v10774_v15 }
0x19e8   : > { %10783 = vadd.xlane.f32.xlu1 %v10782_v24 }
0x1a6d   : > { %v10779_v3 = vpop.xlane.xlu0 %10778 }
0x1a6e   : > { %v10785_v5 = vmul.f32 0.001953125, %v10779_v3 }
0x1a70   : > { %v10787_v19 = vadd.f32 1e-05, %v10785_v5 }
0x1a71   : > { %v10784_v46 = vpop.xlane.xlu1 %10783 }
0x1a72   : > { %14469 = vrsqrt.f32 %v10787_v19  ;;  %v10786_v21 = vmul.f32 0.001953125, %v10784_v46 }
0x1a74   : > { %v10788_v45 = vadd.f32 1e-05, %v10786_v21 }
0x1a76   : > { %14471 = vrsqrt.f32 %v10788_v45 }
0x1a7f   : > { %v14470_v20 = vpop.eup %14469 }
0x1a80   : > { %v10791_v52 = vmul.f32 %v14470_v20, %v10759_v11  ;;  %v10792_v50 = vmul.f32 %v14470_v20, %v10760_v36  ;;  %v10793_v25 = vmul.f32 %v14470_v20, %v10761_v8  ;;  %v10794_v12 = vmul.f32 %v14470_v20, %v10762_v60 }
0x1a82   : > { %v10820_v51 = vmul.f32 %v10803_v47, %v10791_v52  ;;  %v10821_v7 = vmul.f32 %v10807_v39, %v10792_v50  ;;  %v10822_v61 = vmul.f32 %v10811_v27, %v10793_v25  ;;  %v10823_v38 = vmul.f32 %v10815_v55, %v10794_v12 }
0x1a83   : > { %v14472_v30 = vpop.eup %14471 }
0x1a84   : > { %v17238_v44 = vadd.f32 %v10832_v58, %v10820_v51  ;;  %v10850_v0 = vadd.f32 %v10836_v62, %v10821_v7  ;;  %v17240_v43 = vadd.f32 %v10840_v32, %v10822_v61  ;;  %v10852_v33 = vadd.f32 %v10844_v37, %v10823_v38 }
0x1a85   : > { %v10795_v41 = vmul.f32 %v14472_v30, %v10763_v9  ;;  %v10796_v22 = vmul.f32 %v14472_v30, %v10764_v31  ;;  %v10797_v59 = vmul.f32 %v14472_v30, %v10765_v53  ;;  %v10798_v23 = vmul.f32 %v14472_v30, %v10766_v4 }
0x1a86   : > { %10857 = vst [vmem:[#allocation2 + $0x30] sm:$0xff] %v17238_v44  ;;  %10858 = vst [vmem:[#allocation2] sm:$0xff] %v10850_v0 }
0x1a87   : > { %10859 = vst [vmem:[#allocation2 + $0x18] sm:$0xff] %v17240_v43  ;;  %10860 = vst [vmem:[#allocation2 + $0x10] sm:$0xff] %v10852_v33  ;;  %v10824_v63 = vmul.f32 %v10803_v47, %v10795_v41  ;;  %v10825_v26 = vmul.f32 %v10807_v39, %v10796_v22  ;;  %v10826_v10 = vmul.f32 %v10811_v27, %v10797_v59 }
0x1a88   : > { %v10827_v17 = vmul.f32 %v10815_v55, %v10798_v23  ;;  %10868 = sbr.rel (%p12765_p2) target bundleno = 7033 (0x1b79), region = 156 }
0x1a89   : > { %v17244_v49 = vadd.f32 %v10832_v58, %v10824_v63  ;;  %v10854_v42 = vadd.f32 %v10836_v62, %v10825_v26  ;;  %v17246_v11 = vadd.f32 %v10840_v32, %v10826_v10 }
0x1a8a   : > { %v10856_v36 = vadd.f32 %v10844_v37, %v10827_v17 }
0x1a8b   : > { %10861 = vst [vmem:[#allocation2 + $0x8] sm:$0xff] %v17244_v49  ;;  %10862 = vst [vmem:[#allocation2 + $0x20] sm:$0xff] %v10854_v42 }
0x1a8c   : > { %10863 = vst [vmem:[#allocation2 + $0x28] sm:$0xff] %v17246_v11  ;;  %10864 = vst [vmem:[#allocation2 + $0x38] sm:$0xff] %v10856_v36 }
0x1a8d   : > { %v14484_v8 = vld [vmem:[#allocation21 + $0x78] sm:$0xff]   ;;  %v10875_v1 = vrot.slane %v10850_v0, 4  ;;  %v10899_v29 = vrot.slane %v10854_v42, 4  ;;  %v10887_v31 = vrot.slane %v10852_v33, 4  ;;  %v14488_v16 = vld [vmem:[#allocation21 + $0x70] sm:$0xff]   ;;  %v10911_v40 = vrot.slane %v10856_v36, 4 }
0x1a8e   : > { %v14485_v60 = vld [vmem:[#allocation21 + $0xf8] sm:$0xff]   ;;  %12877 = vmatprep.subr.bf16.mxu0 %v14484_v8  ;;  %v14489_v54 = vld [vmem:[#allocation21 + $0xf0] sm:$0xff]   ;;  %v14492_v56 = vld [vmem:[#allocation21 + $0x68] sm:$0xff]   ;;  %vm11021_vm5 = vcmask 1041409   ;;  %v10869_v30 = vrot.slane %v17238_v44, 4  ;;  %v10893_v22 = vrot.slane %v17244_v49, 4 }
0x1a8f   : > { %v14486_v34 = vld [vmem:[#allocation21 + $0x38] sm:$0xff]   ;;  %v10876_v48 = vadd.f32 %v10875_v1, %v10850_v0  ;;  %12899 = vmatprep.subr.bf16.mxu1 %v14485_v60  ;;  %v10900_v9 = vadd.f32 %v10899_v29, %v10854_v42  ;;  %v10888_v4 = vadd.f32 %v10887_v31, %v10852_v33  ;;  %v14490_v14 = vld [vmem:[#allocation21 + $0x30] sm:$0xff]   ;;  %v10912_v3 = vadd.f32 %v10911_v40, %v10856_v36  ;;  %v14493_v5 = vld [vmem:[#allocation21 + $0xe8] sm:$0xff]  }
0x1a90   : > { %v14487_v6 = vld [vmem:[#allocation21 + $0xb8] sm:$0xff]   ;;  %12878 = vmatpush3.bf16.msra.mxu0 %v14486_v34  ;;  %v14491_v13 = vld [vmem:[#allocation21 + $0xb0] sm:$0xff]   ;;  %v14494_v21 = vld [vmem:[#allocation21 + $0x28] sm:$0xff]   ;;  %v10870_v63 = vadd.f32 %v10869_v30, %v17238_v44  ;;  %v10894_v17 = vadd.f32 %v10893_v22, %v17244_v49  ;;  %v10881_v42 = vrot.slane %v17240_v43, 4  ;;  %v10905_v49 = vrot.slane %v17246_v11, 4 }
0x1a91   : > { %v10877_v53 = vrot.slane %v10876_v48, 2  ;;  %12900 = vmatpush3.bf16.msra.mxu1 %v14487_v6  ;;  %v10901_v57 = vrot.slane %v10900_v9, 2  ;;  %12879 = vmatprep.subr.bf16.mxu0 %v14488_v16  ;;  %v10889_v15 = vrot.slane %v10888_v4, 2  ;;  %v10913_v28 = vrot.slane %v10912_v3, 2  ;;  %v14495_v2 = vld [vmem:[#allocation21 + $0xa8] sm:$0xff]   ;;  %v14496_v27 = vld [vmem:[#allocation21 + $0x60] sm:$0xff]  }
0x1a92   : > { %12901 = vmatprep.subr.bf16.mxu1 %v14489_v54  ;;  %v14497_v58 = vld [vmem:[#allocation21 + $0xe0] sm:$0xff]   ;;  %v14500_v7 = vld [vmem:[#allocation21 + $0x58] sm:$0xff]   ;;  %v14504_v36 = vld [vmem:[#allocation21 + $0x50] sm:$0xff]   ;;  %v10871_v29 = vrot.slane %v10870_v63, 2  ;;  %v10882_v6 = vadd.f32 %v10881_v42, %v17240_v43 }
0x1a93   : > { %v10878_v35 = vadd.f32 %v10877_v53, %v10876_v48  ;;  %v10902_v18 = vadd.f32 %v10901_v57, %v10900_v9  ;;  %v10890_v46 = vadd.f32 %v10889_v15, %v10888_v4  ;;  %v10914_v20 = vadd.f32 %v10913_v28, %v10912_v3  ;;  %v14498_v37 = vld [vmem:[#allocation21 + $0x20] sm:$0xff]   ;;  %v14501_v0 = vld [vmem:[#allocation21 + $0xd8] sm:$0xff]   ;;  %v14505_v34 = vld [vmem:[#allocation21 + $0xd0] sm:$0xff]  }
0x1a94   : > { %12880 = vmatpush3.bf16.msra.mxu0 %v14490_v14  ;;  %v14499_v25 = vld [vmem:[#allocation21 + $0xa0] sm:$0xff]   ;;  %v14502_v59 = vld [vmem:[#allocation21 + $0x18] sm:$0xff]   ;;  %v10895_v48 = vrot.slane %v10894_v17, 2  ;;  %v14506_v44 = vld [vmem:[#allocation21 + $0x10] sm:$0xff]   ;;  %v10872_v31 = vadd.f32 %v10871_v29, %v10870_v63  ;;  %v10883_v54 = vrot.slane %v10882_v6, 2 }
0x1a95   : > { %v10879_v24 = vrot.slane %v10878_v35, 1  ;;  %12902 = vmatpush3.bf16.msra.mxu1 %v14491_v13  ;;  %v10903_v19 = vrot.slane %v10902_v18, 1  ;;  %12881 = vmatprep.subr.bf16.mxu0 %v14492_v56  ;;  %v10891_v39 = vrot.slane %v10890_v46, 1  ;;  %v10915_v50 = vrot.slane %v10914_v20, 1  ;;  %v14503_v26 = vld [vmem:[#allocation21 + $0x98] sm:$0xff]   ;;  %v14507_v16 = vld [vmem:[#allocation21 + $0x90] sm:$0xff]  }
0x1a96   : > { %12903 = vmatprep.subr.bf16.mxu1 %v14493_v5  ;;  %v10896_v53 = vadd.f32 %v10895_v48, %v10894_v17  ;;  %v14508_v57 = vld [vmem:[#allocation21 + $0x48] sm:$0xff]   ;;  %v10873_v14 = vrot.slane %v10872_v31, 1 }
0x1a97   : > { %v10880_v45 = vadd.f32 %v10879_v24, %v10878_v35  ;;  %v10904_v47 = vadd.f32 %v10903_v19, %v10902_v18  ;;  %v10892_v32 = vadd.f32 %v10891_v39, %v10890_v46  ;;  %v10916_v38 = vadd.f32 %v10915_v50, %v10914_v20  ;;  %v14509_v43 = vld [vmem:[#allocation21 + $0xc8] sm:$0xff]   ;;  %v14512_v46 = vld [vmem:[#allocation21 + $0x40] sm:$0xff]  }
0x1a98   : > { %12882 = vmatpush3.bf16.msra.mxu0 %v14494_v21  ;;  %v10906_v35 = vadd.f32 %v10905_v49, %v17246_v11  ;;  %v10897_v13 = vrot.slane %v10896_v53, 1  ;;  %v10884_v18 = vadd.f32 %v10883_v54, %v10882_v6  ;;  %v14510_v15 = vld [vmem:[#allocation21 + $0x8] sm:$0xff]   ;;  %v10874_v56 = vadd.f32 %v10873_v14, %v10872_v31  ;;  %v14513_v11 = vld [vmem:[#allocation21 + $0xc0] sm:$0xff]  }
0x1a99   : > { %v10919_v55 = vmul.f32 0.125, %v10880_v45  ;;  %12904 = vmatpush3.bf16.msra.mxu1 %v14495_v2  ;;  %v10923_v62 = vmul.f32 0.125, %v10904_v47  ;;  %12883 = vmatprep.subr.bf16.mxu0 %v14496_v27  ;;  %v10921_v51 = vmul.f32 0.125, %v10892_v32  ;;  %v10925_v23 = vmul.f32 0.125, %v10916_v38  ;;  %v14511_v3 = vld [vmem:[#allocation21 + $0x88] sm:$0xff]   ;;  %v14514_v47 = vld [vmem:[#allocation21] sm:$0xff]  }
0x1a9a   : > { %12905 = vmatprep.subr.bf16.mxu1 %v14497_v58  ;;  %v10907_v24 = vrot.slane %v10906_v35, 2  ;;  %v10898_v5 = vadd.f32 %v10897_v13, %v10896_v53  ;;  %v10885_v19 = vrot.slane %v10884_v18, 1  ;;  %v10918_v21 = vmul.f32 0.125, %v10874_v56 }
0x1a9b   : > { %v10927_v52 = vpack.c.bf16 %v10919_v55, %v10919_v55  ;;  %v10931_v12 = vpack.c.bf16 %v10923_v62, %v10923_v62  ;;  %v10929_v41 = vpack.c.bf16 %v10921_v51, %v10921_v51  ;;  %v10933_v1 = vpack.c.bf16 %v10925_v23, %v10925_v23  ;;  %v14515_v55 = vld [vmem:[#allocation21 + $0x80] sm:$0xff]  }
0x1a9c   : > { %12884 = vmatpush3.bf16.msra.mxu0 %v14498_v37  ;;  %v10908_v45 = vadd.f32 %v10907_v24, %v10906_v35  ;;  %v10922_v28 = vmul.f32 0.125, %v10898_v5  ;;  %v10886_v2 = vadd.f32 %v10885_v19, %v10884_v18  ;;  %v10926_v39 = vpack.c.bf16 %v10918_v21, %v10918_v21 }
0x1a9d   : > { %v11014_v61 = vunpack.c.l.b16 %v10927_v52  ;;  %12906 = vmatpush3.bf16.msra.mxu1 %v14499_v25  ;;  %v11018_v33 = vunpack.c.l.b16 %v10931_v12  ;;  %12885 = vmatprep.subr.bf16.mxu0 %v14500_v7  ;;  %v11016_v60 = vunpack.c.l.b16 %v10929_v41  ;;  %v11020_v9 = vunpack.c.l.b16 %v10933_v1  ;;  %v12766_v41 = vld [vmem:[#allocation22] ss:$0 sm:$0xff] }
0x1a9e   : > { %12907 = vmatprep.subr.bf16.mxu1 %v14501_v0  ;;  %v10909_v27 = vrot.slane %v10908_v45, 1  ;;  %v10930_v20 = vpack.c.bf16 %v10922_v28, %v10922_v28  ;;  %v10920_v58 = vmul.f32 0.125, %v10886_v2  ;;  %v11013_v62 = vunpack.c.l.b16 %v10926_v39 }
0x1a9f   : > { %v11023_v10 = vsel %vm11021_vm5, %v11018_v33, %v11014_v61  ;;  %v11025_v4 = vsel %vm11021_vm5, %v11020_v9, %v11016_v60 }
0x1aa0   : > { %12886 = vmatpush3.bf16.msra.mxu0 %v14502_v59  ;;  %v11027_v8 = vpack.c.b16 %v11023_v10, %v11023_v10  ;;  %v11029_v40 = vpack.c.b16 %v11025_v4, %v11025_v4  ;;  %v10910_v32 = vadd.f32 %v10909_v27, %v10908_v45  ;;  %v11017_v37 = vunpack.c.l.b16 %v10930_v20 }
0x1aa1   : > { %12908 = vmatpush3.bf16.msra.mxu1 %v14503_v26  ;;  %12887 = vmatprep.subr.bf16.mxu0 %v14504_v36  ;;  %v10928_v52 = vpack.c.bf16 %v10920_v58, %v10920_v58 }
0x1aa2   : > { %11258 = vmatprep.mubr.bf16.mxu0 %v11027_v8  ;;  %12909 = vmatprep.subr.bf16.mxu1 %v14505_v34  ;;  %v10924_v50 = vmul.f32 0.125, %v10910_v32  ;;  %v11022_v25 = vsel %vm11021_vm5, %v11017_v37, %v11013_v62 }
0x1aa3   : > { %11298 = vmatprep.mubr.bf16.mxu1 %v11029_v40  ;;  %v11026_v12 = vpack.c.b16 %v11022_v25, %v11022_v25  ;;  %v11015_v7 = vunpack.c.l.b16 %v10928_v52 }
0x1aa4   : > { %12888 = vmatpush3.bf16.msra.mxu0 %v14506_v44  ;;  %v10932_v51 = vpack.c.bf16 %v10924_v50, %v10924_v50 }
0x1aa5   : > { %12910 = vmatpush3.bf16.msra.mxu1 %v14507_v16  ;;  %12889 = vmatprep.subr.bf16.mxu0 %v14508_v57 }
0x1aa6   : > { %12911 = vmatprep.subr.bf16.mxu1 %v14509_v43  ;;  %v11019_v61 = vunpack.c.l.b16 %v10932_v51 }
0x1aa8   : > { %12890 = vmatpush3.bf16.msra.mxu0 %v14510_v15  ;;  %v11024_v38 = vsel %vm11021_vm5, %v11019_v61, %v11015_v7 }
0x1aa9   : > { %12912 = vmatpush3.bf16.msra.mxu1 %v14511_v3  ;;  %12891 = vmatprep.subr.bf16.mxu0 %v14512_v46  ;;  %v11028_v30 = vpack.c.b16 %v11024_v38, %v11024_v38 }
0x1aaa   : > { %12913 = vmatprep.subr.bf16.mxu1 %v14513_v11 }
0x1aac   : > { %12892 = vmatpush3.bf16.msra.mxu0 %v14514_v47 }
0x1aad   : > { %12914 = vmatpush3.bf16.msra.mxu1 %v14515_v55 }
0x1aaf   : > { %11259 = vmatmul.mubr.bf16.vlgmr.msra.gmra.mxu0 %v11026_v12 }
0x1ab0   : > { %11299 = vmatmul.mubr.bf16.vlgmr.msra.gmra.mxu1 %v11028_v30 }
0x1b6f   : > { %v12893_v0 = vpop.f32.mrf.mxu0 }
0x1b70   : > { %v12915_v23 = vpop.f32.mrf.mxu1 }
0x1b71   : > { %v12894_v33 = vpop.f32.mrf.mxu0 }
0x1b72   : > { %v12895_v22 = vadd.f32 %v12894_v33, %v12893_v0  ;;  %v12916_v10 = vpop.f32.mrf.mxu1 }
0x1b73   : > { %v12896_v59 = vpop.f32.mrf.mxu0  ;;  %v12917_v17 = vadd.f32 %v12916_v10, %v12915_v23 }
0x1b74   : > { %v11261_v63 = vadd.f32 %v12895_v22, %v12766_v41  ;;  %v12918_v42 = vpop.f32.mrf.mxu1 }
0x1b75   : > { %v12897_v26 = vpop.f32.mrf.mxu0 }
0x1b76   : > { %v11301_v36 = vadd.f32 %v12917_v17, %v11261_v63  ;;  %v12919_v8 = vpop.f32.mrf.mxu1 }
0x1b78   : > { %11308 = vst [vmem:[#allocation24] sm:$0x3] %v11301_v36 }
0x1b79 PF: > { %s17380_s17 = sld [smem:[#allocation34_spill]]  ;;  %s15055_s4 = smov [#allocation24]  }
0x1b7a   : > { %s11316_s1 = sshll.u32 %s15055_s4, 4  ;;  %s11317_s1 = int_to_ptr.vmem [resolvable:$true] %s11316_s1 }
0x1b7b   : > { %s14930_s26 = scalar_lea.vmem %s11317_s1, 32  ;;  %p14937_p0 = scmp.lt.s32.totalorder %s11317_s1, %s11317_s1 }
0x1b7c   : > { %p14931_p8 = scmp.ne.s32.totalorder %s11317_s1, %s14930_s26  ;;  %p14938_p1 = scmp.lt.s32.totalorder %s14930_s26, %s14930_s26 }
0x1b7e   : > { %p14939_p13 = por %p14938_p1, %p14937_p0 }
0x1b7f   : > { %p13181_p12 = scmp.eq.s32.totalorder %s17380_s17, 1 }
0x1b81   : > { %p14932_p9 = pnand %p14931_p8, %p13181_p12 }
0x1b83   : > { %p14933_p11 = pneg %p14932_p9 }
0x1b85   : > { %p14940_p3 = pnand %p14939_p13, %p14933_p11 }
0x1b87   : > { %14943 = shalt.err (!%p14940_p3)
}
0x1b88   : > { %s17381_s27 = sld [smem:[#allocation48_spill]] }
0x1b8e   : > { %13160 = dma.vmem_to_hbm [thread:$0]  (%p13181_p12), %s11317_s1, 32, %s17381_s27, [#allocation6]  }
0x1b8f   : > { %14999 = dma.done.wait (%p13181_p12), [#allocation6], 32  }
0x1b90   : > { %15001 = vsyncadd (%p13181_p12), [#allocation6], 4294967264 }
0x1b91 PF: > { %s17382_s22 = sld [smem:[#allocation33_spill]] }
0x1b92   : > { %s17383_s21 = sld [smem:[#allocation31_spill]] }
0x1b93   : > { %s17384_s24 = sld [smem:[#allocation37_spill]] }
0x1b94   : > { %s17385_s19 = sld [smem:[#allocation35_spill]] }
0x1b97   : > { %s32_s26 = sadd.s32 1, %s17382_s22   ;;  %s17386_s22 = smov %s15012_s23 }
0x1b98   : > { %p29_p10 = scmp.ge.s32.totalorder %s32_s26, 4  }
0x1b99   : > { %s17387_s23 = smov %s17384_s24  ;;  %s17388_s24 = smov %s15020_s25 }
0x1b9a   : > { %s17389_s25 = smov %s17385_s19  ;;  %31 = sbr.rel (!%p29_p10) target bundleno = 18 (0x12), region = 277 }
0x1b9f   :  { %11329 = vsyncpa [#allocation5], 1 }
0x1ba0   :  { %11331 = vsyncpa [#allocation5 + $0x1], 1 }
0x1ba1   :  { %11332 = vsyncpa [#allocation8], 1 }
0x1ba2   :  { %11333 = vsyncpa [#allocation23], 1 }
0x1ba3   :  { %11334 = vsyncpa [#allocation6], 1 }
0x1ba4   :  { %11336 = vsyncpa [#allocation6 + $0x1], 1 }

</bundles_post_ra>
